<compile_context>
chip_gen: v7x
topology: tpu7x:2x2x1
jax: 0.10.0
libtpu: 0.0.40
codegen_flags: <defaults>
</compile_context>

<pallas_src>
import functools
import math

import jax
import jax.numpy as jnp
from jax.experimental import pallas as pl
from jax.experimental.pallas import tpu as pltpu


# ----------------------------- Pallas kernel -------------------------------- #
def mlp_part_kernel(x_ref,
                    w0_ref, b0_ref,          # fused fc_parts_0 + part_0
                    wp1_ref, bp1_ref,        # fc_parts_1
                    wpo_ref, bpo_ref,        # fc_parts_out
                    wf1_ref, bf1_ref,        # part_1 (grouped, block-diag)
                    wf2_ref, bf2_ref,        # part_2 (grouped, block-diag)
                    wfo_ref, bfo_ref,        # part_out (grouped, block-diag)
                    out_full_ref, out_parts_ref,
                    *, h_parts, num_parts):
    x = x_ref[0]                                      # (C_in, TN), f32
    wdt = w0_ref.dtype                                # compute dtype (f32 or bf16)

    def mm(w_ref, h):
        # MXU matmul; inputs cast to the weight dtype, accumulation in f32.
        return jnp.dot(w_ref[...], h.astype(wdt),
                       preferred_element_type=jnp.float32)

    # Fused first layer: one pass over the poorly-utilized K=C_in contraction
    # serves both fc_parts_0 (rows [0, h_parts)) and part_0 (rows [h_parts, :)).
    h0 = jnp.maximum(mm(w0_ref, x) + b0_ref[...], 0.0)        # (h_parts+256*NP, TN)
    hp = h0[:h_parts]                                          # parts branch (512, TN)
    hf = h0[h_parts:]                                          # full branch (256*NP, TN)

    # ---- parts branch: fc_parts_1 -> relu -> fc_parts_out ----
    hp = jnp.maximum(mm(wp1_ref, hp) + bp1_ref[...], 0.0)      # (256, TN)
    out_parts = mm(wpo_ref, hp) + bpo_ref[...]                 # (NP, TN)

    # ---- full branch: part_1 -> relu -> part_2 -> relu -> part_out ----
    hf = jnp.maximum(mm(wf1_ref, hf) + bf1_ref[...], 0.0)      # (128*NP, TN)
    hf = jnp.maximum(mm(wf2_ref, hf) + bf2_ref[...], 0.0)      # (128*NP, TN)
    net_full = mm(wfo_ref, hf) + bfo_ref[...]                  # (NP, TN)

    # softmax over the parts axis (axis 0 here == PyTorch dim=1), then
    # weighted mean over parts.
    if num_parts == 2:
        # 2-way softmax == sigmoid: pure VPU/EUP, no cross-sublane reduce needed.
        p1 = 1.0 / (1.0 + jnp.exp(out_parts[0:1] - out_parts[1:2]))   # (1, TN)
        out_full = (net_full[0:1] * (1.0 - p1) + net_full[1:2] * p1) * 0.5
    else:
        m = jnp.max(out_parts, axis=0, keepdims=True)
        e = jnp.exp(out_parts - m)
        parts_sm = e / jnp.sum(e, axis=0, keepdims=True)
        out_full = jnp.mean(net_full * parts_sm, axis=0, keepdims=True)

    out_full_ref[0] = out_full.astype(out_full_ref.dtype)       # (1, TN)  lane-dense
    out_parts_ref[0] = out_parts.astype(out_parts_ref.dtype)    # (NP, TN) lane-dense


# ------------------------------ wrapper ------------------------------------- #
def mlp_part_forward(feature_bcn, packed, *, num_parts=2, h_parts=512, tn=512):
    """feature_bcn: [B, C_in, N] (PyTorch layout, unchanged).  `packed` comes from
    pack_params().  Returns (out_full [B,1,N], out_parts [B,num_parts,N])."""
    B, C_in, N = feature_bcn.shape
    tn = min(tn, N)
    assert N % tn == 0 and tn % 128 == 0, "N must be a multiple of the (128-aligned) tile"

    (w0, b0), (wp1, bp1), (wpo, bpo), (wf1, bf1), (wf2, bf2), (wfo, bfo) = packed
    flat = [w0, b0, wp1, bp1, wpo, bpo, wf1, bf1, wf2, bf2, wfo, bfo]

    grid = (B, N // tn)
    xmap = lambda b, n: (b, 0, n)
    wmap = lambda b, n: (0, 0)

    in_specs = [pl.BlockSpec((1, C_in, tn), xmap)]
    in_specs += [pl.BlockSpec(a.shape, wmap) for a in flat]

    out_specs = [pl.BlockSpec((1, 1, tn), xmap),
                 pl.BlockSpec((1, num_parts, tn), xmap)]
    out_shape = (jax.ShapeDtypeStruct((B, 1, N), jnp.float32),
                 jax.ShapeDtypeStruct((B, num_parts, N), jnp.float32))

    kernel = functools.partial(mlp_part_kernel, h_parts=h_parts, num_parts=num_parts)

    return pl.pallas_call(
        kernel,
        out_shape=out_shape,
        grid_spec=pltpu.PrefetchScalarGridSpec(
            num_scalar_prefetch=0,
            grid=grid,
            in_specs=in_specs,
            out_specs=out_specs,
        ),
        compiler_params=pltpu.CompilerParams(
            dimension_semantics=("parallel", "parallel")),
    )(feature_bcn, *flat)


# --------------------- parameter packing (one-time, trace-free) -------------- #
def pack_params(params, *, num_parts, weight_dtype=jnp.float32):
    """Transpose weights to [C_out, C_in] (so the kernel computes W @ X with N on
    lanes), fuse fc_parts_0 with part_0, cast weights to `weight_dtype`.  Biases
    become (C_out, 1) f32 columns (elementwise math stays f32)."""
    del num_parts  # shapes already carry it
    (wp0, bp0), (wp1, bp1), (wpo, bpo), (wf0, bf0), (wf1, bf1), (wf2, bf2), (wfo, bfo) = params

    def wt(w):
        return jnp.asarray(w.T, weight_dtype)

    def bt(b):
        return jnp.asarray(b.T, jnp.float32)

    w0 = jnp.concatenate([wp0, wf0], axis=1)   # (C_in, 512 + 256*NP)
    b0 = jnp.concatenate([bp0, bf0], axis=1)   # (1,    512 + 256*NP)
    return ((wt(w0), bt(b0)),
            (wt(wp1), bt(bp1)),
            (wt(wpo), bt(bpo)),
            (wt(wf1), bt(bf1)),
            (wt(wf2), bt(bf2)),
            (wt(wfo), bt(bfo)))


# ------------------------- deterministic parameter init ---------------------- #
def _init_dense(key, cin, cout):
    kw, kb = jax.random.split(key)
    w = jax.random.normal(kw, (cin, cout), jnp.float32) * (1.0 / math.sqrt(cin))
    b = jax.random.normal(kb, (1, cout), jnp.float32) * 0.01
    return w, b


def _init_grouped(key, cin_per_g, cout_per_g, ng):
    """PyTorch Conv1d(cin_per_g*ng, cout_per_g*ng, 1, groups=ng) -> block-diagonal
    dense weight [cin_per_g*ng, cout_per_g*ng]."""
    keys = jax.random.split(key, ng + 1)
    ws = [jax.random.normal(keys[i], (cin_per_g, cout_per_g), jnp.float32)
          * (1.0 / math.sqrt(cin_per_g)) for i in range(ng)]
    w = jax.scipy.linalg.block_diag(*ws)
    b = jax.random.normal(keys[-1], (1, cout_per_g * ng), jnp.float32) * 0.01
    return w, b


def make_params(key, c_in, num_parts):
    ks = jax.random.split(key, 7)
    fc_parts_0 = _init_dense(ks[0], c_in, 512)
    fc_parts_1 = _init_dense(ks[1], 512, 256)
    fc_parts_out = _init_dense(ks[2], 256, num_parts)
    part_0 = _init_dense(ks[3], c_in, 256 * num_parts)
    part_1 = _init_grouped(ks[4], 256, 128, num_parts)
    part_2 = _init_grouped(ks[5], 128, 128, num_parts)
    part_out = _init_grouped(ks[6], 128, 1, num_parts)
    return (fc_parts_0, fc_parts_1, fc_parts_out, part_0, part_1, part_2, part_out)


# ---------------------------- pure-JAX reference ----------------------------- #
def reference_forward(feature_bcn, params, num_parts):
    (wp0, bp0), (wp1, bp1), (wpo, bpo), (wf0, bf0), (wf1, bf1), (wf2, bf2), (wfo, bfo) = params
    x = jnp.transpose(feature_bcn, (0, 2, 1))
    relu = lambda v: jnp.maximum(v, 0.0)
    h = relu(x @ wp0 + bp0)
    h = relu(h @ wp1 + bp1)
    out_parts = h @ wpo + bpo
    sm = jax.nn.softmax(out_parts, axis=-1)
    g = relu(x @ wf0 + bf0)
    g = relu(g @ wf1 + bf1)
    g = relu(g @ wf2 + bf2)
    net_full = (g @ wfo + bfo) * sm
    out_full = jnp.mean(net_full, axis=-1, keepdims=True)
    return (jnp.transpose(out_full, (0, 2, 1)),
            jnp.transpose(out_parts, (0, 2, 1)))


# ---------------------------------- main ------------------------------------- #
if __name__ == "__main__":
    B, C_IN, N = 2, 32, 1024
    NUM_PARTS = 2
    TN = 512

    key = jax.random.PRNGKey(0)
    k_x, k_p = jax.random.split(key)
    feature = jax.random.normal(k_x, (B, C_IN, N), jnp.float32)  # [B, C_in, N]
    params = make_params(k_p, C_IN, NUM_PARTS)

    fwd = jax.jit(functools.partial(mlp_part_forward,
                                    num_parts=NUM_PARTS, h_parts=512, tn=TN))

    # --- f32 weights: tight correctness check against the pure-JAX reference ---
    packed_f32 = pack_params(params, num_parts=NUM_PARTS, weight_dtype=jnp.float32)
    out_full, out_parts = fwd(feature, packed_f32)
    jax.block_until_ready((out_full, out_parts))

    ref_full, ref_parts = reference_forward(feature, params, NUM_PARTS)
    assert out_full.shape == (B, 1, N)
    assert out_parts.shape == (B, NUM_PARTS, N)
    assert jnp.allclose(out_full, ref_full, atol=1e-4, rtol=1e-4)
    assert jnp.allclose(out_parts, ref_parts, atol=1e-4, rtol=1e-4)

    # --- bf16 weights: MXU fast path (v6e/v7x); accumulation stays f32 ---
    packed_bf16 = pack_params(params, num_parts=NUM_PARTS, weight_dtype=jnp.bfloat16)
    out_full_bf, out_parts_bf = fwd(feature, packed_bf16)
    jax.block_until_ready((out_full_bf, out_parts_bf))
    assert out_full_bf.shape == (B, 1, N)
    assert out_parts_bf.shape == (B, NUM_PARTS, N)
    # loose tolerance: bf16 weight quantization changes low-order digits
    assert jnp.allclose(out_full_bf, ref_full, atol=0.25, rtol=0.25)
    assert jnp.allclose(out_parts_bf, ref_parts, atol=0.25, rtol=0.25)

    print("KERNEL_OK")
</pallas_src>

<mosaic_0001>
module attributes {stable_mosaic.version = 11 : i64} {
  func.func @mlp_part_kernel(%arg0: i32, %arg1: i32, %arg2: memref<1x32x512xf32, #tpu.memory_space<vmem>>, %arg3: memref<1024x32xf32, #tpu.memory_space<vmem>>, %arg4: memref<1024x1xf32, #tpu.memory_space<vmem>>, %arg5: memref<256x512xf32, #tpu.memory_space<vmem>>, %arg6: memref<256x1xf32, #tpu.memory_space<vmem>>, %arg7: memref<2x256xf32, #tpu.memory_space<vmem>>, %arg8: memref<2x1xf32, #tpu.memory_space<vmem>>, %arg9: memref<256x512xf32, #tpu.memory_space<vmem>>, %arg10: memref<256x1xf32, #tpu.memory_space<vmem>>, %arg11: memref<256x256xf32, #tpu.memory_space<vmem>>, %arg12: memref<256x1xf32, #tpu.memory_space<vmem>>, %arg13: memref<2x256xf32, #tpu.memory_space<vmem>>, %arg14: memref<2x1xf32, #tpu.memory_space<vmem>>, %arg15: memref<1x1x512xf32, #tpu.memory_space<vmem>>, %arg16: memref<1x2x512xf32, #tpu.memory_space<vmem>>) attributes {dimension_semantics = [#tpu.dimension_semantics<parallel>, #tpu.dimension_semantics<parallel>], iteration_bounds = array<i64: 2, 2>, scalar_prefetch = 0 : i64, scratch_operands = 0 : i64, tpu.core_type = #tpu.core_type<tc>, window_params = [{transform_indices = @transform_0, window_bounds = array<i64: 1, 32, 512>}, {pipeline_mode = #tpu.pipeline_mode<synchronous>, transform_indices = @transform_1, window_bounds = array<i64: 1024, 32>}, {pipeline_mode = #tpu.pipeline_mode<synchronous>, transform_indices = @transform_2, window_bounds = array<i64: 1024, 1>}, {pipeline_mode = #tpu.pipeline_mode<synchronous>, transform_indices = @transform_3, window_bounds = array<i64: 256, 512>}, {pipeline_mode = #tpu.pipeline_mode<synchronous>, transform_indices = @transform_4, window_bounds = array<i64: 256, 1>}, {pipeline_mode = #tpu.pipeline_mode<synchronous>, transform_indices = @transform_5, window_bounds = array<i64: 2, 256>}, {pipeline_mode = #tpu.pipeline_mode<synchronous>, transform_indices = @transform_6, window_bounds = array<i64: 2, 1>}, {pipeline_mode = #tpu.pipeline_mode<synchronous>, transform_indices = @transform_7, window_bounds = array<i64: 256, 512>}, {pipeline_mode = #tpu.pipeline_mode<synchronous>, transform_indices = @transform_8, window_bounds = array<i64: 256, 1>}, {pipeline_mode = #tpu.pipeline_mode<synchronous>, transform_indices = @transform_9, window_bounds = array<i64: 256, 256>}, {pipeline_mode = #tpu.pipeline_mode<synchronous>, transform_indices = @transform_10, window_bounds = array<i64: 256, 1>}, {pipeline_mode = #tpu.pipeline_mode<synchronous>, transform_indices = @transform_11, window_bounds = array<i64: 2, 256>}, {pipeline_mode = #tpu.pipeline_mode<synchronous>, transform_indices = @transform_12, window_bounds = array<i64: 2, 1>}, {transform_indices = @transform_13, window_bounds = array<i64: 1, 1, 512>}, {transform_indices = @transform_14, window_bounds = array<i64: 1, 2, 512>}]} {
    %c0 = arith.constant 0 : index
    %c0_0 = arith.constant 0 : index
    %c0_1 = arith.constant 0 : index
    %0 = vector.load %arg2[%c0, %c0_0, %c0_1] : memref<1x32x512xf32, #tpu.memory_space<vmem>>, vector<1x32x512xf32>
    %1 = vector.shape_cast %0 : vector<1x32x512xf32> to vector<32x512xf32>
    %c0_2 = arith.constant 0 : index
    %c0_3 = arith.constant 0 : index
    %2 = vector.load %arg3[%c0_2, %c0_3] : memref<1024x32xf32, #tpu.memory_space<vmem>>, vector<1024x32xf32>
    %cst = arith.constant dense<0.000000e+00> : vector<1024x512xf32>
    %3 = tpu.matmul %2, %1, %cst {dimension_numbers = #tpu.dot_dimension_numbers<[1], [0], [0], [1], [0, 0, 1, 1], [], []>} : vector<1024x32xf32>, vector<32x512xf32>, vector<1024x512xf32> -> vector<1024x512xf32>
    %c0_4 = arith.constant 0 : index
    %c0_5 = arith.constant 0 : index
    %4 = vector.load %arg4[%c0_4, %c0_5] : memref<1024x1xf32, #tpu.memory_space<vmem>>, vector<1024x1xf32>
    %5 = vector.broadcast %4 : vector<1024x1xf32> to vector<1024x512xf32>
    %6 = arith.addf %3, %5 : vector<1024x512xf32>
    %cst_6 = arith.constant 0.000000e+00 : f32
    %7 = vector.broadcast %cst_6 : f32 to vector<1024x512xf32>
    %8 = arith.maximumf %6, %7 : vector<1024x512xf32>
    %9 = vector.extract_strided_slice %8 {offsets = [0, 0], sizes = [512, 512], strides = [1, 1]} : vector<1024x512xf32> to vector<512x512xf32>
    %10 = vector.extract_strided_slice %8 {offsets = [512, 0], sizes = [512, 512], strides = [1, 1]} : vector<1024x512xf32> to vector<512x512xf32>
    %c0_7 = arith.constant 0 : index
    %c0_8 = arith.constant 0 : index
    %11 = vector.load %arg5[%c0_7, %c0_8] : memref<256x512xf32, #tpu.memory_space<vmem>>, vector<256x512xf32>
    %cst_9 = arith.constant dense<0.000000e+00> : vector<256x512xf32>
    %12 = tpu.matmul %11, %9, %cst_9 {dimension_numbers = #tpu.dot_dimension_numbers<[1], [0], [0], [1], [0, 0, 1, 1], [], []>} : vector<256x512xf32>, vector<512x512xf32>, vector<256x512xf32> -> vector<256x512xf32>
    %c0_10 = arith.constant 0 : index
    %c0_11 = arith.constant 0 : index
    %13 = vector.load %arg6[%c0_10, %c0_11] : memref<256x1xf32, #tpu.memory_space<vmem>>, vector<256x1xf32>
    %14 = vector.broadcast %13 : vector<256x1xf32> to vector<256x512xf32>
    %15 = arith.addf %12, %14 : vector<256x512xf32>
    %cst_12 = arith.constant 0.000000e+00 : f32
    %16 = vector.broadcast %cst_12 : f32 to vector<256x512xf32>
    %17 = arith.maximumf %15, %16 : vector<256x512xf32>
    %c0_13 = arith.constant 0 : index
    %c0_14 = arith.constant 0 : index
    %18 = vector.load %arg7[%c0_13, %c0_14] : memref<2x256xf32, #tpu.memory_space<vmem>>, vector<2x256xf32>
    %cst_15 = arith.constant dense<0.000000e+00> : vector<2x512xf32>
    %19 = tpu.matmul %18, %17, %cst_15 {dimension_numbers = #tpu.dot_dimension_numbers<[1], [0], [0], [1], [0, 0, 1, 1], [], []>} : vector<2x256xf32>, vector<256x512xf32>, vector<2x512xf32> -> vector<2x512xf32>
    %c0_16 = arith.constant 0 : index
    %c0_17 = arith.constant 0 : index
    %20 = vector.load %arg8[%c0_16, %c0_17] : memref<2x1xf32, #tpu.memory_space<vmem>>, vector<2x1xf32>
    %21 = vector.broadcast %20 : vector<2x1xf32> to vector<2x512xf32>
    %22 = arith.addf %19, %21 : vector<2x512xf32>
    %c0_18 = arith.constant 0 : index
    %c0_19 = arith.constant 0 : index
    %23 = vector.load %arg9[%c0_18, %c0_19] : memref<256x512xf32, #tpu.memory_space<vmem>>, vector<256x512xf32>
    %cst_20 = arith.constant dense<0.000000e+00> : vector<256x512xf32>
    %24 = tpu.matmul %23, %10, %cst_20 {dimension_numbers = #tpu.dot_dimension_numbers<[1], [0], [0], [1], [0, 0, 1, 1], [], []>} : vector<256x512xf32>, vector<512x512xf32>, vector<256x512xf32> -> vector<256x512xf32>
    %c0_21 = arith.constant 0 : index
    %c0_22 = arith.constant 0 : index
    %25 = vector.load %arg10[%c0_21, %c0_22] : memref<256x1xf32, #tpu.memory_space<vmem>>, vector<256x1xf32>
    %26 = vector.broadcast %25 : vector<256x1xf32> to vector<256x512xf32>
    %27 = arith.addf %24, %26 : vector<256x512xf32>
    %cst_23 = arith.constant 0.000000e+00 : f32
    %28 = vector.broadcast %cst_23 : f32 to vector<256x512xf32>
    %29 = arith.maximumf %27, %28 : vector<256x512xf32>
    %c0_24 = arith.constant 0 : index
    %c0_25 = arith.constant 0 : index
    %30 = vector.load %arg11[%c0_24, %c0_25] : memref<256x256xf32, #tpu.memory_space<vmem>>, vector<256x256xf32>
    %cst_26 = arith.constant dense<0.000000e+00> : vector<256x512xf32>
    %31 = tpu.matmul %30, %29, %cst_26 {dimension_numbers = #tpu.dot_dimension_numbers<[1], [0], [0], [1], [0, 0, 1, 1], [], []>} : vector<256x256xf32>, vector<256x512xf32>, vector<256x512xf32> -> vector<256x512xf32>
    %c0_27 = arith.constant 0 : index
    %c0_28 = arith.constant 0 : index
    %32 = vector.load %arg12[%c0_27, %c0_28] : memref<256x1xf32, #tpu.memory_space<vmem>>, vector<256x1xf32>
    %33 = vector.broadcast %32 : vector<256x1xf32> to vector<256x512xf32>
    %34 = arith.addf %31, %33 : vector<256x512xf32>
    %cst_29 = arith.constant 0.000000e+00 : f32
    %35 = vector.broadcast %cst_29 : f32 to vector<256x512xf32>
    %36 = arith.maximumf %34, %35 : vector<256x512xf32>
    %c0_30 = arith.constant 0 : index
    %c0_31 = arith.constant 0 : index
    %37 = vector.load %arg13[%c0_30, %c0_31] : memref<2x256xf32, #tpu.memory_space<vmem>>, vector<2x256xf32>
    %cst_32 = arith.constant dense<0.000000e+00> : vector<2x512xf32>
    %38 = tpu.matmul %37, %36, %cst_32 {dimension_numbers = #tpu.dot_dimension_numbers<[1], [0], [0], [1], [0, 0, 1, 1], [], []>} : vector<2x256xf32>, vector<256x512xf32>, vector<2x512xf32> -> vector<2x512xf32>
    %c0_33 = arith.constant 0 : index
    %c0_34 = arith.constant 0 : index
    %39 = vector.load %arg14[%c0_33, %c0_34] : memref<2x1xf32, #tpu.memory_space<vmem>>, vector<2x1xf32>
    %40 = vector.broadcast %39 : vector<2x1xf32> to vector<2x512xf32>
    %41 = arith.addf %38, %40 : vector<2x512xf32>
    %42 = vector.extract_strided_slice %22 {offsets = [0, 0], sizes = [1, 512], strides = [1, 1]} : vector<2x512xf32> to vector<1x512xf32>
    %43 = vector.extract_strided_slice %22 {offsets = [1, 0], sizes = [1, 512], strides = [1, 1]} : vector<2x512xf32> to vector<1x512xf32>
    %44 = arith.subf %42, %43 : vector<1x512xf32>
    %45 = math.exp %44 : vector<1x512xf32>
    %cst_35 = arith.constant 1.000000e+00 : f32
    %46 = vector.broadcast %cst_35 : f32 to vector<1x512xf32>
    %47 = arith.addf %46, %45 : vector<1x512xf32>
    %cst_36 = arith.constant 1.000000e+00 : f32
    %48 = vector.broadcast %cst_36 : f32 to vector<1x512xf32>
    %49 = arith.divf %48, %47 : vector<1x512xf32>
    %50 = vector.extract_strided_slice %41 {offsets = [0, 0], sizes = [1, 512], strides = [1, 1]} : vector<2x512xf32> to vector<1x512xf32>
    %cst_37 = arith.constant 1.000000e+00 : f32
    %51 = vector.broadcast %cst_37 : f32 to vector<1x512xf32>
    %52 = arith.subf %51, %49 : vector<1x512xf32>
    %53 = arith.mulf %50, %52 : vector<1x512xf32>
    %54 = vector.extract_strided_slice %41 {offsets = [1, 0], sizes = [1, 512], strides = [1, 1]} : vector<2x512xf32> to vector<1x512xf32>
    %55 = arith.mulf %54, %49 : vector<1x512xf32>
    %56 = arith.addf %53, %55 : vector<1x512xf32>
    %cst_38 = arith.constant 5.000000e-01 : f32
    %57 = vector.broadcast %cst_38 : f32 to vector<1x512xf32>
    %58 = arith.mulf %56, %57 : vector<1x512xf32>
    %c0_39 = arith.constant 0 : index
    %c0_40 = arith.constant 0 : index
    %c0_41 = arith.constant 0 : index
    %59 = vector.load %arg15[%c0_39, %c0_40, %c0_41] : memref<1x1x512xf32, #tpu.memory_space<vmem>>, vector<1x1x512xf32>
    %60 = vector.shape_cast %59 : vector<1x1x512xf32> to vector<1x512xf32>
    %61 = vector.shape_cast %58 : vector<1x512xf32> to vector<1x1x512xf32>
    tpu.vector_store %arg15[%c0_39, %c0_40, %c0_41], %61 {strides = array<i32>} : memref<1x1x512xf32, #tpu.memory_space<vmem>>, vector<1x1x512xf32>,
    %c0_42 = arith.constant 0 : index
    %c0_43 = arith.constant 0 : index
    %c0_44 = arith.constant 0 : index
    %62 = vector.load %arg16[%c0_42, %c0_43, %c0_44] : memref<1x2x512xf32, #tpu.memory_space<vmem>>, vector<1x2x512xf32>
    %63 = vector.shape_cast %62 : vector<1x2x512xf32> to vector<2x512xf32>
    %64 = vector.shape_cast %22 : vector<2x512xf32> to vector<1x2x512xf32>
    tpu.vector_store %arg16[%c0_42, %c0_43, %c0_44], %64 {strides = array<i32>} : memref<1x2x512xf32, #tpu.memory_space<vmem>>, vector<1x2x512xf32>,
    return
  }
  func.func @transform_0(%arg0: i32, %arg1: i32) -> (i32, i32, i32) {
    %c0_i32 = arith.constant 0 : i32
    %c0_i32_0 = arith.constant 0 : i32
    return %arg0, %c0_i32, %arg1 : i32, i32, i32
  }
  func.func @transform_1(%arg0: i32, %arg1: i32) -> (i32, i32) {
    %c0_i32 = arith.constant 0 : i32
    %c0_i32_0 = arith.constant 0 : i32
    %c0_i32_1 = arith.constant 0 : i32
    return %c0_i32, %c0_i32_0 : i32, i32
  }
  func.func @transform_2(%arg0: i32, %arg1: i32) -> (i32, i32) {
    %c0_i32 = arith.constant 0 : i32
    %c0_i32_0 = arith.constant 0 : i32
    %c0_i32_1 = arith.constant 0 : i32
    return %c0_i32, %c0_i32_0 : i32, i32
  }
  func.func @transform_3(%arg0: i32, %arg1: i32) -> (i32, i32) {
    %c0_i32 = arith.constant 0 : i32
    %c0_i32_0 = arith.constant 0 : i32
    %c0_i32_1 = arith.constant 0 : i32
    return %c0_i32, %c0_i32_0 : i32, i32
  }
  func.func @transform_4(%arg0: i32, %arg1: i32) -> (i32, i32) {
    %c0_i32 = arith.constant 0 : i32
    %c0_i32_0 = arith.constant 0 : i32
    %c0_i32_1 = arith.constant 0 : i32
    return %c0_i32, %c0_i32_0 : i32, i32
  }
  func.func @transform_5(%arg0: i32, %arg1: i32) -> (i32, i32) {
    %c0_i32 = arith.constant 0 : i32
    %c0_i32_0 = arith.constant 0 : i32
    %c0_i32_1 = arith.constant 0 : i32
    return %c0_i32, %c0_i32_0 : i32, i32
  }
  func.func @transform_6(%arg0: i32, %arg1: i32) -> (i32, i32) {
    %c0_i32 = arith.constant 0 : i32
    %c0_i32_0 = arith.constant 0 : i32
    %c0_i32_1 = arith.constant 0 : i32
    return %c0_i32, %c0_i32_0 : i32, i32
  }
  func.func @transform_7(%arg0: i32, %arg1: i32) -> (i32, i32) {
    %c0_i32 = arith.constant 0 : i32
    %c0_i32_0 = arith.constant 0 : i32
    %c0_i32_1 = arith.constant 0 : i32
    return %c0_i32, %c0_i32_0 : i32, i32
  }
  func.func @transform_8(%arg0: i32, %arg1: i32) -> (i32, i32) {
    %c0_i32 = arith.constant 0 : i32
    %c0_i32_0 = arith.constant 0 : i32
    %c0_i32_1 = arith.constant 0 : i32
    return %c0_i32, %c0_i32_0 : i32, i32
  }
  func.func @transform_9(%arg0: i32, %arg1: i32) -> (i32, i32) {
    %c0_i32 = arith.constant 0 : i32
    %c0_i32_0 = arith.constant 0 : i32
    %c0_i32_1 = arith.constant 0 : i32
    return %c0_i32, %c0_i32_0 : i32, i32
  }
  func.func @transform_10(%arg0: i32, %arg1: i32) -> (i32, i32) {
    %c0_i32 = arith.constant 0 : i32
    %c0_i32_0 = arith.constant 0 : i32
    %c0_i32_1 = arith.constant 0 : i32
    return %c0_i32, %c0_i32_0 : i32, i32
  }
  func.func @transform_11(%arg0: i32, %arg1: i32) -> (i32, i32) {
    %c0_i32 = arith.constant 0 : i32
    %c0_i32_0 = arith.constant 0 : i32
    %c0_i32_1 = arith.constant 0 : i32
    return %c0_i32, %c0_i32_0 : i32, i32
  }
  func.func @transform_12(%arg0: i32, %arg1: i32) -> (i32, i32) {
    %c0_i32 = arith.constant 0 : i32
    %c0_i32_0 = arith.constant 0 : i32
    %c0_i32_1 = arith.constant 0 : i32
    return %c0_i32, %c0_i32_0 : i32, i32
  }
  func.func @transform_13(%arg0: i32, %arg1: i32) -> (i32, i32, i32) {
    %c0_i32 = arith.constant 0 : i32
    %c0_i32_0 = arith.constant 0 : i32
    return %arg0, %c0_i32, %arg1 : i32, i32, i32
  }
  func.func @transform_14(%arg0: i32, %arg1: i32) -> (i32, i32, i32) {
    %c0_i32 = arith.constant 0 : i32
    %c0_i32_0 = arith.constant 0 : i32
    return %arg0, %c0_i32, %arg1 : i32, i32, i32
  }
}

</mosaic_0001>

<bundles_post_ra>
// kernel: mlp_part_forward.1
= control target key start
LH: loop header
LB: loop body
LE: loop exit
PB: predicated region body
PF: predicated region fallthrough
CT: control target
= control target key end

     0   :  { %s14817_s0 = inlined_call_operand.vmem [shape: f32[2,32,1024], index: 0, kind: input, shape index: {}]   ;;  %s14818_s1 = inlined_call_operand.vmem [shape: f32[1024,32], index: 1, kind: input, shape index: {}]   ;;  %s14819_s2 = inlined_call_operand.vmem [shape: f32[1024,1], index: 2, kind: input, shape index: {}]   ;;  %s14820_s3 = inlined_call_operand.vmem [shape: f32[256,512], index: 3, kind: input, shape index: {}]   ;;  %s14821_s4 = inlined_call_operand.vmem [shape: f32[256,1], index: 4, kind: input, shape index: {}]   ;;  %s14822_s5 = inlined_call_operand.vmem [shape: f32[2,256], index: 5, kind: input, shape index: {}]   ;;  %s14823_s6 = inlined_call_operand.vmem [shape: f32[2,1], index: 6, kind: input, shape index: {}]   ;;  %s14824_s7 = inlined_call_operand.vmem [shape: f32[256,512], index: 7, kind: input, shape index: {}]   ;;  %s14825_s8 = inlined_call_operand.vmem [shape: f32[256,1], index: 8, kind: input, shape index: {}]   ;;  %s14826_s9 = inlined_call_operand.vmem [shape: f32[256,256], index: 9, kind: input, shape index: {}]   ;;  %s14827_s10 = inlined_call_operand.vmem [shape: f32[256,1], index: 10, kind: input, shape index: {}]   ;;  %s14828_s11 = inlined_call_operand.vmem [shape: f32[2,256], index: 11, kind: input, shape index: {}]   ;;  %s14829_s12 = inlined_call_operand.vmem [shape: f32[2,1], index: 12, kind: input, shape index: {}]   ;;  %s14830_s13 = inlined_call_operand.hbm [shape: f32[2,1,1024], index: 13, kind: output, shape index: {0}]   ;;  %s14831_s14 = inlined_call_operand.hbm [shape: f32[2,2,1024], index: 14, kind: output, shape index: {1}]  }
   0x1   :  { %14908 = sst [smem:[#allocation140_spill]] %s14817_s0 }
   0x2   :  { %14909 = sst [smem:[#allocation141_spill]] %s14818_s1 }
   0x3   :  { %14910 = sst [smem:[#allocation142_spill]] %s14819_s2 }
   0x4   :  { %14911 = sst [smem:[#allocation143_spill]] %s14820_s3 }
   0x5   :  { %14912 = sst [smem:[#allocation144_spill]] %s14821_s4 }
   0x6   :  { %14913 = sst [smem:[#allocation145_spill]] %s14822_s5 }
   0x7   :  { %14914 = sst [smem:[#allocation146_spill]] %s14830_s13 }
   0x8   :  { %14915 = sst [smem:[#allocation147_spill]] %s14831_s14 }
   0x9   :  { %20 = vsyncpa [#allocation4], 0 }
   0xa   :  { %22 = vsyncpa [#allocation4 + $0x1], 0 }
   0xb   :  { %23 = vsyncpa [#allocation6], 0 }
   0xc   :  { %25 = vsyncpa [#allocation6 + $0x1], 0  ;;  %s10495_s29 = smov 0   ;;  %s10497_s30 = smov 0  }
   0xd   :  { %s10499_s15 = smov 0   ;;  %s10501_s16 = smov 0  }
   0xe   :  { %s10503_s17 = smov 0   ;;  %s10505_s18 = smov 0  }
   0xf   :  { %s10507_s19 = smov 0   ;;  %s10509_s20 = smov 0  }
  0x10 LB: > { %14916 = sst [smem:[#allocation9_spill]] %s10384_s29  ;;  %s8483_s21 = sadd.s32 4294967295, %s10412_s20   ;;  %s10412_s20 = sphi %s10509_s20, %s31_s20   ;;  %s10408_s19 = sphi %s10507_s19, %s15339_s19   ;;  %s10404_s18 = sphi %s10505_s18, %s15338_s18   ;;  %s10400_s17 = sphi %s10503_s17, %s15337_s17   ;;  %s10396_s16 = sphi %s10501_s16, %s15336_s16   ;;  %s10392_s15 = sphi %s10499_s15, %s15335_s15   ;;  %s10388_s30 = sphi %s10497_s30, %s15334_s30   ;;  %s10384_s29 = sphi %s10495_s29, %s15333_s29  }
  0x11   : > { %14917 = sst [smem:[#allocation10_spill]] %s10400_s17  ;;  %s8484_s22 = sadd.s32 4294967294, %s10412_s20  }
  0x12   : > { %s40_s23 = sadd.s32 1, %s10404_s18  ;;  %s43_s24 = sadd.s32 1, %s10408_s19 }
  0x13   : > { %p41_p0 = scmp.ge.s32.totalorder %s40_s23, 2  ;;  %p59_p1 = scmp.ne.s32.totalorder %s10392_s15, %s10388_s30 }
  0x14   : > { %p60_p2 = scmp.eq.s32.totalorder %s10412_s20, 0  ;;  %p343_p5 = scmp.eq.s32.totalorder %s8483_s21, 3 }
  0x15   : > { %s15341_s23 = smov (%p41_p0, %s40_s23), 0  ;;  %s15343_s24 = smov (!%p41_p0, %s43_s24), %s10408_s19 }
  0x16   : > { %14918 = sst [smem:[#allocation11_spill]] %s15341_s23  ;;  %s48_s25 = ssub.s32 %s10404_s18, %s15341_s23 }
  0x17   : > { %p10547_p3 = por %p60_p2, %p59_p1  ;;  %p45_p4 = scmp.ge.s32.totalorder %s15343_s24, 2 }
  0x18   : > { %p348_p6 = scmp.ne.s32.totalorder %s10388_s30, %s10384_s29  ;;  %p349_p7 = scmp.eq.s32.totalorder %s8484_s22, 3 }
  0x19   : > { %s15345_s24 = smov (%p45_p4, %s15343_s24), 0  ;;  %p10555_p8 = por %p343_p5, %p59_p1 }
  0x1a   : > { %14920 = sst [smem:[#allocation12_spill]] %s15345_s24  ;;  %p10559_p9 = por %p349_p7, %p348_p6 }
  0x1b   : > { %s14921_s27 = scalar_select %p10555_p8, 1, 0 }
  0x1c   : > { %s14923_s28 = scalar_select %p10559_p9, 1, 0 }
  0x1d   : > { %14922 = sst [smem:[#allocation13_spill]] %s14921_s27  ;;  %s47_s23 = ssub.s32 %s10408_s19, %s15345_s24 }
  0x1e   : > { %14924 = sst [smem:[#allocation14_spill]] %s14923_s28  ;;  %s49_s13 = sor.u32 %s48_s25, %s47_s23 }
  0x1f   : > { %s52_s14 = sadd.s32 1, %s10392_s15  ;;  %p50_p10 = scmp.eq.s32.totalorder %s49_s13, 0 }
  0x20   : > { %p8486_p11 = scmp.ge.s32.totalorder %s10412_s20, 4 }
  0x21   : > { %s10567_s17 = scalar_select %p50_p10, %s10392_s15, %s52_s14  }
  0x22   : > { %429 = sbr.rel (%p8486_p11) target bundleno = 59 (0x3b), region = 64 }
  0x29   : > { %432 = sbr.rel (!%p10547_p3) target bundleno = 59 (0x3b), region = 68  ;;  %s434_s21 = sand.u32 (%p10547_p3), 1, %s10392_s15  }
  0x2a   : > { %s8488_s22 = sshll.u32 (%p10547_p3), %s10404_s18, 2  ;;  %s8487_s29 = sshll.u32 (%p10547_p3), %s434_s21, 7 }
  0x2b   : > { %s8489_s27 = sshll.u32 (%p10547_p3), %s10408_s19, 5  ;;  %s14925_s0 = sld [smem:[#allocation140_spill]] (%p10547_p3) }
  0x2c   : > { %s439_s28 = sadd.s32 (%p10547_p3), %s8489_s27, %s8488_s22  ;;  %s436_s14 = scalar_lea.vmem (%p10547_p3), [#allocation2], %s8487_s29 }
  0x2d   : > { %s8490_s24 = sshll.u32 (%p10547_p3), %s439_s28, 3 }
  0x31   : > { %s10578_s13 = scalar_lea.vmem %s14925_s0, %s8490_s24 }
  0x32   : > { %v454_v0 = vld [vmem:[%s10578_s13] sm:$0xff]  ;;  %v456_v1 = vld [vmem:[%s10578_s13 + $0x8] sm:$0xff]  ;;  %v458_v2 = vld [vmem:[%s10578_s13 + $0x10] sm:$0xff] }
  0x33   : > { %455 = vst [vmem:[%s436_s14] sm:$0xff] %v454_v0  ;;  %457 = vst [vmem:[%s436_s14 + $0x8] sm:$0xff] %v456_v1  ;;  %v460_v3 = vld [vmem:[%s10578_s13 + $0x18] sm:$0xff]  ;;  %v462_v4 = vld [vmem:[%s10578_s13 + $0x40] sm:$0xff] }
  0x34   : > { %459 = vst [vmem:[%s436_s14 + $0x10] sm:$0xff] %v458_v2  ;;  %v464_v5 = vld [vmem:[%s10578_s13 + $0x48] sm:$0xff]  ;;  %461 = vst [vmem:[%s436_s14 + $0x18] sm:$0xff] %v460_v3  ;;  %v466_v6 = vld [vmem:[%s10578_s13 + $0x50] sm:$0xff] }
  0x35   : > { %463 = vst [vmem:[%s436_s14 + $0x20] sm:$0xff] %v462_v4  ;;  %465 = vst [vmem:[%s436_s14 + $0x28] sm:$0xff] %v464_v5  ;;  %v468_v7 = vld [vmem:[%s10578_s13 + $0x58] sm:$0xff]  ;;  %v470_v8 = vld [vmem:[%s10578_s13 + $0x80] sm:$0xff] }
  0x36   : > { %467 = vst [vmem:[%s436_s14 + $0x30] sm:$0xff] %v466_v6  ;;  %469 = vst [vmem:[%s436_s14 + $0x38] sm:$0xff] %v468_v7  ;;  %v472_v9 = vld [vmem:[%s10578_s13 + $0x88] sm:$0xff]  ;;  %v474_v10 = vld [vmem:[%s10578_s13 + $0x90] sm:$0xff] }
  0x37   : > { %471 = vst [vmem:[%s436_s14 + $0x40] sm:$0xff] %v470_v8  ;;  %v476_v11 = vld [vmem:[%s10578_s13 + $0x98] sm:$0xff]  ;;  %473 = vst [vmem:[%s436_s14 + $0x48] sm:$0xff] %v472_v9  ;;  %v478_v12 = vld [vmem:[%s10578_s13 + $0xc0] sm:$0xff] }
  0x38   : > { %475 = vst [vmem:[%s436_s14 + $0x50] sm:$0xff] %v474_v10  ;;  %477 = vst [vmem:[%s436_s14 + $0x58] sm:$0xff] %v476_v11  ;;  %v480_v13 = vld [vmem:[%s10578_s13 + $0xc8] sm:$0xff]  ;;  %v482_v14 = vld [vmem:[%s10578_s13 + $0xd0] sm:$0xff] }
  0x39   : > { %479 = vst [vmem:[%s436_s14 + $0x60] sm:$0xff] %v478_v12  ;;  %481 = vst [vmem:[%s436_s14 + $0x68] sm:$0xff] %v480_v13  ;;  %v484_v15 = vld [vmem:[%s10578_s13 + $0xd8] sm:$0xff] }
  0x3a   : > { %483 = vst [vmem:[%s436_s14 + $0x70] sm:$0xff] %v482_v14  ;;  %485 = vst [vmem:[%s436_s14 + $0x78] sm:$0xff] %v484_v15 }
  0x3b PF: > { %p8491_p12 = scmp.ge.s32.totalorder %s10412_s20, 1  ;;  %p490_p13 = scmp.lt.s32.totalorder %s10412_s20, 5 }
  0x3d   : > { %p491_p0 = pnand %p8491_p12, %p490_p13 }
  0x3f   : > { %494 = sbr.rel (%p491_p0) target bundleno = 2208 (0x8a0), region = 91 }
  0x46   : > { %s14926_s2 = sld [smem:[#allocation142_spill]]  ;;  %s10605_s28 = sand.u32 1, %s10388_s30   ;;  %v10414_v18 = vmov 0   ;;  %v14841_v24 = vmov 0.0   ;;  %vm1462_vm0 = vcmask 261120  }
  0x47   : > { %10268 = vset.pattern.permute.xlu1 %v10414_v18  ;;  %10267 = vset.pattern.permute.xlu0 %v10414_v18  ;;  %s8492_s21 = sshll.u32 %s10605_s28, 7  ;;  %s14927_s1 = sld [smem:[#allocation141_spill]] }
  0x48   : > { %s10614_s14 = scalar_lea.vmem [#allocation2], %s8492_s21  ;;  %1911 = vmatprep.mubr.f32.mxu0 %v14841_v24  ;;  %2744 = vmatprep.mubr.f32.mxu1 %v14841_v24  ;;  %s14928_s4 = sld [smem:[#allocation144_spill]] }
  0x49   : > { %v551_v21 = vld [vmem:[%s10614_s14 + $0x8] sm:$0xff]  ;;  %v553_v23 = vld [vmem:[%s10614_s14 + $0x18] sm:$0xff]  ;;  %v550_v27 = vld [vmem:[%s10614_s14] sm:$0xff]  ;;  %s15058_s3 = sld [smem:[#allocation143_spill]]  ;;  %s15200_s5 = sld [smem:[#allocation145_spill]] }
  0x4a   : > { %v555_v22 = vld [vmem:[%s10614_s14 + $0x28] sm:$0xff]  ;;  %v557_v26 = vld [vmem:[%s10614_s14 + $0x38] sm:$0xff]  ;;  %v554_v28 = vld [vmem:[%s10614_s14 + $0x20] sm:$0xff]  ;;  %s8494_s23 = sshll.u32 %s10605_s28, 3  ;;  %s15324_s24 = sld [smem:[#allocation10_spill]] }
  0x4b   : > { %v8763_v25 = vpack.c.bf16 %v555_v22, %v551_v21  ;;  %v8771_v29 = vpack.c.bf16 %v557_v26, %v553_v23  ;;  %v8765_v30 = vpack.c.bf16 %v554_v28, %v550_v27  ;;  %v552_v31 = vld [vmem:[%s10614_s14 + $0x10] sm:$0xff]  ;;  %v559_v35 = vld [vmem:[%s10614_s14 + $0x48] sm:$0xff]  ;;  %v561_v38 = vld [vmem:[%s10614_s14 + $0x58] sm:$0xff]  ;;  %s14255_s22 = scalar_lea.vmem [#allocation5], %s8494_s23  ;;  %s8755_s21 = sshll.u32 %s10396_s16, 2 }
  0x4c   : > { %v696_v16 = vld [vmem:[%s14926_s2 + $0x10] sm:$0xff]  ;;  %v694_v17 = vld [vmem:[%s14926_s2] sm:$0xff]  ;;  %v697_v19 = vld [vmem:[%s14926_s2 + $0x18] sm:$0xff]  ;;  %s10417_s26 = smov [#allocation5]  }
  0x4d   : > { %834 = vperm.xlu1 %10268, %v696_v16   ;;  %824 = vperm.xlu0 %10267, %v694_v17   ;;  %v695_v20 = vld [vmem:[%s14926_s2 + $0x8] sm:$0xff]  ;;  %v556_v32 = vld [vmem:[%s10614_s14 + $0x30] sm:$0xff]  ;;  %v698_v34 = vld [vmem:[%s14926_s2 + $0x20] sm:$0xff]  ;;  %s10290_s16 = sshll.u32 %s10417_s26, 4  ;;  %s10291_s16 = int_to_ptr.vmem [resolvable:$false] %s10290_s16 }
  0x4e   : > { %v699_v33 = vld [vmem:[%s14926_s2 + $0x28] sm:$0xff]  ;;  %v8773_v36 = vpack.c.bf16 %v556_v32, %v552_v31  ;;  %v565_v39 = vld [vmem:[%s10614_s14 + $0x78] sm:$0xff]  ;;  %8764 = vmatprep.subr.bf16.mxu0 %v8763_v25  ;;  %8772 = vmatprep.subr.bf16.mxu1 %v8771_v29  ;;  %v558_v42 = vld [vmem:[%s10614_s14 + $0x40] sm:$0xff] }
  0x4f   : > { %v563_v37 = vld [vmem:[%s10614_s14 + $0x68] sm:$0xff]  ;;  %v8775_v41 = vpack.c.bf16 %v565_v39, %v561_v38  ;;  %v562_v43 = vld [vmem:[%s10614_s14 + $0x60] sm:$0xff]  ;;  %v560_v44 = vld [vmem:[%s10614_s14 + $0x50] sm:$0xff]  ;;  %8766 = vmatpush1.bf16.msra.mxu0 %v8765_v30 }
  0x50   : > { %v8767_v40 = vpack.c.bf16 %v563_v37, %v559_v35  ;;  %8774 = vmatpush1.bf16.msra.mxu1 %v8773_v36  ;;  %v8769_v45 = vpack.c.bf16 %v562_v43, %v558_v42  ;;  %v564_v46 = vld [vmem:[%s10614_s14 + $0x70] sm:$0xff]  ;;  %v701_v48 = vld [vmem:[%s14926_s2 + $0x38] sm:$0xff]  ;;  %v566_v50 = vld [vmem:[%s14927_s1] sm:$0xff]  ;;  %s8756_s25 = sshll.u32 %s15324_s24, 3  ;;  %s10292_s24 = scalar_lea.vmem %s10291_s16, 256 }
  0x51   : > { %839 = vperm.xlu1 %10268, %v697_v19   ;;  %829 = vperm.xlu0 %10267, %v695_v20   ;;  %v8777_v47 = vpack.c.bf16 %v564_v46, %v560_v44  ;;  %v700_v49 = vld [vmem:[%s14926_s2 + $0x30] sm:$0xff]  ;;  %v703_v51 = vld [vmem:[%s14926_s2 + $0x48] sm:$0xff]  ;;  %v702_v52 = vld [vmem:[%s14926_s2 + $0x40] sm:$0xff]  ;;  %s14721_s13 = sadd.s32 %s8756_s25, %s8755_s21 }
  0x52   : > { %8768 = vmatprep.subr.bf16.mxu0 %v8767_v40  ;;  %8776 = vmatprep.subr.bf16.mxu1 %v8775_v41  ;;  %v567_v53 = vld [vmem:[%s14927_s1 + $0x8] sm:$0xff]  ;;  %v705_v54 = vld [vmem:[%s14926_s2 + $0x58] sm:$0xff]  ;;  %v704_v55 = vld [vmem:[%s14926_s2 + $0x50] sm:$0xff]  ;;  %s8760_s29 = sshll.u32 %s14721_s13, 5 }
  0x53   : > { %8770 = vmatpush1.bf16.msra.mxu0 %v8769_v45  ;;  %v568_v56 = vld [vmem:[%s14927_s1 + $0x10] sm:$0xff]  ;;  %v707_v57 = vld [vmem:[%s14926_s2 + $0x68] sm:$0xff]  ;;  %v706_v58 = vld [vmem:[%s14926_s2 + $0x60] sm:$0xff] }
  0x54   : > { %8778 = vmatpush1.bf16.msra.mxu1 %v8777_v47  ;;  %v569_v59 = vld [vmem:[%s14927_s1 + $0x18] sm:$0xff]  ;;  %v708_v61 = vld [vmem:[%s14926_s2 + $0x70] sm:$0xff]  ;;  %v570_v62 = vld [vmem:[%s14927_s1 + $0x20] sm:$0xff] }
  0x55   : > { %849 = vperm.xlu1 %10268, %v699_v33   ;;  %844 = vperm.xlu0 %10267, %v698_v34   ;;  %v709_v60 = vld [vmem:[%s14926_s2 + $0x78] sm:$0xff]  ;;  %v711_v63 = vld [vmem:[%s14926_s2 + $0x88] sm:$0xff]  ;;  %v710_v0 = vld [vmem:[%s14926_s2 + $0x80] sm:$0xff] }
  0x56   : > { %8495 = vmatmul.mubr.msk.f32.vlgmr.msra.gmra.mrb[0].mxu0 %vm1462_vm0, %v566_v50  ;;  %v571_v1 = vld [vmem:[%s14927_s1 + $0x28] sm:$0xff]  ;;  %v713_v2 = vld [vmem:[%s14926_s2 + $0x98] sm:$0xff]  ;;  %v712_v3 = vld [vmem:[%s14926_s2 + $0x90] sm:$0xff] }
  0x57   : > { %8623 = vmatmul.mubr.msk.f32.vlgmr.msra.gmra.mrb[0].mxu1 %vm1462_vm0, %v566_v50  ;;  %1917 = vmatprep.mubr.f32.mxu0 %v14841_v24  ;;  %v572_v4 = vld [vmem:[%s14927_s1 + $0x30] sm:$0xff]  ;;  %v715_v5 = vld [vmem:[%s14926_s2 + $0xa8] sm:$0xff]  ;;  %v714_v6 = vld [vmem:[%s14926_s2 + $0xa0] sm:$0xff] }
  0x58   : > { %2750 = vmatprep.mubr.f32.mxu1 %v14841_v24  ;;  %v573_v7 = vld [vmem:[%s14927_s1 + $0x38] sm:$0xff]  ;;  %v716_v9 = vld [vmem:[%s14926_s2 + $0xb0] sm:$0xff]  ;;  %v574_v10 = vld [vmem:[%s14927_s1 + $0x40] sm:$0xff] }
  0x59   : > { %859 = vperm.xlu1 %10268, %v701_v48   ;;  %854 = vperm.xlu0 %10267, %v700_v49   ;;  %v717_v8 = vld [vmem:[%s14926_s2 + $0xb8] sm:$0xff]  ;;  %v719_v11 = vld [vmem:[%s14926_s2 + $0xc8] sm:$0xff]  ;;  %v718_v12 = vld [vmem:[%s14926_s2 + $0xc0] sm:$0xff] }
  0x5a   : > { %8496 = vmatmul.mubr.msk.f32.gmra.mrb[2].mxu0 %vm1462_vm0, %v567_v53  ;;  %v575_v13 = vld [vmem:[%s14927_s1 + $0x48] sm:$0xff]  ;;  %v721_v14 = vld [vmem:[%s14926_s2 + $0xd8] sm:$0xff]  ;;  %v720_v15 = vld [vmem:[%s14926_s2 + $0xd0] sm:$0xff] }
  0x5b   : > { %8624 = vmatmul.mubr.msk.f32.gmra.mrb[2].mxu1 %vm1462_vm0, %v567_v53  ;;  %1923 = vmatprep.mubr.f32.mxu0 %v14841_v24  ;;  %v576_v16 = vld [vmem:[%s14927_s1 + $0x50] sm:$0xff]  ;;  %v723_v17 = vld [vmem:[%s14926_s2 + $0xe8] sm:$0xff]  ;;  %v722_v18 = vld [vmem:[%s14926_s2 + $0xe0] sm:$0xff] }
  0x5c   : > { %2756 = vmatprep.mubr.f32.mxu1 %v14841_v24  ;;  %v577_v19 = vld [vmem:[%s14927_s1 + $0x58] sm:$0xff]  ;;  %v724_v21 = vld [vmem:[%s14926_s2 + $0xf0] sm:$0xff]  ;;  %v578_v22 = vld [vmem:[%s14927_s1 + $0x60] sm:$0xff] }
  0x5d   : > { %869 = vperm.xlu1 %10268, %v703_v51   ;;  %864 = vperm.xlu0 %10267, %v702_v52   ;;  %v725_v20 = vld [vmem:[%s14926_s2 + $0xf8] sm:$0xff]  ;;  %v727_v23 = vld [vmem:[%s14926_s2 + $0x108] sm:$0xff]  ;;  %v726_v25 = vld [vmem:[%s14926_s2 + $0x100] sm:$0xff] }
  0x5e   : > { %8497 = vmatmul.mubr.msk.f32.gmra.mrb[4].mxu0 %vm1462_vm0, %v568_v56  ;;  %v579_v26 = vld [vmem:[%s14927_s1 + $0x68] sm:$0xff]  ;;  %v729_v27 = vld [vmem:[%s14926_s2 + $0x118] sm:$0xff]  ;;  %v728_v28 = vld [vmem:[%s14926_s2 + $0x110] sm:$0xff] }
  0x5f   : > { %8625 = vmatmul.mubr.msk.f32.gmra.mrb[4].mxu1 %vm1462_vm0, %v568_v56  ;;  %1929 = vmatprep.mubr.f32.mxu0 %v14841_v24  ;;  %v580_v29 = vld [vmem:[%s14927_s1 + $0x70] sm:$0xff]  ;;  %v731_v30 = vld [vmem:[%s14926_s2 + $0x128] sm:$0xff]  ;;  %v730_v31 = vld [vmem:[%s14926_s2 + $0x120] sm:$0xff] }
  0x60   : > { %2762 = vmatprep.mubr.f32.mxu1 %v14841_v24  ;;  %v581_v32 = vld [vmem:[%s14927_s1 + $0x78] sm:$0xff]  ;;  %v732_v34 = vld [vmem:[%s14926_s2 + $0x130] sm:$0xff]  ;;  %v582_v35 = vld [vmem:[%s14927_s1 + $0x80] sm:$0xff] }
  0x61   : > { %879 = vperm.xlu1 %10268, %v705_v54   ;;  %874 = vperm.xlu0 %10267, %v704_v55   ;;  %v733_v33 = vld [vmem:[%s14926_s2 + $0x138] sm:$0xff]  ;;  %v735_v36 = vld [vmem:[%s14926_s2 + $0x148] sm:$0xff]  ;;  %v734_v37 = vld [vmem:[%s14926_s2 + $0x140] sm:$0xff] }
  0x62   : > { %8498 = vmatmul.mubr.msk.f32.gmra.mrb[6].mxu0 %vm1462_vm0, %v569_v59  ;;  %v583_v38 = vld [vmem:[%s14927_s1 + $0x88] sm:$0xff]  ;;  %v737_v39 = vld [vmem:[%s14926_s2 + $0x158] sm:$0xff]  ;;  %v736_v40 = vld [vmem:[%s14926_s2 + $0x150] sm:$0xff] }
  0x63   : > { %8626 = vmatmul.mubr.msk.f32.gmra.mrb[6].mxu1 %vm1462_vm0, %v569_v59  ;;  %1935 = vmatprep.mubr.f32.mxu0 %v14841_v24  ;;  %v584_v41 = vld [vmem:[%s14927_s1 + $0x90] sm:$0xff]  ;;  %v739_v42 = vld [vmem:[%s14926_s2 + $0x168] sm:$0xff]  ;;  %v738_v43 = vld [vmem:[%s14926_s2 + $0x160] sm:$0xff] }
  0x64   : > { %2768 = vmatprep.mubr.f32.mxu1 %v14841_v24  ;;  %v585_v44 = vld [vmem:[%s14927_s1 + $0x98] sm:$0xff]  ;;  %v740_v46 = vld [vmem:[%s14926_s2 + $0x170] sm:$0xff]  ;;  %v586_v47 = vld [vmem:[%s14927_s1 + $0xa0] sm:$0xff] }
  0x65   : > { %889 = vperm.xlu1 %10268, %v707_v57   ;;  %884 = vperm.xlu0 %10267, %v706_v58   ;;  %v741_v45 = vld [vmem:[%s14926_s2 + $0x178] sm:$0xff]  ;;  %v743_v48 = vld [vmem:[%s14926_s2 + $0x188] sm:$0xff]  ;;  %v742_v49 = vld [vmem:[%s14926_s2 + $0x180] sm:$0xff] }
  0x66   : > { %8499 = vmatmul.mubr.msk.f32.gmra.mrb[8].mxu0 %vm1462_vm0, %v570_v62  ;;  %v587_v50 = vld [vmem:[%s14927_s1 + $0xa8] sm:$0xff]  ;;  %v745_v51 = vld [vmem:[%s14926_s2 + $0x198] sm:$0xff]  ;;  %v744_v52 = vld [vmem:[%s14926_s2 + $0x190] sm:$0xff] }
  0x67   : > { %8627 = vmatmul.mubr.msk.f32.gmra.mrb[8].mxu1 %vm1462_vm0, %v570_v62  ;;  %1941 = vmatprep.mubr.f32.mxu0 %v14841_v24  ;;  %v588_v53 = vld [vmem:[%s14927_s1 + $0xb0] sm:$0xff]  ;;  %v747_v54 = vld [vmem:[%s14926_s2 + $0x1a8] sm:$0xff]  ;;  %v746_v55 = vld [vmem:[%s14926_s2 + $0x1a0] sm:$0xff] }
  0x68   : > { %2774 = vmatprep.mubr.f32.mxu1 %v14841_v24  ;;  %v589_v56 = vld [vmem:[%s14927_s1 + $0xb8] sm:$0xff]  ;;  %v748_v58 = vld [vmem:[%s14926_s2 + $0x1b0] sm:$0xff]  ;;  %v590_v59 = vld [vmem:[%s14927_s1 + $0xc0] sm:$0xff] }
  0x69   : > { %899 = vperm.xlu1 %10268, %v709_v60   ;;  %894 = vperm.xlu0 %10267, %v708_v61   ;;  %v749_v57 = vld [vmem:[%s14926_s2 + $0x1b8] sm:$0xff]  ;;  %v751_v60 = vld [vmem:[%s14926_s2 + $0x1c8] sm:$0xff]  ;;  %v750_v61 = vld [vmem:[%s14926_s2 + $0x1c0] sm:$0xff] }
  0x6a   : > { %8500 = vmatmul.mubr.msk.f32.gmra.mrb[10].mxu0 %vm1462_vm0, %v571_v1  ;;  %v591_v62 = vld [vmem:[%s14927_s1 + $0xc8] sm:$0xff] }
  0x6b   : > { %8628 = vmatmul.mubr.msk.f32.gmra.mrb[10].mxu1 %vm1462_vm0, %v571_v1  ;;  %1947 = vmatprep.mubr.f32.mxu0 %v14841_v24  ;;  %v592_v1 = vld [vmem:[%s14927_s1 + $0xd0] sm:$0xff] }
  0x6c   : > { %2780 = vmatprep.mubr.f32.mxu1 %v14841_v24 }
  0x6d   : > { %909 = vperm.xlu1 %10268, %v711_v63   ;;  %904 = vperm.xlu0 %10267, %v710_v0   ;;  %v753_v63 = vld [vmem:[%s14926_s2 + $0x1d8] sm:$0xff]  ;;  %v752_v0 = vld [vmem:[%s14926_s2 + $0x1d0] sm:$0xff] }
  0x6e   : > { %8501 = vmatmul.mubr.msk.f32.gmra.mrb[12].mxu0 %vm1462_vm0, %v572_v4 }
  0x6f   : > { %8629 = vmatmul.mubr.msk.f32.gmra.mrb[12].mxu1 %vm1462_vm0, %v572_v4  ;;  %1953 = vmatprep.mubr.f32.mxu0 %v14841_v24  ;;  %v593_v4 = vld [vmem:[%s14927_s1 + $0xd8] sm:$0xff] }
  0x70   : > { %2786 = vmatprep.mubr.f32.mxu1 %v14841_v24 }
  0x71   : > { %919 = vperm.xlu1 %10268, %v713_v2   ;;  %914 = vperm.xlu0 %10267, %v712_v3   ;;  %v755_v2 = vld [vmem:[%s14926_s2 + $0x1e8] sm:$0xff]  ;;  %v754_v3 = vld [vmem:[%s14926_s2 + $0x1e0] sm:$0xff] }
  0x72   : > { %8502 = vmatmul.mubr.msk.f32.gmra.mrb[14].mxu0 %vm1462_vm0, %v573_v7 }
  0x73   : > { %8630 = vmatmul.mubr.msk.f32.gmra.mrb[14].mxu1 %vm1462_vm0, %v573_v7  ;;  %1959 = vmatprep.mubr.f32.mxu0 %v14841_v24  ;;  %v594_v7 = vld [vmem:[%s14927_s1 + $0xe0] sm:$0xff] }
  0x74   : > { %2792 = vmatprep.mubr.f32.mxu1 %v14841_v24 }
  0x75   : > { %929 = vperm.xlu1 %10268, %v715_v5   ;;  %924 = vperm.xlu0 %10267, %v714_v6   ;;  %v757_v5 = vld [vmem:[%s14926_s2 + $0x1f8] sm:$0xff]  ;;  %v756_v6 = vld [vmem:[%s14926_s2 + $0x1f0] sm:$0xff] }
  0x76   : > { %8503 = vmatmul.mubr.msk.f32.gmra.mrb[16].mxu0 %vm1462_vm0, %v574_v10 }
  0x77   : > { %8631 = vmatmul.mubr.msk.f32.gmra.mrb[16].mxu1 %vm1462_vm0, %v574_v10  ;;  %1965 = vmatprep.mubr.f32.mxu0 %v14841_v24  ;;  %v595_v10 = vld [vmem:[%s14927_s1 + $0xe8] sm:$0xff] }
  0x78   : > { %2798 = vmatprep.mubr.f32.mxu1 %v14841_v24 }
  0x79   : > { %939 = vperm.xlu1 %10268, %v717_v8   ;;  %934 = vperm.xlu0 %10267, %v716_v9   ;;  %v4154_v8 = vld [vmem:[%s14928_s4 + $0x8] sm:$0xff]  ;;  %v4153_v9 = vld [vmem:[%s14928_s4] sm:$0xff] }
  0x7a   : > { %8504 = vmatmul.mubr.msk.f32.gmra.mrb[18].mxu0 %vm1462_vm0, %v575_v13 }
  0x7b   : > { %8632 = vmatmul.mubr.msk.f32.gmra.mrb[18].mxu1 %vm1462_vm0, %v575_v13  ;;  %1971 = vmatprep.mubr.f32.mxu0 %v14841_v24  ;;  %v4156_v13 = vld [vmem:[%s14928_s4 + $0x18] sm:$0xff] }
  0x7c   : > { %2804 = vmatprep.mubr.f32.mxu1 %v14841_v24 }
  0x7d   : > { %949 = vperm.xlu1 %10268, %v719_v11   ;;  %944 = vperm.xlu0 %10267, %v718_v12  }
  0x7e   : > { %8505 = vmatmul.mubr.msk.f32.gmra.mrb[20].mxu0 %vm1462_vm0, %v576_v16 }
  0x7f   : > { %8633 = vmatmul.mubr.msk.f32.gmra.mrb[20].mxu1 %vm1462_vm0, %v576_v16  ;;  %1977 = vmatprep.mubr.f32.mxu0 %v14841_v24 }
  0x80   : > { %2810 = vmatprep.mubr.f32.mxu1 %v14841_v24 }
  0x81   : > { %959 = vperm.xlu1 %10268, %v721_v14   ;;  %954 = vperm.xlu0 %10267, %v720_v15   ;;  %v4155_v14 = vld [vmem:[%s14928_s4 + $0x10] sm:$0xff] }
  0x82   : > { %8506 = vmatmul.mubr.msk.f32.gmra.mrb[22].mxu0 %vm1462_vm0, %v577_v19  ;;  %v596_v15 = vld [vmem:[%s14927_s1 + $0xf0] sm:$0xff] }
  0x83   : > { %8634 = vmatmul.mubr.msk.f32.gmra.mrb[22].mxu1 %vm1462_vm0, %v577_v19  ;;  %1983 = vmatprep.mubr.f32.mxu0 %v14841_v24  ;;  %v4157_v19 = vld [vmem:[%s14928_s4 + $0x20] sm:$0xff] }
  0x84   : > { %2816 = vmatprep.mubr.f32.mxu1 %v14841_v24 }
  0x85   : > { %969 = vperm.xlu1 %10268, %v723_v17   ;;  %964 = vperm.xlu0 %10267, %v722_v18   ;;  %v4158_v18 = vld [vmem:[%s14928_s4 + $0x28] sm:$0xff] }
  0x86   : > { %8507 = vmatmul.mubr.msk.f32.gmra.mrb[24].mxu0 %vm1462_vm0, %v578_v22 }
  0x87   : > { %8635 = vmatmul.mubr.msk.f32.gmra.mrb[24].mxu1 %vm1462_vm0, %v578_v22  ;;  %1989 = vmatprep.mubr.f32.mxu0 %v14841_v24 }
  0x88   : > { %2822 = vmatprep.mubr.f32.mxu1 %v14841_v24 }
  0x89   : > { %979 = vperm.xlu1 %10268, %v725_v20   ;;  %974 = vperm.xlu0 %10267, %v724_v21   ;;  %v597_v20 = vld [vmem:[%s14927_s1 + $0xf8] sm:$0xff] }
  0x8a   : > { %8508 = vmatmul.mubr.msk.f32.gmra.mrb[26].mxu0 %vm1462_vm0, %v579_v26 }
  0x8b   : > { %8636 = vmatmul.mubr.msk.f32.gmra.mrb[26].mxu1 %vm1462_vm0, %v579_v26  ;;  %1995 = vmatprep.mubr.f32.mxu0 %v14841_v24  ;;  %v598_v26 = vld [vmem:[%s14927_s1 + $0x100] sm:$0xff] }
  0x8c   : > { %2828 = vmatprep.mubr.f32.mxu1 %v14841_v24 }
  0x8d   : > { %989 = vperm.xlu1 %10268, %v727_v23   ;;  %984 = vperm.xlu0 %10267, %v726_v25   ;;  %v4160_v23 = vld [vmem:[%s14928_s4 + $0x38] sm:$0xff]  ;;  %v4159_v25 = vld [vmem:[%s14928_s4 + $0x30] sm:$0xff] }
  0x8e   : > { %8509 = vmatmul.mubr.msk.f32.gmra.mrb[28].mxu0 %vm1462_vm0, %v580_v29 }
  0x8f   : > { %8637 = vmatmul.mubr.msk.f32.gmra.mrb[28].mxu1 %vm1462_vm0, %v580_v29  ;;  %2001 = vmatprep.mubr.f32.mxu0 %v14841_v24  ;;  %v4162_v29 = vld [vmem:[%s14928_s4 + $0x48] sm:$0xff] }
  0x90   : > { %2834 = vmatprep.mubr.f32.mxu1 %v14841_v24 }
  0x91   : > { %999 = vperm.xlu1 %10268, %v729_v27   ;;  %994 = vperm.xlu0 %10267, %v728_v28  }
  0x92   : > { %8510 = vmatmul.mubr.msk.f32.gmra.mrb[30].mxu0 %vm1462_vm0, %v581_v32 }
  0x93   : > { %8638 = vmatmul.mubr.msk.f32.gmra.mrb[30].mxu1 %vm1462_vm0, %v581_v32  ;;  %2007 = vmatprep.mubr.f32.mxu0 %v14841_v24 }
  0x94   : > { %2840 = vmatprep.mubr.f32.mxu1 %v14841_v24 }
  0x95   : > { %1009 = vperm.xlu1 %10268, %v731_v30   ;;  %1004 = vperm.xlu0 %10267, %v730_v31   ;;  %v4161_v30 = vld [vmem:[%s14928_s4 + $0x40] sm:$0xff]  ;;  %v599_v31 = vld [vmem:[%s14927_s1 + $0x108] sm:$0xff] }
  0x96   : > { %8511 = vmatmul.mubr.msk.f32.gmra.mrb[32].mxu0 %vm1462_vm0, %v582_v35 }
  0x97   : > { %8639 = vmatmul.mubr.msk.f32.gmra.mrb[32].mxu1 %vm1462_vm0, %v582_v35  ;;  %2013 = vmatprep.mubr.f32.mxu0 %v14841_v24  ;;  %v4163_v35 = vld [vmem:[%s14928_s4 + $0x50] sm:$0xff] }
  0x98   : > { %2846 = vmatprep.mubr.f32.mxu1 %v14841_v24 }
  0x99   : > { %1019 = vperm.xlu1 %10268, %v733_v33   ;;  %1014 = vperm.xlu0 %10267, %v732_v34   ;;  %v4164_v34 = vld [vmem:[%s14928_s4 + $0x58] sm:$0xff] }
  0x9a   : > { %8512 = vmatmul.mubr.msk.f32.gmra.mrb[34].mxu0 %vm1462_vm0, %v583_v38 }
  0x9b   : > { %8640 = vmatmul.mubr.msk.f32.gmra.mrb[34].mxu1 %vm1462_vm0, %v583_v38  ;;  %2019 = vmatprep.mubr.f32.mxu0 %v14841_v24 }
  0x9c   : > { %2852 = vmatprep.mubr.f32.mxu1 %v14841_v24 }
  0x9d   : > { %1029 = vperm.xlu1 %10268, %v735_v36   ;;  %1024 = vperm.xlu0 %10267, %v734_v37   ;;  %v600_v36 = vld [vmem:[%s14927_s1 + $0x110] sm:$0xff] }
  0x9e   : > { %8513 = vmatmul.mubr.msk.f32.gmra.mrb[36].mxu0 %vm1462_vm0, %v584_v41 }
  0x9f   : > { %8641 = vmatmul.mubr.msk.f32.gmra.mrb[36].mxu1 %vm1462_vm0, %v584_v41  ;;  %2025 = vmatprep.mubr.f32.mxu0 %v14841_v24  ;;  %v601_v41 = vld [vmem:[%s14927_s1 + $0x118] sm:$0xff] }
  0xa0   : > { %2858 = vmatprep.mubr.f32.mxu1 %v14841_v24 }
  0xa1   : > { %1039 = vperm.xlu1 %10268, %v737_v39   ;;  %1034 = vperm.xlu0 %10267, %v736_v40   ;;  %v4166_v39 = vld [vmem:[%s14928_s4 + $0x68] sm:$0xff]  ;;  %v4165_v40 = vld [vmem:[%s14928_s4 + $0x60] sm:$0xff] }
  0xa2   : > { %8514 = vmatmul.mubr.msk.f32.gmra.mrb[38].mxu0 %vm1462_vm0, %v585_v44 }
  0xa3   : > { %8642 = vmatmul.mubr.msk.f32.gmra.mrb[38].mxu1 %vm1462_vm0, %v585_v44  ;;  %2031 = vmatprep.mubr.f32.mxu0 %v14841_v24  ;;  %v4168_v44 = vld [vmem:[%s14928_s4 + $0x78] sm:$0xff] }
  0xa4   : > { %2864 = vmatprep.mubr.f32.mxu1 %v14841_v24 }
  0xa5   : > { %1049 = vperm.xlu1 %10268, %v739_v42   ;;  %1044 = vperm.xlu0 %10267, %v738_v43  }
  0xa6   : > { %8515 = vmatmul.mubr.msk.f32.gmra.mrb[40].mxu0 %vm1462_vm0, %v586_v47 }
  0xa7   : > { %8643 = vmatmul.mubr.msk.f32.gmra.mrb[40].mxu1 %vm1462_vm0, %v586_v47  ;;  %2037 = vmatprep.mubr.f32.mxu0 %v14841_v24 }
  0xa8   : > { %2870 = vmatprep.mubr.f32.mxu1 %v14841_v24 }
  0xa9   : > { %1059 = vperm.xlu1 %10268, %v741_v45   ;;  %1054 = vperm.xlu0 %10267, %v740_v46   ;;  %v4167_v45 = vld [vmem:[%s14928_s4 + $0x70] sm:$0xff]  ;;  %v602_v46 = vld [vmem:[%s14927_s1 + $0x120] sm:$0xff] }
  0xaa   : > { %8516 = vmatmul.mubr.msk.f32.gmra.mrb[42].mxu0 %vm1462_vm0, %v587_v50 }
  0xab   : > { %8644 = vmatmul.mubr.msk.f32.gmra.mrb[42].mxu1 %vm1462_vm0, %v587_v50  ;;  %2043 = vmatprep.mubr.f32.mxu0 %v14841_v24  ;;  %v4169_v50 = vld [vmem:[%s14928_s4 + $0x80] sm:$0xff] }
  0xac   : > { %2876 = vmatprep.mubr.f32.mxu1 %v14841_v24 }
  0xad   : > { %1069 = vperm.xlu1 %10268, %v743_v48   ;;  %1064 = vperm.xlu0 %10267, %v742_v49   ;;  %v4170_v49 = vld [vmem:[%s14928_s4 + $0x88] sm:$0xff] }
  0xae   : > { %8517 = vmatmul.mubr.msk.f32.gmra.mrb[44].mxu0 %vm1462_vm0, %v588_v53 }
  0xaf   : > { %8645 = vmatmul.mubr.msk.f32.gmra.mrb[44].mxu1 %vm1462_vm0, %v588_v53  ;;  %2049 = vmatprep.mubr.f32.mxu0 %v14841_v24 }
  0xb0   : > { %2882 = vmatprep.mubr.f32.mxu1 %v14841_v24 }
  0xb1   : > { %1079 = vperm.xlu1 %10268, %v745_v51   ;;  %1074 = vperm.xlu0 %10267, %v744_v52   ;;  %v603_v51 = vld [vmem:[%s14927_s1 + $0x128] sm:$0xff] }
  0xb2   : > { %8518 = vmatmul.mubr.msk.f32.gmra.mrb[46].mxu0 %vm1462_vm0, %v589_v56 }
  0xb3   : > { %8646 = vmatmul.mubr.msk.f32.gmra.mrb[46].mxu1 %vm1462_vm0, %v589_v56  ;;  %2055 = vmatprep.mubr.f32.mxu0 %v14841_v24  ;;  %v604_v56 = vld [vmem:[%s14927_s1 + $0x130] sm:$0xff] }
  0xb4   : > { %2888 = vmatprep.mubr.f32.mxu1 %v14841_v24 }
  0xb5   : > { %1089 = vperm.xlu1 %10268, %v747_v54   ;;  %1084 = vperm.xlu0 %10267, %v746_v55   ;;  %v4172_v54 = vld [vmem:[%s14928_s4 + $0x98] sm:$0xff]  ;;  %v4171_v55 = vld [vmem:[%s14928_s4 + $0x90] sm:$0xff] }
  0xb6   : > { %8519 = vmatmul.mubr.msk.f32.gmra.mrb[48].mxu0 %vm1462_vm0, %v590_v59 }
  0xb7   : > { %8647 = vmatmul.mubr.msk.f32.gmra.mrb[48].mxu1 %vm1462_vm0, %v590_v59  ;;  %2061 = vmatprep.mubr.f32.mxu0 %v14841_v24  ;;  %v4174_v59 = vld [vmem:[%s14928_s4 + $0xa8] sm:$0xff] }
  0xb8   : > { %2894 = vmatprep.mubr.f32.mxu1 %v14841_v24 }
  0xb9   : > { %1099 = vperm.xlu1 %10268, %v749_v57   ;;  %1094 = vperm.xlu0 %10267, %v748_v58  }
  0xba   : > { %8520 = vmatmul.mubr.msk.f32.gmra.mrb[50].mxu0 %vm1462_vm0, %v591_v62 }
  0xbb   : > { %8648 = vmatmul.mubr.msk.f32.gmra.mrb[50].mxu1 %vm1462_vm0, %v591_v62  ;;  %2067 = vmatprep.mubr.f32.mxu0 %v14841_v24 }
  0xbc   : > { %2900 = vmatprep.mubr.f32.mxu1 %v14841_v24 }
  0xbd   : > { %1109 = vperm.xlu1 %10268, %v751_v60   ;;  %1104 = vperm.xlu0 %10267, %v750_v61   ;;  %v4173_v60 = vld [vmem:[%s14928_s4 + $0xa0] sm:$0xff]  ;;  %v605_v61 = vld [vmem:[%s14927_s1 + $0x138] sm:$0xff] }
  0xbe   : > { %8521 = vmatmul.mubr.msk.f32.gmra.mrb[52].mxu0 %vm1462_vm0, %v592_v1 }
  0xbf   : > { %8649 = vmatmul.mubr.msk.f32.gmra.mrb[52].mxu1 %vm1462_vm0, %v592_v1  ;;  %2073 = vmatprep.mubr.f32.mxu0 %v14841_v24  ;;  %v4175_v1 = vld [vmem:[%s14928_s4 + $0xb0] sm:$0xff] }
  0xc0   : > { %2906 = vmatprep.mubr.f32.mxu1 %v14841_v24 }
  0xc1   : > { %1119 = vperm.xlu1 %10268, %v753_v63   ;;  %1114 = vperm.xlu0 %10267, %v752_v0   ;;  %v4176_v0 = vld [vmem:[%s14928_s4 + $0xb8] sm:$0xff] }
  0xc2   : > { %8522 = vmatmul.mubr.msk.f32.gmra.mrb[54].mxu0 %vm1462_vm0, %v593_v4 }
  0xc3   : > { %8650 = vmatmul.mubr.msk.f32.gmra.mrb[54].mxu1 %vm1462_vm0, %v593_v4  ;;  %2079 = vmatprep.mubr.f32.mxu0 %v14841_v24 }
  0xc4   : > { %2912 = vmatprep.mubr.f32.mxu1 %v14841_v24 }
  0xc5   : > { %1129 = vperm.xlu1 %10268, %v755_v2   ;;  %1124 = vperm.xlu0 %10267, %v754_v3   ;;  %v606_v2 = vld [vmem:[%s14927_s1 + $0x140] sm:$0xff] }
  0xc6   : > { %8523 = vmatmul.mubr.msk.f32.gmra.mrb[56].mxu0 %vm1462_vm0, %v594_v7 }
  0xc7   : > { %8651 = vmatmul.mubr.msk.f32.gmra.mrb[56].mxu1 %vm1462_vm0, %v594_v7  ;;  %2085 = vmatprep.mubr.f32.mxu0 %v14841_v24  ;;  %v607_v7 = vld [vmem:[%s14927_s1 + $0x148] sm:$0xff] }
  0xc8   : > { %2918 = vmatprep.mubr.f32.mxu1 %v14841_v24 }
  0xc9   : > { %1139 = vperm.xlu1 %10268, %v757_v5   ;;  %1134 = vperm.xlu0 %10267, %v756_v6   ;;  %v4178_v5 = vld [vmem:[%s14928_s4 + $0xc8] sm:$0xff]  ;;  %v4177_v6 = vld [vmem:[%s14928_s4 + $0xc0] sm:$0xff] }
  0xca   : > { %8524 = vmatmul.mubr.msk.f32.gmra.mrb[58].mxu0 %vm1462_vm0, %v595_v10 }
  0xcb   : > { %8652 = vmatmul.mubr.msk.f32.gmra.mrb[58].mxu1 %vm1462_vm0, %v595_v10  ;;  %2091 = vmatprep.mubr.f32.mxu0 %v14841_v24  ;;  %v4180_v10 = vld [vmem:[%s14928_s4 + $0xd8] sm:$0xff] }
  0xcc   : > { %v11026_v11 = vpop.permute.xlu1 %834  ;;  %v11028_v12 = vpop.permute.xlu0 %824  ;;  %2924 = vmatprep.mubr.f32.mxu1 %v14841_v24 }
  0xcd   : > { %4192 = vperm.xlu1 %10268, %v4154_v8   ;;  %4187 = vperm.xlu0 %10267, %v4153_v9  }
  0xce   : > { %8525 = vmatmul.mubr.msk.f32.gmra.mrb[60].mxu0 %vm1462_vm0, %v596_v15 }
  0xcf   : > { %8653 = vmatmul.mubr.msk.f32.gmra.mrb[60].mxu1 %vm1462_vm0, %v596_v15  ;;  %2097 = vmatprep.mubr.f32.mxu0 %v14841_v24 }
  0xd0   : > { %v11043_v16 = vpop.permute.xlu1 %839  ;;  %v11045_v17 = vpop.permute.xlu0 %829  ;;  %2930 = vmatprep.mubr.f32.mxu1 %v14841_v24 }
  0xd1   : > { %4202 = vperm.xlu1 %10268, %v4156_v13   ;;  %4197 = vperm.xlu0 %10267, %v4155_v14   ;;  %v4179_v13 = vld [vmem:[%s14928_s4 + $0xd0] sm:$0xff] }
  0xd2   : > { %8526 = vmatmul.mubr.msk.f32.gmra.mrb[62].mxu0 %vm1462_vm0, %v597_v20  ;;  %v608_v14 = vld [vmem:[%s14927_s1 + $0x150] sm:$0xff] }
  0xd3   : > { %8654 = vmatmul.mubr.msk.f32.gmra.mrb[62].mxu1 %vm1462_vm0, %v597_v20  ;;  %2103 = vmatprep.mubr.f32.mxu0 %v14841_v24  ;;  %v4181_v20 = vld [vmem:[%s14928_s4 + $0xe0] sm:$0xff] }
  0xd4   : > { %v11060_v21 = vpop.permute.xlu1 %849  ;;  %v11062_v22 = vpop.permute.xlu0 %844  ;;  %2936 = vmatprep.mubr.f32.mxu1 %v14841_v24 }
  0xd5   : > { %4212 = vperm.xlu1 %10268, %v4158_v18   ;;  %4207 = vperm.xlu0 %10267, %v4157_v19   ;;  %v4182_v19 = vld [vmem:[%s14928_s4 + $0xe8] sm:$0xff] }
  0xd6   : > { %8527 = vmatmul.mubr.msk.f32.gmra.mrb[64].mxu0 %vm1462_vm0, %v598_v26 }
  0xd7   : > { %8655 = vmatmul.mubr.msk.f32.gmra.mrb[64].mxu1 %vm1462_vm0, %v598_v26  ;;  %2109 = vmatprep.mubr.f32.mxu0 %v14841_v24 }
  0xd8   : > { %v11077_v27 = vpop.permute.xlu1 %859  ;;  %v11079_v28 = vpop.permute.xlu0 %854  ;;  %2942 = vmatprep.mubr.f32.mxu1 %v14841_v24 }
  0xd9   : > { %4222 = vperm.xlu1 %10268, %v4160_v23   ;;  %4217 = vperm.xlu0 %10267, %v4159_v25   ;;  %v609_v23 = vld [vmem:[%s14927_s1 + $0x158] sm:$0xff] }
  0xda   : > { %8528 = vmatmul.mubr.msk.f32.gmra.mrb[66].mxu0 %vm1462_vm0, %v599_v31 }
  0xdb   : > { %8656 = vmatmul.mubr.msk.f32.gmra.mrb[66].mxu1 %vm1462_vm0, %v599_v31  ;;  %2115 = vmatprep.mubr.f32.mxu0 %v14841_v24  ;;  %v610_v31 = vld [vmem:[%s14927_s1 + $0x160] sm:$0xff] }
  0xdc   : > { %v11094_v32 = vpop.permute.xlu1 %869  ;;  %v11096_v33 = vpop.permute.xlu0 %864  ;;  %2948 = vmatprep.mubr.f32.mxu1 %v14841_v24 }
  0xdd   : > { %4232 = vperm.xlu1 %10268, %v4162_v29   ;;  %4227 = vperm.xlu0 %10267, %v4161_v30   ;;  %v4184_v29 = vld [vmem:[%s14928_s4 + $0xf8] sm:$0xff]  ;;  %v4183_v30 = vld [vmem:[%s14928_s4 + $0xf0] sm:$0xff]  ;;  %s8334_s4 = scalar_lea.sflag [#allocation6], %s10605_s28 }
  0xde   : > { %8529 = vmatmul.mubr.msk.f32.gmra.mrb[68].mxu0 %vm1462_vm0, %v600_v36 }
  0xdf   : > { %8657 = vmatmul.mubr.msk.f32.gmra.mrb[68].mxu1 %vm1462_vm0, %v600_v36  ;;  %2121 = vmatprep.mubr.f32.mxu0 %v14841_v24  ;;  %v759_v36 = vld [vmem:[%s14926_s2 + $0x208] sm:$0xff] }
  0xe0   : > { %v11111_v37 = vpop.permute.xlu1 %879  ;;  %v11113_v38 = vpop.permute.xlu0 %874  ;;  %2954 = vmatprep.mubr.f32.mxu1 %v14841_v24 }
  0xe1   : > { %4242 = vperm.xlu1 %10268, %v4164_v34   ;;  %4237 = vperm.xlu0 %10267, %v4163_v35  }
  0xe2   : > { %8530 = vmatmul.mubr.msk.f32.gmra.mrb[70].mxu0 %vm1462_vm0, %v601_v41 }
  0xe3   : > { %8658 = vmatmul.mubr.msk.f32.gmra.mrb[70].mxu1 %vm1462_vm0, %v601_v41  ;;  %2127 = vmatprep.mubr.f32.mxu0 %v14841_v24 }
  0xe4   : > { %v11128_v42 = vpop.permute.xlu1 %889  ;;  %v11130_v43 = vpop.permute.xlu0 %884  ;;  %2960 = vmatprep.mubr.f32.mxu1 %v14841_v24 }
  0xe5   : > { %4252 = vperm.xlu1 %10268, %v4166_v39   ;;  %4247 = vperm.xlu0 %10267, %v4165_v40   ;;  %v758_v39 = vld [vmem:[%s14926_s2 + $0x200] sm:$0xff]  ;;  %v611_v40 = vld [vmem:[%s14927_s1 + $0x168] sm:$0xff] }
  0xe6   : > { %8531 = vmatmul.mubr.msk.f32.gmra.mrb[72].mxu0 %vm1462_vm0, %v602_v46 }
  0xe7   : > { %8659 = vmatmul.mubr.msk.f32.gmra.mrb[72].mxu1 %vm1462_vm0, %v602_v46  ;;  %2133 = vmatprep.mubr.f32.mxu0 %v14841_v24  ;;  %v760_v46 = vld [vmem:[%s14926_s2 + $0x210] sm:$0xff] }
  0xe8   : > { %v11145_v47 = vpop.permute.xlu1 %899  ;;  %v11147_v48 = vpop.permute.xlu0 %894  ;;  %2966 = vmatprep.mubr.f32.mxu1 %v14841_v24 }
  0xe9   : > { %4262 = vperm.xlu1 %10268, %v4168_v44   ;;  %4257 = vperm.xlu0 %10267, %v4167_v45   ;;  %v761_v45 = vld [vmem:[%s14926_s2 + $0x218] sm:$0xff] }
  0xea   : > { %8532 = vmatmul.mubr.msk.f32.gmra.mrb[74].mxu0 %vm1462_vm0, %v603_v51 }
  0xeb   : > { %8660 = vmatmul.mubr.msk.f32.gmra.mrb[74].mxu1 %vm1462_vm0, %v603_v51  ;;  %2139 = vmatprep.mubr.f32.mxu0 %v14841_v24 }
  0xec   : > { %v11162_v52 = vpop.permute.xlu1 %909  ;;  %v11164_v53 = vpop.permute.xlu0 %904  ;;  %2972 = vmatprep.mubr.f32.mxu1 %v14841_v24 }
  0xed   : > { %4272 = vperm.xlu1 %10268, %v4170_v49   ;;  %4267 = vperm.xlu0 %10267, %v4169_v50   ;;  %v612_v49 = vld [vmem:[%s14927_s1 + $0x170] sm:$0xff] }
  0xee   : > { %8533 = vmatmul.mubr.msk.f32.gmra.mrb[76].mxu0 %vm1462_vm0, %v604_v56 }
  0xef   : > { %8661 = vmatmul.mubr.msk.f32.gmra.mrb[76].mxu1 %vm1462_vm0, %v604_v56  ;;  %2145 = vmatprep.mubr.f32.mxu0 %v14841_v24  ;;  %v613_v56 = vld [vmem:[%s14927_s1 + $0x178] sm:$0xff] }
  0xf0   : > { %v11179_v57 = vpop.permute.xlu1 %919  ;;  %v11181_v58 = vpop.permute.xlu0 %914  ;;  %2978 = vmatprep.mubr.f32.mxu1 %v14841_v24 }
  0xf1   : > { %4282 = vperm.xlu1 %10268, %v4172_v54   ;;  %4277 = vperm.xlu0 %10267, %v4171_v55   ;;  %v763_v54 = vld [vmem:[%s14926_s2 + $0x228] sm:$0xff]  ;;  %v762_v55 = vld [vmem:[%s14926_s2 + $0x220] sm:$0xff] }
  0xf2   : > { %8534 = vmatmul.mubr.msk.f32.gmra.mrb[78].mxu0 %vm1462_vm0, %v605_v61 }
  0xf3   : > { %8662 = vmatmul.mubr.msk.f32.gmra.mrb[78].mxu1 %vm1462_vm0, %v605_v61  ;;  %2151 = vmatprep.mubr.f32.mxu0 %v14841_v24  ;;  %v765_v61 = vld [vmem:[%s14926_s2 + $0x238] sm:$0xff] }
  0xf4   : > { %v11196_v62 = vpop.permute.xlu1 %929  ;;  %v11198_v63 = vpop.permute.xlu0 %924  ;;  %2984 = vmatprep.mubr.f32.mxu1 %v14841_v24 }
  0xf5   : > { %4292 = vperm.xlu1 %10268, %v4174_v59   ;;  %4287 = vperm.xlu0 %10267, %v4173_v60  }
  0xf6   : > { %8535 = vmatmul.mubr.msk.f32.gmra.mrb[80].mxu0 %vm1462_vm0, %v606_v2 }
  0xf7   : > { %8663 = vmatmul.mubr.msk.f32.gmra.mrb[80].mxu1 %vm1462_vm0, %v606_v2  ;;  %2157 = vmatprep.mubr.f32.mxu0 %v14841_v24 }
  0xf8   : > { %v11213_v3 = vpop.permute.xlu1 %939  ;;  %v11215_v4 = vpop.permute.xlu0 %934  ;;  %2990 = vmatprep.mubr.f32.mxu1 %v14841_v24 }
  0xf9   : > { %4302 = vperm.xlu1 %10268, %v4176_v0   ;;  %4297 = vperm.xlu0 %10267, %v4175_v1   ;;  %v764_v0 = vld [vmem:[%s14926_s2 + $0x230] sm:$0xff]  ;;  %v614_v1 = vld [vmem:[%s14927_s1 + $0x180] sm:$0xff] }
  0xfa   : > { %8536 = vmatmul.mubr.msk.f32.gmra.mrb[82].mxu0 %vm1462_vm0, %v607_v7 }
  0xfb   : > { %8664 = vmatmul.mubr.msk.f32.gmra.mrb[82].mxu1 %vm1462_vm0, %v607_v7  ;;  %2163 = vmatprep.mubr.f32.mxu0 %v14841_v24  ;;  %v766_v7 = vld [vmem:[%s14926_s2 + $0x240] sm:$0xff] }
  0xfc   : > { %v11230_v8 = vpop.permute.xlu1 %949  ;;  %v11232_v9 = vpop.permute.xlu0 %944  ;;  %2996 = vmatprep.mubr.f32.mxu1 %v14841_v24 }
  0xfd   : > { %4312 = vperm.xlu1 %10268, %v4178_v5   ;;  %4307 = vperm.xlu0 %10267, %v4177_v6   ;;  %v767_v6 = vld [vmem:[%s14926_s2 + $0x248] sm:$0xff] }
  0xfe   : > { %8537 = vmatmul.mubr.msk.f32.gmra.mrb[84].mxu0 %vm1462_vm0, %v608_v14 }
  0xff   : > { %8665 = vmatmul.mubr.msk.f32.gmra.mrb[84].mxu1 %vm1462_vm0, %v608_v14  ;;  %2169 = vmatprep.mubr.f32.mxu0 %v14841_v24 }
 0x100   : > { %v11247_v15 = vpop.permute.xlu1 %959  ;;  %v11249_v18 = vpop.permute.xlu0 %954  ;;  %3002 = vmatprep.mubr.f32.mxu1 %v14841_v24 }
 0x101   : > { %4322 = vperm.xlu1 %10268, %v4180_v10   ;;  %4317 = vperm.xlu0 %10267, %v4179_v13   ;;  %v615_v10 = vld [vmem:[%s14927_s1 + $0x188] sm:$0xff] }
 0x102   : > { %8538 = vmatmul.mubr.msk.f32.gmra.mrb[86].mxu0 %vm1462_vm0, %v609_v23 }
 0x103   : > { %8666 = vmatmul.mubr.msk.f32.gmra.mrb[86].mxu1 %vm1462_vm0, %v609_v23  ;;  %2175 = vmatprep.mubr.f32.mxu0 %v14841_v24  ;;  %v616_v23 = vld [vmem:[%s14927_s1 + $0x190] sm:$0xff] }
 0x104   : > { %v11264_v25 = vpop.permute.xlu1 %969  ;;  %v11266_v26 = vpop.permute.xlu0 %964  ;;  %3008 = vmatprep.mubr.f32.mxu1 %v14841_v24 }
 0x105   : > { %4332 = vperm.xlu1 %10268, %v4182_v19   ;;  %4327 = vperm.xlu0 %10267, %v4181_v20   ;;  %v769_v19 = vld [vmem:[%s14926_s2 + $0x258] sm:$0xff]  ;;  %v768_v20 = vld [vmem:[%s14926_s2 + $0x250] sm:$0xff] }
 0x106   : > { %8539 = vmatmul.mubr.msk.f32.gmra.mrb[88].mxu0 %vm1462_vm0, %v610_v31 }
 0x107   : > { %8667 = vmatmul.mubr.msk.f32.gmra.mrb[88].mxu1 %vm1462_vm0, %v610_v31  ;;  %2181 = vmatprep.mubr.f32.mxu0 %v14841_v24  ;;  %v771_v31 = vld [vmem:[%s14926_s2 + $0x268] sm:$0xff] }
 0x108   : > { %v11281_v34 = vpop.permute.xlu1 %979  ;;  %v11283_v35 = vpop.permute.xlu0 %974  ;;  %3014 = vmatprep.mubr.f32.mxu1 %v14841_v24 }
 0x109   : > { %4342 = vperm.xlu1 %10268, %v4184_v29   ;;  %4337 = vperm.xlu0 %10267, %v4183_v30  }
 0x10a   : > { %8540 = vmatmul.mubr.msk.f32.gmra.mrb[90].mxu0 %vm1462_vm0, %v611_v40 }
 0x10b   : > { %8668 = vmatmul.mubr.msk.f32.gmra.mrb[90].mxu1 %vm1462_vm0, %v611_v40  ;;  %2187 = vmatprep.mubr.f32.mxu0 %v14841_v24 }
 0x10c   : > { %v11298_v41 = vpop.permute.xlu1 %989  ;;  %v11300_v44 = vpop.permute.xlu0 %984  ;;  %3020 = vmatprep.mubr.f32.mxu1 %v14841_v24 }
 0x10d   : > { %1149 = vperm.xlu1 %10268, %v759_v36   ;;  %1144 = vperm.xlu0 %10267, %v758_v39   ;;  %v770_v36 = vld [vmem:[%s14926_s2 + $0x260] sm:$0xff]  ;;  %v617_v39 = vld [vmem:[%s14927_s1 + $0x198] sm:$0xff] }
 0x10e   : > { %8541 = vmatmul.mubr.msk.f32.gmra.mrb[92].mxu0 %vm1462_vm0, %v612_v49 }
 0x10f   : > { %8669 = vmatmul.mubr.msk.f32.gmra.mrb[92].mxu1 %vm1462_vm0, %v612_v49  ;;  %2193 = vmatprep.mubr.f32.mxu0 %v14841_v24  ;;  %v772_v49 = vld [vmem:[%s14926_s2 + $0x270] sm:$0xff] }
 0x110   : > { %v11315_v50 = vpop.permute.xlu1 %999  ;;  %v11317_v51 = vpop.permute.xlu0 %994  ;;  %3026 = vmatprep.mubr.f32.mxu1 %v14841_v24 }
 0x111   : > { %1159 = vperm.xlu1 %10268, %v761_v45   ;;  %1154 = vperm.xlu0 %10267, %v760_v46   ;;  %v773_v46 = vld [vmem:[%s14926_s2 + $0x278] sm:$0xff] }
 0x112   : > { %8542 = vmatmul.mubr.msk.f32.gmra.mrb[94].mxu0 %vm1462_vm0, %v613_v56 }
 0x113   : > { %8670 = vmatmul.mubr.msk.f32.gmra.mrb[94].mxu1 %vm1462_vm0, %v613_v56  ;;  %2199 = vmatprep.mubr.f32.mxu0 %v14841_v24 }
 0x114   : > { %v11332_v59 = vpop.permute.xlu1 %1009  ;;  %v11334_v60 = vpop.permute.xlu0 %1004  ;;  %3032 = vmatprep.mubr.f32.mxu1 %v14841_v24 }
 0x115   : > { %1169 = vperm.xlu1 %10268, %v763_v54   ;;  %1164 = vperm.xlu0 %10267, %v762_v55   ;;  %v618_v54 = vld [vmem:[%s14927_s1 + $0x1a0] sm:$0xff] }
 0x116   : > { %8543 = vmatmul.mubr.msk.f32.gmra.mrb[96].mxu0 %vm1462_vm0, %v614_v1 }
 0x117   : > { %8671 = vmatmul.mubr.msk.f32.gmra.mrb[96].mxu1 %vm1462_vm0, %v614_v1  ;;  %2205 = vmatprep.mubr.f32.mxu0 %v14841_v24  ;;  %v619_v1 = vld [vmem:[%s14927_s1 + $0x1a8] sm:$0xff] }
 0x118   : > { %v11349_v2 = vpop.permute.xlu1 %1019  ;;  %v11351_v5 = vpop.permute.xlu0 %1014  ;;  %3038 = vmatprep.mubr.f32.mxu1 %v14841_v24 }
 0x119   : > { %1179 = vperm.xlu1 %10268, %v765_v61   ;;  %1174 = vperm.xlu0 %10267, %v764_v0   ;;  %v775_v61 = vld [vmem:[%s14926_s2 + $0x288] sm:$0xff]  ;;  %v774_v0 = vld [vmem:[%s14926_s2 + $0x280] sm:$0xff] }
 0x11a   : > { %8544 = vmatmul.mubr.msk.f32.gmra.mrb[98].mxu0 %vm1462_vm0, %v615_v10 }
 0x11b   : > { %8672 = vmatmul.mubr.msk.f32.gmra.mrb[98].mxu1 %vm1462_vm0, %v615_v10  ;;  %2211 = vmatprep.mubr.f32.mxu0 %v14841_v24 }
 0x11c   : > { %v11366_v13 = vpop.permute.xlu1 %1029  ;;  %v11368_v14 = vpop.permute.xlu0 %1024  ;;  %3044 = vmatprep.mubr.f32.mxu1 %v14841_v24 }
 0x11d   : > { %1189 = vperm.xlu1 %10268, %v767_v6   ;;  %1184 = vperm.xlu0 %10267, %v766_v7  }
 0x11e   : > { %8545 = vmatmul.mubr.msk.f32.gmra.mrb[100].mxu0 %vm1462_vm0, %v616_v23 }
 0x11f   : > { %8673 = vmatmul.mubr.msk.f32.gmra.mrb[100].mxu1 %vm1462_vm0, %v616_v23  ;;  %2217 = vmatprep.mubr.f32.mxu0 %v14841_v24 }
 0x120   : > { %v11383_v29 = vpop.permute.xlu1 %1039  ;;  %v11385_v30 = vpop.permute.xlu0 %1034  ;;  %3050 = vmatprep.mubr.f32.mxu1 %v14841_v24 }
 0x121   : > { %14929 = vst [vmem:[#allocation15_spill] sm:$0xff] %v11383_v29  ;;  %14930 = vst [vmem:[#allocation16_spill] sm:$0xff] %v11385_v30  ;;  %1199 = vperm.xlu1 %10268, %v769_v19   ;;  %1194 = vperm.xlu0 %10267, %v768_v20  }
 0x122   : > { %8546 = vmatmul.mubr.msk.f32.gmra.mrb[102].mxu0 %vm1462_vm0, %v617_v39 }
 0x123   : > { %8674 = vmatmul.mubr.msk.f32.gmra.mrb[102].mxu1 %vm1462_vm0, %v617_v39  ;;  %2223 = vmatprep.mubr.f32.mxu0 %v14841_v24  ;;  %v620_v39 = vld [vmem:[%s14927_s1 + $0x1b0] sm:$0xff] }
 0x124   : > { %v11400_v40 = vpop.permute.xlu1 %1049  ;;  %v11402_v45 = vpop.permute.xlu0 %1044  ;;  %3056 = vmatprep.mubr.f32.mxu1 %v14841_v24 }
 0x125   : > { %14931 = vst [vmem:[#allocation17_spill] sm:$0xff] %v11400_v40  ;;  %14932 = vst [vmem:[#allocation18_spill] sm:$0xff] %v11402_v45  ;;  %1209 = vperm.xlu1 %10268, %v771_v31   ;;  %1204 = vperm.xlu0 %10267, %v770_v36   ;;  %v777_v31 = vld [vmem:[%s14926_s2 + $0x298] sm:$0xff]  ;;  %v776_v36 = vld [vmem:[%s14926_s2 + $0x290] sm:$0xff] }
 0x126   : > { %8547 = vmatmul.mubr.msk.f32.gmra.mrb[104].mxu0 %vm1462_vm0, %v618_v54 }
 0x127   : > { %8675 = vmatmul.mubr.msk.f32.gmra.mrb[104].mxu1 %vm1462_vm0, %v618_v54  ;;  %2229 = vmatprep.mubr.f32.mxu0 %v14841_v24 }
 0x128   : > { %v11417_v55 = vpop.permute.xlu1 %1059  ;;  %v11419_v56 = vpop.permute.xlu0 %1054  ;;  %3062 = vmatprep.mubr.f32.mxu1 %v14841_v24 }
 0x129   : > { %14933 = vst [vmem:[#allocation19_spill] sm:$0xff] %v11417_v55  ;;  %14934 = vst [vmem:[#allocation20_spill] sm:$0xff] %v11419_v56  ;;  %1219 = vperm.xlu1 %10268, %v773_v46   ;;  %1214 = vperm.xlu0 %10267, %v772_v49   ;;  %v1913_v10 = vpop.f32.mrb[0].mxu0 }
 0x12a   : > { %v2746_v19 = vpop.f32.mrb[0].mxu1  ;;  %v1915_v20 = vpop.f32.mrb[1].mxu0  ;;  %8548 = vmatmul.mubr.msk.f32.gmra.mrb[106].mxu0 %vm1462_vm0, %v619_v1  ;;  %v1914_v46 = vadd.f32 %v1913_v10, %v11028_v12 }
 0x12b   : > { %v2748_v23 = vpop.f32.mrb[1].mxu1  ;;  %8676 = vmatmul.mubr.msk.f32.gmra.mrb[106].mxu1 %vm1462_vm0, %v619_v1  ;;  %2235 = vmatprep.mubr.f32.mxu0 %v14841_v24 }
 0x12c   : > { %v11434_v6 = vpop.permute.xlu1 %1069  ;;  %v11436_v7 = vpop.permute.xlu0 %1064  ;;  %3068 = vmatprep.mubr.f32.mxu1 %v14841_v24  ;;  %v2747_v24 = vadd.f32 %v2746_v19, %v11028_v12 }
 0x12d   : > { %14935 = vst [vmem:[#allocation21_spill] sm:$0xff] %v11434_v6  ;;  %14936 = vst [vmem:[#allocation22_spill] sm:$0xff] %v11436_v7  ;;  %1229 = vperm.xlu1 %10268, %v775_v61   ;;  %1224 = vperm.xlu0 %10267, %v774_v0   ;;  %v1916_v61 = vadd.f32 %v1915_v20, %v11028_v12  ;;  %v2749_v0 = vadd.f32 %v2748_v23, %v11028_v12  ;;  %v1919_v1 = vpop.f32.mrb[2].mxu0  ;;  %v779_v20 = vld [vmem:[%s14926_s2 + $0x2a8] sm:$0xff]  ;;  %v778_v23 = vld [vmem:[%s14926_s2 + $0x2a0] sm:$0xff] }
 0x12e   : > { %v2752_v6 = vpop.f32.mrb[2].mxu1  ;;  %v1920_v7 = vadd.f32 %v1919_v1, %v11045_v17  ;;  %v1921_v56 = vpop.f32.mrb[3].mxu0  ;;  %8549 = vmatmul.mubr.msk.f32.gmra.mrb[108].mxu0 %vm1462_vm0, %v620_v39  ;;  %v3515_v30 = vmax.f32 %v2747_v24, 0.0  ;;  %v780_v24 = vld [vmem:[%s14926_s2 + $0x2b0] sm:$0xff] }
 0x12f   : > { %v2753_v55 = vadd.f32 %v2752_v6, %v11045_v17  ;;  %v2754_v10 = vpop.f32.mrb[3].mxu1  ;;  %8677 = vmatmul.mubr.msk.f32.gmra.mrb[108].mxu1 %vm1462_vm0, %v620_v39  ;;  %v1922_v12 = vadd.f32 %v1921_v56, %v11045_v17  ;;  %v621_v6 = vld [vmem:[%s14927_s1 + $0x1b8] sm:$0xff]  ;;  %v3516_v45 = vmax.f32 %v2749_v0, 0.0 }
 0x130   : > { %v11452_v49 = vpop.permute.xlu1 %1079  ;;  %v11454_v54 = vpop.permute.xlu0 %1074  ;;  %v2755_v19 = vadd.f32 %v2754_v10, %v11045_v17  ;;  %v3517_v39 = vmax.f32 %v1920_v7, 0.0  ;;  %v3514_v17 = vmax.f32 %v1916_v61, 0.0  ;;  %v781_v61 = vld [vmem:[%s14926_s2 + $0x2b8] sm:$0xff] }
 0x131   : > { %14937 = vst [vmem:[#allocation23_spill] sm:$0xff] %v11452_v49  ;;  %14938 = vst [vmem:[#allocation24_spill] sm:$0xff] %v11454_v54  ;;  %1239 = vperm.xlu1 %10268, %v777_v31   ;;  %1234 = vperm.xlu0 %10267, %v776_v36   ;;  %v14939_v31 = vmov 0.0   ;;  %v3513_v36 = vmax.f32 %v1914_v46, 0.0  ;;  %v3519_v1 = vmax.f32 %v2753_v55, 0.0  ;;  %v1925_v56 = vpop.f32.mrb[4].mxu0 }
 0x132   : > { %2241 = vmatprep.mubr.f32.mxu0 %v14939_v31  ;;  %3074 = vmatprep.mubr.f32.mxu1 %v14939_v31  ;;  %v2758_v40 = vpop.f32.mrb[4].mxu1  ;;  %v3518_v10 = vmax.f32 %v1922_v12, 0.0  ;;  %v3520_v29 = vmax.f32 %v2755_v19, 0.0  ;;  %v1927_v46 = vpop.f32.mrb[5].mxu0  ;;  %v1926_v19 = vadd.f32 %v1925_v56, %v11026_v11 }
 0x133   : > { %8550 = vmatmul.mubr.msk.f32.gmra.mrb[110].mxu0 %vm1462_vm0, %v621_v6  ;;  %8678 = vmatmul.mubr.msk.f32.gmra.mrb[110].mxu1 %vm1462_vm0, %v621_v6  ;;  %v2760_v7 = vpop.f32.mrb[5].mxu1  ;;  %v8781_v55 = vpack.c.bf16 %v3517_v39, %v3513_v36  ;;  %v622_v6 = vld [vmem:[%s14927_s1 + $0x1c0] sm:$0xff]  ;;  %v8909_v36 = vpack.c.bf16 %v3519_v1, %v3515_v30  ;;  %v783_v1 = vld [vmem:[%s14926_s2 + $0x2c8] sm:$0xff] }
 0x134   : > { %v11476_v49 = vpop.permute.xlu1 %1089  ;;  %v11478_v54 = vpop.permute.xlu0 %1084  ;;  %2247 = vmatprep.mubr.f32.mxu0 %v14939_v31  ;;  %3080 = vmatprep.mubr.f32.mxu1 %v14939_v31 }
 0x135   : > { %14940 = vst [vmem:[#allocation25_spill] sm:$0xff] %v11476_v49  ;;  %1249 = vperm.xlu1 %10268, %v779_v20   ;;  %1244 = vperm.xlu0 %10267, %v778_v23   ;;  %v8779_v20 = vpack.c.bf16 %v3518_v10, %v3514_v17  ;;  %v8907_v23 = vpack.c.bf16 %v3520_v29, %v3516_v45  ;;  %v1931_v39 = vpop.f32.mrb[6].mxu0 }
 0x136   : > { %v2759_v29 = vadd.f32 %v2758_v40, %v11026_v11  ;;  %v1928_v45 = vadd.f32 %v1927_v46, %v11026_v11  ;;  %v2764_v17 = vpop.f32.mrb[6].mxu1  ;;  %v2761_v10 = vadd.f32 %v2760_v7, %v11026_v11  ;;  %v782_v11 = vld [vmem:[%s14926_s2 + $0x2c0] sm:$0xff]  ;;  %v3521_v46 = vmax.f32 %v1926_v19, 0.0 }
 0x137   : > { %8780 = vmatprep.subr.bf16.mxu0 %v8779_v20  ;;  %8908 = vmatprep.subr.bf16.mxu1 %v8907_v23  ;;  %v2765_v56 = vadd.f32 %v2764_v17, %v11043_v16  ;;  %v2766_v49 = vpop.f32.mrb[7].mxu1 }
 0x138   : > { %v11490_v0 = vpop.permute.xlu1 %1099  ;;  %v11492_v12 = vpop.permute.xlu0 %1094  ;;  %8551 = vmatmul.mubr.msk.f32.gmra.mrb[112].mxu0 %vm1462_vm0, %v622_v6  ;;  %8679 = vmatmul.mubr.msk.f32.gmra.mrb[112].mxu1 %vm1462_vm0, %v622_v6  ;;  %v2767_v40 = vadd.f32 %v2766_v49, %v11043_v16  ;;  %v3523_v6 = vmax.f32 %v2759_v29, 0.0 }
 0x139   : > { %14941 = vst [vmem:[#allocation26_spill] sm:$0xff] %v11490_v0  ;;  %14942 = vst [vmem:[#allocation27_spill] sm:$0xff] %v11492_v12  ;;  %1259 = vperm.xlu1 %10268, %v781_v61   ;;  %1254 = vperm.xlu0 %10267, %v780_v24   ;;  %v1932_v0 = vadd.f32 %v1931_v39, %v11043_v16  ;;  %v1933_v12 = vpop.f32.mrb[7].mxu0  ;;  %v3527_v20 = vmax.f32 %v2765_v56, 0.0  ;;  %v3524_v39 = vmax.f32 %v2761_v10, 0.0  ;;  %v785_v56 = vld [vmem:[%s14926_s2 + $0x2d8] sm:$0xff] }
 0x13a   : > { %v1934_v30 = vadd.f32 %v1933_v12, %v11043_v16  ;;  %8782 = vmatpush1.bf16.msra.mxu0 %v8781_v55  ;;  %8910 = vmatpush1.bf16.msra.mxu1 %v8909_v36  ;;  %v623_v16 = vld [vmem:[%s14927_s1 + $0x1c8] sm:$0xff]  ;;  %v1937_v49 = vpop.f32.mrb[8].mxu0  ;;  %v2770_v24 = vpop.f32.mrb[8].mxu1  ;;  %v3522_v12 = vmax.f32 %v1928_v45, 0.0  ;;  %v3528_v55 = vmax.f32 %v2767_v40, 0.0  ;;  %v784_v45 = vld [vmem:[%s14926_s2 + $0x2d0] sm:$0xff] }
 0x13b   : > { %v3525_v7 = vmax.f32 %v1932_v0, 0.0  ;;  %2253 = vmatprep.mubr.f32.mxu0 %v14939_v31  ;;  %3086 = vmatprep.mubr.f32.mxu1 %v14939_v31  ;;  %v1939_v0 = vpop.f32.mrb[9].mxu0  ;;  %v2772_v36 = vpop.f32.mrb[9].mxu1  ;;  %v1938_v29 = vadd.f32 %v1937_v49, %v11062_v22  ;;  %v624_v10 = vld [vmem:[%s14927_s1 + $0x1d0] sm:$0xff] }
 0x13c   : > { %v11513_v23 = vpop.permute.xlu1 %1109  ;;  %v11515_v61 = vpop.permute.xlu0 %1104  ;;  %v3526_v19 = vmax.f32 %v1934_v30, 0.0  ;;  %8552 = vmatmul.mubr.msk.f32.gmra.mrb[114].mxu0 %vm1462_vm0, %v623_v16  ;;  %8680 = vmatmul.mubr.msk.f32.gmra.mrb[114].mxu1 %vm1462_vm0, %v623_v16  ;;  %v1940_v16 = vadd.f32 %v1939_v0, %v11062_v22 }
 0x13d   : > { %14943 = vst [vmem:[#allocation28_spill] sm:$0xff] %v11513_v23  ;;  %14944 = vst [vmem:[#allocation29_spill] sm:$0xff] %v11515_v61  ;;  %1269 = vperm.xlu1 %10268, %v783_v1   ;;  %1264 = vperm.xlu0 %10267, %v782_v11   ;;  %v8785_v17 = vpack.c.bf16 %v3525_v7, %v3521_v46  ;;  %v8911_v11 = vpack.c.bf16 %v3528_v55, %v3524_v39 }
 0x13e   : > { %v8783_v30 = vpack.c.bf16 %v3526_v19, %v3522_v12  ;;  %2259 = vmatprep.mubr.f32.mxu0 %v14939_v31  ;;  %3092 = vmatprep.mubr.f32.mxu1 %v14939_v31  ;;  %v8913_v46 = vpack.c.bf16 %v3527_v20, %v3523_v6  ;;  %v2771_v7 = vadd.f32 %v2770_v24, %v11062_v22  ;;  %v1943_v12 = vpop.f32.mrb[10].mxu0  ;;  %v2776_v49 = vpop.f32.mrb[10].mxu1  ;;  %v786_v24 = vld [vmem:[%s14926_s2 + $0x2e0] sm:$0xff]  ;;  %v3529_v6 = vmax.f32 %v1938_v29, 0.0 }
 0x13f   : > { %v2773_v19 = vadd.f32 %v2772_v36, %v11062_v22  ;;  %v1945_v23 = vpop.f32.mrb[11].mxu0  ;;  %v2778_v61 = vpop.f32.mrb[11].mxu1  ;;  %v787_v22 = vld [vmem:[%s14926_s2 + $0x2e8] sm:$0xff]  ;;  %8912 = vmatprep.subr.bf16.mxu1 %v8911_v11  ;;  %v789_v11 = vld [vmem:[%s14926_s2 + $0x2f8] sm:$0xff] }
 0x140   : > { %v11531_v40 = vpop.permute.xlu1 %1119  ;;  %v11533_v1 = vpop.permute.xlu0 %1114  ;;  %8784 = vmatprep.subr.bf16.mxu0 %v8783_v30  ;;  %v1946_v55 = vadd.f32 %v1945_v23, %v11060_v21  ;;  %8553 = vmatmul.mubr.msk.f32.gmra.mrb[116].mxu0 %vm1462_vm0, %v624_v10  ;;  %v2779_v20 = vadd.f32 %v2778_v61, %v11060_v21 }
 0x141   : > { %14945 = vst [vmem:[#allocation30_spill] sm:$0xff] %v11531_v40  ;;  %14946 = vst [vmem:[#allocation31_spill] sm:$0xff] %v11533_v1  ;;  %v1944_v40 = vadd.f32 %v1943_v12, %v11060_v21  ;;  %v2777_v1 = vadd.f32 %v2776_v49, %v11060_v21  ;;  %1279 = vperm.xlu1 %10268, %v785_v56   ;;  %1274 = vperm.xlu0 %10267, %v784_v45   ;;  %v625_v21 = vld [vmem:[%s14927_s1 + $0x1d8] sm:$0xff]  ;;  %v1949_v61 = vpop.f32.mrb[12].mxu0  ;;  %v3530_v45 = vmax.f32 %v1940_v16, 0.0 }
 0x142   : > { %8681 = vmatmul.mubr.msk.f32.gmra.mrb[116].mxu1 %vm1462_vm0, %v624_v10  ;;  %2265 = vmatprep.mubr.f32.mxu0 %v14939_v31  ;;  %v2782_v56 = vpop.f32.mrb[12].mxu1  ;;  %v3534_v30 = vmax.f32 %v1946_v55, 0.0  ;;  %v3536_v29 = vmax.f32 %v2779_v20, 0.0  ;;  %v3532_v12 = vmax.f32 %v2773_v19, 0.0  ;;  %v788_v55 = vld [vmem:[%s14926_s2 + $0x2f0] sm:$0xff]  ;;  %v626_v20 = vld [vmem:[%s14927_s1 + $0x1e0] sm:$0xff] }
 0x143   : > { %v3533_v0 = vmax.f32 %v1944_v40, 0.0  ;;  %v3535_v36 = vmax.f32 %v2777_v1, 0.0  ;;  %3098 = vmatprep.mubr.f32.mxu1 %v14939_v31  ;;  %8786 = vmatpush1.bf16.msra.mxu0 %v8785_v17  ;;  %v3531_v40 = vmax.f32 %v2771_v7, 0.0  ;;  %v1951_v1 = vpop.f32.mrb[13].mxu0  ;;  %v2784_v10 = vpop.f32.mrb[13].mxu1  ;;  %v1950_v17 = vadd.f32 %v1949_v61, %v11079_v28 }
 0x144   : > { %v11555_v39 = vpop.permute.xlu1 %1129  ;;  %v11557_v23 = vpop.permute.xlu0 %1124  ;;  %8554 = vmatmul.mubr.msk.f32.gmra.mrb[118].mxu0 %vm1462_vm0, %v625_v21  ;;  %8914 = vmatpush1.bf16.msra.mxu1 %v8913_v46  ;;  %v8915_v19 = vpack.c.bf16 %v3536_v29, %v3532_v12  ;;  %v1952_v46 = vadd.f32 %v1951_v1, %v11079_v28 }
 0x145   : > { %14947 = vst [vmem:[#allocation32_spill] sm:$0xff] %v11555_v39  ;;  %1289 = vperm.xlu1 %10268, %v787_v22   ;;  %1284 = vperm.xlu0 %10267, %v786_v24   ;;  %v8789_v49 = vpack.c.bf16 %v3533_v0, %v3529_v6  ;;  %v8787_v39 = vpack.c.bf16 %v3534_v30, %v3530_v45  ;;  %v1955_v6 = vpop.f32.mrb[14].mxu0 }
 0x146   : > { %8682 = vmatmul.mubr.msk.f32.gmra.mrb[118].mxu1 %vm1462_vm0, %v625_v21  ;;  %2271 = vmatprep.mubr.f32.mxu0 %v14939_v31  ;;  %v8917_v22 = vpack.c.bf16 %v3535_v36, %v3531_v40  ;;  %v2783_v24 = vadd.f32 %v2782_v56, %v11079_v28  ;;  %v2788_v0 = vpop.f32.mrb[14].mxu1  ;;  %v2785_v21 = vadd.f32 %v2784_v10, %v11079_v28  ;;  %v1957_v30 = vpop.f32.mrb[15].mxu0  ;;  %v3537_v28 = vmax.f32 %v1950_v17, 0.0 }
 0x147   : > { %3104 = vmatprep.mubr.f32.mxu1 %v14939_v31  ;;  %8788 = vmatprep.subr.bf16.mxu0 %v8787_v39  ;;  %v1956_v61 = vadd.f32 %v1955_v6, %v11077_v27  ;;  %v2789_v45 = vadd.f32 %v2788_v0, %v11077_v27  ;;  %v2790_v29 = vpop.f32.mrb[15].mxu1  ;;  %v1958_v36 = vadd.f32 %v1957_v30, %v11077_v27  ;;  %v791_v39 = vld [vmem:[%s14926_s2 + $0x308] sm:$0xff] }
 0x148   : > { %v11570_v16 = vpop.permute.xlu1 %1139  ;;  %v11572_v7 = vpop.permute.xlu0 %1134  ;;  %8916 = vmatprep.subr.bf16.mxu1 %v8915_v19  ;;  %8555 = vmatmul.mubr.msk.f32.gmra.mrb[120].mxu0 %vm1462_vm0, %v626_v20  ;;  %v2791_v56 = vadd.f32 %v2790_v29, %v11077_v27  ;;  %v627_v27 = vld [vmem:[%s14927_s1 + $0x1e8] sm:$0xff]  ;;  %v3539_v6 = vmax.f32 %v2783_v24, 0.0 }
 0x149   : > { %1299 = vperm.xlu1 %10268, %v789_v11   ;;  %1294 = vperm.xlu0 %10267, %v788_v55   ;;  %v3541_v40 = vmax.f32 %v1956_v61, 0.0  ;;  %v3543_v1 = vmax.f32 %v2789_v45, 0.0  ;;  %v790_v11 = vld [vmem:[%s14926_s2 + $0x300] sm:$0xff]  ;;  %v1961_v19 = vpop.f32.mrb[16].mxu0  ;;  %v3538_v55 = vmax.f32 %v1952_v46, 0.0  ;;  %v3540_v45 = vmax.f32 %v2785_v21, 0.0 }
 0x14a   : > { %8683 = vmatmul.mubr.msk.f32.gmra.mrb[120].mxu1 %vm1462_vm0, %v626_v20  ;;  %8790 = vmatpush1.bf16.msra.mxu0 %v8789_v49  ;;  %v2794_v17 = vpop.f32.mrb[16].mxu1  ;;  %v3542_v20 = vmax.f32 %v1958_v36, 0.0  ;;  %v3544_v49 = vmax.f32 %v2791_v56, 0.0  ;;  %v1963_v0 = vpop.f32.mrb[17].mxu0  ;;  %v1962_v46 = vadd.f32 %v1961_v19, %v11096_v33  ;;  %v792_v56 = vld [vmem:[%s14926_s2 + $0x310] sm:$0xff] }
 0x14b   : > { %8918 = vmatpush1.bf16.msra.mxu1 %v8917_v22  ;;  %2277 = vmatprep.mubr.f32.mxu0 %v14939_v31  ;;  %v2796_v61 = vpop.f32.mrb[17].mxu1  ;;  %v8793_v30 = vpack.c.bf16 %v3541_v40, %v3537_v28  ;;  %v793_v22 = vld [vmem:[%s14926_s2 + $0x318] sm:$0xff]  ;;  %v8921_v28 = vpack.c.bf16 %v3543_v1, %v3539_v6  ;;  %v2795_v40 = vadd.f32 %v2794_v17, %v11096_v33  ;;  %v795_v6 = vld [vmem:[%s14926_s2 + $0x328] sm:$0xff] }
 0x14c   : > { %v11594_v10 = vpop.permute.xlu1 %4192  ;;  %v11596_v12 = vpop.permute.xlu0 %4187  ;;  %3110 = vmatprep.mubr.f32.mxu1 %v14939_v31  ;;  %8556 = vmatmul.mubr.msk.f32.gmra.mrb[122].mxu0 %vm1462_vm0, %v627_v27  ;;  %v8791_v29 = vpack.c.bf16 %v3542_v20, %v3538_v55  ;;  %v8919_v21 = vpack.c.bf16 %v3544_v49, %v3540_v45  ;;  %v2797_v55 = vadd.f32 %v2796_v61, %v11096_v33 }
 0x14d   : > { %14948 = vst [vmem:[#allocation33_spill] sm:$0xff] %v11594_v10  ;;  %14949 = vst [vmem:[#allocation34_spill] sm:$0xff] %v11596_v12  ;;  %1309 = vperm.xlu1 %10268, %v791_v39   ;;  %1304 = vperm.xlu0 %10267, %v790_v11   ;;  %v628_v39 = vld [vmem:[%s14927_s1 + $0x1f0] sm:$0xff]  ;;  %v1964_v11 = vadd.f32 %v1963_v0, %v11096_v33  ;;  %v3545_v33 = vmax.f32 %v1962_v46, 0.0 }
 0x14e   : > { %8684 = vmatmul.mubr.msk.f32.gmra.mrb[122].mxu1 %vm1462_vm0, %v627_v27  ;;  %2283 = vmatprep.mubr.f32.mxu0 %v14939_v31  ;;  %v1967_v27 = vpop.f32.mrb[18].mxu0  ;;  %v2800_v19 = vpop.f32.mrb[18].mxu1 }
 0x14f   : > { %3116 = vmatprep.mubr.f32.mxu1 %v14939_v31  ;;  %8792 = vmatprep.subr.bf16.mxu0 %v8791_v29  ;;  %v1968_v20 = vadd.f32 %v1967_v27, %v11094_v32  ;;  %v2801_v49 = vadd.f32 %v2800_v19, %v11094_v32  ;;  %v1969_v45 = vpop.f32.mrb[19].mxu0  ;;  %v3547_v27 = vmax.f32 %v2795_v40, 0.0 }
 0x150   : > { %v11612_v24 = vpop.permute.xlu1 %4202  ;;  %v11614_v36 = vpop.permute.xlu0 %4197  ;;  %8920 = vmatprep.subr.bf16.mxu1 %v8919_v21  ;;  %v1970_v1 = vadd.f32 %v1969_v45, %v11094_v32  ;;  %8557 = vmatmul.mubr.msk.f32.gmra.mrb[124].mxu0 %vm1462_vm0, %v628_v39  ;;  %v794_v21 = vld [vmem:[%s14926_s2 + $0x320] sm:$0xff] }
 0x151   : > { %14950 = vst [vmem:[#allocation35_spill] sm:$0xff] %v11612_v24  ;;  %14951 = vst [vmem:[#allocation36_spill] sm:$0xff] %v11614_v36  ;;  %1319 = vperm.xlu1 %10268, %v793_v22   ;;  %v2802_v24 = vpop.f32.mrb[19].mxu1  ;;  %1314 = vperm.xlu0 %10267, %v792_v56   ;;  %v3549_v0 = vmax.f32 %v1968_v20, 0.0  ;;  %v3551_v61 = vmax.f32 %v2801_v49, 0.0  ;;  %v3546_v56 = vmax.f32 %v1964_v11, 0.0 }
 0x152   : > { %v2803_v17 = vadd.f32 %v2802_v24, %v11094_v32  ;;  %8685 = vmatmul.mubr.msk.f32.gmra.mrb[124].mxu1 %vm1462_vm0, %v628_v39  ;;  %8794 = vmatpush1.bf16.msra.mxu0 %v8793_v30  ;;  %v629_v32 = vld [vmem:[%s14927_s1 + $0x1f8] sm:$0xff]  ;;  %v1973_v24 = vpop.f32.mrb[20].mxu0  ;;  %v2806_v46 = vpop.f32.mrb[20].mxu1  ;;  %v3550_v39 = vmax.f32 %v1970_v1, 0.0  ;;  %v3548_v49 = vmax.f32 %v2797_v55, 0.0  ;;  %v14984_v36 = vld [vmem:[#allocation18_spill] sm:$0xff] }
 0x153   : > { %8922 = vmatpush1.bf16.msra.mxu1 %v8921_v28  ;;  %2289 = vmatprep.mubr.f32.mxu0 %v14939_v31  ;;  %v1975_v19 = vpop.f32.mrb[21].mxu0  ;;  %v2808_v20 = vpop.f32.mrb[21].mxu1  ;;  %v8797_v45 = vpack.c.bf16 %v3549_v0, %v3545_v33  ;;  %v797_v28 = vld [vmem:[%s14926_s2 + $0x338] sm:$0xff]  ;;  %v1974_v11 = vadd.f32 %v1973_v24, %v11113_v38  ;;  %v8925_v33 = vpack.c.bf16 %v3551_v61, %v3547_v27 }
 0x154   : > { %v11636_v29 = vpop.permute.xlu1 %4212  ;;  %v11638_v22 = vpop.permute.xlu0 %4207  ;;  %v3552_v30 = vmax.f32 %v2803_v17, 0.0  ;;  %3122 = vmatprep.mubr.f32.mxu1 %v14939_v31  ;;  %8558 = vmatmul.mubr.msk.f32.gmra.mrb[126].mxu0 %vm1462_vm0, %v629_v32  ;;  %v796_v17 = vld [vmem:[%s14926_s2 + $0x330] sm:$0xff]  ;;  %v2807_v0 = vadd.f32 %v2806_v46, %v11113_v38 }
 0x155   : > { %14952 = vst [vmem:[#allocation37_spill] sm:$0xff] %v11636_v29  ;;  %14953 = vst [vmem:[#allocation38_spill] sm:$0xff] %v11638_v22  ;;  %1329 = vperm.xlu1 %10268, %v795_v6   ;;  %1324 = vperm.xlu0 %10267, %v794_v21   ;;  %v8795_v29 = vpack.c.bf16 %v3550_v39, %v3546_v56  ;;  %v630_v6 = vld [vmem:[%s14927_s1 + $0x200] sm:$0xff]  ;;  %v1976_v21 = vadd.f32 %v1975_v19, %v11113_v38 }
 0x156   : > { %8686 = vmatmul.mubr.msk.f32.gmra.mrb[126].mxu1 %vm1462_vm0, %v629_v32  ;;  %2295 = vmatprep.mubr.f32.mxu0 %v14939_v31  ;;  %v8923_v55 = vpack.c.bf16 %v3552_v30, %v3548_v49  ;;  %v1979_v32 = vpop.f32.mrb[22].mxu0  ;;  %v2812_v24 = vpop.f32.mrb[22].mxu1  ;;  %v2809_v56 = vadd.f32 %v2808_v20, %v11113_v38  ;;  %v3553_v38 = vmax.f32 %v1974_v11, 0.0 }
 0x157   : > { %3128 = vmatprep.mubr.f32.mxu1 %v14939_v31  ;;  %8796 = vmatprep.subr.bf16.mxu0 %v8795_v29  ;;  %v1980_v39 = vadd.f32 %v1979_v32, %v11111_v37  ;;  %v2813_v30 = vadd.f32 %v2812_v24, %v11111_v37  ;;  %v1981_v49 = vpop.f32.mrb[23].mxu0  ;;  %v799_v29 = vld [vmem:[%s14926_s2 + $0x348] sm:$0xff]  ;;  %v3555_v32 = vmax.f32 %v2807_v0, 0.0 }
 0x158   : > { %v11654_v40 = vpop.permute.xlu1 %4222  ;;  %v11656_v1 = vpop.permute.xlu0 %4217  ;;  %8924 = vmatprep.subr.bf16.mxu1 %v8923_v55  ;;  %v1982_v61 = vadd.f32 %v1981_v49, %v11111_v37  ;;  %8559 = vmatmul.mubr.msk.f32.gmra.mrb[128].mxu0 %vm1462_vm0, %v630_v6  ;;  %v798_v55 = vld [vmem:[%s14926_s2 + $0x340] sm:$0xff] }
 0x159   : > { %14954 = vst [vmem:[#allocation39_spill] sm:$0xff] %v11654_v40  ;;  %14955 = vst [vmem:[#allocation40_spill] sm:$0xff] %v11656_v1  ;;  %1339 = vperm.xlu1 %10268, %v797_v28   ;;  %v2814_v40 = vpop.f32.mrb[23].mxu1  ;;  %1334 = vperm.xlu0 %10267, %v796_v17   ;;  %v3557_v27 = vmax.f32 %v1980_v39, 0.0  ;;  %v3559_v19 = vmax.f32 %v2813_v30, 0.0  ;;  %v3554_v17 = vmax.f32 %v1976_v21, 0.0 }
 0x15a   : > { %v2815_v46 = vadd.f32 %v2814_v40, %v11111_v37  ;;  %8687 = vmatmul.mubr.msk.f32.gmra.mrb[128].mxu1 %vm1462_vm0, %v630_v6  ;;  %8798 = vmatpush1.bf16.msra.mxu0 %v8797_v45  ;;  %v631_v37 = vld [vmem:[%s14927_s1 + $0x208] sm:$0xff]  ;;  %v1985_v40 = vpop.f32.mrb[24].mxu0  ;;  %v2818_v11 = vpop.f32.mrb[24].mxu1  ;;  %v3558_v6 = vmax.f32 %v1982_v61, 0.0  ;;  %v3556_v30 = vmax.f32 %v2809_v56, 0.0 }
 0x15b   : > { %8926 = vmatpush1.bf16.msra.mxu1 %v8925_v33  ;;  %2301 = vmatprep.mubr.f32.mxu0 %v14939_v31  ;;  %v1987_v24 = vpop.f32.mrb[25].mxu0  ;;  %v2820_v39 = vpop.f32.mrb[25].mxu1  ;;  %v8801_v49 = vpack.c.bf16 %v3557_v27, %v3553_v38  ;;  %v801_v33 = vld [vmem:[%s14926_s2 + $0x358] sm:$0xff]  ;;  %v1986_v21 = vadd.f32 %v1985_v40, %v11130_v43  ;;  %v8929_v38 = vpack.c.bf16 %v3559_v19, %v3555_v32 }
 0x15c   : > { %v11678_v20 = vpop.permute.xlu1 %4232  ;;  %v11680_v28 = vpop.permute.xlu0 %4227  ;;  %v3560_v45 = vmax.f32 %v2815_v46, 0.0  ;;  %3134 = vmatprep.mubr.f32.mxu1 %v14939_v31  ;;  %8560 = vmatmul.mubr.msk.f32.gmra.mrb[130].mxu0 %vm1462_vm0, %v631_v37  ;;  %v800_v46 = vld [vmem:[%s14926_s2 + $0x350] sm:$0xff]  ;;  %v2819_v27 = vadd.f32 %v2818_v11, %v11130_v43 }
 0x15d   : > { %14956 = vst [vmem:[#allocation41_spill] sm:$0xff] %v11678_v20  ;;  %14957 = vst [vmem:[#allocation42_spill] sm:$0xff] %v11680_v28  ;;  %1349 = vperm.xlu1 %10268, %v799_v29   ;;  %1344 = vperm.xlu0 %10267, %v798_v55   ;;  %v8799_v20 = vpack.c.bf16 %v3558_v6, %v3554_v17  ;;  %v632_v29 = vld [vmem:[%s14927_s1 + $0x210] sm:$0xff]  ;;  %v1988_v55 = vadd.f32 %v1987_v24, %v11130_v43 }
 0x15e   : > { %8688 = vmatmul.mubr.msk.f32.gmra.mrb[130].mxu1 %vm1462_vm0, %v631_v37  ;;  %2307 = vmatprep.mubr.f32.mxu0 %v14939_v31  ;;  %v8927_v56 = vpack.c.bf16 %v3560_v45, %v3556_v30  ;;  %v1991_v37 = vpop.f32.mrb[26].mxu0  ;;  %v2824_v40 = vpop.f32.mrb[26].mxu1  ;;  %v2821_v17 = vadd.f32 %v2820_v39, %v11130_v43  ;;  %v3561_v43 = vmax.f32 %v1986_v21, 0.0 }
 0x15f   : > { %3140 = vmatprep.mubr.f32.mxu1 %v14939_v31  ;;  %8800 = vmatprep.subr.bf16.mxu0 %v8799_v20  ;;  %v1992_v6 = vadd.f32 %v1991_v37, %v11128_v42  ;;  %v2825_v45 = vadd.f32 %v2824_v40, %v11128_v42  ;;  %v1993_v30 = vpop.f32.mrb[27].mxu0  ;;  %v803_v20 = vld [vmem:[%s14926_s2 + $0x368] sm:$0xff]  ;;  %v3563_v37 = vmax.f32 %v2819_v27, 0.0 }
 0x160   : > { %v11696_v0 = vpop.permute.xlu1 %4242  ;;  %v11698_v61 = vpop.permute.xlu0 %4237  ;;  %8928 = vmatprep.subr.bf16.mxu1 %v8927_v56  ;;  %v1994_v19 = vadd.f32 %v1993_v30, %v11128_v42  ;;  %8561 = vmatmul.mubr.msk.f32.gmra.mrb[132].mxu0 %vm1462_vm0, %v632_v29  ;;  %v802_v56 = vld [vmem:[%s14926_s2 + $0x360] sm:$0xff] }
 0x161   : > { %14958 = vst [vmem:[#allocation43_spill] sm:$0xff] %v11696_v0  ;;  %14959 = vst [vmem:[#allocation44_spill] sm:$0xff] %v11698_v61  ;;  %1359 = vperm.xlu1 %10268, %v801_v33   ;;  %v2826_v0 = vpop.f32.mrb[27].mxu1  ;;  %1354 = vperm.xlu0 %10267, %v800_v46   ;;  %v3565_v32 = vmax.f32 %v1992_v6, 0.0  ;;  %v3567_v24 = vmax.f32 %v2825_v45, 0.0  ;;  %v3562_v46 = vmax.f32 %v1988_v55, 0.0 }
 0x162   : > { %v2827_v11 = vadd.f32 %v2826_v0, %v11128_v42  ;;  %8689 = vmatmul.mubr.msk.f32.gmra.mrb[132].mxu1 %vm1462_vm0, %v632_v29  ;;  %8802 = vmatpush1.bf16.msra.mxu0 %v8801_v49  ;;  %v633_v42 = vld [vmem:[%s14927_s1 + $0x218] sm:$0xff]  ;;  %v1997_v0 = vpop.f32.mrb[28].mxu0  ;;  %v2830_v21 = vpop.f32.mrb[28].mxu1  ;;  %v3566_v29 = vmax.f32 %v1994_v19, 0.0  ;;  %v3564_v45 = vmax.f32 %v2821_v17, 0.0 }
 0x163   : > { %8930 = vmatpush1.bf16.msra.mxu1 %v8929_v38  ;;  %2313 = vmatprep.mubr.f32.mxu0 %v14939_v31  ;;  %v1999_v40 = vpop.f32.mrb[29].mxu0  ;;  %v2832_v6 = vpop.f32.mrb[29].mxu1  ;;  %v8805_v30 = vpack.c.bf16 %v3565_v32, %v3561_v43  ;;  %v805_v38 = vld [vmem:[%s14926_s2 + $0x378] sm:$0xff]  ;;  %v1998_v55 = vadd.f32 %v1997_v0, %v11147_v48  ;;  %v8933_v43 = vpack.c.bf16 %v3567_v24, %v3563_v37 }
 0x164   : > { %v11720_v39 = vpop.permute.xlu1 %4252  ;;  %v11722_v33 = vpop.permute.xlu0 %4247  ;;  %v3568_v49 = vmax.f32 %v2827_v11, 0.0  ;;  %3146 = vmatprep.mubr.f32.mxu1 %v14939_v31  ;;  %8562 = vmatmul.mubr.msk.f32.gmra.mrb[134].mxu0 %vm1462_vm0, %v633_v42  ;;  %v804_v11 = vld [vmem:[%s14926_s2 + $0x370] sm:$0xff]  ;;  %v2831_v32 = vadd.f32 %v2830_v21, %v11147_v48 }
 0x165   : > { %14960 = vst [vmem:[#allocation45_spill] sm:$0xff] %v11720_v39  ;;  %14961 = vst [vmem:[#allocation46_spill] sm:$0xff] %v11722_v33  ;;  %1369 = vperm.xlu1 %10268, %v803_v20   ;;  %1364 = vperm.xlu0 %10267, %v802_v56   ;;  %v8803_v39 = vpack.c.bf16 %v3566_v29, %v3562_v46  ;;  %v634_v20 = vld [vmem:[%s14927_s1 + $0x220] sm:$0xff]  ;;  %v2000_v56 = vadd.f32 %v1999_v40, %v11147_v48 }
 0x166   : > { %8690 = vmatmul.mubr.msk.f32.gmra.mrb[134].mxu1 %vm1462_vm0, %v633_v42  ;;  %2319 = vmatprep.mubr.f32.mxu0 %v14939_v31  ;;  %v8931_v17 = vpack.c.bf16 %v3568_v49, %v3564_v45  ;;  %v2003_v42 = vpop.f32.mrb[30].mxu0  ;;  %v2836_v0 = vpop.f32.mrb[30].mxu1  ;;  %v2833_v46 = vadd.f32 %v2832_v6, %v11147_v48  ;;  %v3569_v48 = vmax.f32 %v1998_v55, 0.0  ;;  %v806_v6 = vld [vmem:[%s14926_s2 + $0x380] sm:$0xff] }
 0x167   : > { %3152 = vmatprep.mubr.f32.mxu1 %v14939_v31  ;;  %8804 = vmatprep.subr.bf16.mxu0 %v8803_v39  ;;  %v2004_v29 = vadd.f32 %v2003_v42, %v11145_v47  ;;  %v2837_v49 = vadd.f32 %v2836_v0, %v11145_v47  ;;  %v2005_v45 = vpop.f32.mrb[31].mxu0  ;;  %v807_v39 = vld [vmem:[%s14926_s2 + $0x388] sm:$0xff]  ;;  %v3571_v42 = vmax.f32 %v2831_v32, 0.0 }
 0x168   : > { %v11738_v27 = vpop.permute.xlu1 %4262  ;;  %v11740_v19 = vpop.permute.xlu0 %4257  ;;  %8932 = vmatprep.subr.bf16.mxu1 %v8931_v17  ;;  %v2006_v24 = vadd.f32 %v2005_v45, %v11145_v47  ;;  %8563 = vmatmul.mubr.msk.f32.gmra.mrb[136].mxu0 %vm1462_vm0, %v634_v20  ;;  %v3570_v17 = vmax.f32 %v2000_v56, 0.0  ;;  %v3572_v0 = vmax.f32 %v2833_v46, 0.0 }
 0x169   : > { %14962 = vst [vmem:[#allocation47_spill] sm:$0xff] %v11738_v27  ;;  %14963 = vst [vmem:[#allocation48_spill] sm:$0xff] %v11740_v19  ;;  %1379 = vperm.xlu1 %10268, %v805_v38   ;;  %v2838_v27 = vpop.f32.mrb[31].mxu1  ;;  %1374 = vperm.xlu0 %10267, %v804_v11   ;;  %v3573_v37 = vmax.f32 %v2004_v29, 0.0  ;;  %v3575_v40 = vmax.f32 %v2837_v49, 0.0  ;;  %v635_v38 = vld [vmem:[%s14927_s1 + $0x228] sm:$0xff] }
 0x16a   : > { %v2839_v21 = vadd.f32 %v2838_v27, %v11145_v47  ;;  %8691 = vmatmul.mubr.msk.f32.gmra.mrb[136].mxu1 %vm1462_vm0, %v634_v20  ;;  %8806 = vmatpush1.bf16.msra.mxu0 %v8805_v30  ;;  %v2009_v47 = vpop.f32.mrb[32].mxu0  ;;  %v2842_v27 = vpop.f32.mrb[32].mxu1  ;;  %v3574_v55 = vmax.f32 %v2006_v24, 0.0  ;;  %v808_v24 = vld [vmem:[%s14926_s2 + $0x390] sm:$0xff] }
 0x16b   : > { %8934 = vmatpush1.bf16.msra.mxu1 %v8933_v43  ;;  %2325 = vmatprep.mubr.f32.mxu0 %v14939_v31  ;;  %v2011_v30 = vpop.f32.mrb[33].mxu0  ;;  %v2844_v20 = vpop.f32.mrb[33].mxu1  ;;  %v8809_v29 = vpack.c.bf16 %v3573_v37, %v3569_v48  ;;  %v809_v43 = vld [vmem:[%s14926_s2 + $0x398] sm:$0xff]  ;;  %v2010_v32 = vadd.f32 %v2009_v47, %v11164_v53  ;;  %v2843_v48 = vadd.f32 %v2842_v27, %v11164_v53 }
 0x16c   : > { %v3576_v11 = vmax.f32 %v2839_v21, 0.0  ;;  %3158 = vmatprep.mubr.f32.mxu1 %v14939_v31  ;;  %8564 = vmatmul.mubr.msk.f32.gmra.mrb[138].mxu0 %vm1462_vm0, %v635_v38  ;;  %v8807_v49 = vpack.c.bf16 %v3574_v55, %v3570_v17  ;;  %v11774_v45 = vpop.permute.xlu1 %4272  ;;  %v11776_v56 = vpop.permute.xlu0 %4267  ;;  %v636_v21 = vld [vmem:[%s14927_s1 + $0x230] sm:$0xff]  ;;  %v2012_v37 = vadd.f32 %v2011_v30, %v11164_v53 }
 0x16d   : > { %1389 = vperm.xlu1 %10268, %v807_v39   ;;  %1384 = vperm.xlu0 %10267, %v806_v6   ;;  %14964 = vst [vmem:[#allocation49_spill] sm:$0xff] %v11774_v45  ;;  %14965 = vst [vmem:[#allocation50_spill] sm:$0xff] %v11776_v56  ;;  %v8937_v39 = vpack.c.bf16 %v3575_v40, %v3571_v42  ;;  %v2015_v6 = vpop.f32.mrb[34].mxu0  ;;  %v811_v42 = vld [vmem:[%s14926_s2 + $0x3a8] sm:$0xff] }
 0x16e   : > { %8692 = vmatmul.mubr.msk.f32.gmra.mrb[138].mxu1 %vm1462_vm0, %v635_v38  ;;  %2331 = vmatprep.mubr.f32.mxu0 %v14939_v31  ;;  %v8935_v46 = vpack.c.bf16 %v3576_v11, %v3572_v0  ;;  %v2848_v47 = vpop.f32.mrb[34].mxu1  ;;  %v2845_v38 = vadd.f32 %v2844_v20, %v11164_v53  ;;  %v2016_v17 = vadd.f32 %v2015_v6, %v11162_v52  ;;  %v2017_v11 = vpop.f32.mrb[35].mxu0  ;;  %v3577_v53 = vmax.f32 %v2010_v32, 0.0 }
 0x16f   : > { %3164 = vmatprep.mubr.f32.mxu1 %v14939_v31  ;;  %8808 = vmatprep.subr.bf16.mxu0 %v8807_v49  ;;  %v2849_v55 = vadd.f32 %v2848_v47, %v11162_v52  ;;  %v2850_v0 = vpop.f32.mrb[35].mxu1  ;;  %v2018_v40 = vadd.f32 %v2017_v11, %v11162_v52  ;;  %v810_v49 = vld [vmem:[%s14926_s2 + $0x3a0] sm:$0xff]  ;;  %v3579_v47 = vmax.f32 %v2843_v48, 0.0 }
 0x170   : > { %8936 = vmatprep.subr.bf16.mxu1 %v8935_v46  ;;  %8565 = vmatmul.mubr.msk.f32.gmra.mrb[140].mxu0 %vm1462_vm0, %v636_v21  ;;  %v2851_v27 = vadd.f32 %v2850_v0, %v11162_v52  ;;  %v3581_v30 = vmax.f32 %v2016_v17, 0.0  ;;  %v3580_v17 = vmax.f32 %v2845_v38, 0.0  ;;  %v11812_v0 = vpop.permute.xlu1 %4282 }
 0x171   : > { %1399 = vperm.xlu1 %10268, %v809_v43   ;;  %1394 = vperm.xlu0 %10267, %v808_v24   ;;  %v3583_v20 = vmax.f32 %v2849_v55, 0.0  ;;  %v637_v43 = vld [vmem:[%s14927_s1 + $0x238] sm:$0xff]  ;;  %v2021_v52 = vpop.f32.mrb[36].mxu0  ;;  %v3578_v24 = vmax.f32 %v2012_v37, 0.0  ;;  %v3582_v32 = vmax.f32 %v2018_v40, 0.0  ;;  %14966 = vst [vmem:[#allocation51_spill] sm:$0xff] %v11812_v0  ;;  %v11814_v37 = vpop.permute.xlu0 %4277 }
 0x172   : > { %8693 = vmatmul.mubr.msk.f32.gmra.mrb[140].mxu1 %vm1462_vm0, %v636_v21  ;;  %8810 = vmatpush1.bf16.msra.mxu0 %v8809_v29  ;;  %v2854_v46 = vpop.f32.mrb[36].mxu1  ;;  %v3584_v6 = vmax.f32 %v2851_v27, 0.0  ;;  %v2023_v29 = vpop.f32.mrb[37].mxu0  ;;  %v8813_v55 = vpack.c.bf16 %v3581_v30, %v3577_v53  ;;  %14967 = vst [vmem:[#allocation52_spill] sm:$0xff] %v11814_v37  ;;  %v2022_v48 = vadd.f32 %v2021_v52, %v11181_v58  ;;  %v812_v40 = vld [vmem:[%s14926_s2 + $0x3b0] sm:$0xff]  ;;  %v638_v27 = vld [vmem:[%s14927_s1 + $0x240] sm:$0xff] }
 0x173   : > { %8938 = vmatpush1.bf16.msra.mxu1 %v8937_v39  ;;  %2337 = vmatprep.mubr.f32.mxu0 %v14939_v31  ;;  %v2856_v21 = vpop.f32.mrb[37].mxu1  ;;  %v8811_v11 = vpack.c.bf16 %v3582_v32, %v3578_v24  ;;  %v813_v39 = vld [vmem:[%s14926_s2 + $0x3b8] sm:$0xff]  ;;  %v2855_v53 = vadd.f32 %v2854_v46, %v11181_v58  ;;  %v2024_v30 = vadd.f32 %v2023_v29, %v11181_v58 }
 0x174   : > { %3170 = vmatprep.mubr.f32.mxu1 %v14939_v31  ;;  %8566 = vmatmul.mubr.msk.f32.gmra.mrb[142].mxu0 %vm1462_vm0, %v637_v43  ;;  %v8939_v38 = vpack.c.bf16 %v3584_v6, %v3580_v17 }
 0x175   : > { %1409 = vperm.xlu1 %10268, %v811_v42   ;;  %1404 = vperm.xlu0 %10267, %v810_v49   ;;  %v8941_v42 = vpack.c.bf16 %v3583_v20, %v3579_v47  ;;  %v2027_v49 = vpop.f32.mrb[38].mxu0  ;;  %v815_v47 = vld [vmem:[%s14926_s2 + $0x3c8] sm:$0xff] }
 0x176   : > { %8694 = vmatmul.mubr.msk.f32.gmra.mrb[142].mxu1 %vm1462_vm0, %v637_v43  ;;  %2343 = vmatprep.mubr.f32.mxu0 %v14939_v31  ;;  %v2860_v52 = vpop.f32.mrb[38].mxu1  ;;  %v2857_v43 = vadd.f32 %v2856_v21, %v11181_v58  ;;  %v2028_v24 = vadd.f32 %v2027_v49, %v11179_v57  ;;  %v2029_v6 = vpop.f32.mrb[39].mxu0  ;;  %v3585_v58 = vmax.f32 %v2022_v48, 0.0 }
 0x177   : > { %3176 = vmatprep.mubr.f32.mxu1 %v14939_v31  ;;  %8812 = vmatprep.subr.bf16.mxu0 %v8811_v11  ;;  %v2861_v32 = vadd.f32 %v2860_v52, %v11179_v57  ;;  %v2862_v17 = vpop.f32.mrb[39].mxu1  ;;  %v2030_v20 = vadd.f32 %v2029_v6, %v11179_v57  ;;  %v814_v11 = vld [vmem:[%s14926_s2 + $0x3c0] sm:$0xff]  ;;  %v3587_v52 = vmax.f32 %v2855_v53, 0.0 }
 0x178   : > { %8940 = vmatprep.subr.bf16.mxu1 %v8939_v38  ;;  %8567 = vmatmul.mubr.msk.f32.gmra.mrb[144].mxu0 %vm1462_vm0, %v638_v27  ;;  %v2863_v46 = vadd.f32 %v2862_v17, %v11179_v57  ;;  %v3589_v29 = vmax.f32 %v2028_v24, 0.0  ;;  %v3588_v24 = vmax.f32 %v2857_v43, 0.0  ;;  %v11850_v17 = vpop.permute.xlu1 %4292 }
 0x179   : > { %1419 = vperm.xlu1 %10268, %v813_v39   ;;  %1414 = vperm.xlu0 %10267, %v812_v40   ;;  %v3591_v21 = vmax.f32 %v2861_v32, 0.0  ;;  %v639_v39 = vld [vmem:[%s14927_s1 + $0x248] sm:$0xff]  ;;  %v2033_v57 = vpop.f32.mrb[40].mxu0  ;;  %v3586_v40 = vmax.f32 %v2024_v30, 0.0  ;;  %v3590_v48 = vmax.f32 %v2030_v20, 0.0  ;;  %14968 = vst [vmem:[#allocation53_spill] sm:$0xff] %v11850_v17  ;;  %v11852_v30 = vpop.permute.xlu0 %4287 }
 0x17a   : > { %8695 = vmatmul.mubr.msk.f32.gmra.mrb[144].mxu1 %vm1462_vm0, %v638_v27  ;;  %8814 = vmatpush1.bf16.msra.mxu0 %v8813_v55  ;;  %v2866_v38 = vpop.f32.mrb[40].mxu1  ;;  %v3592_v49 = vmax.f32 %v2863_v46, 0.0  ;;  %v2035_v55 = vpop.f32.mrb[41].mxu0  ;;  %v8817_v32 = vpack.c.bf16 %v3589_v29, %v3585_v58  ;;  %14969 = vst [vmem:[#allocation54_spill] sm:$0xff] %v11852_v30  ;;  %v2034_v53 = vadd.f32 %v2033_v57, %v11198_v63  ;;  %v816_v20 = vld [vmem:[%s14926_s2 + $0x3d0] sm:$0xff] }
 0x17b   : > { %8942 = vmatpush1.bf16.msra.mxu1 %v8941_v42  ;;  %2349 = vmatprep.mubr.f32.mxu0 %v14939_v31  ;;  %v2868_v27 = vpop.f32.mrb[41].mxu1  ;;  %v8815_v6 = vpack.c.bf16 %v3590_v48, %v3586_v40  ;;  %v817_v42 = vld [vmem:[%s14926_s2 + $0x3d8] sm:$0xff]  ;;  %v640_v46 = vld [vmem:[%s14927_s1 + $0x250] sm:$0xff]  ;;  %v2867_v58 = vadd.f32 %v2866_v38, %v11198_v63  ;;  %v2036_v29 = vadd.f32 %v2035_v55, %v11198_v63 }
 0x17c   : > { %3182 = vmatprep.mubr.f32.mxu1 %v14939_v31  ;;  %8568 = vmatmul.mubr.msk.f32.gmra.mrb[146].mxu0 %vm1462_vm0, %v639_v39  ;;  %v8943_v43 = vpack.c.bf16 %v3592_v49, %v3588_v24 }
 0x17d   : > { %1429 = vperm.xlu1 %10268, %v815_v47   ;;  %1424 = vperm.xlu0 %10267, %v814_v11   ;;  %v8945_v47 = vpack.c.bf16 %v3591_v21, %v3587_v52  ;;  %v2039_v11 = vpop.f32.mrb[42].mxu0  ;;  %v819_v52 = vld [vmem:[%s14926_s2 + $0x3e8] sm:$0xff] }
 0x17e   : > { %8696 = vmatmul.mubr.msk.f32.gmra.mrb[146].mxu1 %vm1462_vm0, %v639_v39  ;;  %2355 = vmatprep.mubr.f32.mxu0 %v14939_v31  ;;  %v2872_v57 = vpop.f32.mrb[42].mxu1  ;;  %v2869_v39 = vadd.f32 %v2868_v27, %v11198_v63  ;;  %v2040_v40 = vadd.f32 %v2039_v11, %v11196_v62  ;;  %v2041_v49 = vpop.f32.mrb[43].mxu0  ;;  %v3593_v63 = vmax.f32 %v2034_v53, 0.0 }
 0x17f   : > { %3188 = vmatprep.mubr.f32.mxu1 %v14939_v31  ;;  %8816 = vmatprep.subr.bf16.mxu0 %v8815_v6  ;;  %v2873_v48 = vadd.f32 %v2872_v57, %v11196_v62  ;;  %v2874_v24 = vpop.f32.mrb[43].mxu1  ;;  %v2042_v21 = vadd.f32 %v2041_v49, %v11196_v62  ;;  %v818_v6 = vld [vmem:[%s14926_s2 + $0x3e0] sm:$0xff]  ;;  %v3595_v57 = vmax.f32 %v2867_v58, 0.0 }
 0x180   : > { %8944 = vmatprep.subr.bf16.mxu1 %v8943_v43  ;;  %8569 = vmatmul.mubr.msk.f32.gmra.mrb[148].mxu0 %vm1462_vm0, %v640_v46  ;;  %v2875_v38 = vadd.f32 %v2874_v24, %v11196_v62  ;;  %v3597_v55 = vmax.f32 %v2040_v40, 0.0  ;;  %v3596_v40 = vmax.f32 %v2869_v39, 0.0  ;;  %v11888_v24 = vpop.permute.xlu1 %4302 }
 0x181   : > { %1439 = vperm.xlu1 %10268, %v817_v42   ;;  %1434 = vperm.xlu0 %10267, %v816_v20   ;;  %v3599_v27 = vmax.f32 %v2873_v48, 0.0  ;;  %v641_v42 = vld [vmem:[%s14927_s1 + $0x258] sm:$0xff]  ;;  %v2045_v62 = vpop.f32.mrb[44].mxu0  ;;  %v3594_v20 = vmax.f32 %v2036_v29, 0.0  ;;  %v3598_v53 = vmax.f32 %v2042_v21, 0.0  ;;  %14970 = vst [vmem:[#allocation55_spill] sm:$0xff] %v11888_v24  ;;  %v11890_v29 = vpop.permute.xlu0 %4297 }
 0x182   : > { %8697 = vmatmul.mubr.msk.f32.gmra.mrb[148].mxu1 %vm1462_vm0, %v640_v46  ;;  %8818 = vmatpush1.bf16.msra.mxu0 %v8817_v32  ;;  %v2878_v43 = vpop.f32.mrb[44].mxu1  ;;  %v3600_v11 = vmax.f32 %v2875_v38, 0.0  ;;  %v2047_v32 = vpop.f32.mrb[45].mxu0  ;;  %v8821_v48 = vpack.c.bf16 %v3597_v55, %v3593_v63  ;;  %14971 = vst [vmem:[#allocation56_spill] sm:$0xff] %v11890_v29  ;;  %v2046_v58 = vadd.f32 %v2045_v62, %v11215_v4  ;;  %v820_v21 = vld [vmem:[%s14926_s2 + $0x3f0] sm:$0xff]  ;;  %v642_v38 = vld [vmem:[%s14927_s1 + $0x260] sm:$0xff] }
 0x183   : > { %8946 = vmatpush1.bf16.msra.mxu1 %v8945_v47  ;;  %2361 = vmatprep.mubr.f32.mxu0 %v14939_v31  ;;  %v2880_v46 = vpop.f32.mrb[45].mxu1  ;;  %v8819_v49 = vpack.c.bf16 %v3598_v53, %v3594_v20  ;;  %v821_v47 = vld [vmem:[%s14926_s2 + $0x3f8] sm:$0xff]  ;;  %v2879_v63 = vadd.f32 %v2878_v43, %v11215_v4  ;;  %v2048_v55 = vadd.f32 %v2047_v32, %v11215_v4 }
 0x184   : > { %3194 = vmatprep.mubr.f32.mxu1 %v14939_v31  ;;  %8570 = vmatmul.mubr.msk.f32.gmra.mrb[150].mxu0 %vm1462_vm0, %v641_v42  ;;  %v8947_v39 = vpack.c.bf16 %v3600_v11, %v3596_v40 }
 0x185   : > { %1449 = vperm.xlu1 %10268, %v819_v52   ;;  %1444 = vperm.xlu0 %10267, %v818_v6   ;;  %v8949_v52 = vpack.c.bf16 %v3599_v27, %v3595_v57  ;;  %v2051_v6 = vpop.f32.mrb[46].mxu0  ;;  %v5790_v57 = vld [vmem:[%s14825_s8 + $0x8] sm:$0xff] }
 0x186   : > { %8698 = vmatmul.mubr.msk.f32.gmra.mrb[150].mxu1 %vm1462_vm0, %v641_v42  ;;  %2367 = vmatprep.mubr.f32.mxu0 %v14939_v31  ;;  %v2884_v62 = vpop.f32.mrb[46].mxu1  ;;  %v2881_v42 = vadd.f32 %v2880_v46, %v11215_v4  ;;  %v2052_v20 = vadd.f32 %v2051_v6, %v11213_v3  ;;  %v2053_v11 = vpop.f32.mrb[47].mxu0  ;;  %v3601_v4 = vmax.f32 %v2046_v58, 0.0 }
 0x187   : > { %3200 = vmatprep.mubr.f32.mxu1 %v14939_v31  ;;  %8820 = vmatprep.subr.bf16.mxu0 %v8819_v49  ;;  %v2885_v53 = vadd.f32 %v2884_v62, %v11213_v3  ;;  %v2886_v40 = vpop.f32.mrb[47].mxu1  ;;  %v2054_v27 = vadd.f32 %v2053_v11, %v11213_v3  ;;  %v5789_v49 = vld [vmem:[%s14825_s8] sm:$0xff]  ;;  %v3603_v62 = vmax.f32 %v2879_v63, 0.0 }
 0x188   : > { %8948 = vmatprep.subr.bf16.mxu1 %v8947_v39  ;;  %8571 = vmatmul.mubr.msk.f32.gmra.mrb[152].mxu0 %vm1462_vm0, %v642_v38  ;;  %v2887_v43 = vadd.f32 %v2886_v40, %v11213_v3  ;;  %v3605_v32 = vmax.f32 %v2052_v20, 0.0  ;;  %v3604_v20 = vmax.f32 %v2881_v42, 0.0  ;;  %v11926_v40 = vpop.permute.xlu1 %4312 }
 0x189   : > { %1459 = vperm.xlu1 %10268, %v821_v47   ;;  %1454 = vperm.xlu0 %10267, %v820_v21   ;;  %v3607_v46 = vmax.f32 %v2885_v53, 0.0  ;;  %v643_v47 = vld [vmem:[%s14927_s1 + $0x268] sm:$0xff]  ;;  %v2057_v3 = vpop.f32.mrb[48].mxu0  ;;  %v3602_v21 = vmax.f32 %v2048_v55, 0.0  ;;  %v3606_v58 = vmax.f32 %v2054_v27, 0.0  ;;  %14972 = vst [vmem:[#allocation57_spill] sm:$0xff] %v11926_v40  ;;  %v11928_v55 = vpop.permute.xlu0 %4307 }
 0x18a   : > { %8699 = vmatmul.mubr.msk.f32.gmra.mrb[152].mxu1 %vm1462_vm0, %v642_v38  ;;  %8822 = vmatpush1.bf16.msra.mxu0 %v8821_v48  ;;  %v2890_v39 = vpop.f32.mrb[48].mxu1  ;;  %v3608_v6 = vmax.f32 %v2887_v43, 0.0  ;;  %v2059_v48 = vpop.f32.mrb[49].mxu0  ;;  %v8825_v53 = vpack.c.bf16 %v3605_v32, %v3601_v4  ;;  %14973 = vst [vmem:[#allocation58_spill] sm:$0xff] %v11928_v55  ;;  %v2058_v63 = vadd.f32 %v2057_v3, %v11232_v9  ;;  %v5791_v27 = vld [vmem:[%s14825_s8 + $0x10] sm:$0xff] }
 0x18b   : > { %8950 = vmatpush1.bf16.msra.mxu1 %v8949_v52  ;;  %2373 = vmatprep.mubr.f32.mxu0 %v14939_v31  ;;  %v2892_v38 = vpop.f32.mrb[49].mxu1  ;;  %v8823_v11 = vpack.c.bf16 %v3606_v58, %v3602_v21  ;;  %v5792_v52 = vld [vmem:[%s14825_s8 + $0x18] sm:$0xff]  ;;  %v644_v43 = vld [vmem:[%s14927_s1 + $0x270] sm:$0xff]  ;;  %v2891_v4 = vadd.f32 %v2890_v39, %v11232_v9  ;;  %v2060_v32 = vadd.f32 %v2059_v48, %v11232_v9 }
 0x18c   : > { %3206 = vmatprep.mubr.f32.mxu1 %v14939_v31  ;;  %8572 = vmatmul.mubr.msk.f32.gmra.mrb[154].mxu0 %vm1462_vm0, %v643_v47  ;;  %v8951_v42 = vpack.c.bf16 %v3608_v6, %v3604_v20 }
 0x18d   : > { %5828 = vperm.xlu1 %10268, %v5790_v57   ;;  %5823 = vperm.xlu0 %10267, %v5789_v49   ;;  %v8953_v57 = vpack.c.bf16 %v3607_v46, %v3603_v62  ;;  %v2063_v49 = vpop.f32.mrb[50].mxu0  ;;  %v5794_v62 = vld [vmem:[%s14825_s8 + $0x28] sm:$0xff] }
 0x18e   : > { %8700 = vmatmul.mubr.msk.f32.gmra.mrb[154].mxu1 %vm1462_vm0, %v643_v47  ;;  %2379 = vmatprep.mubr.f32.mxu0 %v14939_v31  ;;  %v2896_v3 = vpop.f32.mrb[50].mxu1  ;;  %v2893_v47 = vadd.f32 %v2892_v38, %v11232_v9  ;;  %v2064_v21 = vadd.f32 %v2063_v49, %v11230_v8  ;;  %v2065_v6 = vpop.f32.mrb[51].mxu0  ;;  %v3609_v9 = vmax.f32 %v2058_v63, 0.0 }
 0x18f   : > { %3212 = vmatprep.mubr.f32.mxu1 %v14939_v31  ;;  %8824 = vmatprep.subr.bf16.mxu0 %v8823_v11  ;;  %v2897_v58 = vadd.f32 %v2896_v3, %v11230_v8  ;;  %v2898_v20 = vpop.f32.mrb[51].mxu1  ;;  %v2066_v46 = vadd.f32 %v2065_v6, %v11230_v8  ;;  %v5793_v11 = vld [vmem:[%s14825_s8 + $0x20] sm:$0xff]  ;;  %v3611_v3 = vmax.f32 %v2891_v4, 0.0 }
 0x190   : > { %8952 = vmatprep.subr.bf16.mxu1 %v8951_v42  ;;  %8573 = vmatmul.mubr.msk.f32.gmra.mrb[156].mxu0 %vm1462_vm0, %v644_v43  ;;  %v2899_v39 = vadd.f32 %v2898_v20, %v11230_v8  ;;  %v3613_v48 = vmax.f32 %v2064_v21, 0.0  ;;  %v3612_v21 = vmax.f32 %v2893_v47, 0.0  ;;  %v11964_v20 = vpop.permute.xlu1 %4322 }
 0x191   : > { %5838 = vperm.xlu1 %10268, %v5792_v52   ;;  %5833 = vperm.xlu0 %10267, %v5791_v27   ;;  %v3615_v38 = vmax.f32 %v2897_v58, 0.0  ;;  %v645_v52 = vld [vmem:[%s14927_s1 + $0x278] sm:$0xff]  ;;  %v2069_v8 = vpop.f32.mrb[52].mxu0  ;;  %v3610_v27 = vmax.f32 %v2060_v32, 0.0  ;;  %v3614_v63 = vmax.f32 %v2066_v46, 0.0  ;;  %14974 = vst [vmem:[#allocation59_spill] sm:$0xff] %v11964_v20  ;;  %v11966_v32 = vpop.permute.xlu0 %4317 }
 0x192   : > { %8701 = vmatmul.mubr.msk.f32.gmra.mrb[156].mxu1 %vm1462_vm0, %v644_v43  ;;  %8826 = vmatpush1.bf16.msra.mxu0 %v8825_v53  ;;  %v2902_v42 = vpop.f32.mrb[52].mxu1  ;;  %v3616_v49 = vmax.f32 %v2899_v39, 0.0  ;;  %v2071_v53 = vpop.f32.mrb[53].mxu0  ;;  %v8829_v58 = vpack.c.bf16 %v3613_v48, %v3609_v9  ;;  %14975 = vst [vmem:[#allocation60_spill] sm:$0xff] %v11966_v32  ;;  %v2070_v4 = vadd.f32 %v2069_v8, %v11249_v18  ;;  %v5795_v46 = vld [vmem:[%s14825_s8 + $0x30] sm:$0xff]  ;;  %v646_v39 = vld [vmem:[%s14927_s1 + $0x280] sm:$0xff] }
 0x193   : > { %8954 = vmatpush1.bf16.msra.mxu1 %v8953_v57  ;;  %2385 = vmatprep.mubr.f32.mxu0 %v14939_v31  ;;  %v2904_v43 = vpop.f32.mrb[53].mxu1  ;;  %v8827_v6 = vpack.c.bf16 %v3614_v63, %v3610_v27  ;;  %v5796_v57 = vld [vmem:[%s14825_s8 + $0x38] sm:$0xff]  ;;  %v2903_v9 = vadd.f32 %v2902_v42, %v11249_v18  ;;  %v2072_v48 = vadd.f32 %v2071_v53, %v11249_v18 }
 0x194   : > { %3218 = vmatprep.mubr.f32.mxu1 %v14939_v31  ;;  %8574 = vmatmul.mubr.msk.f32.gmra.mrb[158].mxu0 %vm1462_vm0, %v645_v52  ;;  %v8955_v47 = vpack.c.bf16 %v3616_v49, %v3612_v21 }
 0x195   : > { %5848 = vperm.xlu1 %10268, %v5794_v62   ;;  %5843 = vperm.xlu0 %10267, %v5793_v11   ;;  %v8957_v62 = vpack.c.bf16 %v3615_v38, %v3611_v3  ;;  %v2075_v11 = vpop.f32.mrb[54].mxu0  ;;  %v5798_v3 = vld [vmem:[%s14825_s8 + $0x48] sm:$0xff] }
 0x196   : > { %8702 = vmatmul.mubr.msk.f32.gmra.mrb[158].mxu1 %vm1462_vm0, %v645_v52  ;;  %2391 = vmatprep.mubr.f32.mxu0 %v14939_v31  ;;  %v2908_v8 = vpop.f32.mrb[54].mxu1  ;;  %v2905_v52 = vadd.f32 %v2904_v43, %v11249_v18  ;;  %v2076_v27 = vadd.f32 %v2075_v11, %v11247_v15  ;;  %v2077_v49 = vpop.f32.mrb[55].mxu0  ;;  %v3617_v18 = vmax.f32 %v2070_v4, 0.0 }
 0x197   : > { %3224 = vmatprep.mubr.f32.mxu1 %v14939_v31  ;;  %8828 = vmatprep.subr.bf16.mxu0 %v8827_v6  ;;  %v2909_v63 = vadd.f32 %v2908_v8, %v11247_v15  ;;  %v2910_v21 = vpop.f32.mrb[55].mxu1  ;;  %v2078_v38 = vadd.f32 %v2077_v49, %v11247_v15  ;;  %v5797_v6 = vld [vmem:[%s14825_s8 + $0x40] sm:$0xff]  ;;  %v3619_v8 = vmax.f32 %v2903_v9, 0.0 }
 0x198   : > { %8956 = vmatprep.subr.bf16.mxu1 %v8955_v47  ;;  %8575 = vmatmul.mubr.msk.f32.gmra.mrb[160].mxu0 %vm1462_vm0, %v646_v39  ;;  %v2911_v42 = vadd.f32 %v2910_v21, %v11247_v15  ;;  %v3621_v53 = vmax.f32 %v2076_v27, 0.0  ;;  %v3620_v27 = vmax.f32 %v2905_v52, 0.0  ;;  %v12002_v21 = vpop.permute.xlu1 %4332 }
 0x199   : > { %5858 = vperm.xlu1 %10268, %v5796_v57   ;;  %5853 = vperm.xlu0 %10267, %v5795_v46   ;;  %v3623_v43 = vmax.f32 %v2909_v63, 0.0  ;;  %v647_v57 = vld [vmem:[%s14927_s1 + $0x288] sm:$0xff]  ;;  %v2081_v15 = vpop.f32.mrb[56].mxu0  ;;  %v3618_v46 = vmax.f32 %v2072_v48, 0.0  ;;  %v3622_v4 = vmax.f32 %v2078_v38, 0.0  ;;  %14976 = vst [vmem:[#allocation61_spill] sm:$0xff] %v12002_v21  ;;  %v12004_v48 = vpop.permute.xlu0 %4327 }
 0x19a   : > { %8703 = vmatmul.mubr.msk.f32.gmra.mrb[160].mxu1 %vm1462_vm0, %v646_v39  ;;  %8830 = vmatpush1.bf16.msra.mxu0 %v8829_v58  ;;  %v2914_v47 = vpop.f32.mrb[56].mxu1  ;;  %v3624_v11 = vmax.f32 %v2911_v42, 0.0  ;;  %v2083_v58 = vpop.f32.mrb[57].mxu0  ;;  %v8833_v63 = vpack.c.bf16 %v3621_v53, %v3617_v18  ;;  %14977 = vst [vmem:[#allocation62_spill] sm:$0xff] %v12004_v48  ;;  %v2082_v9 = vadd.f32 %v2081_v15, %v11266_v26  ;;  %v5799_v38 = vld [vmem:[%s14825_s8 + $0x50] sm:$0xff] }
 0x19b   : > { %8958 = vmatpush1.bf16.msra.mxu1 %v8957_v62  ;;  %2397 = vmatprep.mubr.f32.mxu0 %v14939_v31  ;;  %v2916_v39 = vpop.f32.mrb[57].mxu1  ;;  %v8831_v49 = vpack.c.bf16 %v3622_v4, %v3618_v46  ;;  %v5800_v62 = vld [vmem:[%s14825_s8 + $0x58] sm:$0xff]  ;;  %v648_v42 = vld [vmem:[%s14927_s1 + $0x290] sm:$0xff]  ;;  %v2915_v18 = vadd.f32 %v2914_v47, %v11266_v26  ;;  %v2084_v53 = vadd.f32 %v2083_v58, %v11266_v26 }
 0x19c   : > { %3230 = vmatprep.mubr.f32.mxu1 %v14939_v31  ;;  %8576 = vmatmul.mubr.msk.f32.gmra.mrb[162].mxu0 %vm1462_vm0, %v647_v57  ;;  %v8959_v52 = vpack.c.bf16 %v3624_v11, %v3620_v27 }
 0x19d   : > { %5868 = vperm.xlu1 %10268, %v5798_v3   ;;  %5863 = vperm.xlu0 %10267, %v5797_v6   ;;  %v8961_v3 = vpack.c.bf16 %v3623_v43, %v3619_v8  ;;  %v2087_v6 = vpop.f32.mrb[58].mxu0  ;;  %v5802_v8 = vld [vmem:[%s14825_s8 + $0x68] sm:$0xff] }
 0x19e   : > { %8704 = vmatmul.mubr.msk.f32.gmra.mrb[162].mxu1 %vm1462_vm0, %v647_v57  ;;  %2403 = vmatprep.mubr.f32.mxu0 %v14939_v31  ;;  %v2920_v15 = vpop.f32.mrb[58].mxu1  ;;  %v2917_v57 = vadd.f32 %v2916_v39, %v11266_v26  ;;  %v2088_v46 = vadd.f32 %v2087_v6, %v11264_v25  ;;  %v2089_v11 = vpop.f32.mrb[59].mxu0  ;;  %v3625_v26 = vmax.f32 %v2082_v9, 0.0 }
 0x19f   : > { %3236 = vmatprep.mubr.f32.mxu1 %v14939_v31  ;;  %8832 = vmatprep.subr.bf16.mxu0 %v8831_v49  ;;  %v2921_v4 = vadd.f32 %v2920_v15, %v11264_v25  ;;  %v2922_v27 = vpop.f32.mrb[59].mxu1  ;;  %v2090_v43 = vadd.f32 %v2089_v11, %v11264_v25  ;;  %v5801_v49 = vld [vmem:[%s14825_s8 + $0x60] sm:$0xff]  ;;  %v3627_v15 = vmax.f32 %v2915_v18, 0.0 }
 0x1a0   : > { %8960 = vmatprep.subr.bf16.mxu1 %v8959_v52  ;;  %8577 = vmatmul.mubr.msk.f32.gmra.mrb[164].mxu0 %vm1462_vm0, %v648_v42  ;;  %v2923_v47 = vadd.f32 %v2922_v27, %v11264_v25  ;;  %v3629_v58 = vmax.f32 %v2088_v46, 0.0  ;;  %v3628_v46 = vmax.f32 %v2917_v57, 0.0  ;;  %v12040_v27 = vpop.permute.xlu1 %4342 }
 0x1a1   : > { %5878 = vperm.xlu1 %10268, %v5800_v62   ;;  %5873 = vperm.xlu0 %10267, %v5799_v38   ;;  %v3631_v39 = vmax.f32 %v2921_v4, 0.0  ;;  %v649_v62 = vld [vmem:[%s14927_s1 + $0x298] sm:$0xff]  ;;  %v2093_v25 = vpop.f32.mrb[60].mxu0  ;;  %v3626_v38 = vmax.f32 %v2084_v53, 0.0  ;;  %v3630_v9 = vmax.f32 %v2090_v43, 0.0  ;;  %14978 = vst [vmem:[#allocation63_spill] sm:$0xff] %v12040_v27  ;;  %v12042_v53 = vpop.permute.xlu0 %4337 }
 0x1a2   : > { %8705 = vmatmul.mubr.msk.f32.gmra.mrb[164].mxu1 %vm1462_vm0, %v648_v42  ;;  %8834 = vmatpush1.bf16.msra.mxu0 %v8833_v63  ;;  %v2926_v52 = vpop.f32.mrb[60].mxu1  ;;  %v3632_v6 = vmax.f32 %v2923_v47, 0.0  ;;  %v2095_v63 = vpop.f32.mrb[61].mxu0  ;;  %v8837_v4 = vpack.c.bf16 %v3629_v58, %v3625_v26  ;;  %14979 = vst [vmem:[#allocation64_spill] sm:$0xff] %v12042_v53  ;;  %v2094_v18 = vadd.f32 %v2093_v25, %v11283_v35  ;;  %v5803_v43 = vld [vmem:[%s14825_s8 + $0x70] sm:$0xff]  ;;  %v650_v47 = vld [vmem:[%s14927_s1 + $0x2a0] sm:$0xff] }
 0x1a3   : > { %8962 = vmatpush1.bf16.msra.mxu1 %v8961_v3  ;;  %2409 = vmatprep.mubr.f32.mxu0 %v14939_v31  ;;  %v2928_v42 = vpop.f32.mrb[61].mxu1  ;;  %v8835_v11 = vpack.c.bf16 %v3630_v9, %v3626_v38  ;;  %v5804_v3 = vld [vmem:[%s14825_s8 + $0x78] sm:$0xff]  ;;  %v2927_v26 = vadd.f32 %v2926_v52, %v11283_v35  ;;  %v2096_v58 = vadd.f32 %v2095_v63, %v11283_v35 }
 0x1a4   : > { %3242 = vmatprep.mubr.f32.mxu1 %v14939_v31  ;;  %8578 = vmatmul.mubr.msk.f32.gmra.mrb[166].mxu0 %vm1462_vm0, %v649_v62  ;;  %v8963_v57 = vpack.c.bf16 %v3632_v6, %v3628_v46 }
 0x1a5   : > { %5888 = vperm.xlu1 %10268, %v5802_v8   ;;  %5883 = vperm.xlu0 %10267, %v5801_v49   ;;  %v8965_v8 = vpack.c.bf16 %v3631_v39, %v3627_v15  ;;  %v2099_v49 = vpop.f32.mrb[62].mxu0  ;;  %v5806_v15 = vld [vmem:[%s14825_s8 + $0x88] sm:$0xff] }
 0x1a6   : > { %8706 = vmatmul.mubr.msk.f32.gmra.mrb[166].mxu1 %vm1462_vm0, %v649_v62  ;;  %2415 = vmatprep.mubr.f32.mxu0 %v14939_v31  ;;  %v2932_v25 = vpop.f32.mrb[62].mxu1  ;;  %v2929_v62 = vadd.f32 %v2928_v42, %v11283_v35  ;;  %v2100_v38 = vadd.f32 %v2099_v49, %v11281_v34  ;;  %v2101_v6 = vpop.f32.mrb[63].mxu0  ;;  %v3633_v35 = vmax.f32 %v2094_v18, 0.0 }
 0x1a7   : > { %3248 = vmatprep.mubr.f32.mxu1 %v14939_v31  ;;  %8836 = vmatprep.subr.bf16.mxu0 %v8835_v11  ;;  %v2933_v9 = vadd.f32 %v2932_v25, %v11281_v34  ;;  %v2934_v46 = vpop.f32.mrb[63].mxu1  ;;  %v2102_v39 = vadd.f32 %v2101_v6, %v11281_v34  ;;  %v5805_v11 = vld [vmem:[%s14825_s8 + $0x80] sm:$0xff]  ;;  %v3635_v25 = vmax.f32 %v2927_v26, 0.0 }
 0x1a8   : > { %8964 = vmatprep.subr.bf16.mxu1 %v8963_v57  ;;  %8579 = vmatmul.mubr.msk.f32.gmra.mrb[168].mxu0 %vm1462_vm0, %v650_v47  ;;  %v2935_v52 = vadd.f32 %v2934_v46, %v11281_v34  ;;  %v3637_v63 = vmax.f32 %v2100_v38, 0.0  ;;  %v3636_v38 = vmax.f32 %v2929_v62, 0.0  ;;  %v12078_v46 = vpop.permute.xlu1 %1149 }
 0x1a9   : > { %5898 = vperm.xlu1 %10268, %v5804_v3   ;;  %5893 = vperm.xlu0 %10267, %v5803_v43   ;;  %v3639_v42 = vmax.f32 %v2933_v9, 0.0  ;;  %v651_v3 = vld [vmem:[%s14927_s1 + $0x2a8] sm:$0xff]  ;;  %v2105_v34 = vpop.f32.mrb[64].mxu0  ;;  %v3634_v43 = vmax.f32 %v2096_v58, 0.0  ;;  %v3638_v18 = vmax.f32 %v2102_v39, 0.0  ;;  %v12080_v58 = vpop.permute.xlu0 %1144  ;;  %v5807_v39 = vld [vmem:[%s14825_s8 + $0x90] sm:$0xff] }
 0x1aa   : > { %8707 = vmatmul.mubr.msk.f32.gmra.mrb[168].mxu1 %vm1462_vm0, %v650_v47  ;;  %8838 = vmatpush1.bf16.msra.mxu0 %v8837_v4  ;;  %v2938_v57 = vpop.f32.mrb[64].mxu1  ;;  %v3640_v49 = vmax.f32 %v2935_v52, 0.0  ;;  %v2107_v4 = vpop.f32.mrb[65].mxu0  ;;  %v8841_v9 = vpack.c.bf16 %v3637_v63, %v3633_v35  ;;  %v2106_v26 = vadd.f32 %v2105_v34, %v11300_v44  ;;  %v652_v52 = vld [vmem:[%s14927_s1 + $0x2b0] sm:$0xff] }
 0x1ab   : > { %8966 = vmatpush1.bf16.msra.mxu1 %v8965_v8  ;;  %2421 = vmatprep.mubr.f32.mxu0 %v14939_v31  ;;  %v2940_v47 = vpop.f32.mrb[65].mxu1  ;;  %v8839_v6 = vpack.c.bf16 %v3638_v18, %v3634_v43  ;;  %v5808_v8 = vld [vmem:[%s14825_s8 + $0x98] sm:$0xff]  ;;  %v2939_v35 = vadd.f32 %v2938_v57, %v11300_v44  ;;  %v2108_v63 = vadd.f32 %v2107_v4, %v11300_v44 }
 0x1ac   : > { %3254 = vmatprep.mubr.f32.mxu1 %v14939_v31  ;;  %8580 = vmatmul.mubr.msk.f32.gmra.mrb[170].mxu0 %vm1462_vm0, %v651_v3  ;;  %v8967_v62 = vpack.c.bf16 %v3640_v49, %v3636_v38 }
 0x1ad   : > { %5908 = vperm.xlu1 %10268, %v5806_v15   ;;  %5903 = vperm.xlu0 %10267, %v5805_v11   ;;  %v8969_v15 = vpack.c.bf16 %v3639_v42, %v3635_v25  ;;  %v2111_v11 = vpop.f32.mrb[66].mxu0  ;;  %v5810_v25 = vld [vmem:[%s14825_s8 + $0xa8] sm:$0xff] }
 0x1ae   : > { %8708 = vmatmul.mubr.msk.f32.gmra.mrb[170].mxu1 %vm1462_vm0, %v651_v3  ;;  %2427 = vmatprep.mubr.f32.mxu0 %v14939_v31  ;;  %v2944_v34 = vpop.f32.mrb[66].mxu1  ;;  %v2941_v3 = vadd.f32 %v2940_v47, %v11300_v44  ;;  %v2112_v43 = vadd.f32 %v2111_v11, %v11298_v41  ;;  %v2113_v49 = vpop.f32.mrb[67].mxu0  ;;  %v3641_v44 = vmax.f32 %v2106_v26, 0.0 }
 0x1af   : > { %3260 = vmatprep.mubr.f32.mxu1 %v14939_v31  ;;  %8840 = vmatprep.subr.bf16.mxu0 %v8839_v6  ;;  %v2945_v18 = vadd.f32 %v2944_v34, %v11298_v41  ;;  %v2946_v38 = vpop.f32.mrb[67].mxu1  ;;  %v2114_v42 = vadd.f32 %v2113_v49, %v11298_v41  ;;  %v5809_v6 = vld [vmem:[%s14825_s8 + $0xa0] sm:$0xff]  ;;  %v3643_v34 = vmax.f32 %v2939_v35, 0.0  ;;  %v12114_v49 = vpop.permute.xlu1 %1159  ;;  %v5812_v35 = vld [vmem:[%s14825_s8 + $0xb8] sm:$0xff] }
 0x1b0   : > { %8968 = vmatprep.subr.bf16.mxu1 %v8967_v62  ;;  %8581 = vmatmul.mubr.msk.f32.gmra.mrb[172].mxu0 %vm1462_vm0, %v652_v52  ;;  %v2947_v57 = vadd.f32 %v2946_v38, %v11298_v41  ;;  %v3645_v4 = vmax.f32 %v2112_v43, 0.0  ;;  %v3642_v62 = vmax.f32 %v2108_v63, 0.0  ;;  %v3644_v43 = vmax.f32 %v2941_v3, 0.0  ;;  %v12116_v38 = vpop.permute.xlu0 %1154  ;;  %v5811_v3 = vld [vmem:[%s14825_s8 + $0xb0] sm:$0xff] }
 0x1b1   : > { %5918 = vperm.xlu1 %10268, %v5808_v8   ;;  %5913 = vperm.xlu0 %10267, %v5807_v39   ;;  %v3647_v47 = vmax.f32 %v2945_v18, 0.0  ;;  %v653_v8 = vld [vmem:[%s14927_s1 + $0x2b8] sm:$0xff]  ;;  %v2117_v41 = vpop.f32.mrb[68].mxu0  ;;  %v3646_v26 = vmax.f32 %v2114_v42, 0.0  ;;  %v654_v42 = vld [vmem:[%s14927_s1 + $0x2c0] sm:$0xff] }
 0x1b2   : > { %8709 = vmatmul.mubr.msk.f32.gmra.mrb[172].mxu1 %vm1462_vm0, %v652_v52  ;;  %8842 = vmatpush1.bf16.msra.mxu0 %v8841_v9  ;;  %v2950_v39 = vpop.f32.mrb[68].mxu1  ;;  %v3648_v11 = vmax.f32 %v2947_v57, 0.0  ;;  %v2119_v9 = vpop.f32.mrb[69].mxu0  ;;  %v12112_v18 = vpack.c.bf16 %v3645_v4, %v3641_v44 }
 0x1b3   : > { %8970 = vmatpush1.bf16.msra.mxu1 %v8969_v15  ;;  %2433 = vmatprep.mubr.f32.mxu0 %v14939_v31  ;;  %v2952_v52 = vpop.f32.mrb[69].mxu1  ;;  %v8843_v15 = vpack.c.bf16 %v3646_v26, %v3642_v62  ;;  %v12130_v57 = vpack.c.bf16 %v3647_v47, %v3643_v34  ;;  %v2951_v44 = vadd.f32 %v2950_v39, %v11317_v51  ;;  %v5814_v39 = vld [vmem:[%s14825_s8 + $0xc8] sm:$0xff] }
 0x1b4   : > { %3266 = vmatprep.mubr.f32.mxu1 %v14939_v31  ;;  %8582 = vmatmul.mubr.msk.f32.gmra.mrb[174].mxu0 %vm1462_vm0, %v653_v8  ;;  %v8971_v63 = vpack.c.bf16 %v3648_v11, %v3644_v43  ;;  %v2120_v4 = vadd.f32 %v2119_v9, %v11317_v51  ;;  %v2953_v62 = vadd.f32 %v2952_v52, %v11317_v51  ;;  %v655_v9 = vld [vmem:[%s14927_s1 + $0x2c8] sm:$0xff]  ;;  %v12153_v52 = vpop.permute.xlu1 %1169 }
 0x1b5   : > { %5928 = vperm.xlu1 %10268, %v5810_v25   ;;  %5923 = vperm.xlu0 %10267, %v5809_v6   ;;  %v2118_v25 = vadd.f32 %v2117_v41, %v11317_v51  ;;  %v2123_v6 = vpop.f32.mrb[70].mxu0  ;;  %v5813_v51 = vld [vmem:[%s14825_s8 + $0xc0] sm:$0xff] }
 0x1b6   : > { %8710 = vmatmul.mubr.msk.f32.gmra.mrb[174].mxu1 %vm1462_vm0, %v653_v8  ;;  %2439 = vmatprep.mubr.f32.mxu0 %v14939_v31  ;;  %v2956_v8 = vpop.f32.mrb[70].mxu1  ;;  %v2124_v26 = vadd.f32 %v2123_v6, %v11315_v50  ;;  %v2125_v11 = vpop.f32.mrb[71].mxu0  ;;  %v3650_v6 = vmax.f32 %v2120_v4, 0.0  ;;  %v656_v4 = vld [vmem:[%s14927_s1 + $0x2d0] sm:$0xff] }
 0x1b7   : > { %3272 = vmatprep.mubr.f32.mxu1 %v14939_v31  ;;  %8844 = vmatprep.subr.bf16.mxu0 %v8843_v15  ;;  %v2957_v47 = vadd.f32 %v2956_v8, %v11315_v50  ;;  %v2958_v41 = vpop.f32.mrb[71].mxu1  ;;  %v2126_v34 = vadd.f32 %v2125_v11, %v11315_v50  ;;  %v12155_v15 = vpop.permute.xlu0 %1164 }
 0x1b8   : > { %8972 = vmatprep.subr.bf16.mxu1 %v8971_v63  ;;  %8583 = vmatmul.mubr.msk.f32.gmra.mrb[176].mxu0 %vm1462_vm0, %v654_v42  ;;  %v2959_v43 = vadd.f32 %v2958_v41, %v11315_v50  ;;  %v3653_v63 = vmax.f32 %v2124_v26, 0.0  ;;  %v3651_v41 = vmax.f32 %v2951_v44, 0.0  ;;  %v3652_v26 = vmax.f32 %v2953_v62, 0.0  ;;  %v5815_v44 = vld [vmem:[%s14825_s8 + $0xd0] sm:$0xff] }
 0x1b9   : > { %5938 = vperm.xlu1 %10268, %v5812_v35   ;;  %5933 = vperm.xlu0 %10267, %v5811_v3   ;;  %v3649_v35 = vmax.f32 %v2118_v25, 0.0  ;;  %v3655_v3 = vmax.f32 %v2957_v47, 0.0  ;;  %v2129_v50 = vpop.f32.mrb[72].mxu0  ;;  %v3654_v8 = vmax.f32 %v2126_v34, 0.0  ;;  %v5816_v25 = vld [vmem:[%s14825_s8 + $0xd8] sm:$0xff] }
 0x1ba   : > { %8711 = vmatmul.mubr.msk.f32.gmra.mrb[176].mxu1 %vm1462_vm0, %v654_v42  ;;  %2445 = vmatprep.mubr.f32.mxu0 %v14939_v31  ;;  %v2962_v42 = vpop.f32.mrb[72].mxu1  ;;  %v3656_v11 = vmax.f32 %v2959_v43, 0.0  ;;  %v2131_v27 = vpop.f32.mrb[73].mxu0  ;;  %v2130_v34 = vadd.f32 %v2129_v50, %v11334_v60 }
 0x1bb   : > { %3278 = vmatprep.mubr.f32.mxu1 %v14939_v31  ;;  %v2964_v53 = vpop.f32.mrb[73].mxu1  ;;  %v12162_v47 = vpack.c.bf16 %v3653_v63, %v3649_v35  ;;  %v12178_v43 = vpack.c.bf16 %v3655_v3, %v3651_v41  ;;  %v5818_v3 = vld [vmem:[%s14825_s8 + $0xe8] sm:$0xff] }
 0x1bc   : > { %8584 = vmatmul.mubr.msk.f32.gmra.mrb[178].mxu0 %vm1462_vm0, %v655_v9  ;;  %v12176_v62 = vpack.c.bf16 %v3656_v11, %v3652_v26  ;;  %v2965_v21 = vadd.f32 %v2964_v53, %v11334_v60  ;;  %v657_v53 = vld [vmem:[%s14927_s1 + $0x2d8] sm:$0xff]  ;;  %v3657_v26 = vmax.f32 %v2130_v34, 0.0 }
 0x1bd   : > { %5948 = vperm.xlu1 %10268, %v5814_v39   ;;  %5943 = vperm.xlu0 %10267, %v5813_v51   ;;  %v12172_v39 = vpack.c.bf16 %v3654_v8, %v3650_v6  ;;  %v2963_v51 = vadd.f32 %v2962_v42, %v11334_v60  ;;  %v2135_v35 = vpop.f32.mrb[74].mxu0  ;;  %v12189_v42 = vpop.permute.xlu1 %1179  ;;  %v5820_v34 = vld [vmem:[%s14825_s8 + $0xf8] sm:$0xff] }
 0x1be   : > { %8712 = vmatmul.mubr.msk.f32.gmra.mrb[178].mxu1 %vm1462_vm0, %v655_v9  ;;  %2451 = vmatprep.mubr.f32.mxu0 %v14939_v31  ;;  %v2132_v9 = vadd.f32 %v2131_v27, %v11334_v60  ;;  %v2968_v63 = vpop.f32.mrb[74].mxu1  ;;  %v2136_v6 = vadd.f32 %v2135_v35, %v11332_v59  ;;  %v2137_v50 = vpop.f32.mrb[75].mxu0  ;;  %v5817_v60 = vld [vmem:[%s14825_s8 + $0xe0] sm:$0xff] }
 0x1bf   : > { %3284 = vmatprep.mubr.f32.mxu1 %v14939_v31  ;;  %v2969_v8 = vadd.f32 %v2968_v63, %v11332_v59  ;;  %v2970_v11 = vpop.f32.mrb[75].mxu1  ;;  %v2138_v27 = vadd.f32 %v2137_v50, %v11332_v59  ;;  %v3659_v48 = vmax.f32 %v2963_v51, 0.0  ;;  %v5819_v51 = vld [vmem:[%s14825_s8 + $0xf0] sm:$0xff] }
 0x1c0   : > { %8585 = vmatmul.mubr.msk.f32.gmra.mrb[180].mxu0 %vm1462_vm0, %v656_v4  ;;  %v2971_v41 = vadd.f32 %v2970_v11, %v11332_v59 }
 0x1c1   : > { %5958 = vperm.xlu1 %10268, %v5816_v25   ;;  %5953 = vperm.xlu0 %10267, %v5815_v44   ;;  %v12201_v25 = vpop.permute.xlu0 %1174  ;;  %v3661_v44 = vmax.f32 %v2136_v6, 0.0  ;;  %v3663_v35 = vmax.f32 %v2969_v8, 0.0  ;;  %v2141_v59 = vpop.f32.mrb[76].mxu0  ;;  %v3662_v50 = vmax.f32 %v2138_v27, 0.0  ;;  %v3660_v6 = vmax.f32 %v2965_v21, 0.0 }
 0x1c2   : > { %8713 = vmatmul.mubr.msk.f32.gmra.mrb[180].mxu1 %vm1462_vm0, %v656_v4  ;;  %2457 = vmatprep.mubr.f32.mxu0 %v14939_v31  ;;  %v2974_v63 = vpop.f32.mrb[76].mxu1  ;;  %v3658_v4 = vmax.f32 %v2132_v9, 0.0  ;;  %v3664_v11 = vmax.f32 %v2971_v41, 0.0  ;;  %v2143_v20 = vpop.f32.mrb[77].mxu0  ;;  %v2142_v40 = vadd.f32 %v2141_v59, %v11351_v5  ;;  %v658_v9 = vld [vmem:[%s14927_s1 + $0x2e0] sm:$0xff] }
 0x1c3   : > { %3290 = vmatprep.mubr.f32.mxu1 %v14939_v31  ;;  %v2976_v32 = vpop.f32.mrb[77].mxu1  ;;  %v12208_v8 = vpack.c.bf16 %v3661_v44, %v3657_v26  ;;  %v2975_v21 = vadd.f32 %v2974_v63, %v11351_v5  ;;  %v2144_v26 = vadd.f32 %v2143_v20, %v11351_v5 }
 0x1c4   : > { %8586 = vmatmul.mubr.msk.f32.gmra.mrb[182].mxu0 %vm1462_vm0, %v657_v53  ;;  %v12223_v41 = vpack.c.bf16 %v3664_v11, %v3660_v6  ;;  %v3665_v20 = vmax.f32 %v2142_v40, 0.0 }
 0x1c5   : > { %5968 = vperm.xlu1 %10268, %v5818_v3   ;;  %5963 = vperm.xlu0 %10267, %v5817_v60   ;;  %v12219_v3 = vpack.c.bf16 %v3662_v50, %v3658_v4  ;;  %v2147_v27 = vpop.f32.mrb[78].mxu0  ;;  %v12225_v60 = vpack.c.bf16 %v3663_v35, %v3659_v48  ;;  %v2977_v4 = vadd.f32 %v2976_v32, %v11351_v5  ;;  %v7202_v48 = vld [vmem:[%s14827_s10 + $0x8] sm:$0xff]  ;;  %v12237_v35 = vpop.permute.xlu0 %1184  ;;  %v7201_v5 = vld [vmem:[%s14827_s10] sm:$0xff] }
 0x1c6   : > { %8714 = vmatmul.mubr.msk.f32.gmra.mrb[182].mxu1 %vm1462_vm0, %v657_v53  ;;  %2463 = vmatprep.mubr.f32.mxu0 %v14939_v31  ;;  %v12227_v53 = vpop.permute.xlu1 %1189  ;;  %v2148_v44 = vadd.f32 %v2147_v27, %v11349_v2  ;;  %v2980_v59 = vpop.f32.mrb[78].mxu1  ;;  %v659_v32 = vld [vmem:[%s14927_s1 + $0x2e8] sm:$0xff] }
 0x1c7   : > { %3296 = vmatprep.mubr.f32.mxu1 %v14939_v31  ;;  %v2981_v50 = vadd.f32 %v2980_v59, %v11349_v2  ;;  %v2149_v63 = vpop.f32.mrb[79].mxu0  ;;  %v2982_v11 = vpop.f32.mrb[79].mxu1 }
 0x1c8   : > { %8587 = vmatmul.mubr.msk.f32.gmra.mrb[184].mxu0 %vm1462_vm0, %v658_v9  ;;  %v3669_v6 = vmax.f32 %v2148_v44, 0.0  ;;  %v2150_v27 = vadd.f32 %v2149_v63, %v11349_v2 }
 0x1c9   : > { %5978 = vperm.xlu1 %10268, %v5820_v34   ;;  %5973 = vperm.xlu0 %10267, %v5819_v51   ;;  %v2983_v34 = vadd.f32 %v2982_v11, %v11349_v2  ;;  %v3667_v51 = vmax.f32 %v2975_v21, 0.0  ;;  %v3671_v59 = vmax.f32 %v2981_v50, 0.0  ;;  %v2153_v40 = vpop.f32.mrb[80].mxu0  ;;  %v3666_v2 = vmax.f32 %v2144_v26, 0.0  ;;  %v7204_v21 = vld [vmem:[%s14827_s10 + $0x18] sm:$0xff] }
 0x1ca   : > { %8715 = vmatmul.mubr.msk.f32.gmra.mrb[184].mxu1 %vm1462_vm0, %v658_v9  ;;  %2469 = vmatprep.mubr.f32.mxu0 %v14939_v31  ;;  %v2986_v44 = vpop.f32.mrb[80].mxu1  ;;  %v3670_v63 = vmax.f32 %v2150_v27, 0.0  ;;  %v12250_v11 = vpack.c.bf16 %v3669_v6, %v3665_v20  ;;  %v2155_v55 = vpop.f32.mrb[81].mxu0  ;;  %v3668_v50 = vmax.f32 %v2977_v4, 0.0  ;;  %v2154_v26 = vadd.f32 %v2153_v40, %v11368_v14  ;;  %v660_v20 = vld [vmem:[%s14927_s1 + $0x2f0] sm:$0xff] }
 0x1cb   : > { %3302 = vmatprep.mubr.f32.mxu1 %v14939_v31  ;;  %v3672_v9 = vmax.f32 %v2983_v34, 0.0  ;;  %v2988_v24 = vpop.f32.mrb[81].mxu1  ;;  %v12256_v29 = vpack.c.bf16 %v3671_v59, %v3667_v51  ;;  %v12258_v17 = vpop.permute.xlu1 %1199  ;;  %v2987_v4 = vadd.f32 %v2986_v44, %v11368_v14 }
 0x1cc   : > { %8588 = vmatmul.mubr.msk.f32.gmra.mrb[186].mxu0 %vm1462_vm0, %v659_v32  ;;  %v12269_v6 = vpack.c.bf16 %v3670_v63, %v3666_v2  ;;  %v2989_v40 = vadd.f32 %v2988_v24, %v11368_v14  ;;  %v661_v24 = vld [vmem:[%s14927_s1 + $0x2f8] sm:$0xff] }
 0x1cd   : > { %7240 = vperm.xlu1 %10268, %v7202_v48   ;;  %7235 = vperm.xlu0 %10267, %v7201_v5   ;;  %v7203_v48 = vld [vmem:[%s14827_s10 + $0x10] sm:$0xff]  ;;  %v2159_v27 = vpop.f32.mrb[82].mxu0  ;;  %v12273_v34 = vpack.c.bf16 %v3672_v9, %v3668_v50  ;;  %v12275_v5 = vpop.permute.xlu0 %1194  ;;  %v7206_v9 = vld [vmem:[%s14827_s10 + $0x28] sm:$0xff]  ;;  %v3673_v50 = vmax.f32 %v2154_v26, 0.0 }
 0x1ce   : > { %8716 = vmatmul.mubr.msk.f32.gmra.mrb[186].mxu1 %vm1462_vm0, %v659_v32  ;;  %2475 = vmatprep.mubr.f32.mxu0 %v14939_v31  ;;  %v2156_v32 = vadd.f32 %v2155_v55, %v11368_v14  ;;  %v2160_v51 = vadd.f32 %v2159_v27, %v11366_v13  ;;  %v2992_v59 = vpop.f32.mrb[82].mxu1  ;;  %v2161_v63 = vpop.f32.mrb[83].mxu0  ;;  %v7205_v14 = vld [vmem:[%s14827_s10 + $0x20] sm:$0xff] }
 0x1cf   : > { %3308 = vmatprep.mubr.f32.mxu1 %v14939_v31  ;;  %v2993_v2 = vadd.f32 %v2992_v59, %v11366_v13  ;;  %v2994_v44 = vpop.f32.mrb[83].mxu1  ;;  %v2162_v55 = vadd.f32 %v2161_v63, %v11366_v13 }
 0x1d0   : > { %8589 = vmatmul.mubr.msk.f32.gmra.mrb[188].mxu0 %vm1462_vm0, %v660_v20  ;;  %v3677_v30 = vmax.f32 %v2160_v51, 0.0  ;;  %v2995_v27 = vadd.f32 %v2994_v44, %v11366_v13  ;;  %v12296_v51 = vpop.permute.xlu1 %1209 }
 0x1d1   : > { %7250 = vperm.xlu1 %10268, %v7204_v21   ;;  %7245 = vperm.xlu0 %10267, %v7203_v48   ;;  %v3675_v21 = vmax.f32 %v2987_v4, 0.0  ;;  %v3679_v48 = vmax.f32 %v2993_v2, 0.0  ;;  %v2165_v26 = vpop.f32.mrb[84].mxu0  ;;  %v3678_v59 = vmax.f32 %v2162_v55, 0.0  ;;  %v7208_v4 = vld [vmem:[%s14827_s10 + $0x38] sm:$0xff]  ;;  %v3676_v2 = vmax.f32 %v2989_v40, 0.0  ;;  %v12306_v56 = vpop.permute.xlu0 %1204 }
 0x1d2   : > { %8717 = vmatmul.mubr.msk.f32.gmra.mrb[188].mxu1 %vm1462_vm0, %v660_v20  ;;  %2481 = vmatprep.mubr.f32.mxu0 %v14939_v31  ;;  %v2998_v13 = vpop.f32.mrb[84].mxu1  ;;  %v3674_v20 = vmax.f32 %v2156_v32, 0.0  ;;  %v3680_v63 = vmax.f32 %v2995_v27, 0.0  ;;  %v12298_v44 = vpack.c.bf16 %v3677_v30, %v3673_v50  ;;  %v2167_v0 = vpop.f32.mrb[85].mxu0  ;;  %v7207_v30 = vld [vmem:[%s14827_s10 + $0x30] sm:$0xff]  ;;  %v662_v50 = vld [vmem:[%s14927_s1 + $0x300] sm:$0xff] }
 0x1d3   : > { %3314 = vmatprep.mubr.f32.mxu1 %v14939_v31  ;;  %v3000_v37 = vpop.f32.mrb[85].mxu1  ;;  %v12304_v45 = vpack.c.bf16 %v3679_v48, %v3675_v21  ;;  %v14981_v21 = vld [vmem:[#allocation15_spill] sm:$0xff] }
 0x1d4   : > { %8590 = vmatmul.mubr.msk.f32.gmra.mrb[190].mxu0 %vm1462_vm0, %v661_v24  ;;  %v12317_v55 = vpack.c.bf16 %v3678_v59, %v3674_v20  ;;  %v7210_v59 = vld [vmem:[%s14827_s10 + $0x48] sm:$0xff] }
 0x1d5   : > { %7260 = vperm.xlu1 %10268, %v7206_v9   ;;  %7255 = vperm.xlu0 %10267, %v7205_v14   ;;  %v14980_v9 = vld [vmem:[#allocation16_spill] sm:$0xff]  ;;  %v2171_v27 = vpop.f32.mrb[86].mxu0  ;;  %v12321_v14 = vpack.c.bf16 %v3680_v63, %v3676_v2  ;;  %v12331_v63 = vpop.permute.xlu1 %1219 }
 0x1d6   : > { %v2166_v32 = vadd.f32 %v2165_v26, %v14980_v9  ;;  %8718 = vmatmul.mubr.msk.f32.gmra.mrb[190].mxu1 %vm1462_vm0, %v661_v24  ;;  %2487 = vmatprep.mubr.f32.mxu0 %v14939_v31  ;;  %v2999_v40 = vadd.f32 %v2998_v13, %v14980_v9  ;;  %v2168_v24 = vadd.f32 %v2167_v0, %v14980_v9  ;;  %v3004_v26 = vpop.f32.mrb[86].mxu1  ;;  %v2173_v20 = vpop.f32.mrb[87].mxu0 }
 0x1d7   : > { %3320 = vmatprep.mubr.f32.mxu1 %v14939_v31  ;;  %v2172_v48 = vadd.f32 %v2171_v27, %v14981_v21  ;;  %v3001_v19 = vadd.f32 %v3000_v37, %v14980_v9  ;;  %v3005_v33 = vadd.f32 %v3004_v26, %v14981_v21  ;;  %v3006_v13 = vpop.f32.mrb[87].mxu1  ;;  %v2174_v27 = vadd.f32 %v2173_v20, %v14981_v21  ;;  %v7209_v37 = vld [vmem:[%s14827_s10 + $0x40] sm:$0xff]  ;;  %v663_v9 = vld [vmem:[%s14927_s1 + $0x308] sm:$0xff] }
 0x1d8   : > { %8591 = vmatmul.mubr.msk.f32.gmra.mrb[192].mxu0 %vm1462_vm0, %v662_v50  ;;  %v3681_v0 = vmax.f32 %v2166_v32, 0.0 }
 0x1d9   : > { %7270 = vperm.xlu1 %10268, %v7208_v4   ;;  %7265 = vperm.xlu0 %10267, %v7207_v30   ;;  %v3685_v2 = vmax.f32 %v2172_v48, 0.0  ;;  %v3007_v4 = vadd.f32 %v3006_v13, %v14981_v21  ;;  %v3683_v30 = vmax.f32 %v2999_v40, 0.0  ;;  %v3687_v26 = vmax.f32 %v3005_v33, 0.0  ;;  %v2177_v32 = vpop.f32.mrb[88].mxu0  ;;  %v12344_v48 = vpop.permute.xlu0 %1214  ;;  %v7212_v33 = vld [vmem:[%s14827_s10 + $0x58] sm:$0xff] }
 0x1da   : > { %8719 = vmatmul.mubr.msk.f32.gmra.mrb[192].mxu1 %vm1462_vm0, %v662_v50  ;;  %2493 = vmatprep.mubr.f32.mxu0 %v14939_v31  ;;  %v3010_v21 = vpop.f32.mrb[88].mxu1  ;;  %v3682_v50 = vmax.f32 %v2168_v24, 0.0  ;;  %v3686_v20 = vmax.f32 %v2174_v27, 0.0  ;;  %v2179_v28 = vpop.f32.mrb[89].mxu0  ;;  %v3684_v40 = vmax.f32 %v3001_v19, 0.0  ;;  %v2178_v10 = vadd.f32 %v2177_v32, %v14984_v36  ;;  %v7211_v24 = vld [vmem:[%s14827_s10 + $0x50] sm:$0xff] }
 0x1db   : > { %3326 = vmatprep.mubr.f32.mxu1 %v14939_v31  ;;  %v3688_v13 = vmax.f32 %v3007_v4, 0.0  ;;  %v12346_v61 = vpack.c.bf16 %v3685_v2, %v3681_v0  ;;  %v3012_v1 = vpop.f32.mrb[89].mxu1  ;;  %v12352_v22 = vpack.c.bf16 %v3687_v26, %v3683_v30  ;;  %v3011_v19 = vadd.f32 %v3010_v21, %v14984_v36  ;;  %v12369_v4 = vpop.permute.xlu1 %1229 }
 0x1dc   : > { %8592 = vmatmul.mubr.msk.f32.gmra.mrb[194].mxu0 %vm1462_vm0, %v663_v9  ;;  %v12363_v0 = vpack.c.bf16 %v3686_v20, %v3682_v50  ;;  %14986 = vst [vmem:[#allocation65_spill] sm:$0xff] %v12369_v4  ;;  %v3013_v32 = vadd.f32 %v3012_v1, %v14984_v36  ;;  %v665_v1 = vld [vmem:[%s14927_s1 + $0x318] sm:$0xff] }
 0x1dd   : > { %7280 = vperm.xlu1 %10268, %v7210_v59   ;;  %14982 = vst [vmem:[#allocation16_spill] sm:$0xff] %v12346_v61  ;;  %7275 = vperm.xlu0 %10267, %v7209_v37   ;;  %14983 = vst [vmem:[#allocation15_spill] sm:$0xff] %v12352_v22  ;;  %v664_v59 = vld [vmem:[%s14927_s1 + $0x310] sm:$0xff]  ;;  %v2183_v2 = vpop.f32.mrb[90].mxu0  ;;  %v12367_v27 = vpack.c.bf16 %v3688_v13, %v3684_v40  ;;  %v2180_v37 = vadd.f32 %v2179_v28, %v14984_v36  ;;  %v7214_v13 = vld [vmem:[%s14827_s10 + $0x68] sm:$0xff]  ;;  %v12379_v40 = vpop.permute.xlu0 %1224  ;;  %v3689_v28 = vmax.f32 %v2178_v10, 0.0 }
 0x1de   : > { %8720 = vmatmul.mubr.msk.f32.gmra.mrb[194].mxu1 %vm1462_vm0, %v663_v9  ;;  %2499 = vmatprep.mubr.f32.mxu0 %v14939_v31  ;;  %v14987_v9 = vld [vmem:[#allocation17_spill] sm:$0xff]  ;;  %v3016_v26 = vpop.f32.mrb[90].mxu1  ;;  %v2185_v20 = vpop.f32.mrb[91].mxu0  ;;  %v7213_v36 = vld [vmem:[%s14827_s10 + $0x60] sm:$0xff] }
 0x1df   : > { %3332 = vmatprep.mubr.f32.mxu1 %v14939_v31  ;;  %14985 = vst [vmem:[#allocation18_spill] sm:$0xff] %v12367_v27  ;;  %v2184_v30 = vadd.f32 %v2183_v2, %v14987_v9  ;;  %v3017_v50 = vadd.f32 %v3016_v26, %v14987_v9  ;;  %v3018_v21 = vpop.f32.mrb[91].mxu1  ;;  %14988 = vst [vmem:[#allocation17_spill] sm:$0xff] %v12379_v40  ;;  %v2186_v2 = vadd.f32 %v2185_v20, %v14987_v9  ;;  %v12400_v61 = vpop.permute.xlu1 %1239 }
 0x1e0   : > { %8593 = vmatmul.mubr.msk.f32.gmra.mrb[196].mxu0 %vm1462_vm0, %v664_v59  ;;  %14991 = vst [vmem:[#allocation68_spill] sm:$0xff] %v12400_v61 }
 0x1e1   : > { %7290 = vperm.xlu1 %10268, %v7212_v33   ;;  %7285 = vperm.xlu0 %10267, %v7211_v24   ;;  %v3693_v12 = vmax.f32 %v2184_v30, 0.0  ;;  %v3019_v33 = vadd.f32 %v3018_v21, %v14987_v9  ;;  %v3691_v24 = vmax.f32 %v3011_v19, 0.0  ;;  %v3695_v26 = vmax.f32 %v3017_v50, 0.0  ;;  %v2189_v10 = vpop.f32.mrb[92].mxu0  ;;  %v7216_v19 = vld [vmem:[%s14827_s10 + $0x78] sm:$0xff] }
 0x1e2   : > { %8721 = vmatmul.mubr.msk.f32.gmra.mrb[196].mxu1 %vm1462_vm0, %v664_v59  ;;  %2505 = vmatprep.mubr.f32.mxu0 %v14939_v31  ;;  %v3022_v30 = vpop.f32.mrb[92].mxu1  ;;  %v3690_v9 = vmax.f32 %v2180_v37, 0.0  ;;  %v3694_v20 = vmax.f32 %v2186_v2, 0.0  ;;  %v2191_v4 = vpop.f32.mrb[93].mxu0  ;;  %v3692_v50 = vmax.f32 %v3013_v32, 0.0 }
 0x1e3   : > { %3338 = vmatprep.mubr.f32.mxu1 %v14939_v31  ;;  %v3696_v59 = vmax.f32 %v3019_v33, 0.0  ;;  %v12392_v21 = vpack.c.bf16 %v3693_v12, %v3689_v28  ;;  %v3024_v22 = vpop.f32.mrb[93].mxu1  ;;  %v12398_v40 = vpack.c.bf16 %v3695_v26, %v3691_v24  ;;  %v7215_v12 = vld [vmem:[%s14827_s10 + $0x70] sm:$0xff]  ;;  %v666_v28 = vld [vmem:[%s14927_s1 + $0x320] sm:$0xff]  ;;  %v14996_v26 = vld [vmem:[#allocation19_spill] sm:$0xff] }
 0x1e4   : > { %8594 = vmatmul.mubr.msk.f32.gmra.mrb[198].mxu0 %vm1462_vm0, %v665_v1  ;;  %v12411_v2 = vpack.c.bf16 %v3694_v20, %v3690_v9 }
 0x1e5   : > { %7300 = vperm.xlu1 %10268, %v7214_v13   ;;  %14989 = vst [vmem:[#allocation66_spill] sm:$0xff] %v12392_v21  ;;  %7295 = vperm.xlu0 %10267, %v7213_v36   ;;  %14990 = vst [vmem:[#allocation67_spill] sm:$0xff] %v12398_v40  ;;  %v14992_v13 = vld [vmem:[#allocation20_spill] sm:$0xff]  ;;  %v2195_v33 = vpop.f32.mrb[94].mxu0  ;;  %v12415_v36 = vpack.c.bf16 %v3696_v59, %v3692_v50  ;;  %v7218_v59 = vld [vmem:[%s14827_s10 + $0x88] sm:$0xff] }
 0x1e6   : > { %v2190_v37 = vadd.f32 %v2189_v10, %v14992_v13  ;;  %8722 = vmatmul.mubr.msk.f32.gmra.mrb[198].mxu1 %vm1462_vm0, %v665_v1  ;;  %2511 = vmatprep.mubr.f32.mxu0 %v14939_v31  ;;  %14993 = vst [vmem:[#allocation20_spill] sm:$0xff] %v12411_v2  ;;  %v3023_v32 = vadd.f32 %v3022_v30, %v14992_v13  ;;  %v12417_v1 = vpop.permute.xlu0 %1234  ;;  %v3028_v61 = vpop.f32.mrb[94].mxu1 }
 0x1e7   : > { %3344 = vmatprep.mubr.f32.mxu1 %v14939_v31  ;;  %14994 = vst [vmem:[#allocation69_spill] sm:$0xff] %v12415_v36  ;;  %14995 = vst [vmem:[#allocation70_spill] sm:$0xff] %v12417_v1  ;;  %v2192_v24 = vadd.f32 %v2191_v4, %v14992_v13  ;;  %v2196_v10 = vadd.f32 %v2195_v33, %v14996_v26  ;;  %v3025_v40 = vadd.f32 %v3024_v22, %v14992_v13  ;;  %v2197_v20 = vpop.f32.mrb[95].mxu0  ;;  %v3030_v30 = vpop.f32.mrb[95].mxu1  ;;  %v7217_v22 = vld [vmem:[%s14827_s10 + $0x80] sm:$0xff] }
 0x1e8   : > { %v3029_v9 = vadd.f32 %v3028_v61, %v14996_v26  ;;  %8595 = vmatmul.mubr.msk.f32.gmra.mrb[200].mxu0 %vm1462_vm0, %v666_v28  ;;  %v3697_v50 = vmax.f32 %v2190_v37, 0.0  ;;  %v2198_v4 = vadd.f32 %v2197_v20, %v14996_v26  ;;  %v3031_v33 = vadd.f32 %v3030_v30, %v14996_v26  ;;  %v667_v61 = vld [vmem:[%s14927_s1 + $0x328] sm:$0xff] }
 0x1e9   : > { %7310 = vperm.xlu1 %10268, %v7216_v19   ;;  %7305 = vperm.xlu0 %10267, %v7215_v12   ;;  %v3701_v1 = vmax.f32 %v2196_v10, 0.0  ;;  %v3699_v19 = vmax.f32 %v3023_v32, 0.0  ;;  %v2201_v37 = vpop.f32.mrb[96].mxu0  ;;  %v12438_v12 = vpop.permute.xlu1 %1249  ;;  %v7220_v32 = vld [vmem:[%s14827_s10 + $0x98] sm:$0xff] }
 0x1ea   : > { %8723 = vmatmul.mubr.msk.f32.gmra.mrb[200].mxu1 %vm1462_vm0, %v666_v28  ;;  %2517 = vmatprep.mubr.f32.mxu0 %v14939_v31  ;;  %v3703_v13 = vmax.f32 %v3029_v9, 0.0  ;;  %14997 = vst [vmem:[#allocation19_spill] sm:$0xff] %v12438_v12  ;;  %v3034_v26 = vpop.f32.mrb[96].mxu1  ;;  %v3698_v28 = vmax.f32 %v2192_v24, 0.0  ;;  %v3702_v10 = vmax.f32 %v2198_v4, 0.0  ;;  %v3704_v20 = vmax.f32 %v3031_v33, 0.0  ;;  %v12448_v12 = vpop.permute.xlu0 %1244 }
 0x1eb   : > { %3350 = vmatprep.mubr.f32.mxu1 %v14939_v31  ;;  %v12440_v30 = vpack.c.bf16 %v3701_v1, %v3697_v50  ;;  %v2203_v21 = vpop.f32.mrb[97].mxu0  ;;  %v3036_v36 = vpop.f32.mrb[97].mxu1  ;;  %v3700_v9 = vmax.f32 %v3025_v40, 0.0  ;;  %15000 = vst [vmem:[#allocation73_spill] sm:$0xff] %v12448_v12  ;;  %v7219_v1 = vld [vmem:[%s14827_s10 + $0x90] sm:$0xff] }
 0x1ec   : > { %8596 = vmatmul.mubr.msk.f32.gmra.mrb[202].mxu0 %vm1462_vm0, %v667_v61  ;;  %v12446_v2 = vpack.c.bf16 %v3703_v13, %v3699_v19  ;;  %v668_v50 = vld [vmem:[%s14927_s1 + $0x330] sm:$0xff]  ;;  %v12459_v4 = vpack.c.bf16 %v3702_v10, %v3698_v28  ;;  %v15004_v19 = vld [vmem:[#allocation21_spill] sm:$0xff] }
 0x1ed   : > { %7320 = vperm.xlu1 %10268, %v7218_v59   ;;  %14998 = vst [vmem:[#allocation71_spill] sm:$0xff] %v12440_v30  ;;  %7315 = vperm.xlu0 %10267, %v7217_v22   ;;  %v15001_v59 = vld [vmem:[#allocation22_spill] sm:$0xff]  ;;  %v2207_v33 = vpop.f32.mrb[98].mxu0  ;;  %v12463_v22 = vpack.c.bf16 %v3704_v20, %v3700_v9  ;;  %v7222_v10 = vld [vmem:[%s14827_s10 + $0xa8] sm:$0xff]  ;;  %v12473_v20 = vpop.permute.xlu1 %1259 }
 0x1ee   : > { %14999 = vst [vmem:[#allocation72_spill] sm:$0xff] %v12446_v2  ;;  %v2202_v24 = vadd.f32 %v2201_v37, %v15001_v59  ;;  %8724 = vmatmul.mubr.msk.f32.gmra.mrb[202].mxu1 %vm1462_vm0, %v667_v61  ;;  %2523 = vmatprep.mubr.f32.mxu0 %v14939_v31  ;;  %15002 = vst [vmem:[#allocation22_spill] sm:$0xff] %v12459_v4  ;;  %v3035_v40 = vadd.f32 %v3034_v26, %v15001_v59  ;;  %v3040_v37 = vpop.f32.mrb[98].mxu1  ;;  %v2209_v28 = vpop.f32.mrb[99].mxu0 }
 0x1ef   : > { %3356 = vmatprep.mubr.f32.mxu1 %v14939_v31  ;;  %15003 = vst [vmem:[#allocation74_spill] sm:$0xff] %v12463_v22  ;;  %v2204_v61 = vadd.f32 %v2203_v21, %v15001_v59  ;;  %v2208_v13 = vadd.f32 %v2207_v33, %v15004_v19  ;;  %v3037_v12 = vadd.f32 %v3036_v36, %v15001_v59  ;;  %v3042_v26 = vpop.f32.mrb[99].mxu1  ;;  %15005 = vst [vmem:[#allocation21_spill] sm:$0xff] %v12473_v20  ;;  %v7221_v36 = vld [vmem:[%s14827_s10 + $0xa0] sm:$0xff]  ;;  %v669_v59 = vld [vmem:[%s14927_s1 + $0x338] sm:$0xff] }
 0x1f0   : > { %v3041_v2 = vadd.f32 %v3040_v37, %v15004_v19  ;;  %8597 = vmatmul.mubr.msk.f32.gmra.mrb[204].mxu0 %vm1462_vm0, %v668_v50  ;;  %v3705_v21 = vmax.f32 %v2202_v24, 0.0  ;;  %v2210_v33 = vadd.f32 %v2209_v28, %v15004_v19 }
 0x1f1   : > { %7330 = vperm.xlu1 %10268, %v7220_v32   ;;  %7325 = vperm.xlu0 %10267, %v7219_v1   ;;  %v3709_v9 = vmax.f32 %v2208_v13, 0.0  ;;  %v3043_v32 = vadd.f32 %v3042_v26, %v15004_v19  ;;  %v3707_v1 = vmax.f32 %v3035_v40, 0.0  ;;  %v2213_v24 = vpop.f32.mrb[100].mxu0  ;;  %v12486_v13 = vpop.permute.xlu0 %1254  ;;  %v3708_v40 = vmax.f32 %v3037_v12, 0.0 }
 0x1f2   : > { %8725 = vmatmul.mubr.msk.f32.gmra.mrb[204].mxu1 %vm1462_vm0, %v668_v50  ;;  %2529 = vmatprep.mubr.f32.mxu0 %v14939_v31  ;;  %v3711_v37 = vmax.f32 %v3041_v2, 0.0  ;;  %15006 = vst [vmem:[#allocation75_spill] sm:$0xff] %v12486_v13  ;;  %v3046_v19 = vpop.f32.mrb[100].mxu1  ;;  %v3706_v50 = vmax.f32 %v2204_v61, 0.0  ;;  %v3710_v28 = vmax.f32 %v2210_v33, 0.0  ;;  %v2215_v30 = vpop.f32.mrb[101].mxu0 }
 0x1f3   : > { %3362 = vmatprep.mubr.f32.mxu1 %v14939_v31  ;;  %v3712_v26 = vmax.f32 %v3043_v32, 0.0  ;;  %v12488_v20 = vpack.c.bf16 %v3709_v9, %v3705_v21  ;;  %v3048_v22 = vpop.f32.mrb[101].mxu1  ;;  %v7224_v2 = vld [vmem:[%s14827_s10 + $0xb8] sm:$0xff]  ;;  %v15009_v13 = vld [vmem:[#allocation24_spill] sm:$0xff]  ;;  %v7223_v61 = vld [vmem:[%s14827_s10 + $0xb0] sm:$0xff]  ;;  %v12511_v32 = vpop.permute.xlu1 %1269 }
 0x1f4   : > { %8598 = vmatmul.mubr.msk.f32.gmra.mrb[206].mxu0 %vm1462_vm0, %v669_v59  ;;  %v12494_v4 = vpack.c.bf16 %v3711_v37, %v3707_v1  ;;  %v2214_v27 = vadd.f32 %v2213_v24, %v15009_v13  ;;  %v12505_v21 = vpack.c.bf16 %v3710_v28, %v3706_v50  ;;  %v3047_v12 = vadd.f32 %v3046_v19, %v15009_v13 }
 0x1f5   : > { %7340 = vperm.xlu1 %10268, %v7222_v10   ;;  %15007 = vst [vmem:[#allocation76_spill] sm:$0xff] %v12488_v20  ;;  %7335 = vperm.xlu0 %10267, %v7221_v36   ;;  %v670_v10 = vld [vmem:[%s14927_s1 + $0x340] sm:$0xff]  ;;  %v2219_v9 = vpop.f32.mrb[102].mxu0  ;;  %v12509_v33 = vpack.c.bf16 %v3712_v26, %v3708_v40  ;;  %15011 = vst [vmem:[#allocation78_spill] sm:$0xff] %v12511_v32  ;;  %v2216_v36 = vadd.f32 %v2215_v30, %v15009_v13  ;;  %v7226_v26 = vld [vmem:[%s14827_s10 + $0xc8] sm:$0xff]  ;;  %v12521_v40 = vpop.permute.xlu0 %1264 }
 0x1f6   : > { %15008 = vst [vmem:[#allocation77_spill] sm:$0xff] %v12494_v4  ;;  %8726 = vmatmul.mubr.msk.f32.gmra.mrb[206].mxu1 %vm1462_vm0, %v669_v59  ;;  %2535 = vmatprep.mubr.f32.mxu0 %v14939_v31  ;;  %v15012_v59 = vld [vmem:[#allocation23_spill] sm:$0xff]  ;;  %v3052_v37 = vpop.f32.mrb[102].mxu1  ;;  %v3049_v24 = vadd.f32 %v3048_v22, %v15009_v13  ;;  %v2221_v28 = vpop.f32.mrb[103].mxu0  ;;  %v3713_v30 = vmax.f32 %v2214_v27, 0.0  ;;  %v7225_v22 = vld [vmem:[%s14827_s10 + $0xc0] sm:$0xff] }
 0x1f7   : > { %3368 = vmatprep.mubr.f32.mxu1 %v14939_v31  ;;  %15010 = vst [vmem:[#allocation24_spill] sm:$0xff] %v12509_v33  ;;  %v2220_v1 = vadd.f32 %v2219_v9, %v15012_v59  ;;  %v3053_v50 = vadd.f32 %v3052_v37, %v15012_v59  ;;  %v3054_v19 = vpop.f32.mrb[103].mxu1  ;;  %15013 = vst [vmem:[#allocation23_spill] sm:$0xff] %v12521_v40  ;;  %v2222_v9 = vadd.f32 %v2221_v28, %v15012_v59  ;;  %v671_v13 = vld [vmem:[%s14927_s1 + $0x348] sm:$0xff]  ;;  %v12542_v33 = vpop.permute.xlu1 %1279 }
 0x1f8   : > { %8599 = vmatmul.mubr.msk.f32.gmra.mrb[208].mxu0 %vm1462_vm0, %v670_v10  ;;  %15016 = vst [vmem:[#allocation81_spill] sm:$0xff] %v12542_v33 }
 0x1f9   : > { %7350 = vperm.xlu1 %10268, %v7224_v2   ;;  %7345 = vperm.xlu0 %10267, %v7223_v61   ;;  %v3717_v32 = vmax.f32 %v2220_v1, 0.0  ;;  %v3055_v2 = vadd.f32 %v3054_v19, %v15012_v59  ;;  %v3715_v61 = vmax.f32 %v3047_v12, 0.0  ;;  %v3719_v37 = vmax.f32 %v3053_v50, 0.0  ;;  %v2225_v27 = vpop.f32.mrb[104].mxu0  ;;  %v7228_v12 = vld [vmem:[%s14827_s10 + $0xd8] sm:$0xff] }
 0x1fa   : > { %8727 = vmatmul.mubr.msk.f32.gmra.mrb[208].mxu1 %vm1462_vm0, %v670_v10  ;;  %2541 = vmatprep.mubr.f32.mxu0 %v14939_v31  ;;  %v3058_v1 = vpop.f32.mrb[104].mxu1  ;;  %v3714_v59 = vmax.f32 %v2216_v36, 0.0  ;;  %v3718_v28 = vmax.f32 %v2222_v9, 0.0  ;;  %v2227_v40 = vpop.f32.mrb[105].mxu0  ;;  %v3716_v50 = vmax.f32 %v3049_v24, 0.0  ;;  %v2226_v36 = vadd.f32 %v2225_v27, %v11478_v54 }
 0x1fb   : > { %3374 = vmatprep.mubr.f32.mxu1 %v14939_v31  ;;  %v3720_v10 = vmax.f32 %v3055_v2, 0.0  ;;  %v12534_v19 = vpack.c.bf16 %v3717_v32, %v3713_v30  ;;  %v3060_v4 = vpop.f32.mrb[105].mxu1  ;;  %v12540_v20 = vpack.c.bf16 %v3719_v37, %v3715_v61  ;;  %v7227_v32 = vld [vmem:[%s14827_s10 + $0xd0] sm:$0xff]  ;;  %v3059_v24 = vadd.f32 %v3058_v1, %v11478_v54  ;;  %v15020_v61 = vld [vmem:[#allocation25_spill] sm:$0xff] }
 0x1fc   : > { %8600 = vmatmul.mubr.msk.f32.gmra.mrb[210].mxu0 %vm1462_vm0, %v671_v13  ;;  %v12553_v30 = vpack.c.bf16 %v3718_v28, %v3714_v59  ;;  %v3061_v33 = vadd.f32 %v3060_v4, %v11478_v54  ;;  %v673_v4 = vld [vmem:[%s14927_s1 + $0x358] sm:$0xff] }
 0x1fd   : > { %7360 = vperm.xlu1 %10268, %v7226_v26   ;;  %15014 = vst [vmem:[#allocation79_spill] sm:$0xff] %v12534_v19  ;;  %7355 = vperm.xlu0 %10267, %v7225_v22   ;;  %15015 = vst [vmem:[#allocation80_spill] sm:$0xff] %v12540_v20  ;;  %v672_v26 = vld [vmem:[%s14927_s1 + $0x350] sm:$0xff]  ;;  %v2231_v9 = vpop.f32.mrb[106].mxu0  ;;  %v12557_v2 = vpack.c.bf16 %v3720_v10, %v3716_v50  ;;  %v12559_v22 = vpop.permute.xlu0 %1274  ;;  %v7230_v10 = vld [vmem:[%s14827_s10 + $0xe8] sm:$0xff]  ;;  %v3721_v50 = vmax.f32 %v2226_v36, 0.0 }
 0x1fe   : > { %8728 = vmatmul.mubr.msk.f32.gmra.mrb[210].mxu1 %vm1462_vm0, %v671_v13  ;;  %2547 = vmatprep.mubr.f32.mxu0 %v14939_v31  ;;  %15017 = vst [vmem:[#allocation82_spill] sm:$0xff] %v12553_v30  ;;  %15019 = vst [vmem:[#allocation84_spill] sm:$0xff] %v12559_v22  ;;  %v2228_v13 = vadd.f32 %v2227_v40, %v11478_v54  ;;  %v2232_v37 = vadd.f32 %v2231_v9, %v15020_v61  ;;  %v3064_v27 = vpop.f32.mrb[106].mxu1  ;;  %v2233_v28 = vpop.f32.mrb[107].mxu0  ;;  %v7229_v54 = vld [vmem:[%s14827_s10 + $0xe0] sm:$0xff] }
 0x1ff   : > { %3380 = vmatprep.mubr.f32.mxu1 %v14939_v31  ;;  %15018 = vst [vmem:[#allocation83_spill] sm:$0xff] %v12557_v2  ;;  %v3065_v59 = vadd.f32 %v3064_v27, %v15020_v61  ;;  %v3066_v1 = vpop.f32.mrb[107].mxu1  ;;  %v2234_v40 = vadd.f32 %v2233_v28, %v15020_v61 }
 0x200   : > { %8601 = vmatmul.mubr.msk.f32.gmra.mrb[212].mxu0 %vm1462_vm0, %v672_v26  ;;  %v3725_v22 = vmax.f32 %v2232_v37, 0.0  ;;  %v3067_v9 = vadd.f32 %v3066_v1, %v15020_v61  ;;  %v12580_v37 = vpop.permute.xlu1 %1289 }
 0x201   : > { %7370 = vperm.xlu1 %10268, %v7228_v12   ;;  %7365 = vperm.xlu0 %10267, %v7227_v32   ;;  %v3723_v12 = vmax.f32 %v3059_v24, 0.0  ;;  %v3727_v32 = vmax.f32 %v3065_v59, 0.0  ;;  %v2237_v36 = vpop.f32.mrb[108].mxu0  ;;  %15021 = vst [vmem:[#allocation25_spill] sm:$0xff] %v12580_v37  ;;  %v3726_v27 = vmax.f32 %v2234_v40, 0.0  ;;  %v7232_v24 = vld [vmem:[%s14827_s10 + $0xf8] sm:$0xff]  ;;  %v12590_v37 = vpop.permute.xlu0 %1284 }
 0x202   : > { %8729 = vmatmul.mubr.msk.f32.gmra.mrb[212].mxu1 %vm1462_vm0, %v672_v26  ;;  %2553 = vmatprep.mubr.f32.mxu0 %v14939_v31  ;;  %v3070_v61 = vpop.f32.mrb[108].mxu1  ;;  %v3722_v26 = vmax.f32 %v2228_v13, 0.0  ;;  %v3728_v28 = vmax.f32 %v3067_v9, 0.0  ;;  %v12582_v1 = vpack.c.bf16 %v3725_v22, %v3721_v50  ;;  %v2239_v20 = vpop.f32.mrb[109].mxu0  ;;  %v3724_v59 = vmax.f32 %v3061_v33, 0.0  ;;  %15024 = vst [vmem:[#allocation87_spill] sm:$0xff] %v12590_v37 }
 0x203   : > { %3386 = vmatprep.mubr.f32.mxu1 %v14939_v31  ;;  %v3072_v19 = vpop.f32.mrb[109].mxu1  ;;  %v12588_v2 = vpack.c.bf16 %v3727_v32, %v3723_v12  ;;  %v7231_v22 = vld [vmem:[%s14827_s10 + $0xf0] sm:$0xff]  ;;  %v674_v50 = vld [vmem:[%s14927_s1 + $0x360] sm:$0xff] }
 0x204   : > { %15022 = vst [vmem:[#allocation85_spill] sm:$0xff] %v12582_v1  ;;  %8602 = vmatmul.mubr.msk.f32.gmra.mrb[214].mxu0 %vm1462_vm0, %v673_v4  ;;  %v12601_v40 = vpack.c.bf16 %v3726_v27, %v3722_v26  ;;  %v15028_v12 = vld [vmem:[#allocation26_spill] sm:$0xff]  ;;  %v8036_v27 = vld [vmem:[%s14829_s12] sm:$0x3] }
 0x205   : > { %7380 = vperm.xlu1 %10268, %v7230_v10   ;;  %7375 = vperm.xlu0 %10267, %v7229_v54   ;;  %15023 = vst [vmem:[#allocation86_spill] sm:$0xff] %v12588_v2  ;;  %v15025_v10 = vld [vmem:[#allocation27_spill] sm:$0xff]  ;;  %v12605_v54 = vpack.c.bf16 %v3728_v28, %v3724_v59 }
 0x206   : > { %v2238_v13 = vadd.f32 %v2237_v36, %v15025_v10  ;;  %8730 = vmatmul.mubr.msk.f32.gmra.mrb[214].mxu1 %vm1462_vm0, %v673_v4  ;;  %2559 = vmatprep.mubr.f32.mxu0 %v14939_v31  ;;  %15026 = vst [vmem:[#allocation27_spill] sm:$0xff] %v12601_v40  ;;  %v3071_v33 = vadd.f32 %v3070_v61, %v15025_v10  ;;  %v2243_v9 = vpop.f32.mrb[110].mxu0  ;;  %v3076_v36 = vpop.f32.mrb[110].mxu1 }
 0x207   : > { %3392 = vmatprep.mubr.f32.mxu1 %v14939_v31  ;;  %15027 = vst [vmem:[#allocation88_spill] sm:$0xff] %v12605_v54  ;;  %v2240_v4 = vadd.f32 %v2239_v20, %v15025_v10  ;;  %v2244_v32 = vadd.f32 %v2243_v9, %v15028_v12  ;;  %v3073_v37 = vadd.f32 %v3072_v19, %v15025_v10  ;;  %v2245_v26 = vpop.f32.mrb[111].mxu0  ;;  %v3078_v61 = vpop.f32.mrb[111].mxu1  ;;  %v5502_v19 = vld [vmem:[%s14823_s6] sm:$0x3] }
 0x208   : > { %v3077_v2 = vadd.f32 %v3076_v36, %v15028_v12  ;;  %8603 = vmatmul.mubr.msk.f32.gmra.mrb[216].mxu0 %vm1462_vm0, %v674_v50  ;;  %v3729_v28 = vmax.f32 %v2238_v13, 0.0  ;;  %v2246_v20 = vadd.f32 %v2245_v26, %v15028_v12  ;;  %v3079_v9 = vadd.f32 %v3078_v61, %v15028_v12  ;;  %v12625_v10 = vpop.permute.xlu1 %1299 }
 0x209   : > { %7390 = vperm.xlu1 %10268, %v7232_v24   ;;  %7385 = vperm.xlu0 %10267, %v7231_v22   ;;  %v3733_v59 = vmax.f32 %v2244_v32, 0.0  ;;  %v675_v24 = vld [vmem:[%s14927_s1 + $0x368] sm:$0xff]  ;;  %15029 = vst [vmem:[#allocation26_spill] sm:$0xff] %v12625_v10  ;;  %v3731_v13 = vmax.f32 %v3071_v33, 0.0  ;;  %v12628_v32 = vpop.permute.xlu0 %1294  ;;  %v3732_v40 = vmax.f32 %v3073_v37, 0.0  ;;  %v676_v33 = vld [vmem:[%s14927_s1 + $0x370] sm:$0xff] }
 0x20a   : > { %8731 = vmatmul.mubr.msk.f32.gmra.mrb[216].mxu1 %vm1462_vm0, %v674_v50  ;;  %2565 = vmatprep.mubr.f32.mxu0 %v14939_v31  ;;  %v3735_v22 = vmax.f32 %v3077_v2, 0.0  ;;  %15030 = vst [vmem:[#allocation89_spill] sm:$0xff] %v12628_v32  ;;  %v3730_v50 = vmax.f32 %v2240_v4, 0.0  ;;  %v3734_v36 = vmax.f32 %v2246_v20, 0.0  ;;  %v3736_v26 = vmax.f32 %v3079_v9, 0.0 }
 0x20b   : > { %3398 = vmatprep.mubr.f32.mxu1 %v14939_v31  ;;  %v2249_v12 = vpop.f32.mrb[112].mxu0  ;;  %v12630_v61 = vpack.c.bf16 %v3733_v59, %v3729_v28  ;;  %v3082_v1 = vpop.f32.mrb[112].mxu1 }
 0x20c   : > { %v2251_v54 = vpop.f32.mrb[113].mxu0  ;;  %8604 = vmatmul.mubr.msk.f32.gmra.mrb[218].mxu0 %vm1462_vm0, %v675_v24  ;;  %v12633_v10 = vpack.c.bf16 %v3735_v22, %v3731_v13  ;;  %v3084_v2 = vpop.f32.mrb[113].mxu1  ;;  %v12640_v4 = vpack.c.bf16 %v3734_v36, %v3730_v50  ;;  %v12644_v59 = vpack.c.bf16 %v3736_v26, %v3732_v40 }
 0x20d   : > { %8039 = vperm.xlu1 %10268, %v8036_v27   ;;  %15031 = vst [vmem:[#allocation90_spill] sm:$0xff] %v12630_v61  ;;  %5505 = vperm.xlu0 %10267, %v5502_v19   ;;  %v15034_v27 = vld [vmem:[#allocation29_spill] sm:$0xff] }
 0x20e   : > { %15032 = vst [vmem:[#allocation91_spill] sm:$0xff] %v12633_v10  ;;  %8732 = vmatmul.mubr.msk.f32.gmra.mrb[218].mxu1 %vm1462_vm0, %v675_v24  ;;  %2571 = vmatprep.mubr.f32.mxu0 %v14939_v31  ;;  %15033 = vst [vmem:[#allocation92_spill] sm:$0xff] %v12640_v4  ;;  %v2250_v28 = vadd.f32 %v2249_v12, %v15034_v27  ;;  %v2252_v37 = vadd.f32 %v2251_v54, %v15034_v27  ;;  %v15036_v24 = vld [vmem:[#allocation28_spill] sm:$0xff] }
 0x20f   : > { %3404 = vmatprep.mubr.f32.mxu1 %v14939_v31  ;;  %15035 = vst [vmem:[#allocation29_spill] sm:$0xff] %v12644_v59  ;;  %v2255_v20 = vpop.f32.mrb[114].mxu0  ;;  %v3083_v9 = vadd.f32 %v3082_v1, %v15034_v27  ;;  %v3085_v19 = vadd.f32 %v3084_v2, %v15034_v27  ;;  %v3088_v22 = vpop.f32.mrb[114].mxu1  ;;  %v677_v1 = vld [vmem:[%s14927_s1 + $0x378] sm:$0xff] }
 0x210   : > { %v2256_v13 = vadd.f32 %v2255_v20, %v15036_v24  ;;  %v2257_v32 = vpop.f32.mrb[115].mxu0  ;;  %8605 = vmatmul.mubr.msk.f32.gmra.mrb[220].mxu0 %vm1462_vm0, %v676_v33  ;;  %v3089_v50 = vadd.f32 %v3088_v22, %v15036_v24  ;;  %v3090_v36 = vpop.f32.mrb[115].mxu1  ;;  %v3737_v40 = vmax.f32 %v2250_v28, 0.0  ;;  %v3738_v20 = vmax.f32 %v2252_v37, 0.0  ;;  %v678_v28 = vld [vmem:[%s14927_s1 + $0x380] sm:$0xff] }
 0x211   : > { %v2258_v12 = vadd.f32 %v2257_v32, %v15036_v24  ;;  %2577 = vmatprep.mubr.f32.mxu0 %v14939_v31  ;;  %v3091_v26 = vadd.f32 %v3090_v36, %v15036_v24  ;;  %v3739_v32 = vmax.f32 %v3083_v9, 0.0  ;;  %v15039_v9 = vld [vmem:[#allocation31_spill] sm:$0xff] }
 0x212   : > { %8733 = vmatmul.mubr.msk.f32.gmra.mrb[220].mxu1 %vm1462_vm0, %v676_v33  ;;  %v3741_v54 = vmax.f32 %v2256_v13, 0.0  ;;  %v3743_v2 = vmax.f32 %v3089_v50, 0.0  ;;  %v3740_v33 = vmax.f32 %v3085_v19, 0.0 }
 0x213   : > { %3410 = vmatprep.mubr.f32.mxu1 %v14939_v31  ;;  %v2261_v27 = vpop.f32.mrb[116].mxu0  ;;  %v3742_v22 = vmax.f32 %v2258_v12, 0.0  ;;  %v3744_v59 = vmax.f32 %v3091_v26, 0.0 }
 0x214   : > { %v2263_v61 = vpop.f32.mrb[117].mxu0  ;;  %8606 = vmatmul.mubr.msk.f32.gmra.mrb[222].mxu0 %vm1462_vm0, %v677_v1  ;;  %v12661_v4 = vpack.c.bf16 %v3741_v54, %v3737_v40  ;;  %v2262_v24 = vadd.f32 %v2261_v27, %v15039_v9  ;;  %v12674_v19 = vpack.c.bf16 %v3743_v2, %v3739_v32  ;;  %v15042_v40 = vld [vmem:[#allocation30_spill] sm:$0xff] }
 0x215   : > { %v3094_v10 = vpop.f32.mrb[116].mxu1  ;;  %2583 = vmatprep.mubr.f32.mxu0 %v14939_v31  ;;  %v12668_v37 = vpack.c.bf16 %v3742_v22, %v3738_v20  ;;  %v12672_v13 = vpack.c.bf16 %v3744_v59, %v3740_v33  ;;  %v2264_v50 = vadd.f32 %v2263_v61, %v15039_v9 }
 0x216   : > { %15037 = vst [vmem:[#allocation28_spill] sm:$0xff] %v12661_v4  ;;  %v3096_v30 = vpop.f32.mrb[117].mxu1  ;;  %8734 = vmatmul.mubr.msk.f32.gmra.mrb[222].mxu1 %vm1462_vm0, %v677_v1  ;;  %15041 = vst [vmem:[#allocation94_spill] sm:$0xff] %v12674_v19  ;;  %v3095_v36 = vadd.f32 %v3094_v10, %v15039_v9  ;;  %v679_v10 = vld [vmem:[%s14927_s1 + $0x388] sm:$0xff] }
 0x217   : > { %15038 = vst [vmem:[#allocation93_spill] sm:$0xff] %v12668_v37  ;;  %3416 = vmatprep.mubr.f32.mxu1 %v14939_v31  ;;  %15040 = vst [vmem:[#allocation31_spill] sm:$0xff] %v12672_v13  ;;  %v2267_v12 = vpop.f32.mrb[118].mxu0  ;;  %v3097_v1 = vadd.f32 %v3096_v30, %v15039_v9  ;;  %v3745_v30 = vmax.f32 %v2262_v24, 0.0  ;;  %v3746_v9 = vmax.f32 %v2264_v50, 0.0  ;;  %v680_v24 = vld [vmem:[%s14927_s1 + $0x390] sm:$0xff] }
 0x218   : > { %v2268_v54 = vadd.f32 %v2267_v12, %v15042_v40  ;;  %v2269_v20 = vpop.f32.mrb[119].mxu0  ;;  %8607 = vmatmul.mubr.msk.f32.gmra.mrb[224].mxu0 %vm1462_vm0, %v678_v28 }
 0x219   : > { %v3100_v26 = vpop.f32.mrb[118].mxu1  ;;  %v2270_v59 = vadd.f32 %v2269_v20, %v15042_v40  ;;  %2589 = vmatprep.mubr.f32.mxu0 %v14939_v31 }
 0x21a   : > { %v3101_v27 = vadd.f32 %v3100_v26, %v15042_v40  ;;  %v3102_v22 = vpop.f32.mrb[119].mxu1  ;;  %8735 = vmatmul.mubr.msk.f32.gmra.mrb[224].mxu1 %vm1462_vm0, %v678_v28  ;;  %v3749_v61 = vmax.f32 %v2268_v54, 0.0  ;;  %v3747_v26 = vmax.f32 %v3095_v36, 0.0  ;;  %v3748_v28 = vmax.f32 %v3097_v1, 0.0 }
 0x21b   : > { %v3103_v2 = vadd.f32 %v3102_v22, %v15042_v40  ;;  %3422 = vmatprep.mubr.f32.mxu1 %v14939_v31  ;;  %v2273_v33 = vpop.f32.mrb[120].mxu0  ;;  %v3750_v12 = vmax.f32 %v2270_v59, 0.0 }
 0x21c   : > { %v3751_v32 = vmax.f32 %v3101_v27, 0.0  ;;  %v2275_v19 = vpop.f32.mrb[121].mxu0  ;;  %8608 = vmatmul.mubr.msk.f32.gmra.mrb[226].mxu0 %vm1462_vm0, %v679_v10  ;;  %v12691_v13 = vpack.c.bf16 %v3749_v61, %v3745_v30  ;;  %v2274_v36 = vadd.f32 %v2273_v33, %v11557_v23 }
 0x21d   : > { %v3106_v20 = vpop.f32.mrb[120].mxu1  ;;  %v3752_v4 = vmax.f32 %v3103_v2, 0.0  ;;  %2595 = vmatprep.mubr.f32.mxu0 %v14939_v31  ;;  %v12698_v50 = vpack.c.bf16 %v3750_v12, %v3746_v9  ;;  %v2276_v54 = vadd.f32 %v2275_v19, %v11557_v23  ;;  %v681_v19 = vld [vmem:[%s14927_s1 + $0x398] sm:$0xff] }
 0x21e   : > { %15043 = vst [vmem:[#allocation30_spill] sm:$0xff] %v12691_v13  ;;  %v3108_v37 = vpop.f32.mrb[121].mxu1  ;;  %8736 = vmatmul.mubr.msk.f32.gmra.mrb[226].mxu1 %vm1462_vm0, %v679_v10  ;;  %v12704_v1 = vpack.c.bf16 %v3751_v32, %v3747_v26  ;;  %v3107_v59 = vadd.f32 %v3106_v20, %v11557_v23  ;;  %v15046_v10 = vld [vmem:[#allocation32_spill] sm:$0xff] }
 0x21f   : > { %3428 = vmatprep.mubr.f32.mxu1 %v14939_v31  ;;  %v12702_v40 = vpack.c.bf16 %v3752_v4, %v3748_v28  ;;  %v2279_v27 = vpop.f32.mrb[122].mxu0  ;;  %v3109_v22 = vadd.f32 %v3108_v37, %v11557_v23  ;;  %v3753_v23 = vmax.f32 %v2274_v36, 0.0  ;;  %v3754_v20 = vmax.f32 %v2276_v54, 0.0  ;;  %v682_v36 = vld [vmem:[%s14927_s1 + $0x3a0] sm:$0xff] }
 0x220   : > { %15045 = vst [vmem:[#allocation96_spill] sm:$0xff] %v12704_v1  ;;  %v2280_v30 = vadd.f32 %v2279_v27, %v15046_v10  ;;  %v2281_v2 = vpop.f32.mrb[123].mxu0  ;;  %8609 = vmatmul.mubr.msk.f32.gmra.mrb[228].mxu0 %vm1462_vm0, %v680_v24  ;;  %v3755_v27 = vmax.f32 %v3107_v59, 0.0 }
 0x221   : > { %15044 = vst [vmem:[#allocation95_spill] sm:$0xff] %v12702_v40  ;;  %v3112_v61 = vpop.f32.mrb[122].mxu1  ;;  %v2282_v4 = vadd.f32 %v2281_v2, %v15046_v10  ;;  %2601 = vmatprep.mubr.f32.mxu0 %v14939_v31 }
 0x222   : > { %v3113_v33 = vadd.f32 %v3112_v61, %v15046_v10  ;;  %v3114_v9 = vpop.f32.mrb[123].mxu1  ;;  %8737 = vmatmul.mubr.msk.f32.gmra.mrb[228].mxu1 %vm1462_vm0, %v680_v24  ;;  %v3757_v37 = vmax.f32 %v2280_v30, 0.0  ;;  %v3756_v24 = vmax.f32 %v3109_v22, 0.0 }
 0x223   : > { %v3115_v32 = vadd.f32 %v3114_v9, %v15046_v10  ;;  %3434 = vmatprep.mubr.f32.mxu1 %v14939_v31  ;;  %v2285_v26 = vpop.f32.mrb[124].mxu0  ;;  %v3758_v28 = vmax.f32 %v2282_v4, 0.0 }
 0x224   : > { %v3759_v12 = vmax.f32 %v3113_v33, 0.0  ;;  %v2287_v2 = vpop.f32.mrb[125].mxu0  ;;  %8610 = vmatmul.mubr.msk.f32.gmra.mrb[230].mxu0 %vm1462_vm0, %v681_v19  ;;  %v12721_v13 = vpack.c.bf16 %v3757_v37, %v3753_v23  ;;  %v2286_v59 = vadd.f32 %v2285_v26, %v11572_v7 }
 0x225   : > { %v3118_v61 = vpop.f32.mrb[124].mxu1  ;;  %v3760_v1 = vmax.f32 %v3115_v32, 0.0  ;;  %2607 = vmatprep.mubr.f32.mxu0 %v14939_v31  ;;  %v12728_v54 = vpack.c.bf16 %v3758_v28, %v3754_v20  ;;  %v2288_v30 = vadd.f32 %v2287_v2, %v11572_v7 }
 0x226   : > { %15047 = vst [vmem:[#allocation32_spill] sm:$0xff] %v12721_v13  ;;  %v3120_v40 = vpop.f32.mrb[125].mxu1  ;;  %8738 = vmatmul.mubr.msk.f32.gmra.mrb[230].mxu1 %vm1462_vm0, %v681_v19  ;;  %v12734_v22 = vpack.c.bf16 %v3759_v12, %v3755_v27  ;;  %v3119_v4 = vadd.f32 %v3118_v61, %v11572_v7  ;;  %v683_v12 = vld [vmem:[%s14927_s1 + $0x3a8] sm:$0xff] }
 0x227   : > { %3440 = vmatprep.mubr.f32.mxu1 %v14939_v31  ;;  %v12732_v10 = vpack.c.bf16 %v3760_v1, %v3756_v24  ;;  %v2291_v33 = vpop.f32.mrb[126].mxu0  ;;  %v3121_v9 = vadd.f32 %v3120_v40, %v11572_v7  ;;  %v3761_v7 = vmax.f32 %v2286_v59, 0.0  ;;  %v3762_v61 = vmax.f32 %v2288_v30, 0.0 }
 0x228   : > { %15048 = vst [vmem:[#allocation97_spill] sm:$0xff] %v12734_v22  ;;  %v2292_v19 = vadd.f32 %v2291_v33, %v11570_v16  ;;  %v2293_v37 = vpop.f32.mrb[127].mxu0  ;;  %8611 = vmatmul.mubr.msk.f32.gmra.mrb[232].mxu0 %vm1462_vm0, %v682_v36  ;;  %v3763_v24 = vmax.f32 %v3119_v4, 0.0 }
 0x229   : > { %v3124_v23 = vpop.f32.mrb[126].mxu1  ;;  %v2294_v1 = vadd.f32 %v2293_v37, %v11570_v16  ;;  %2613 = vmatprep.mubr.f32.mxu0 %v14939_v31 }
 0x22a   : > { %v3125_v32 = vadd.f32 %v3124_v23, %v11570_v16  ;;  %v3126_v26 = vpop.f32.mrb[127].mxu1  ;;  %8739 = vmatmul.mubr.msk.f32.gmra.mrb[232].mxu1 %vm1462_vm0, %v682_v36  ;;  %v3765_v40 = vmax.f32 %v2292_v19, 0.0  ;;  %v3764_v36 = vmax.f32 %v3121_v9, 0.0 }
 0x22b   : > { %v3127_v20 = vadd.f32 %v3126_v26, %v11570_v16  ;;  %3446 = vmatprep.mubr.f32.mxu1 %v14939_v31  ;;  %v2297_v27 = vpop.f32.mrb[128].mxu0  ;;  %v3766_v2 = vmax.f32 %v2294_v1, 0.0  ;;  %v684_v16 = vld [vmem:[%s14927_s1 + $0x3b0] sm:$0xff] }
 0x22c   : > { %v3767_v28 = vmax.f32 %v3125_v32, 0.0  ;;  %v2299_v23 = vpop.f32.mrb[129].mxu0  ;;  %8612 = vmatmul.mubr.msk.f32.gmra.mrb[234].mxu0 %vm1462_vm0, %v683_v12  ;;  %v12751_v22 = vpack.c.bf16 %v3765_v40, %v3761_v7  ;;  %v2298_v30 = vadd.f32 %v2297_v27, %v12080_v58 }
 0x22d   : > { %v3130_v33 = vpop.f32.mrb[128].mxu1  ;;  %v3768_v37 = vmax.f32 %v3127_v20, 0.0  ;;  %2619 = vmatprep.mubr.f32.mxu0 %v14939_v31  ;;  %v12758_v59 = vpack.c.bf16 %v3766_v2, %v3762_v61  ;;  %v2300_v1 = vadd.f32 %v2299_v23, %v12080_v58 }
 0x22e   : > { %15049 = vst [vmem:[#allocation98_spill] sm:$0xff] %v12751_v22  ;;  %v3132_v13 = vpop.f32.mrb[129].mxu1  ;;  %8740 = vmatmul.mubr.msk.f32.gmra.mrb[234].mxu1 %vm1462_vm0, %v683_v12  ;;  %v12764_v9 = vpack.c.bf16 %v3767_v28, %v3763_v24  ;;  %v3131_v19 = vadd.f32 %v3130_v33, %v12080_v58  ;;  %v685_v28 = vld [vmem:[%s14927_s1 + $0x3b8] sm:$0xff] }
 0x22f   : > { %3452 = vmatprep.mubr.f32.mxu1 %v14939_v31  ;;  %v12762_v4 = vpack.c.bf16 %v3768_v37, %v3764_v36  ;;  %v2303_v32 = vpop.f32.mrb[130].mxu0  ;;  %v3133_v26 = vadd.f32 %v3132_v13, %v12080_v58  ;;  %v3769_v58 = vmax.f32 %v2298_v30, 0.0 }
 0x230   : > { %15050 = vst [vmem:[#allocation99_spill] sm:$0xff] %v12764_v9  ;;  %v2304_v12 = vadd.f32 %v2303_v32, %v12078_v46  ;;  %v2305_v40 = vpop.f32.mrb[131].mxu0  ;;  %8613 = vmatmul.mubr.msk.f32.gmra.mrb[236].mxu0 %vm1462_vm0, %v684_v16  ;;  %v3771_v24 = vmax.f32 %v3131_v19, 0.0 }
 0x231   : > { %v3136_v7 = vpop.f32.mrb[130].mxu1  ;;  %v2306_v27 = vadd.f32 %v2305_v40, %v12078_v46  ;;  %2625 = vmatprep.mubr.f32.mxu0 %v14939_v31  ;;  %v3770_v40 = vmax.f32 %v2300_v1, 0.0  ;;  %v3772_v9 = vmax.f32 %v3133_v26, 0.0 }
 0x232   : > { %v3137_v20 = vadd.f32 %v3136_v7, %v12078_v46  ;;  %v3138_v61 = vpop.f32.mrb[131].mxu1  ;;  %8741 = vmatmul.mubr.msk.f32.gmra.mrb[236].mxu1 %vm1462_vm0, %v684_v16  ;;  %v3773_v13 = vmax.f32 %v2304_v12, 0.0 }
 0x233   : > { %v3139_v2 = vadd.f32 %v3138_v61, %v12078_v46  ;;  %3458 = vmatprep.mubr.f32.mxu1 %v14939_v31  ;;  %v3774_v23 = vmax.f32 %v2306_v27, 0.0  ;;  %v2309_v36 = vpop.f32.mrb[132].mxu0  ;;  %v686_v46 = vld [vmem:[%s14927_s1 + $0x3c0] sm:$0xff] }
 0x234   : > { %v3775_v33 = vmax.f32 %v3137_v20, 0.0  ;;  %v12780_v37 = vpack.c.bf16 %v3773_v13, %v3769_v58  ;;  %v2311_v7 = vpop.f32.mrb[133].mxu0  ;;  %8614 = vmatmul.mubr.msk.f32.gmra.mrb[238].mxu0 %vm1462_vm0, %v685_v28  ;;  %v2310_v19 = vadd.f32 %v2309_v36, %v12116_v38 }
 0x235   : > { %v3776_v32 = vmax.f32 %v3139_v2, 0.0  ;;  %v3142_v16 = vpop.f32.mrb[132].mxu1  ;;  %2631 = vmatprep.mubr.f32.mxu0 %v14939_v31  ;;  %v12792_v12 = vpack.c.bf16 %v3774_v23, %v3770_v40  ;;  %v2312_v27 = vadd.f32 %v2311_v7, %v12116_v38 }
 0x236   : > { %15051 = vst [vmem:[#allocation100_spill] sm:$0xff] %v12780_v37  ;;  %v12783_v22 = vpack.c.bf16 %v3775_v33, %v3771_v24  ;;  %v3144_v30 = vpop.f32.mrb[133].mxu1  ;;  %8742 = vmatmul.mubr.msk.f32.gmra.mrb[238].mxu1 %vm1462_vm0, %v685_v28  ;;  %v3143_v1 = vadd.f32 %v3142_v16, %v12116_v38 }
 0x237   : > { %3464 = vmatprep.mubr.f32.mxu1 %v14939_v31  ;;  %v12794_v20 = vpack.c.bf16 %v3776_v32, %v3772_v9  ;;  %v2315_v26 = vpop.f32.mrb[134].mxu0  ;;  %v3145_v61 = vadd.f32 %v3144_v30, %v12116_v38  ;;  %v687_v9 = vld [vmem:[%s14927_s1 + $0x3c8] sm:$0xff]  ;;  %v3777_v38 = vmax.f32 %v2310_v19, 0.0  ;;  %v3778_v30 = vmax.f32 %v2312_v27, 0.0 }
 0x238   : > { %15052 = vst [vmem:[#allocation101_spill] sm:$0xff] %v12783_v22  ;;  %v2316_v28 = vadd.f32 %v2315_v26, %v12114_v49  ;;  %v2317_v13 = vpop.f32.mrb[135].mxu0  ;;  %8615 = vmatmul.mubr.msk.f32.gmra.mrb[240].mxu0 %vm1462_vm0, %v686_v46  ;;  %v3779_v32 = vmax.f32 %v3143_v1, 0.0 }
 0x239   : > { %v3148_v58 = vpop.f32.mrb[134].mxu1  ;;  %v2318_v24 = vadd.f32 %v2317_v13, %v12114_v49  ;;  %2637 = vmatprep.mubr.f32.mxu0 %v14939_v31  ;;  %v3780_v26 = vmax.f32 %v3145_v61, 0.0 }
 0x23a   : > { %v3149_v2 = vadd.f32 %v3148_v58, %v12114_v49  ;;  %v3150_v33 = vpop.f32.mrb[135].mxu1  ;;  %8743 = vmatmul.mubr.msk.f32.gmra.mrb[240].mxu1 %vm1462_vm0, %v686_v46  ;;  %v3781_v23 = vmax.f32 %v2316_v28, 0.0 }
 0x23b   : > { %v3151_v36 = vadd.f32 %v3150_v33, %v12114_v49  ;;  %3470 = vmatprep.mubr.f32.mxu1 %v14939_v31  ;;  %v3782_v7 = vmax.f32 %v2318_v24, 0.0  ;;  %v2321_v40 = vpop.f32.mrb[136].mxu0  ;;  %v688_v49 = vld [vmem:[%s14927_s1 + $0x3d0] sm:$0xff] }
 0x23c   : > { %v3783_v16 = vmax.f32 %v3149_v2, 0.0  ;;  %v12810_v58 = vpack.c.bf16 %v3781_v23, %v3777_v38  ;;  %v2323_v22 = vpop.f32.mrb[137].mxu0  ;;  %8616 = vmatmul.mubr.msk.f32.gmra.mrb[242].mxu0 %vm1462_vm0, %v687_v9  ;;  %v2322_v1 = vadd.f32 %v2321_v40, %v12155_v15 }
 0x23d   : > { %v3784_v46 = vmax.f32 %v3151_v36, 0.0  ;;  %v3154_v13 = vpop.f32.mrb[136].mxu1  ;;  %2643 = vmatprep.mubr.f32.mxu0 %v14939_v31  ;;  %v12822_v27 = vpack.c.bf16 %v3782_v7, %v3778_v30  ;;  %v2324_v24 = vadd.f32 %v2323_v22, %v12155_v15  ;;  %v689_v22 = vld [vmem:[%s14927_s1 + $0x3d8] sm:$0xff] }
 0x23e   : > { %15053 = vst [vmem:[#allocation102_spill] sm:$0xff] %v12810_v58  ;;  %v12813_v37 = vpack.c.bf16 %v3783_v16, %v3779_v32  ;;  %v3156_v19 = vpop.f32.mrb[137].mxu1  ;;  %8744 = vmatmul.mubr.msk.f32.gmra.mrb[242].mxu1 %vm1462_vm0, %v687_v9  ;;  %v3155_v28 = vadd.f32 %v3154_v13, %v12155_v15 }
 0x23f   : > { %3476 = vmatprep.mubr.f32.mxu1 %v14939_v31  ;;  %v12824_v61 = vpack.c.bf16 %v3784_v46, %v3780_v26  ;;  %v2327_v2 = vpop.f32.mrb[138].mxu0  ;;  %v3157_v33 = vadd.f32 %v3156_v19, %v12155_v15  ;;  %v3785_v15 = vmax.f32 %v2322_v1, 0.0  ;;  %v3786_v19 = vmax.f32 %v2324_v24, 0.0 }
 0x240   : > { %15054 = vst [vmem:[#allocation103_spill] sm:$0xff] %v12813_v37  ;;  %v2328_v9 = vadd.f32 %v2327_v2, %v12153_v52  ;;  %v2329_v23 = vpop.f32.mrb[139].mxu0  ;;  %8617 = vmatmul.mubr.msk.f32.gmra.mrb[244].mxu0 %vm1462_vm0, %v688_v49  ;;  %v3787_v30 = vmax.f32 %v3155_v28, 0.0 }
 0x241   : > { %v3160_v38 = vpop.f32.mrb[138].mxu1  ;;  %v2330_v32 = vadd.f32 %v2329_v23, %v12153_v52  ;;  %2649 = vmatprep.mubr.f32.mxu0 %v14939_v31  ;;  %v3788_v2 = vmax.f32 %v3157_v33, 0.0 }
 0x242   : > { %v3161_v36 = vadd.f32 %v3160_v38, %v12153_v52  ;;  %v3162_v16 = vpop.f32.mrb[139].mxu1  ;;  %8745 = vmatmul.mubr.msk.f32.gmra.mrb[244].mxu1 %vm1462_vm0, %v688_v49  ;;  %v3789_v7 = vmax.f32 %v2328_v9, 0.0 }
 0x243   : > { %v3163_v40 = vadd.f32 %v3162_v16, %v12153_v52  ;;  %3482 = vmatprep.mubr.f32.mxu1 %v14939_v31  ;;  %v3790_v46 = vmax.f32 %v2330_v32, 0.0  ;;  %v2333_v13 = vpop.f32.mrb[140].mxu0  ;;  %v690_v52 = vld [vmem:[%s14927_s1 + $0x3e0] sm:$0xff] }
 0x244   : > { %v3791_v26 = vmax.f32 %v3161_v36, 0.0  ;;  %v12840_v38 = vpack.c.bf16 %v3789_v7, %v3785_v15  ;;  %v2335_v37 = vpop.f32.mrb[141].mxu0  ;;  %8618 = vmatmul.mubr.msk.f32.gmra.mrb[246].mxu0 %vm1462_vm0, %v689_v22  ;;  %v2334_v28 = vadd.f32 %v2333_v13, %v12201_v25 }
 0x245   : > { %v3792_v49 = vmax.f32 %v3163_v40, 0.0  ;;  %v3166_v23 = vpop.f32.mrb[140].mxu1  ;;  %2655 = vmatprep.mubr.f32.mxu0 %v14939_v31  ;;  %v12852_v24 = vpack.c.bf16 %v3790_v46, %v3786_v19  ;;  %v2336_v32 = vadd.f32 %v2335_v37, %v12201_v25  ;;  %v691_v37 = vld [vmem:[%s14927_s1 + $0x3e8] sm:$0xff] }
 0x246   : > { %15055 = vst [vmem:[#allocation104_spill] sm:$0xff] %v12840_v38  ;;  %v12843_v58 = vpack.c.bf16 %v3791_v26, %v3787_v30  ;;  %v3168_v1 = vpop.f32.mrb[141].mxu1  ;;  %8746 = vmatmul.mubr.msk.f32.gmra.mrb[246].mxu1 %vm1462_vm0, %v689_v22  ;;  %v3167_v9 = vadd.f32 %v3166_v23, %v12201_v25 }
 0x247   : > { %3488 = vmatprep.mubr.f32.mxu1 %v14939_v31  ;;  %v12854_v33 = vpack.c.bf16 %v3792_v49, %v3788_v2  ;;  %v2339_v36 = vpop.f32.mrb[142].mxu0  ;;  %v3169_v16 = vadd.f32 %v3168_v1, %v12201_v25  ;;  %v3793_v25 = vmax.f32 %v2334_v28, 0.0  ;;  %v3794_v1 = vmax.f32 %v2336_v32, 0.0 }
 0x248   : > { %15056 = vst [vmem:[#allocation105_spill] sm:$0xff] %v12843_v58  ;;  %v2340_v22 = vadd.f32 %v2339_v36, %v12189_v42  ;;  %v2341_v7 = vpop.f32.mrb[143].mxu0  ;;  %8619 = vmatmul.mubr.msk.f32.gmra.mrb[248].mxu0 %vm1462_vm0, %v690_v52  ;;  %v3795_v19 = vmax.f32 %v3167_v9, 0.0 }
 0x249   : > { %v3172_v15 = vpop.f32.mrb[142].mxu1  ;;  %v2342_v30 = vadd.f32 %v2341_v7, %v12189_v42  ;;  %2661 = vmatprep.mubr.f32.mxu0 %v14939_v31  ;;  %v3796_v36 = vmax.f32 %v3169_v16, 0.0 }
 0x24a   : > { %v3173_v40 = vadd.f32 %v3172_v15, %v12189_v42  ;;  %v3174_v26 = vpop.f32.mrb[143].mxu1  ;;  %8747 = vmatmul.mubr.msk.f32.gmra.mrb[248].mxu1 %vm1462_vm0, %v690_v52  ;;  %v3797_v46 = vmax.f32 %v2340_v22, 0.0 }
 0x24b   : > { %v3175_v13 = vadd.f32 %v3174_v26, %v12189_v42  ;;  %3494 = vmatprep.mubr.f32.mxu1 %v14939_v31  ;;  %v3798_v49 = vmax.f32 %v2342_v30, 0.0  ;;  %v2345_v23 = vpop.f32.mrb[144].mxu0  ;;  %v692_v42 = vld [vmem:[%s14927_s1 + $0x3f0] sm:$0xff] }
 0x24c   : > { %v3799_v2 = vmax.f32 %v3173_v40, 0.0  ;;  %v12870_v15 = vpack.c.bf16 %v3797_v46, %v3793_v25  ;;  %v2347_v58 = vpop.f32.mrb[145].mxu0  ;;  %8620 = vmatmul.mubr.msk.f32.gmra.mrb[250].mxu0 %vm1462_vm0, %v691_v37  ;;  %v2346_v9 = vadd.f32 %v2345_v23, %v12237_v35 }
 0x24d   : > { %v3800_v52 = vmax.f32 %v3175_v13, 0.0  ;;  %v3178_v7 = vpop.f32.mrb[144].mxu1  ;;  %2667 = vmatprep.mubr.f32.mxu0 %v14939_v31  ;;  %v12882_v32 = vpack.c.bf16 %v3798_v49, %v3794_v1  ;;  %v2348_v30 = vadd.f32 %v2347_v58, %v12237_v35  ;;  %v693_v58 = vld [vmem:[%s14927_s1 + $0x3f8] sm:$0xff]  ;;  %v4026_v1 = vld [vmem:[%s15058_s3 + $0x8] sm:$0xff]  ;;  %s15326_s1 = sld [smem:[#allocation147_spill]] }
 0x24e   : > { %v12873_v38 = vpack.c.bf16 %v3799_v2, %v3795_v19  ;;  %v3180_v28 = vpop.f32.mrb[145].mxu1  ;;  %8748 = vmatmul.mubr.msk.f32.gmra.mrb[250].mxu1 %vm1462_vm0, %v691_v37  ;;  %v3179_v22 = vadd.f32 %v3178_v7, %v12237_v35 }
 0x24f   : > { %3500 = vmatprep.mubr.f32.mxu1 %v14939_v31  ;;  %v12884_v16 = vpack.c.bf16 %v3800_v52, %v3796_v36  ;;  %v2351_v40 = vpop.f32.mrb[146].mxu0  ;;  %v3181_v26 = vadd.f32 %v3180_v28, %v12237_v35  ;;  %v3801_v35 = vmax.f32 %v2346_v9, 0.0 }
 0x250   : > { %15057 = vst [vmem:[#allocation106_spill] sm:$0xff] %v12873_v38  ;;  %v2352_v37 = vadd.f32 %v2351_v40, %v12227_v53  ;;  %v2353_v46 = vpop.f32.mrb[147].mxu0  ;;  %8621 = vmatmul.mubr.msk.f32.gmra.mrb[252].mxu0 %vm1462_vm0, %v692_v42  ;;  %v3803_v36 = vmax.f32 %v3179_v22, 0.0  ;;  %v4025_v22 = vld [vmem:[%s15058_s3] sm:$0xff] }
 0x251   : > { %v3184_v25 = vpop.f32.mrb[146].mxu1  ;;  %v2354_v19 = vadd.f32 %v2353_v46, %v12227_v53  ;;  %2673 = vmatprep.mubr.f32.mxu0 %v14939_v31  ;;  %v3804_v40 = vmax.f32 %v3181_v26, 0.0 }
 0x252   : > { %v3185_v13 = vadd.f32 %v3184_v25, %v12227_v53  ;;  %v3186_v2 = vpop.f32.mrb[147].mxu1  ;;  %8749 = vmatmul.mubr.msk.f32.gmra.mrb[252].mxu1 %vm1462_vm0, %v692_v42  ;;  %v3805_v49 = vmax.f32 %v2352_v37, 0.0  ;;  %v3802_v42 = vmax.f32 %v2348_v30, 0.0 }
 0x253   : > { %v3187_v23 = vadd.f32 %v3186_v2, %v12227_v53  ;;  %3506 = vmatprep.mubr.f32.mxu1 %v14939_v31  ;;  %v3806_v7 = vmax.f32 %v2354_v19, 0.0  ;;  %v2357_v28 = vpop.f32.mrb[148].mxu0  ;;  %s14727_s2 = scalar_lea.hbm %s15326_s1, %s8760_s29 }
 0x254   : > { %v3807_v52 = vmax.f32 %v3185_v13, 0.0  ;;  %v12903_v25 = vpack.c.bf16 %v3805_v49, %v3801_v35  ;;  %v2359_v9 = vpop.f32.mrb[149].mxu0  ;;  %8622 = vmatmul.mubr.msk.f32.gmra.mrb[254].mxu0 %vm1462_vm0, %v693_v58  ;;  %v2358_v30 = vadd.f32 %v2357_v28, %v12275_v5 }
 0x255   : > { %v3808_v46 = vmax.f32 %v3187_v23, 0.0  ;;  %v3190_v38 = vpop.f32.mrb[148].mxu1  ;;  %4409 = vmatprep.mubr.f32.mxu0 %v4026_v1  ;;  %v12913_v26 = vpack.c.bf16 %v3806_v7, %v3802_v42  ;;  %v2360_v2 = vadd.f32 %v2359_v9, %v12275_v5 }
 0x256   : > { %v12906_v53 = vpack.c.bf16 %v3807_v52, %v3803_v36  ;;  %v3192_v31 = vpop.f32.mrb[149].mxu1  ;;  %8750 = vmatmul.mubr.msk.f32.gmra.mrb[254].mxu1 %vm1462_vm0, %v693_v58  ;;  %v3191_v13 = vadd.f32 %v3190_v38, %v12275_v5  ;;  %v3809_v38 = vmax.f32 %v2358_v30, 0.0 }
 0x257   : > { %4923 = vmatprep.mubr.f32.mxu1 %v4026_v1  ;;  %v12915_v37 = vpack.c.bf16 %v3808_v46, %v3804_v40  ;;  %v2363_v19 = vpop.f32.mrb[150].mxu0  ;;  %v3193_v35 = vadd.f32 %v3192_v31, %v12275_v5  ;;  %v4030_v1 = vld [vmem:[%s15058_s3 + $0x28] sm:$0xff]  ;;  %v4029_v5 = vld [vmem:[%s15058_s3 + $0x20] sm:$0xff] }
 0x258   : > { %v2364_v58 = vadd.f32 %v2363_v19, %v12258_v17  ;;  %v2365_v23 = vpop.f32.mrb[151].mxu0  ;;  %4410 = vmatmul.mubr.f32.vlgmr.msra.gmra.mrb[0].mxu0 %v4025_v22  ;;  %v3811_v40 = vmax.f32 %v3191_v13, 0.0 }
 0x259   : > { %v3196_v49 = vpop.f32.mrb[150].mxu1  ;;  %v2366_v52 = vadd.f32 %v2365_v23, %v12258_v17  ;;  %8846 = vmatpush1.bf16.msra.mxu0 %v12112_v18  ;;  %4415 = vmatprep.mubr.f32.mxu0 %v4030_v1  ;;  %v3810_v18 = vmax.f32 %v2360_v2, 0.0 }
 0x25a   : > { %v3197_v36 = vadd.f32 %v3196_v49, %v12258_v17  ;;  %v3198_v7 = vpop.f32.mrb[151].mxu1  ;;  %4924 = vmatmul.mubr.f32.vlgmr.msra.gmra.mrb[0].mxu1 %v4025_v22  ;;  %v3813_v28 = vmax.f32 %v2364_v58, 0.0  ;;  %8848 = vmatprep.subr.bf16.mxu0 %v12172_v39  ;;  %v3812_v22 = vmax.f32 %v3193_v35, 0.0 }
 0x25b   : > { %v3199_v42 = vadd.f32 %v3198_v7, %v12258_v17  ;;  %8974 = vmatpush1.bf16.msra.mxu1 %v12130_v57  ;;  %v3814_v9 = vmax.f32 %v2366_v52, 0.0  ;;  %v2369_v31 = vpop.f32.mrb[152].mxu0  ;;  %4929 = vmatprep.mubr.f32.mxu1 %v4030_v1  ;;  %v4034_v17 = vld [vmem:[%s15058_s3 + $0x48] sm:$0xff] }
 0x25c   : > { %v3815_v46 = vmax.f32 %v3197_v36, 0.0  ;;  %8976 = vmatprep.subr.bf16.mxu1 %v12176_v62  ;;  %v12934_v19 = vpack.c.bf16 %v3813_v28, %v3809_v38  ;;  %v2371_v58 = vpop.f32.mrb[153].mxu0  ;;  %4416 = vmatmul.mubr.f32.gmra.mrb[2].mxu0 %v4029_v5  ;;  %v4033_v62 = vld [vmem:[%s15058_s3 + $0x40] sm:$0xff]  ;;  %v2370_v13 = vadd.f32 %v2369_v31, %v12306_v56 }
 0x25d   : > { %v3816_v49 = vmax.f32 %v3199_v42, 0.0  ;;  %v3202_v30 = vpop.f32.mrb[152].mxu1  ;;  %8850 = vmatpush1.bf16.msra.mxu0 %v12162_v47  ;;  %v12948_v2 = vpack.c.bf16 %v3814_v9, %v3810_v18  ;;  %4421 = vmatprep.mubr.f32.mxu0 %v4034_v17  ;;  %v2372_v1 = vadd.f32 %v2371_v58, %v12306_v56 }
 0x25e   : > { %v12939_v57 = vpack.c.bf16 %v3815_v46, %v3811_v40  ;;  %v3204_v39 = vpop.f32.mrb[153].mxu1  ;;  %4930 = vmatmul.mubr.f32.gmra.mrb[2].mxu1 %v4029_v5  ;;  %8852 = vmatprep.subr.bf16.mxu0 %v12219_v3  ;;  %v3203_v23 = vadd.f32 %v3202_v30, %v12306_v56  ;;  %v4038_v3 = vld [vmem:[%s15058_s3 + $0x68] sm:$0xff]  ;;  %v3817_v28 = vmax.f32 %v2370_v13, 0.0 }
 0x25f   : > { %8978 = vmatpush1.bf16.msra.mxu1 %v12178_v43  ;;  %v12950_v35 = vpack.c.bf16 %v3816_v49, %v3812_v22  ;;  %v2375_v47 = vpop.f32.mrb[154].mxu0  ;;  %v3205_v36 = vadd.f32 %v3204_v39, %v12306_v56  ;;  %4935 = vmatprep.mubr.f32.mxu1 %v4034_v17  ;;  %v4037_v56 = vld [vmem:[%s15058_s3 + $0x60] sm:$0xff] }
 0x260   : > { %8980 = vmatprep.subr.bf16.mxu1 %v12223_v41  ;;  %v2376_v52 = vadd.f32 %v2375_v47, %v12296_v51  ;;  %v2377_v43 = vpop.f32.mrb[155].mxu0  ;;  %4422 = vmatmul.mubr.f32.gmra.mrb[4].mxu0 %v4033_v62  ;;  %v3819_v46 = vmax.f32 %v3203_v23, 0.0 }
 0x261   : > { %v3208_v7 = vpop.f32.mrb[154].mxu1  ;;  %v2378_v41 = vadd.f32 %v2377_v43, %v12296_v51  ;;  %8854 = vmatpush1.bf16.msra.mxu0 %v12208_v8  ;;  %4427 = vmatprep.mubr.f32.mxu0 %v4038_v3  ;;  %v3818_v8 = vmax.f32 %v2372_v1, 0.0  ;;  %v3820_v22 = vmax.f32 %v3205_v36, 0.0 }
 0x262   : > { %v3209_v5 = vadd.f32 %v3208_v7, %v12296_v51  ;;  %v3210_v38 = vpop.f32.mrb[155].mxu1  ;;  %4936 = vmatmul.mubr.f32.gmra.mrb[4].mxu1 %v4033_v62  ;;  %v3821_v42 = vmax.f32 %v2376_v52, 0.0  ;;  %8856 = vmatprep.subr.bf16.mxu0 %v12269_v6 }
 0x263   : > { %v3211_v40 = vadd.f32 %v3210_v38, %v12296_v51  ;;  %8982 = vmatpush1.bf16.msra.mxu1 %v12225_v60  ;;  %v3822_v31 = vmax.f32 %v2378_v41, 0.0  ;;  %v2381_v18 = vpop.f32.mrb[156].mxu0  ;;  %4941 = vmatprep.mubr.f32.mxu1 %v4038_v3  ;;  %v4042_v60 = vld [vmem:[%s15058_s3 + $0x88] sm:$0xff] }
 0x264   : > { %v3823_v9 = vmax.f32 %v3209_v5, 0.0  ;;  %8984 = vmatprep.subr.bf16.mxu1 %v12273_v34  ;;  %v12970_v49 = vpack.c.bf16 %v3821_v42, %v3817_v28  ;;  %v2383_v17 = vpop.f32.mrb[157].mxu0  ;;  %4428 = vmatmul.mubr.f32.gmra.mrb[6].mxu0 %v4037_v56  ;;  %v4041_v34 = vld [vmem:[%s15058_s3 + $0x80] sm:$0xff]  ;;  %v2382_v39 = vadd.f32 %v2381_v18, %v12344_v48  ;;  %v15059_v42 = vld [vmem:[#allocation18_spill] sm:$0xff] }
 0x265   : > { %v3824_v30 = vmax.f32 %v3211_v40, 0.0  ;;  %v3214_v58 = vpop.f32.mrb[156].mxu1  ;;  %8858 = vmatpush1.bf16.msra.mxu0 %v12250_v11  ;;  %v12984_v62 = vpack.c.bf16 %v3822_v31, %v3818_v8  ;;  %4433 = vmatprep.mubr.f32.mxu0 %v4042_v60  ;;  %v2384_v47 = vadd.f32 %v2383_v17, %v12344_v48 }
 0x266   : > { %v12975_v6 = vpack.c.bf16 %v3823_v9, %v3819_v46  ;;  %v3216_v51 = vpop.f32.mrb[157].mxu1  ;;  %4942 = vmatmul.mubr.f32.gmra.mrb[6].mxu1 %v4037_v56  ;;  %8860 = vmatprep.subr.bf16.mxu0 %v12317_v55  ;;  %v3215_v23 = vadd.f32 %v3214_v58, %v12344_v48  ;;  %v4046_v55 = vld [vmem:[%s15058_s3 + $0xa8] sm:$0xff]  ;;  %v3825_v3 = vmax.f32 %v2382_v39, 0.0 }
 0x267   : > { %8986 = vmatpush1.bf16.msra.mxu1 %v12256_v29  ;;  %v12986_v13 = vpack.c.bf16 %v3824_v30, %v3820_v22  ;;  %v2387_v11 = vpop.f32.mrb[158].mxu0  ;;  %v3217_v1 = vadd.f32 %v3216_v51, %v12344_v48  ;;  %4947 = vmatprep.mubr.f32.mxu1 %v4042_v60  ;;  %v4045_v48 = vld [vmem:[%s15058_s3 + $0xa0] sm:$0xff]  ;;  %v15061_v58 = vld [vmem:[#allocation17_spill] sm:$0xff]  ;;  %v15062_v60 = vld [vmem:[#allocation15_spill] sm:$0xff] }
 0x268   : > { %8988 = vmatprep.subr.bf16.mxu1 %v12321_v14  ;;  %v2388_v36 = vadd.f32 %v2387_v11, %v12331_v63  ;;  %v2389_v29 = vpop.f32.mrb[159].mxu0  ;;  %4434 = vmatmul.mubr.f32.gmra.mrb[8].mxu0 %v4041_v34  ;;  %v3827_v38 = vmax.f32 %v3215_v23, 0.0  ;;  %v15060_v22 = vld [vmem:[#allocation16_spill] sm:$0xff]  ;;  %v15064_v11 = vld [vmem:[#allocation69_spill] sm:$0xff] }
 0x269   : > { %v3220_v52 = vpop.f32.mrb[158].mxu1  ;;  %v2390_v14 = vadd.f32 %v2389_v29, %v12331_v63  ;;  %8862 = vmatpush1.bf16.msra.mxu0 %v12298_v44  ;;  %4439 = vmatprep.mubr.f32.mxu0 %v4046_v55  ;;  %v3826_v44 = vmax.f32 %v2384_v47, 0.0  ;;  %v3828_v46 = vmax.f32 %v3217_v1, 0.0  ;;  %v4049_v30 = vld [vmem:[%s15058_s3 + $0xc0] sm:$0xff] }
 0x26a   : > { %v3221_v7 = vadd.f32 %v3220_v52, %v12331_v63  ;;  %v3222_v43 = vpop.f32.mrb[159].mxu1  ;;  %4948 = vmatmul.mubr.f32.gmra.mrb[8].mxu1 %v4041_v34  ;;  %v3829_v5 = vmax.f32 %v2388_v36, 0.0  ;;  %8864 = vmatprep.subr.bf16.mxu0 %v12363_v0  ;;  %v15063_v51 = vld [vmem:[#allocation20_spill] sm:$0xff]  ;;  %v15065_v52 = vld [vmem:[#allocation65_spill] sm:$0xff] }
 0x26b   : > { %v3223_v41 = vadd.f32 %v3222_v43, %v12331_v63  ;;  %8990 = vmatpush1.bf16.msra.mxu1 %v12304_v45  ;;  %v3830_v28 = vmax.f32 %v2390_v14, 0.0  ;;  %v2393_v40 = vpop.f32.mrb[160].mxu0  ;;  %4953 = vmatprep.mubr.f32.mxu1 %v4046_v55  ;;  %v4050_v45 = vld [vmem:[%s15058_s3 + $0xc8] sm:$0xff] }
 0x26c   : > { %v3831_v56 = vmax.f32 %v3221_v7, 0.0  ;;  %8992 = vmatprep.subr.bf16.mxu1 %v15059_v42  ;;  %v13006_v9 = vpack.c.bf16 %v3829_v5, %v3825_v3  ;;  %v2395_v8 = vpop.f32.mrb[161].mxu0  ;;  %4440 = vmatmul.mubr.f32.gmra.mrb[10].mxu0 %v4045_v48  ;;  %v2394_v17 = vadd.f32 %v2393_v40, %v15061_v58  ;;  %v4054_v14 = vld [vmem:[%s15058_s3 + $0xe8] sm:$0xff]  ;;  %v15066_v5 = vld [vmem:[#allocation66_spill] sm:$0xff]  ;;  %v15067_v42 = vld [vmem:[#allocation67_spill] sm:$0xff] }
 0x26d   : > { %v3832_v31 = vmax.f32 %v3223_v41, 0.0  ;;  %v3226_v18 = vpop.f32.mrb[160].mxu1  ;;  %8866 = vmatpush1.bf16.msra.mxu0 %v15060_v22  ;;  %v13020_v34 = vpack.c.bf16 %v3830_v28, %v3826_v44  ;;  %4445 = vmatprep.mubr.f32.mxu0 %v4050_v45  ;;  %v2396_v1 = vadd.f32 %v2395_v8, %v15061_v58  ;;  %v4053_v41 = vld [vmem:[%s15058_s3 + $0xe0] sm:$0xff]  ;;  %v15068_v40 = vld [vmem:[#allocation22_spill] sm:$0xff] }
 0x26e   : > { %v13011_v63 = vpack.c.bf16 %v3831_v56, %v3827_v38  ;;  %v3228_v0 = vpop.f32.mrb[161].mxu1  ;;  %4954 = vmatmul.mubr.f32.gmra.mrb[10].mxu1 %v4045_v48  ;;  %8868 = vmatprep.subr.bf16.mxu0 %v15063_v51  ;;  %v3227_v23 = vadd.f32 %v3226_v18, %v15061_v58  ;;  %v3833_v38 = vmax.f32 %v2394_v17, 0.0  ;;  %v15069_v18 = vld [vmem:[#allocation74_spill] sm:$0xff] }
 0x26f   : > { %8994 = vmatpush1.bf16.msra.mxu1 %v15062_v60  ;;  %v13022_v39 = vpack.c.bf16 %v3832_v31, %v3828_v46  ;;  %v2399_v47 = vpop.f32.mrb[162].mxu0  ;;  %v3229_v36 = vadd.f32 %v3228_v0, %v15061_v58  ;;  %4959 = vmatprep.mubr.f32.mxu1 %v4050_v45  ;;  %v3834_v45 = vmax.f32 %v2396_v1, 0.0  ;;  %v4058_v60 = vld [vmem:[%s15058_s3 + $0x108] sm:$0xff]  ;;  %v15071_v1 = vld [vmem:[#allocation70_spill] sm:$0xff] }
 0x270   : > { %8996 = vmatprep.subr.bf16.mxu1 %v15064_v11  ;;  %v2400_v29 = vadd.f32 %v2399_v47, %v15065_v52  ;;  %v2401_v7 = vpop.f32.mrb[163].mxu0  ;;  %4446 = vmatmul.mubr.f32.gmra.mrb[12].mxu0 %v4049_v30  ;;  %v3835_v44 = vmax.f32 %v3227_v23, 0.0  ;;  %v15070_v11 = vld [vmem:[#allocation71_spill] sm:$0xff]  ;;  %v4057_v47 = vld [vmem:[%s15058_s3 + $0x100] sm:$0xff] }
 0x271   : > { %v3232_v55 = vpop.f32.mrb[162].mxu1  ;;  %v2402_v48 = vadd.f32 %v2401_v7, %v15065_v52  ;;  %8870 = vmatpush1.bf16.msra.mxu0 %v15066_v5  ;;  %4451 = vmatprep.mubr.f32.mxu0 %v4054_v14  ;;  %v3836_v0 = vmax.f32 %v3229_v36, 0.0  ;;  %v15074_v5 = vld [vmem:[#allocation68_spill] sm:$0xff] }
 0x272   : > { %v3233_v43 = vadd.f32 %v3232_v55, %v15065_v52  ;;  %v3234_v3 = vpop.f32.mrb[163].mxu1  ;;  %4960 = vmatmul.mubr.f32.gmra.mrb[12].mxu1 %v4049_v30  ;;  %v3837_v56 = vmax.f32 %v2400_v29, 0.0  ;;  %8872 = vmatprep.subr.bf16.mxu0 %v15068_v40 }
 0x273   : > { %v3235_v28 = vadd.f32 %v3234_v3, %v15065_v52  ;;  %8998 = vmatpush1.bf16.msra.mxu1 %v15067_v42  ;;  %v3838_v31 = vmax.f32 %v2402_v48, 0.0  ;;  %v2405_v8 = vpop.f32.mrb[164].mxu0  ;;  %4965 = vmatprep.mubr.f32.mxu1 %v4054_v14  ;;  %v15072_v52 = vld [vmem:[#allocation72_spill] sm:$0xff] }
 0x274   : > { %v3839_v46 = vmax.f32 %v3233_v43, 0.0  ;;  %9000 = vmatprep.subr.bf16.mxu1 %v15069_v18  ;;  %v13042_v22 = vpack.c.bf16 %v3837_v56, %v3833_v38  ;;  %v2407_v17 = vpop.f32.mrb[165].mxu0  ;;  %4452 = vmatmul.mubr.f32.gmra.mrb[14].mxu0 %v4053_v41  ;;  %v2406_v36 = vadd.f32 %v2405_v8, %v15071_v1  ;;  %v15073_v14 = vld [vmem:[#allocation24_spill] sm:$0xff] }
 0x275   : > { %v3840_v30 = vmax.f32 %v3235_v28, 0.0  ;;  %v3238_v58 = vpop.f32.mrb[164].mxu1  ;;  %8874 = vmatpush1.bf16.msra.mxu0 %v15070_v11  ;;  %v13056_v29 = vpack.c.bf16 %v3838_v31, %v3834_v45  ;;  %4457 = vmatprep.mubr.f32.mxu0 %v4058_v60  ;;  %v2408_v48 = vadd.f32 %v2407_v17, %v15071_v1  ;;  %v15076_v45 = vld [vmem:[#allocation77_spill] sm:$0xff] }
 0x276   : > { %v13047_v51 = vpack.c.bf16 %v3839_v46, %v3835_v44  ;;  %v3240_v23 = vpop.f32.mrb[165].mxu1  ;;  %4966 = vmatmul.mubr.f32.gmra.mrb[14].mxu1 %v4053_v41  ;;  %8876 = vmatprep.subr.bf16.mxu0 %v12505_v21  ;;  %v3239_v7 = vadd.f32 %v3238_v58, %v15071_v1  ;;  %v4062_v21 = vld [vmem:[%s15058_s3 + $0x128] sm:$0xff]  ;;  %v15075_v44 = vld [vmem:[#allocation76_spill] sm:$0xff]  ;;  %v3841_v31 = vmax.f32 %v2406_v36, 0.0 }
 0x277   : > { %9002 = vmatpush1.bf16.msra.mxu1 %v15072_v52  ;;  %v13058_v55 = vpack.c.bf16 %v3840_v30, %v3836_v0  ;;  %v2411_v43 = vpop.f32.mrb[166].mxu0  ;;  %v3241_v3 = vadd.f32 %v3240_v23, %v15071_v1  ;;  %4971 = vmatprep.mubr.f32.mxu1 %v4058_v60  ;;  %v4061_v46 = vld [vmem:[%s15058_s3 + $0x120] sm:$0xff]  ;;  %v15077_v0 = vld [vmem:[#allocation82_spill] sm:$0xff]  ;;  %v15078_v60 = vld [vmem:[#allocation83_spill] sm:$0xff]  ;;  %v3842_v11 = vmax.f32 %v2408_v48, 0.0 }
 0x278   : > { %9004 = vmatprep.subr.bf16.mxu1 %v15073_v14  ;;  %v2412_v41 = vadd.f32 %v2411_v43, %v15074_v5  ;;  %v2413_v56 = vpop.f32.mrb[167].mxu0  ;;  %4458 = vmatmul.mubr.f32.gmra.mrb[16].mxu0 %v4057_v47  ;;  %v3843_v30 = vmax.f32 %v3239_v7, 0.0  ;;  %v4066_v43 = vld [vmem:[%s15058_s3 + $0x148] sm:$0xff]  ;;  %v4065_v48 = vld [vmem:[%s15058_s3 + $0x140] sm:$0xff] }
 0x279   : > { %v3244_v38 = vpop.f32.mrb[166].mxu1  ;;  %v2414_v42 = vadd.f32 %v2413_v56, %v15074_v5  ;;  %8878 = vmatpush1.bf16.msra.mxu0 %v15075_v44  ;;  %4463 = vmatprep.mubr.f32.mxu0 %v4062_v21  ;;  %v15081_v56 = vld [vmem:[#allocation80_spill] sm:$0xff] }
 0x27a   : > { %v3245_v28 = vadd.f32 %v3244_v38, %v15074_v5  ;;  %v3246_v40 = vpop.f32.mrb[167].mxu1  ;;  %4972 = vmatmul.mubr.f32.gmra.mrb[16].mxu1 %v4057_v47  ;;  %v3845_v18 = vmax.f32 %v2412_v41, 0.0  ;;  %8880 = vmatprep.subr.bf16.mxu0 %v15077_v0  ;;  %v3844_v47 = vmax.f32 %v3241_v3, 0.0  ;;  %v15079_v41 = vld [vmem:[#allocation79_spill] sm:$0xff]  ;;  %v15080_v3 = vld [vmem:[#allocation73_spill] sm:$0xff]  ;;  %v15083_v44 = vld [vmem:[#allocation88_spill] sm:$0xff] }
 0x27b   : > { %v3247_v8 = vadd.f32 %v3246_v40, %v15074_v5  ;;  %9006 = vmatpush1.bf16.msra.mxu1 %v15076_v45  ;;  %v3846_v17 = vmax.f32 %v2414_v42, 0.0  ;;  %v2417_v23 = vpop.f32.mrb[168].mxu0  ;;  %4977 = vmatprep.mubr.f32.mxu1 %v4062_v21  ;;  %v15082_v21 = vld [vmem:[#allocation27_spill] sm:$0xff] }
 0x27c   : > { %v3847_v58 = vmax.f32 %v3245_v28, 0.0  ;;  %9008 = vmatprep.subr.bf16.mxu1 %v15078_v60  ;;  %v13078_v1 = vpack.c.bf16 %v3845_v18, %v3841_v31  ;;  %v2419_v14 = vpop.f32.mrb[169].mxu0  ;;  %4464 = vmatmul.mubr.f32.gmra.mrb[18].mxu0 %v4061_v46  ;;  %v2418_v38 = vadd.f32 %v2417_v23, %v15080_v3 }
 0x27d   : > { %v3848_v52 = vmax.f32 %v3247_v8, 0.0  ;;  %v3250_v36 = vpop.f32.mrb[168].mxu1  ;;  %8882 = vmatpush1.bf16.msra.mxu0 %v15079_v41  ;;  %v13092_v28 = vpack.c.bf16 %v3846_v17, %v3842_v11  ;;  %4469 = vmatprep.mubr.f32.mxu0 %v4066_v43  ;;  %v15084_v8 = vld [vmem:[#allocation19_spill] sm:$0xff]  ;;  %v15085_v11 = vld [vmem:[#allocation85_spill] sm:$0xff] }
 0x27e   : > { %v13083_v7 = vpack.c.bf16 %v3847_v58, %v3843_v30  ;;  %v3252_v5 = vpop.f32.mrb[169].mxu1  ;;  %4978 = vmatmul.mubr.f32.gmra.mrb[18].mxu1 %v4061_v46  ;;  %8884 = vmatprep.subr.bf16.mxu0 %v15082_v21  ;;  %v3251_v40 = vadd.f32 %v3250_v36, %v15080_v3  ;;  %v2420_v46 = vadd.f32 %v2419_v14, %v15080_v3  ;;  %v4070_v58 = vld [vmem:[%s15058_s3 + $0x168] sm:$0xff] }
 0x27f   : > { %9010 = vmatpush1.bf16.msra.mxu1 %v15081_v56  ;;  %v13094_v42 = vpack.c.bf16 %v3848_v52, %v3844_v47  ;;  %v2423_v31 = vpop.f32.mrb[170].mxu0  ;;  %v3253_v18 = vadd.f32 %v3252_v5, %v15080_v3  ;;  %4983 = vmatprep.mubr.f32.mxu1 %v4066_v43  ;;  %v4069_v47 = vld [vmem:[%s15058_s3 + $0x160] sm:$0xff]  ;;  %v3849_v52 = vmax.f32 %v2418_v38, 0.0  ;;  %v15086_v43 = vld [vmem:[#allocation86_spill] sm:$0xff]  ;;  %v15088_v21 = vld [vmem:[#allocation29_spill] sm:$0xff] }
 0x280   : > { %9012 = vmatprep.subr.bf16.mxu1 %v15083_v44  ;;  %v2424_v45 = vadd.f32 %v2423_v31, %v15084_v8  ;;  %v2425_v30 = vpop.f32.mrb[171].mxu0  ;;  %4470 = vmatmul.mubr.f32.gmra.mrb[20].mxu0 %v4065_v48  ;;  %v15087_v5 = vld [vmem:[#allocation92_spill] sm:$0xff]  ;;  %v3851_v41 = vmax.f32 %v3251_v40, 0.0 }
 0x281   : > { %v3256_v0 = vpop.f32.mrb[170].mxu1  ;;  %v2426_v60 = vadd.f32 %v2425_v30, %v15084_v8  ;;  %8886 = vmatpush1.bf16.msra.mxu0 %v15085_v11  ;;  %4475 = vmatprep.mubr.f32.mxu0 %v4070_v58  ;;  %v3852_v31 = vmax.f32 %v3253_v18, 0.0  ;;  %v15092_v18 = vld [vmem:[#allocation75_spill] sm:$0xff] }
 0x282   : > { %v3257_v17 = vadd.f32 %v3256_v0, %v15084_v8  ;;  %v3258_v23 = vpop.f32.mrb[171].mxu1  ;;  %4984 = vmatmul.mubr.f32.gmra.mrb[20].mxu1 %v4065_v48  ;;  %v3853_v36 = vmax.f32 %v2424_v45, 0.0  ;;  %8888 = vmatprep.subr.bf16.mxu0 %v15087_v5  ;;  %v3850_v48 = vmax.f32 %v2420_v46, 0.0  ;;  %v4073_v46 = vld [vmem:[%s15058_s3 + $0x180] sm:$0xff]  ;;  %v15093_v11 = vld [vmem:[#allocation91_spill] sm:$0xff] }
 0x283   : > { %v3259_v14 = vadd.f32 %v3258_v23, %v15084_v8  ;;  %9014 = vmatpush1.bf16.msra.mxu1 %v15086_v43  ;;  %v3854_v56 = vmax.f32 %v2426_v60, 0.0  ;;  %v2429_v44 = vpop.f32.mrb[172].mxu0  ;;  %4989 = vmatprep.mubr.f32.mxu1 %v4070_v58  ;;  %v4074_v8 = vld [vmem:[%s15058_s3 + $0x188] sm:$0xff]  ;;  %v15091_v60 = vld [vmem:[#allocation90_spill] sm:$0xff]  ;;  %v15095_v43 = vld [vmem:[#allocation31_spill] sm:$0xff] }
 0x284   : > { %v3855_v3 = vmax.f32 %v3257_v17, 0.0  ;;  %9016 = vmatprep.subr.bf16.mxu1 %v15088_v21  ;;  %v13114_v0 = vpack.c.bf16 %v3853_v36, %v3849_v52  ;;  %v2431_v45 = vpop.f32.mrb[173].mxu0  ;;  %4476 = vmatmul.mubr.f32.gmra.mrb[22].mxu0 %v4069_v47  ;;  %v2430_v23 = vadd.f32 %v2429_v44, %v15092_v18  ;;  %v15094_v58 = vld [vmem:[#allocation93_spill] sm:$0xff] }
 0x285   : > { %v3856_v30 = vmax.f32 %v3259_v14, 0.0  ;;  %v3262_v38 = vpop.f32.mrb[172].mxu1  ;;  %8890 = vmatpush1.bf16.msra.mxu0 %v15091_v60  ;;  %v13128_v52 = vpack.c.bf16 %v3854_v56, %v3850_v48  ;;  %4481 = vmatprep.mubr.f32.mxu0 %v4074_v8  ;;  %v4078_v56 = vld [vmem:[%s15058_s3 + $0x1a8] sm:$0xff] }
 0x286   : > { %15089 = vst [vmem:[#allocation18_spill] sm:$0xff] %v13114_v0  ;;  %v13119_v40 = vpack.c.bf16 %v3855_v3, %v3851_v41  ;;  %v3264_v17 = vpop.f32.mrb[173].mxu1  ;;  %4990 = vmatmul.mubr.f32.gmra.mrb[22].mxu1 %v4069_v47  ;;  %8892 = vmatprep.subr.bf16.mxu0 %v15094_v58  ;;  %v3263_v14 = vadd.f32 %v3262_v38, %v15092_v18  ;;  %v15096_v3 = vld [vmem:[#allocation21_spill] sm:$0xff]  ;;  %v15097_v38 = vld [vmem:[#allocation28_spill] sm:$0xff] }
 0x287   : > { %9018 = vmatpush1.bf16.msra.mxu1 %v15093_v11  ;;  %v13130_v36 = vpack.c.bf16 %v3856_v30, %v3852_v31  ;;  %v2435_v5 = vpop.f32.mrb[174].mxu0  ;;  %v2432_v47 = vadd.f32 %v2431_v45, %v15092_v18  ;;  %v3265_v41 = vadd.f32 %v3264_v17, %v15092_v18  ;;  %4995 = vmatprep.mubr.f32.mxu1 %v4074_v8  ;;  %v4077_v45 = vld [vmem:[%s15058_s3 + $0x1a0] sm:$0xff]  ;;  %v3857_v17 = vmax.f32 %v2430_v23, 0.0  ;;  %v15098_v11 = vld [vmem:[#allocation94_spill] sm:$0xff] }
 0x288   : > { %15090 = vst [vmem:[#allocation16_spill] sm:$0xff] %v13119_v40  ;;  %9020 = vmatprep.subr.bf16.mxu1 %v15095_v43  ;;  %v2436_v21 = vadd.f32 %v2435_v5, %v15096_v3  ;;  %v2437_v60 = vpop.f32.mrb[175].mxu0  ;;  %4482 = vmatmul.mubr.f32.gmra.mrb[24].mxu0 %v4073_v46  ;;  %v3859_v58 = vmax.f32 %v3263_v14, 0.0 }
 0x289   : > { %v3268_v44 = vpop.f32.mrb[174].mxu1  ;;  %v2438_v31 = vadd.f32 %v2437_v60, %v15096_v3  ;;  %8894 = vmatpush1.bf16.msra.mxu0 %v15097_v38  ;;  %4487 = vmatprep.mubr.f32.mxu0 %v4078_v56  ;;  %v3860_v38 = vmax.f32 %v3265_v41, 0.0  ;;  %v15103_v41 = vld [vmem:[#allocation23_spill] sm:$0xff] }
 0x28a   : > { %v3269_v48 = vadd.f32 %v3268_v44, %v15096_v3  ;;  %v3270_v30 = vpop.f32.mrb[175].mxu1  ;;  %4996 = vmatmul.mubr.f32.gmra.mrb[24].mxu1 %v4073_v46  ;;  %v3861_v8 = vmax.f32 %v2436_v21, 0.0  ;;  %8896 = vmatprep.subr.bf16.mxu0 %v12698_v50  ;;  %v15099_v44 = vld [vmem:[#allocation95_spill] sm:$0xff]  ;;  %v3858_v46 = vmax.f32 %v2432_v47, 0.0  ;;  %v4082_v50 = vld [vmem:[%s15058_s3 + $0x1c8] sm:$0xff]  ;;  %v4081_v47 = vld [vmem:[%s15058_s3 + $0x1c0] sm:$0xff] }
 0x28b   : > { %v3271_v18 = vadd.f32 %v3270_v30, %v15096_v3  ;;  %9022 = vmatpush1.bf16.msra.mxu1 %v15098_v11  ;;  %v3862_v5 = vmax.f32 %v2438_v31, 0.0  ;;  %v2441_v60 = vpop.f32.mrb[176].mxu0  ;;  %5001 = vmatprep.mubr.f32.mxu1 %v4078_v56  ;;  %v15104_v30 = vld [vmem:[#allocation96_spill] sm:$0xff] }
 0x28c   : > { %v3863_v43 = vmax.f32 %v3269_v48, 0.0  ;;  %9024 = vmatprep.subr.bf16.mxu1 %v15099_v44  ;;  %v13150_v40 = vpack.c.bf16 %v3861_v8, %v3857_v17  ;;  %v2443_v21 = vpop.f32.mrb[177].mxu0  ;;  %4488 = vmatmul.mubr.f32.gmra.mrb[26].mxu0 %v4077_v45  ;;  %v15102_v48 = vld [vmem:[#allocation30_spill] sm:$0xff]  ;;  %v2442_v31 = vadd.f32 %v2441_v60, %v15103_v41 }
 0x28d   : > { %v3864_v0 = vmax.f32 %v3271_v18, 0.0  ;;  %v3274_v23 = vpop.f32.mrb[176].mxu1  ;;  %8898 = vmatpush1.bf16.msra.mxu0 %v15102_v48  ;;  %v13164_v56 = vpack.c.bf16 %v3862_v5, %v3858_v46  ;;  %4493 = vmatprep.mubr.f32.mxu0 %v4082_v50  ;;  %v15108_v46 = vld [vmem:[#allocation32_spill] sm:$0xff] }
 0x28e   : > { %15100 = vst [vmem:[#allocation17_spill] sm:$0xff] %v13150_v40  ;;  %v13155_v14 = vpack.c.bf16 %v3863_v43, %v3859_v58  ;;  %v3276_v3 = vpop.f32.mrb[177].mxu1  ;;  %5002 = vmatmul.mubr.f32.gmra.mrb[26].mxu1 %v4077_v45  ;;  %8900 = vmatprep.subr.bf16.mxu0 %v12728_v54  ;;  %v3275_v8 = vadd.f32 %v3274_v23, %v15103_v41  ;;  %v15107_v58 = vld [vmem:[#allocation78_spill] sm:$0xff]  ;;  %v4086_v54 = vld [vmem:[%s15058_s3 + $0x1e8] sm:$0xff]  ;;  %v3865_v23 = vmax.f32 %v2442_v31, 0.0 }
 0x28f   : > { %9026 = vmatpush1.bf16.msra.mxu1 %v15104_v30  ;;  %15105 = vst [vmem:[#allocation20_spill] sm:$0xff] %v13164_v56  ;;  %v13166_v17 = vpack.c.bf16 %v3864_v0, %v3860_v38  ;;  %v2447_v18 = vpop.f32.mrb[178].mxu0  ;;  %v2444_v45 = vadd.f32 %v2443_v21, %v15103_v41  ;;  %v3277_v11 = vadd.f32 %v3276_v3, %v15103_v41  ;;  %v4085_v38 = vld [vmem:[%s15058_s3 + $0x1e0] sm:$0xff]  ;;  %v15109_v3 = vld [vmem:[#allocation97_spill] sm:$0xff]  ;;  %v15203_v56 = vld [vmem:[#allocation38_spill] sm:$0xff] }
 0x290   : > { %15101 = vst [vmem:[#allocation15_spill] sm:$0xff] %v13155_v14  ;;  %9028 = vmatprep.subr.bf16.mxu1 %v12732_v10  ;;  %v2448_v43 = vadd.f32 %v2447_v18, %v15107_v58  ;;  %5007 = vmatprep.mubr.f32.mxu1 %v4082_v50  ;;  %v2449_v60 = vpop.f32.mrb[179].mxu0  ;;  %v3867_v48 = vmax.f32 %v3275_v8, 0.0 }
 0x291   : > { %15106 = vst [vmem:[#allocation69_spill] sm:$0xff] %v13166_v17  ;;  %v3280_v44 = vpop.f32.mrb[178].mxu1  ;;  %4494 = vmatmul.mubr.f32.gmra.mrb[28].mxu0 %v4081_v47  ;;  %v2450_v10 = vadd.f32 %v2449_v60, %v15107_v58  ;;  %v3868_v31 = vmax.f32 %v3277_v11, 0.0  ;;  %v15114_v11 = vld [vmem:[#allocation99_spill] sm:$0xff] }
 0x292   : > { %v3281_v0 = vadd.f32 %v3280_v44, %v15107_v58  ;;  %v3282_v5 = vpop.f32.mrb[179].mxu1  ;;  %8902 = vmatpush1.bf16.msra.mxu0 %v15108_v46  ;;  %5008 = vmatmul.mubr.f32.gmra.mrb[28].mxu1 %v4081_v47  ;;  %v3869_v21 = vmax.f32 %v2448_v43, 0.0  ;;  %v4090_v47 = vld [vmem:[%s15058_s3 + $0x208] sm:$0xff]  ;;  %v3866_v44 = vmax.f32 %v2444_v45, 0.0 }
 0x293   : > { %v3283_v50 = vadd.f32 %v3282_v5, %v15107_v58  ;;  %9030 = vmatpush1.bf16.msra.mxu1 %v15109_v3  ;;  %8904 = vmatprep.subr.bf16.mxu0 %v12758_v59  ;;  %v3870_v30 = vmax.f32 %v2450_v10, 0.0  ;;  %v2453_v18 = vpop.f32.mrb[180].mxu0  ;;  %v15113_v10 = vld [vmem:[#allocation84_spill] sm:$0xff] }
 0x294   : > { %v3871_v41 = vmax.f32 %v3281_v0, 0.0  ;;  %9032 = vmatprep.subr.bf16.mxu1 %v12762_v4  ;;  %4499 = vmatprep.mubr.f32.mxu0 %v4086_v54  ;;  %v13189_v43 = vpack.c.bf16 %v3869_v21, %v3865_v23  ;;  %v2455_v5 = vpop.f32.mrb[181].mxu0  ;;  %v15112_v0 = vld [vmem:[#allocation98_spill] sm:$0xff]  ;;  %v4089_v4 = vld [vmem:[%s15058_s3 + $0x200] sm:$0xff]  ;;  %v2454_v45 = vadd.f32 %v2453_v18, %v15113_v10 }
 0x295   : > { %v3872_v58 = vmax.f32 %v3283_v50, 0.0  ;;  %v3286_v60 = vpop.f32.mrb[180].mxu1  ;;  %5013 = vmatprep.mubr.f32.mxu1 %v4086_v54  ;;  %4500 = vmatmul.mubr.f32.gmra.mrb[30].mxu0 %v4085_v38  ;;  %v4094_v54 = vld [vmem:[%s15058_s3 + $0x228] sm:$0xff]  ;;  %v13202_v46 = vpack.c.bf16 %v3870_v30, %v3866_v44  ;;  %v2456_v50 = vadd.f32 %v2455_v5, %v15113_v10 }
 0x296   : > { %15110 = vst [vmem:[#allocation65_spill] sm:$0xff] %v13189_v43  ;;  %v13191_v59 = vpack.c.bf16 %v3871_v41, %v3867_v48  ;;  %v3288_v8 = vpop.f32.mrb[181].mxu1  ;;  %8906 = vmatpush1.bf16.msra.mxu0 %v15112_v0  ;;  %5014 = vmatmul.mubr.f32.gmra.mrb[30].mxu1 %v4085_v38  ;;  %v3287_v21 = vadd.f32 %v3286_v60, %v15113_v10  ;;  %v15117_v48 = vld [vmem:[#allocation81_spill] sm:$0xff] }
 0x297   : > { %9034 = vmatpush1.bf16.msra.mxu1 %v15114_v11  ;;  %4505 = vmatprep.mubr.f32.mxu0 %v4090_v47  ;;  %15115 = vst [vmem:[#allocation67_spill] sm:$0xff] %v13202_v46  ;;  %v13204_v23 = vpack.c.bf16 %v3872_v58, %v3868_v31  ;;  %v2459_v38 = vpop.f32.mrb[182].mxu0  ;;  %v3289_v3 = vadd.f32 %v3288_v8, %v15113_v10  ;;  %v3873_v31 = vmax.f32 %v2454_v45, 0.0  ;;  %v4098_v5 = vld [vmem:[%s15058_s3 + $0x248] sm:$0xff] }
 0x298   : > { %15111 = vst [vmem:[#allocation66_spill] sm:$0xff] %v13191_v59  ;;  %5019 = vmatprep.mubr.f32.mxu1 %v4090_v47  ;;  %v2460_v41 = vadd.f32 %v2459_v38, %v15117_v48  ;;  %v2461_v0 = vpop.f32.mrb[183].mxu0  ;;  %v4093_v47 = vld [vmem:[%s15058_s3 + $0x220] sm:$0xff]  ;;  %v3875_v8 = vmax.f32 %v3287_v21, 0.0  ;;  %v15120_v21 = vld [vmem:[#allocation87_spill] sm:$0xff] }
 0x299   : > { %15116 = vst [vmem:[#allocation22_spill] sm:$0xff] %v13204_v23  ;;  %v3292_v18 = vpop.f32.mrb[182].mxu1  ;;  %4506 = vmatmul.mubr.f32.gmra.mrb[32].mxu0 %v4089_v4  ;;  %v2462_v30 = vadd.f32 %v2461_v0, %v15117_v48  ;;  %v3874_v0 = vmax.f32 %v2456_v50, 0.0  ;;  %v4102_v50 = vld [vmem:[%s15058_s3 + $0x268] sm:$0xff] }
 0x29a   : > { %v3293_v11 = vadd.f32 %v3292_v18, %v15117_v48  ;;  %v3294_v44 = vpop.f32.mrb[183].mxu1  ;;  %5020 = vmatmul.mubr.f32.gmra.mrb[32].mxu1 %v4089_v4  ;;  %4511 = vmatprep.mubr.f32.mxu0 %v4094_v54  ;;  %v3877_v58 = vmax.f32 %v2460_v41, 0.0  ;;  %v3876_v4 = vmax.f32 %v3289_v3, 0.0 }
 0x29b   : > { %v3295_v60 = vadd.f32 %v3294_v44, %v15117_v48  ;;  %5025 = vmatprep.mubr.f32.mxu1 %v4094_v54  ;;  %v3878_v38 = vmax.f32 %v2462_v30, 0.0  ;;  %v2465_v18 = vpop.f32.mrb[184].mxu0  ;;  %v4097_v54 = vld [vmem:[%s15058_s3 + $0x240] sm:$0xff] }
 0x29c   : > { %v3879_v10 = vmax.f32 %v3293_v11, 0.0  ;;  %v13219_v59 = vpack.c.bf16 %v3877_v58, %v3873_v31  ;;  %v2467_v46 = vpop.f32.mrb[185].mxu0  ;;  %v2466_v41 = vadd.f32 %v2465_v18, %v15120_v21  ;;  %v15123_v58 = vld [vmem:[#allocation25_spill] sm:$0xff] }
 0x29d   : > { %v3880_v43 = vmax.f32 %v3295_v60, 0.0  ;;  %v3298_v23 = vpop.f32.mrb[184].mxu1  ;;  %4512 = vmatmul.mubr.f32.gmra.mrb[34].mxu0 %v4093_v47  ;;  %v13230_v3 = vpack.c.bf16 %v3878_v38, %v3874_v0 }
 0x29e   : > { %15118 = vst [vmem:[#allocation74_spill] sm:$0xff] %v13219_v59  ;;  %v13221_v45 = vpack.c.bf16 %v3879_v10, %v3875_v8  ;;  %v3300_v48 = vpop.f32.mrb[185].mxu1  ;;  %5026 = vmatmul.mubr.f32.gmra.mrb[34].mxu1 %v4093_v47  ;;  %4517 = vmatprep.mubr.f32.mxu0 %v4098_v5  ;;  %v3299_v30 = vadd.f32 %v3298_v23, %v15120_v21  ;;  %v3881_v23 = vmax.f32 %v2466_v41, 0.0 }
 0x29f   : > { %5031 = vmatprep.mubr.f32.mxu1 %v4098_v5  ;;  %15121 = vst [vmem:[#allocation70_spill] sm:$0xff] %v13230_v3  ;;  %v13232_v11 = vpack.c.bf16 %v3880_v43, %v3876_v4  ;;  %v2471_v44 = vpop.f32.mrb[186].mxu0  ;;  %v2468_v47 = vadd.f32 %v2467_v46, %v15120_v21  ;;  %v3301_v31 = vadd.f32 %v3300_v48, %v15120_v21  ;;  %v4101_v43 = vld [vmem:[%s15058_s3 + $0x260] sm:$0xff]  ;;  %v4106_v4 = vld [vmem:[%s15058_s3 + $0x288] sm:$0xff] }
 0x2a0   : > { %15119 = vst [vmem:[#allocation71_spill] sm:$0xff] %v13221_v45  ;;  %v2472_v60 = vadd.f32 %v2471_v44, %v15123_v58  ;;  %v2473_v10 = vpop.f32.mrb[187].mxu0  ;;  %v3883_v48 = vmax.f32 %v3299_v30, 0.0  ;;  %v15126_v30 = vld [vmem:[#allocation89_spill] sm:$0xff] }
 0x2a1   : > { %15122 = vst [vmem:[#allocation72_spill] sm:$0xff] %v13232_v11  ;;  %v3304_v8 = vpop.f32.mrb[186].mxu1  ;;  %4518 = vmatmul.mubr.f32.gmra.mrb[36].mxu0 %v4097_v54  ;;  %v2474_v18 = vadd.f32 %v2473_v10, %v15123_v58  ;;  %v3882_v10 = vmax.f32 %v2468_v47, 0.0  ;;  %v4110_v47 = vld [vmem:[%s15058_s3 + $0x2a8] sm:$0xff] }
 0x2a2   : > { %v3305_v5 = vadd.f32 %v3304_v8, %v15123_v58  ;;  %v3306_v38 = vpop.f32.mrb[187].mxu1  ;;  %5032 = vmatmul.mubr.f32.gmra.mrb[36].mxu1 %v4097_v54  ;;  %4523 = vmatprep.mubr.f32.mxu0 %v4102_v50  ;;  %v3885_v46 = vmax.f32 %v2472_v60, 0.0  ;;  %v3884_v54 = vmax.f32 %v3301_v31, 0.0 }
 0x2a3   : > { %v3307_v0 = vadd.f32 %v3306_v38, %v15123_v58  ;;  %5037 = vmatprep.mubr.f32.mxu1 %v4102_v50  ;;  %v3886_v44 = vmax.f32 %v2474_v18, 0.0  ;;  %v2477_v8 = vpop.f32.mrb[188].mxu0  ;;  %v4105_v50 = vld [vmem:[%s15058_s3 + $0x280] sm:$0xff] }
 0x2a4   : > { %v3887_v21 = vmax.f32 %v3305_v5, 0.0  ;;  %v13247_v45 = vpack.c.bf16 %v3885_v46, %v3881_v23  ;;  %v2479_v3 = vpop.f32.mrb[189].mxu0  ;;  %v2478_v60 = vadd.f32 %v2477_v8, %v15126_v30  ;;  %v15129_v46 = vld [vmem:[#allocation26_spill] sm:$0xff] }
 0x2a5   : > { %v3888_v59 = vmax.f32 %v3307_v0, 0.0  ;;  %v3310_v11 = vpop.f32.mrb[188].mxu1  ;;  %4524 = vmatmul.mubr.f32.gmra.mrb[38].mxu0 %v4101_v43  ;;  %v13258_v31 = vpack.c.bf16 %v3886_v44, %v3882_v10 }
 0x2a6   : > { %15124 = vst [vmem:[#allocation24_spill] sm:$0xff] %v13247_v45  ;;  %v13249_v41 = vpack.c.bf16 %v3887_v21, %v3883_v48  ;;  %v3312_v58 = vpop.f32.mrb[189].mxu1  ;;  %5038 = vmatmul.mubr.f32.gmra.mrb[38].mxu1 %v4101_v43  ;;  %4529 = vmatprep.mubr.f32.mxu0 %v4106_v4  ;;  %v3311_v18 = vadd.f32 %v3310_v11, %v15126_v30  ;;  %v3889_v11 = vmax.f32 %v2478_v60, 0.0  ;;  %v1305_v60 = vpop.permute.xlu0 %1304 }
 0x2a7   : > { %5043 = vmatprep.mubr.f32.mxu1 %v4106_v4  ;;  %15127 = vst [vmem:[#allocation76_spill] sm:$0xff] %v13258_v31  ;;  %v13260_v5 = vpack.c.bf16 %v3888_v59, %v3884_v54  ;;  %v2483_v38 = vpop.f32.mrb[190].mxu0  ;;  %v2480_v43 = vadd.f32 %v2479_v3, %v15126_v30  ;;  %v3313_v23 = vadd.f32 %v3312_v58, %v15126_v30  ;;  %v4109_v59 = vld [vmem:[%s15058_s3 + $0x2a0] sm:$0xff]  ;;  %v4114_v54 = vld [vmem:[%s15058_s3 + $0x2c8] sm:$0xff] }
 0x2a8   : > { %15125 = vst [vmem:[#allocation68_spill] sm:$0xff] %v13249_v41  ;;  %v2484_v0 = vadd.f32 %v2483_v38, %v15129_v46  ;;  %v2485_v21 = vpop.f32.mrb[191].mxu0  ;;  %v3891_v58 = vmax.f32 %v3311_v18, 0.0  ;;  %v4113_v18 = vld [vmem:[%s15058_s3 + $0x2c0] sm:$0xff] }
 0x2a9   : > { %15128 = vst [vmem:[#allocation77_spill] sm:$0xff] %v13260_v5  ;;  %v3316_v48 = vpop.f32.mrb[190].mxu1  ;;  %4530 = vmatmul.mubr.f32.gmra.mrb[40].mxu0 %v4105_v50  ;;  %v2486_v8 = vadd.f32 %v2485_v21, %v15129_v46  ;;  %v3890_v21 = vmax.f32 %v2480_v43, 0.0  ;;  %v4118_v43 = vld [vmem:[%s15058_s3 + $0x2e8] sm:$0xff] }
 0x2aa   : > { %v3317_v4 = vadd.f32 %v3316_v48, %v15129_v46  ;;  %v3318_v44 = vpop.f32.mrb[191].mxu1  ;;  %5044 = vmatmul.mubr.f32.gmra.mrb[40].mxu1 %v4105_v50  ;;  %4535 = vmatprep.mubr.f32.mxu0 %v4110_v47  ;;  %v3893_v3 = vmax.f32 %v2484_v0, 0.0  ;;  %v3892_v50 = vmax.f32 %v3313_v23, 0.0 }
 0x2ab   : > { %v3319_v10 = vadd.f32 %v3318_v44, %v15129_v46  ;;  %5049 = vmatprep.mubr.f32.mxu1 %v4110_v47  ;;  %v3894_v38 = vmax.f32 %v2486_v8, 0.0  ;;  %v2489_v48 = vpop.f32.mrb[192].mxu0  ;;  %v1310_v8 = vpop.permute.xlu1 %1309 }
 0x2ac   : > { %v3895_v30 = vmax.f32 %v3317_v4, 0.0  ;;  %v13275_v41 = vpack.c.bf16 %v3893_v3, %v3889_v11  ;;  %v2491_v31 = vpop.f32.mrb[193].mxu0  ;;  %v2490_v46 = vadd.f32 %v2489_v48, %v1305_v60 }
 0x2ad   : > { %v3896_v45 = vmax.f32 %v3319_v10, 0.0  ;;  %v3322_v5 = vpop.f32.mrb[192].mxu1  ;;  %4536 = vmatmul.mubr.f32.gmra.mrb[42].mxu0 %v4109_v59  ;;  %v13285_v23 = vpack.c.bf16 %v3894_v38, %v3890_v21  ;;  %v2492_v3 = vadd.f32 %v2491_v31, %v1305_v60  ;;  %v4117_v38 = vld [vmem:[%s15058_s3 + $0x2e0] sm:$0xff]  ;;  %v4122_v31 = vld [vmem:[%s15058_s3 + $0x308] sm:$0xff] }
 0x2ae   : > { %15130 = vst [vmem:[#allocation82_spill] sm:$0xff] %v13275_v41  ;;  %v13277_v0 = vpack.c.bf16 %v3895_v30, %v3891_v58  ;;  %v3324_v47 = vpop.f32.mrb[193].mxu1  ;;  %5050 = vmatmul.mubr.f32.gmra.mrb[42].mxu1 %v4109_v59  ;;  %4541 = vmatprep.mubr.f32.mxu0 %v4114_v54  ;;  %v3323_v44 = vadd.f32 %v3322_v5, %v1305_v60 }
 0x2af   : > { %5055 = vmatprep.mubr.f32.mxu1 %v4114_v54  ;;  %15132 = vst [vmem:[#allocation79_spill] sm:$0xff] %v13285_v23  ;;  %v13287_v4 = vpack.c.bf16 %v3896_v45, %v3892_v50  ;;  %v2495_v11 = vpop.f32.mrb[194].mxu0  ;;  %v3325_v59 = vadd.f32 %v3324_v47, %v1305_v60  ;;  %v3897_v45 = vmax.f32 %v2490_v46, 0.0  ;;  %v1315_v46 = vpop.permute.xlu0 %1314 }
 0x2b0   : > { %15131 = vst [vmem:[#allocation83_spill] sm:$0xff] %v13277_v0  ;;  %v2496_v10 = vadd.f32 %v2495_v11, %v1310_v8  ;;  %v2497_v30 = vpop.f32.mrb[195].mxu0  ;;  %v3899_v5 = vmax.f32 %v3323_v44, 0.0  ;;  %v4126_v44 = vld [vmem:[%s15058_s3 + $0x328] sm:$0xff] }
 0x2b1   : > { %15133 = vst [vmem:[#allocation73_spill] sm:$0xff] %v13287_v4  ;;  %v3328_v58 = vpop.f32.mrb[194].mxu1  ;;  %4542 = vmatmul.mubr.f32.gmra.mrb[44].mxu0 %v4113_v18  ;;  %v2498_v48 = vadd.f32 %v2497_v30, %v1310_v8  ;;  %v3900_v30 = vmax.f32 %v3325_v59, 0.0 }
 0x2b2   : > { %v3329_v0 = vadd.f32 %v3328_v58, %v1310_v8  ;;  %v3330_v54 = vpop.f32.mrb[195].mxu1  ;;  %5056 = vmatmul.mubr.f32.gmra.mrb[44].mxu1 %v4113_v18  ;;  %4547 = vmatprep.mubr.f32.mxu0 %v4118_v43  ;;  %v3901_v21 = vmax.f32 %v2496_v10, 0.0  ;;  %v3898_v58 = vmax.f32 %v2492_v3, 0.0 }
 0x2b3   : > { %v3331_v50 = vadd.f32 %v3330_v54, %v1310_v8  ;;  %5061 = vmatprep.mubr.f32.mxu1 %v4118_v43  ;;  %v3902_v47 = vmax.f32 %v2498_v48, 0.0  ;;  %v2501_v11 = vpop.f32.mrb[196].mxu0  ;;  %v1320_v48 = vpop.permute.xlu1 %1319 }
 0x2b4   : > { %v3903_v60 = vmax.f32 %v3329_v0, 0.0  ;;  %v13295_v18 = vpack.c.bf16 %v3901_v21, %v3897_v45  ;;  %v2503_v23 = vpop.f32.mrb[197].mxu0  ;;  %v4121_v0 = vld [vmem:[%s15058_s3 + $0x300] sm:$0xff]  ;;  %v2502_v8 = vadd.f32 %v2501_v11, %v1315_v46 }
 0x2b5   : > { %v3904_v41 = vmax.f32 %v3331_v50, 0.0  ;;  %v3334_v4 = vpop.f32.mrb[196].mxu1  ;;  %4548 = vmatmul.mubr.f32.gmra.mrb[46].mxu0 %v4117_v38  ;;  %v13305_v3 = vpack.c.bf16 %v3902_v47, %v3898_v58  ;;  %v2504_v45 = vadd.f32 %v2503_v23, %v1315_v46  ;;  %v4125_v47 = vld [vmem:[%s15058_s3 + $0x320] sm:$0xff] }
 0x2b6   : > { %15134 = vst [vmem:[#allocation80_spill] sm:$0xff] %v13295_v18  ;;  %v13297_v10 = vpack.c.bf16 %v3903_v60, %v3899_v5  ;;  %v3336_v43 = vpop.f32.mrb[197].mxu1  ;;  %5062 = vmatmul.mubr.f32.gmra.mrb[46].mxu1 %v4117_v38  ;;  %4553 = vmatprep.mubr.f32.mxu0 %v4122_v31  ;;  %v3335_v54 = vadd.f32 %v3334_v4, %v1315_v46 }
 0x2b7   : > { %5067 = vmatprep.mubr.f32.mxu1 %v4122_v31  ;;  %15136 = vst [vmem:[#allocation88_spill] sm:$0xff] %v13305_v3  ;;  %v13307_v59 = vpack.c.bf16 %v3904_v41, %v3900_v30  ;;  %v2507_v21 = vpop.f32.mrb[198].mxu0  ;;  %v3337_v38 = vadd.f32 %v3336_v43, %v1315_v46  ;;  %v3905_v41 = vmax.f32 %v2502_v8, 0.0  ;;  %v3906_v4 = vmax.f32 %v2504_v45, 0.0  ;;  %v1325_v8 = vpop.permute.xlu0 %1324 }
 0x2b8   : > { %15135 = vst [vmem:[#allocation27_spill] sm:$0xff] %v13297_v10  ;;  %v2508_v50 = vadd.f32 %v2507_v21, %v1320_v48  ;;  %v2509_v60 = vpop.f32.mrb[199].mxu0  ;;  %v3907_v23 = vmax.f32 %v3335_v54, 0.0 }
 0x2b9   : > { %15137 = vst [vmem:[#allocation19_spill] sm:$0xff] %v13307_v59  ;;  %v3340_v5 = vpop.f32.mrb[198].mxu1  ;;  %4554 = vmatmul.mubr.f32.gmra.mrb[48].mxu0 %v4121_v0  ;;  %v2510_v11 = vadd.f32 %v2509_v60, %v1320_v48  ;;  %v3908_v60 = vmax.f32 %v3337_v38, 0.0  ;;  %v4134_v38 = vld [vmem:[%s15058_s3 + $0x368] sm:$0xff] }
 0x2ba   : > { %v3341_v10 = vadd.f32 %v3340_v5, %v1320_v48  ;;  %v3342_v31 = vpop.f32.mrb[199].mxu1  ;;  %5068 = vmatmul.mubr.f32.gmra.mrb[48].mxu1 %v4121_v0  ;;  %4559 = vmatprep.mubr.f32.mxu0 %v4126_v44  ;;  %v3909_v58 = vmax.f32 %v2508_v50, 0.0  ;;  %v4130_v5 = vld [vmem:[%s15058_s3 + $0x348] sm:$0xff] }
 0x2bb   : > { %v3343_v30 = vadd.f32 %v3342_v31, %v1320_v48  ;;  %5073 = vmatprep.mubr.f32.mxu1 %v4126_v44  ;;  %v3910_v43 = vmax.f32 %v2510_v11, 0.0  ;;  %v2513_v21 = vpop.f32.mrb[200].mxu0  ;;  %v1330_v11 = vpop.permute.xlu1 %1329 }
 0x2bc   : > { %v3911_v46 = vmax.f32 %v3341_v10, 0.0  ;;  %v13315_v0 = vpack.c.bf16 %v3909_v58, %v3905_v41  ;;  %v2515_v3 = vpop.f32.mrb[201].mxu0  ;;  %v4129_v10 = vld [vmem:[%s15058_s3 + $0x340] sm:$0xff]  ;;  %v2514_v45 = vadd.f32 %v2513_v21, %v1325_v8 }
 0x2bd   : > { %v3912_v18 = vmax.f32 %v3343_v30, 0.0  ;;  %v3346_v59 = vpop.f32.mrb[200].mxu1  ;;  %4560 = vmatmul.mubr.f32.gmra.mrb[50].mxu0 %v4125_v47  ;;  %v13319_v44 = vpack.c.bf16 %v3910_v43, %v3906_v4  ;;  %v2516_v41 = vadd.f32 %v2515_v3, %v1325_v8  ;;  %v4133_v21 = vld [vmem:[%s15058_s3 + $0x360] sm:$0xff] }
 0x2be   : > { %15138 = vst [vmem:[#allocation85_spill] sm:$0xff] %v13315_v0  ;;  %v13317_v50 = vpack.c.bf16 %v3911_v46, %v3907_v23  ;;  %v3348_v48 = vpop.f32.mrb[201].mxu1  ;;  %5074 = vmatmul.mubr.f32.gmra.mrb[50].mxu1 %v4125_v47  ;;  %4565 = vmatprep.mubr.f32.mxu0 %v4130_v5  ;;  %v3347_v31 = vadd.f32 %v3346_v59, %v1325_v8 }
 0x2bf   : > { %15140 = vst [vmem:[#allocation92_spill] sm:$0xff] %v13319_v44  ;;  %v13324_v54 = vpack.c.bf16 %v3912_v18, %v3908_v60  ;;  %5079 = vmatprep.mubr.f32.mxu1 %v4130_v5  ;;  %v2519_v58 = vpop.f32.mrb[202].mxu0  ;;  %v3349_v30 = vadd.f32 %v3348_v48, %v1325_v8  ;;  %v3913_v5 = vmax.f32 %v2514_v45, 0.0  ;;  %v3914_v59 = vmax.f32 %v2516_v41, 0.0  ;;  %v1335_v45 = vpop.permute.xlu0 %1334 }
 0x2c0   : > { %15139 = vst [vmem:[#allocation86_spill] sm:$0xff] %v13317_v50  ;;  %v2520_v23 = vadd.f32 %v2519_v58, %v1330_v11  ;;  %v2521_v4 = vpop.f32.mrb[203].mxu0  ;;  %v3915_v3 = vmax.f32 %v3347_v31, 0.0  ;;  %v4137_v31 = vld [vmem:[%s15058_s3 + $0x380] sm:$0xff] }
 0x2c1   : > { %15141 = vst [vmem:[#allocation29_spill] sm:$0xff] %v13324_v54  ;;  %v3352_v47 = vpop.f32.mrb[202].mxu1  ;;  %4566 = vmatmul.mubr.f32.gmra.mrb[52].mxu0 %v4129_v10  ;;  %v2522_v43 = vadd.f32 %v2521_v4, %v1330_v11  ;;  %v3916_v4 = vmax.f32 %v3349_v30, 0.0 }
 0x2c2   : > { %v3353_v46 = vadd.f32 %v3352_v47, %v1330_v11  ;;  %v3354_v18 = vpop.f32.mrb[203].mxu1  ;;  %5080 = vmatmul.mubr.f32.gmra.mrb[52].mxu1 %v4129_v10  ;;  %4571 = vmatprep.mubr.f32.mxu0 %v4134_v38  ;;  %v3917_v60 = vmax.f32 %v2520_v23, 0.0  ;;  %v4138_v47 = vld [vmem:[%s15058_s3 + $0x388] sm:$0xff] }
 0x2c3   : > { %v3355_v50 = vadd.f32 %v3354_v18, %v1330_v11  ;;  %5085 = vmatprep.mubr.f32.mxu1 %v4134_v38  ;;  %v3918_v48 = vmax.f32 %v2522_v43, 0.0  ;;  %v2525_v58 = vpop.f32.mrb[204].mxu0 }
 0x2c4   : > { %v3919_v8 = vmax.f32 %v3353_v46, 0.0  ;;  %v13335_v10 = vpack.c.bf16 %v3917_v60, %v3913_v5  ;;  %v2527_v44 = vpop.f32.mrb[205].mxu0  ;;  %v2526_v30 = vadd.f32 %v2525_v58, %v1335_v45  ;;  %v1340_v46 = vpop.permute.xlu1 %1339  ;;  %v4141_v58 = vld [vmem:[%s15058_s3 + $0x3a0] sm:$0xff] }
 0x2c5   : > { %v3920_v0 = vmax.f32 %v3355_v50, 0.0  ;;  %v3358_v54 = vpop.f32.mrb[204].mxu1  ;;  %4572 = vmatmul.mubr.f32.gmra.mrb[54].mxu0 %v4133_v21  ;;  %v13339_v38 = vpack.c.bf16 %v3918_v48, %v3914_v59  ;;  %v4142_v50 = vld [vmem:[%s15058_s3 + $0x3a8] sm:$0xff]  ;;  %v2528_v18 = vadd.f32 %v2527_v44, %v1335_v45 }
 0x2c6   : > { %15142 = vst [vmem:[#allocation90_spill] sm:$0xff] %v13335_v10  ;;  %v13337_v23 = vpack.c.bf16 %v3919_v8, %v3915_v3  ;;  %v3360_v11 = vpop.f32.mrb[205].mxu1  ;;  %5086 = vmatmul.mubr.f32.gmra.mrb[54].mxu1 %v4133_v21  ;;  %4577 = vmatprep.mubr.f32.mxu0 %v4138_v47  ;;  %v3359_v43 = vadd.f32 %v3358_v54, %v1335_v45 }
 0x2c7   : > { %15144 = vst [vmem:[#allocation91_spill] sm:$0xff] %v13339_v38  ;;  %v13344_v41 = vpack.c.bf16 %v3920_v0, %v3916_v4  ;;  %5091 = vmatprep.mubr.f32.mxu1 %v4138_v47  ;;  %v2531_v5 = vpop.f32.mrb[206].mxu0  ;;  %v3361_v60 = vadd.f32 %v3360_v11, %v1335_v45  ;;  %v3921_v47 = vmax.f32 %v2526_v30, 0.0  ;;  %v3922_v54 = vmax.f32 %v2528_v18, 0.0  ;;  %v1345_v30 = vpop.permute.xlu0 %1344 }
 0x2c8   : > { %15143 = vst [vmem:[#allocation75_spill] sm:$0xff] %v13337_v23  ;;  %v2532_v3 = vadd.f32 %v2531_v5, %v1340_v46  ;;  %v2533_v59 = vpop.f32.mrb[207].mxu0  ;;  %v3923_v44 = vmax.f32 %v3359_v43, 0.0  ;;  %v4145_v43 = vld [vmem:[%s15058_s3 + $0x3c0] sm:$0xff] }
 0x2c9   : > { %15145 = vst [vmem:[#allocation93_spill] sm:$0xff] %v13344_v41  ;;  %v3364_v21 = vpop.f32.mrb[206].mxu1  ;;  %4578 = vmatmul.mubr.f32.gmra.mrb[56].mxu0 %v4137_v31  ;;  %v2534_v48 = vadd.f32 %v2533_v59, %v1340_v46  ;;  %v3924_v59 = vmax.f32 %v3361_v60, 0.0 }
 0x2ca   : > { %v3365_v8 = vadd.f32 %v3364_v21, %v1340_v46  ;;  %v3366_v0 = vpop.f32.mrb[207].mxu1  ;;  %5092 = vmatmul.mubr.f32.gmra.mrb[56].mxu1 %v4137_v31  ;;  %4583 = vmatprep.mubr.f32.mxu0 %v4142_v50  ;;  %v3925_v4 = vmax.f32 %v2532_v3, 0.0  ;;  %v4146_v21 = vld [vmem:[%s15058_s3 + $0x3c8] sm:$0xff] }
 0x2cb   : > { %v3367_v23 = vadd.f32 %v3366_v0, %v1340_v46  ;;  %5097 = vmatprep.mubr.f32.mxu1 %v4142_v50  ;;  %v3926_v11 = vmax.f32 %v2534_v48, 0.0  ;;  %v2537_v5 = vpop.f32.mrb[208].mxu0 }
 0x2cc   : > { %v3927_v45 = vmax.f32 %v3365_v8, 0.0  ;;  %v13355_v31 = vpack.c.bf16 %v3925_v4, %v3921_v47  ;;  %v2539_v38 = vpop.f32.mrb[209].mxu0  ;;  %v2538_v60 = vadd.f32 %v2537_v5, %v1345_v30  ;;  %v1350_v8 = vpop.permute.xlu1 %1349  ;;  %v4149_v5 = vld [vmem:[%s15058_s3 + $0x3e0] sm:$0xff] }
 0x2cd   : > { %v3928_v10 = vmax.f32 %v3367_v23, 0.0  ;;  %v3370_v41 = vpop.f32.mrb[208].mxu1  ;;  %4584 = vmatmul.mubr.f32.gmra.mrb[58].mxu0 %v4141_v58  ;;  %v13359_v50 = vpack.c.bf16 %v3926_v11, %v3922_v54  ;;  %v4150_v23 = vld [vmem:[%s15058_s3 + $0x3e8] sm:$0xff]  ;;  %v2540_v0 = vadd.f32 %v2539_v38, %v1345_v30 }
 0x2ce   : > { %15146 = vst [vmem:[#allocation31_spill] sm:$0xff] %v13355_v31  ;;  %v13357_v3 = vpack.c.bf16 %v3927_v45, %v3923_v44  ;;  %v3372_v46 = vpop.f32.mrb[209].mxu1  ;;  %5098 = vmatmul.mubr.f32.gmra.mrb[58].mxu1 %v4141_v58  ;;  %4589 = vmatprep.mubr.f32.mxu0 %v4146_v21  ;;  %v3371_v48 = vadd.f32 %v3370_v41, %v1345_v30 }
 0x2cf   : > { %15148 = vst [vmem:[#allocation28_spill] sm:$0xff] %v13359_v50  ;;  %v13364_v18 = vpack.c.bf16 %v3928_v10, %v3924_v59  ;;  %5103 = vmatprep.mubr.f32.mxu1 %v4146_v21  ;;  %v2543_v47 = vpop.f32.mrb[210].mxu0  ;;  %v3373_v4 = vadd.f32 %v3372_v46, %v1345_v30  ;;  %v3929_v21 = vmax.f32 %v2538_v60, 0.0  ;;  %v3930_v41 = vmax.f32 %v2540_v0, 0.0  ;;  %v1355_v60 = vpop.permute.xlu0 %1354 }
 0x2d0   : > { %15147 = vst [vmem:[#allocation21_spill] sm:$0xff] %v13357_v3  ;;  %v2544_v44 = vadd.f32 %v2543_v47, %v1350_v8  ;;  %v2545_v54 = vpop.f32.mrb[211].mxu0  ;;  %v3931_v38 = vmax.f32 %v3371_v48, 0.0  ;;  %v4027_v48 = vld [vmem:[%s15058_s3 + $0x10] sm:$0xff] }
 0x2d1   : > { %15149 = vst [vmem:[#allocation94_spill] sm:$0xff] %v13364_v18  ;;  %v3376_v58 = vpop.f32.mrb[210].mxu1  ;;  %4590 = vmatmul.mubr.f32.gmra.mrb[60].mxu0 %v4145_v43  ;;  %v2546_v11 = vadd.f32 %v2545_v54, %v1350_v8  ;;  %v3932_v54 = vmax.f32 %v3373_v4, 0.0 }
 0x2d2   : > { %v3377_v45 = vadd.f32 %v3376_v58, %v1350_v8  ;;  %v3378_v10 = vpop.f32.mrb[211].mxu1  ;;  %5104 = vmatmul.mubr.f32.gmra.mrb[60].mxu1 %v4145_v43  ;;  %4595 = vmatprep.mubr.f32.mxu0 %v4150_v23  ;;  %v3933_v59 = vmax.f32 %v2544_v44, 0.0  ;;  %v4028_v58 = vld [vmem:[%s15058_s3 + $0x18] sm:$0xff] }
 0x2d3   : > { %v3379_v3 = vadd.f32 %v3378_v10, %v1350_v8  ;;  %5109 = vmatprep.mubr.f32.mxu1 %v4150_v23  ;;  %v3934_v46 = vmax.f32 %v2546_v11, 0.0  ;;  %v2549_v47 = vpop.f32.mrb[212].mxu0 }
 0x2d4   : > { %v3935_v30 = vmax.f32 %v3377_v45, 0.0  ;;  %v13375_v43 = vpack.c.bf16 %v3933_v59, %v3929_v21  ;;  %v2551_v50 = vpop.f32.mrb[213].mxu0  ;;  %v2550_v4 = vadd.f32 %v2549_v47, %v1355_v60  ;;  %v1360_v45 = vpop.permute.xlu1 %1359  ;;  %v4031_v47 = vld [vmem:[%s15058_s3 + $0x30] sm:$0xff] }
 0x2d5   : > { %v3936_v31 = vmax.f32 %v3379_v3, 0.0  ;;  %v3382_v18 = vpop.f32.mrb[212].mxu1  ;;  %4596 = vmatmul.mubr.f32.gmra.mrb[62].mxu0 %v4149_v5  ;;  %v13379_v23 = vpack.c.bf16 %v3934_v46, %v3930_v41  ;;  %v4032_v3 = vld [vmem:[%s15058_s3 + $0x38] sm:$0xff]  ;;  %v2552_v10 = vadd.f32 %v2551_v50, %v1355_v60 }
 0x2d6   : > { %15150 = vst [vmem:[#allocation95_spill] sm:$0xff] %v13375_v43  ;;  %v13377_v44 = vpack.c.bf16 %v3935_v30, %v3931_v38  ;;  %v3384_v8 = vpop.f32.mrb[213].mxu1  ;;  %5110 = vmatmul.mubr.f32.gmra.mrb[62].mxu1 %v4149_v5  ;;  %4666 = vmatprep.mubr.f32.mxu0 %v4028_v58  ;;  %v3383_v11 = vadd.f32 %v3382_v18, %v1355_v60 }
 0x2d7   : > { %15152 = vst [vmem:[#allocation23_spill] sm:$0xff] %v13379_v23  ;;  %v13384_v0 = vpack.c.bf16 %v3936_v31, %v3932_v54  ;;  %5180 = vmatprep.mubr.f32.mxu1 %v4028_v58  ;;  %v2555_v21 = vpop.f32.mrb[214].mxu0  ;;  %v3385_v59 = vadd.f32 %v3384_v8, %v1355_v60  ;;  %v3937_v58 = vmax.f32 %v2550_v4, 0.0  ;;  %v3938_v18 = vmax.f32 %v2552_v10, 0.0  ;;  %v1365_v4 = vpop.permute.xlu0 %1364 }
 0x2d8   : > { %15151 = vst [vmem:[#allocation30_spill] sm:$0xff] %v13377_v44  ;;  %v2556_v38 = vadd.f32 %v2555_v21, %v1360_v45  ;;  %v2557_v41 = vpop.f32.mrb[215].mxu0  ;;  %v3939_v50 = vmax.f32 %v3383_v11, 0.0  ;;  %v4035_v11 = vld [vmem:[%s15058_s3 + $0x50] sm:$0xff] }
 0x2d9   : > { %15153 = vst [vmem:[#allocation96_spill] sm:$0xff] %v13384_v0  ;;  %v3388_v5 = vpop.f32.mrb[214].mxu1  ;;  %4667 = vmatmul.mubr.f32.vlgmr.msra.gmra.mrb[0].mxu0 %v4027_v48  ;;  %v2558_v46 = vadd.f32 %v2557_v41, %v1360_v45  ;;  %v3940_v41 = vmax.f32 %v3385_v59, 0.0 }
 0x2da   : > { %v3389_v30 = vadd.f32 %v3388_v5, %v1360_v45  ;;  %v3390_v31 = vpop.f32.mrb[215].mxu1  ;;  %5181 = vmatmul.mubr.f32.vlgmr.msra.gmra.mrb[0].mxu1 %v4027_v48  ;;  %4672 = vmatprep.mubr.f32.mxu0 %v4032_v3  ;;  %v3941_v54 = vmax.f32 %v2556_v38, 0.0  ;;  %v4036_v5 = vld [vmem:[%s15058_s3 + $0x58] sm:$0xff] }
 0x2db   : > { %v3391_v44 = vadd.f32 %v3390_v31, %v1360_v45  ;;  %5186 = vmatprep.mubr.f32.mxu1 %v4032_v3  ;;  %v3942_v8 = vmax.f32 %v2558_v46, 0.0  ;;  %v2561_v21 = vpop.f32.mrb[216].mxu0 }
 0x2dc   : > { %v3943_v60 = vmax.f32 %v3389_v30, 0.0  ;;  %v13395_v48 = vpack.c.bf16 %v3941_v54, %v3937_v58  ;;  %v2563_v23 = vpop.f32.mrb[217].mxu0  ;;  %v2562_v59 = vadd.f32 %v2561_v21, %v1365_v4  ;;  %v1370_v30 = vpop.permute.xlu1 %1369  ;;  %v4039_v21 = vld [vmem:[%s15058_s3 + $0x70] sm:$0xff] }
 0x2dd   : > { %v3944_v43 = vmax.f32 %v3391_v44, 0.0  ;;  %v3394_v0 = vpop.f32.mrb[216].mxu1  ;;  %4673 = vmatmul.mubr.f32.gmra.mrb[2].mxu0 %v4031_v47  ;;  %v13399_v3 = vpack.c.bf16 %v3942_v8, %v3938_v18  ;;  %v4040_v44 = vld [vmem:[%s15058_s3 + $0x78] sm:$0xff]  ;;  %v2564_v31 = vadd.f32 %v2563_v23, %v1365_v4 }
 0x2de   : > { %15154 = vst [vmem:[#allocation78_spill] sm:$0xff] %v13395_v48  ;;  %v13397_v38 = vpack.c.bf16 %v3943_v60, %v3939_v50  ;;  %v3396_v45 = vpop.f32.mrb[217].mxu1  ;;  %5187 = vmatmul.mubr.f32.gmra.mrb[2].mxu1 %v4031_v47  ;;  %4678 = vmatprep.mubr.f32.mxu0 %v4036_v5  ;;  %v3395_v46 = vadd.f32 %v3394_v0, %v1365_v4 }
 0x2df   : > { %15156 = vst [vmem:[#allocation97_spill] sm:$0xff] %v13399_v3  ;;  %v13404_v10 = vpack.c.bf16 %v3944_v43, %v3940_v41  ;;  %5192 = vmatprep.mubr.f32.mxu1 %v4036_v5  ;;  %v2567_v58 = vpop.f32.mrb[218].mxu0  ;;  %v3397_v54 = vadd.f32 %v3396_v45, %v1365_v4  ;;  %v3945_v5 = vmax.f32 %v2562_v59, 0.0  ;;  %v3946_v0 = vmax.f32 %v2564_v31, 0.0  ;;  %v1375_v59 = vpop.permute.xlu0 %1374 }
 0x2e0   : > { %15155 = vst [vmem:[#allocation32_spill] sm:$0xff] %v13397_v38  ;;  %v2568_v50 = vadd.f32 %v2567_v58, %v1370_v30  ;;  %v2569_v18 = vpop.f32.mrb[219].mxu0  ;;  %v3947_v23 = vmax.f32 %v3395_v46, 0.0  ;;  %v4043_v46 = vld [vmem:[%s15058_s3 + $0x90] sm:$0xff] }
 0x2e1   : > { %15157 = vst [vmem:[#allocation98_spill] sm:$0xff] %v13404_v10  ;;  %v3400_v47 = vpop.f32.mrb[218].mxu1  ;;  %4679 = vmatmul.mubr.f32.gmra.mrb[4].mxu0 %v4035_v11  ;;  %v2570_v8 = vadd.f32 %v2569_v18, %v1370_v30  ;;  %v3948_v18 = vmax.f32 %v3397_v54, 0.0 }
 0x2e2   : > { %v3401_v60 = vadd.f32 %v3400_v47, %v1370_v30  ;;  %v3402_v43 = vpop.f32.mrb[219].mxu1  ;;  %5193 = vmatmul.mubr.f32.gmra.mrb[4].mxu1 %v4035_v11  ;;  %4684 = vmatprep.mubr.f32.mxu0 %v4040_v44  ;;  %v3949_v41 = vmax.f32 %v2568_v50, 0.0  ;;  %v4044_v47 = vld [vmem:[%s15058_s3 + $0x98] sm:$0xff] }
 0x2e3   : > { %v3403_v38 = vadd.f32 %v3402_v43, %v1370_v30  ;;  %5198 = vmatprep.mubr.f32.mxu1 %v4040_v44  ;;  %v3950_v45 = vmax.f32 %v2570_v8, 0.0  ;;  %v2573_v58 = vpop.f32.mrb[220].mxu0 }
 0x2e4   : > { %v3951_v4 = vmax.f32 %v3401_v60, 0.0  ;;  %v13415_v11 = vpack.c.bf16 %v3949_v41, %v3945_v5  ;;  %v2575_v3 = vpop.f32.mrb[221].mxu0  ;;  %v2574_v54 = vadd.f32 %v2573_v58, %v1375_v59  ;;  %v1380_v60 = vpop.permute.xlu1 %1379  ;;  %v4047_v58 = vld [vmem:[%s15058_s3 + $0xb0] sm:$0xff] }
 0x2e5   : > { %v3952_v48 = vmax.f32 %v3403_v38, 0.0  ;;  %v3406_v10 = vpop.f32.mrb[220].mxu1  ;;  %4685 = vmatmul.mubr.f32.gmra.mrb[6].mxu0 %v4039_v21  ;;  %v13419_v44 = vpack.c.bf16 %v3950_v45, %v3946_v0  ;;  %v4048_v38 = vld [vmem:[%s15058_s3 + $0xb8] sm:$0xff]  ;;  %v2576_v43 = vadd.f32 %v2575_v3, %v1375_v59 }
 0x2e6   : > { %15158 = vst [vmem:[#allocation84_spill] sm:$0xff] %v13415_v11  ;;  %v13417_v50 = vpack.c.bf16 %v3951_v4, %v3947_v23  ;;  %v3408_v30 = vpop.f32.mrb[221].mxu1  ;;  %5199 = vmatmul.mubr.f32.gmra.mrb[6].mxu1 %v4039_v21  ;;  %4690 = vmatprep.mubr.f32.mxu0 %v4044_v47  ;;  %v3407_v8 = vadd.f32 %v3406_v10, %v1375_v59 }
 0x2e7   : > { %15160 = vst [vmem:[#allocation81_spill] sm:$0xff] %v13419_v44  ;;  %v13424_v31 = vpack.c.bf16 %v3952_v48, %v3948_v18  ;;  %5204 = vmatprep.mubr.f32.mxu1 %v4044_v47  ;;  %v2579_v5 = vpop.f32.mrb[222].mxu0  ;;  %v3409_v41 = vadd.f32 %v3408_v30, %v1375_v59  ;;  %v3953_v47 = vmax.f32 %v2574_v54, 0.0  ;;  %v3954_v10 = vmax.f32 %v2576_v43, 0.0  ;;  %v1385_v54 = vpop.permute.xlu0 %1384 }
 0x2e8   : > { %15159 = vst [vmem:[#allocation99_spill] sm:$0xff] %v13417_v50  ;;  %v2580_v23 = vadd.f32 %v2579_v5, %v1380_v60  ;;  %v2581_v0 = vpop.f32.mrb[223].mxu0  ;;  %v3955_v3 = vmax.f32 %v3407_v8, 0.0  ;;  %v4051_v8 = vld [vmem:[%s15058_s3 + $0xd0] sm:$0xff] }
 0x2e9   : > { %15161 = vst [vmem:[#allocation87_spill] sm:$0xff] %v13424_v31  ;;  %v3412_v21 = vpop.f32.mrb[222].mxu1  ;;  %4691 = vmatmul.mubr.f32.gmra.mrb[8].mxu0 %v4043_v46  ;;  %v2582_v45 = vadd.f32 %v2581_v0, %v1380_v60  ;;  %v3956_v0 = vmax.f32 %v3409_v41, 0.0 }
 0x2ea   : > { %v3413_v4 = vadd.f32 %v3412_v21, %v1380_v60  ;;  %v3414_v48 = vpop.f32.mrb[223].mxu1  ;;  %5205 = vmatmul.mubr.f32.gmra.mrb[8].mxu1 %v4043_v46  ;;  %4696 = vmatprep.mubr.f32.mxu0 %v4048_v38  ;;  %v3957_v18 = vmax.f32 %v2580_v23, 0.0  ;;  %v4052_v21 = vld [vmem:[%s15058_s3 + $0xd8] sm:$0xff] }
 0x2eb   : > { %v3415_v50 = vadd.f32 %v3414_v48, %v1380_v60  ;;  %5210 = vmatprep.mubr.f32.mxu1 %v4048_v38  ;;  %v3958_v30 = vmax.f32 %v2582_v45, 0.0  ;;  %v2585_v5 = vpop.f32.mrb[224].mxu0 }
 0x2ec   : > { %v3959_v59 = vmax.f32 %v3413_v4, 0.0  ;;  %v13435_v46 = vpack.c.bf16 %v3957_v18, %v3953_v47  ;;  %v2587_v44 = vpop.f32.mrb[225].mxu0  ;;  %v2586_v41 = vadd.f32 %v2585_v5, %v1385_v54  ;;  %v1390_v4 = vpop.permute.xlu1 %1389  ;;  %v4055_v5 = vld [vmem:[%s15058_s3 + $0xf0] sm:$0xff] }
 0x2ed   : > { %v3960_v11 = vmax.f32 %v3415_v50, 0.0  ;;  %v3418_v31 = vpop.f32.mrb[224].mxu1  ;;  %4697 = vmatmul.mubr.f32.gmra.mrb[10].mxu0 %v4047_v58  ;;  %v13439_v38 = vpack.c.bf16 %v3958_v30, %v3954_v10  ;;  %v4056_v50 = vld [vmem:[%s15058_s3 + $0xf8] sm:$0xff]  ;;  %v2588_v48 = vadd.f32 %v2587_v44, %v1385_v54 }
 0x2ee   : > { %15162 = vst [vmem:[#allocation25_spill] sm:$0xff] %v13435_v46  ;;  %v13437_v23 = vpack.c.bf16 %v3959_v59, %v3955_v3  ;;  %v3420_v60 = vpop.f32.mrb[225].mxu1  ;;  %5211 = vmatmul.mubr.f32.gmra.mrb[10].mxu1 %v4047_v58  ;;  %4702 = vmatprep.mubr.f32.mxu0 %v4052_v21  ;;  %v3419_v45 = vadd.f32 %v3418_v31, %v1385_v54 }
 0x2ef   : > { %15164 = vst [vmem:[#allocation26_spill] sm:$0xff] %v13439_v38  ;;  %v13444_v43 = vpack.c.bf16 %v3960_v11, %v3956_v0  ;;  %5216 = vmatprep.mubr.f32.mxu1 %v4052_v21  ;;  %v2591_v47 = vpop.f32.mrb[226].mxu0  ;;  %v3421_v18 = vadd.f32 %v3420_v60, %v1385_v54  ;;  %v3961_v21 = vmax.f32 %v2586_v41, 0.0  ;;  %v3962_v31 = vmax.f32 %v2588_v48, 0.0  ;;  %v1395_v41 = vpop.permute.xlu0 %1394 }
 0x2f0   : > { %15163 = vst [vmem:[#allocation89_spill] sm:$0xff] %v13437_v23  ;;  %v2592_v3 = vadd.f32 %v2591_v47, %v1390_v4  ;;  %v2593_v10 = vpop.f32.mrb[227].mxu0  ;;  %v3963_v44 = vmax.f32 %v3419_v45, 0.0  ;;  %v4059_v45 = vld [vmem:[%s15058_s3 + $0x110] sm:$0xff] }
 0x2f1   : > { %15165 = vst [vmem:[#allocation107_spill] sm:$0xff] %v13444_v43  ;;  %v3424_v58 = vpop.f32.mrb[226].mxu1  ;;  %4703 = vmatmul.mubr.f32.gmra.mrb[12].mxu0 %v4051_v8  ;;  %v2594_v30 = vadd.f32 %v2593_v10, %v1390_v4  ;;  %v3964_v10 = vmax.f32 %v3421_v18, 0.0 }
 0x2f2   : > { %v3425_v59 = vadd.f32 %v3424_v58, %v1390_v4  ;;  %v3426_v11 = vpop.f32.mrb[227].mxu1  ;;  %5217 = vmatmul.mubr.f32.gmra.mrb[12].mxu1 %v4051_v8  ;;  %4708 = vmatprep.mubr.f32.mxu0 %v4056_v50  ;;  %v3965_v0 = vmax.f32 %v2592_v3, 0.0  ;;  %v4060_v58 = vld [vmem:[%s15058_s3 + $0x118] sm:$0xff] }
 0x2f3   : > { %v3427_v23 = vadd.f32 %v3426_v11, %v1390_v4  ;;  %5222 = vmatprep.mubr.f32.mxu1 %v4056_v50  ;;  %v3966_v60 = vmax.f32 %v2594_v30, 0.0  ;;  %v2597_v47 = vpop.f32.mrb[228].mxu0 }
 0x2f4   : > { %v3967_v54 = vmax.f32 %v3425_v59, 0.0  ;;  %v13455_v8 = vpack.c.bf16 %v3965_v0, %v3961_v21  ;;  %v2599_v38 = vpop.f32.mrb[229].mxu0  ;;  %v2598_v18 = vadd.f32 %v2597_v47, %v1395_v41  ;;  %v1400_v59 = vpop.permute.xlu1 %1399  ;;  %v4063_v47 = vld [vmem:[%s15058_s3 + $0x130] sm:$0xff] }
 0x2f5   : > { %v3968_v46 = vmax.f32 %v3427_v23, 0.0  ;;  %v3430_v43 = vpop.f32.mrb[228].mxu1  ;;  %4709 = vmatmul.mubr.f32.gmra.mrb[14].mxu0 %v4055_v5  ;;  %v13459_v50 = vpack.c.bf16 %v3966_v60, %v3962_v31  ;;  %v4064_v23 = vld [vmem:[%s15058_s3 + $0x138] sm:$0xff]  ;;  %v2600_v11 = vadd.f32 %v2599_v38, %v1395_v41 }
 0x2f6   : > { %15166 = vst [vmem:[#allocation108_spill] sm:$0xff] %v13455_v8  ;;  %v13457_v3 = vpack.c.bf16 %v3967_v54, %v3963_v44  ;;  %v3432_v4 = vpop.f32.mrb[229].mxu1  ;;  %5223 = vmatmul.mubr.f32.gmra.mrb[14].mxu1 %v4055_v5  ;;  %4714 = vmatprep.mubr.f32.mxu0 %v4060_v58  ;;  %v3431_v30 = vadd.f32 %v3430_v43, %v1395_v41 }
 0x2f7   : > { %15168 = vst [vmem:[#allocation110_spill] sm:$0xff] %v13459_v50  ;;  %v13464_v48 = vpack.c.bf16 %v3968_v46, %v3964_v10  ;;  %5228 = vmatprep.mubr.f32.mxu1 %v4060_v58  ;;  %v2603_v21 = vpop.f32.mrb[230].mxu0  ;;  %v3433_v0 = vadd.f32 %v3432_v4, %v1395_v41  ;;  %v3969_v58 = vmax.f32 %v2598_v18, 0.0  ;;  %v3970_v43 = vmax.f32 %v2600_v11, 0.0  ;;  %v1405_v18 = vpop.permute.xlu0 %1404 }
 0x2f8   : > { %15167 = vst [vmem:[#allocation109_spill] sm:$0xff] %v13457_v3  ;;  %v2604_v44 = vadd.f32 %v2603_v21, %v1400_v59  ;;  %v2605_v31 = vpop.f32.mrb[231].mxu0  ;;  %v3971_v38 = vmax.f32 %v3431_v30, 0.0  ;;  %v4067_v30 = vld [vmem:[%s15058_s3 + $0x150] sm:$0xff] }
 0x2f9   : > { %15169 = vst [vmem:[#allocation111_spill] sm:$0xff] %v13464_v48  ;;  %v3436_v5 = vpop.f32.mrb[230].mxu1  ;;  %4715 = vmatmul.mubr.f32.gmra.mrb[16].mxu0 %v4059_v45  ;;  %v2606_v60 = vadd.f32 %v2605_v31, %v1400_v59  ;;  %v3972_v31 = vmax.f32 %v3433_v0, 0.0 }
 0x2fa   : > { %v3437_v54 = vadd.f32 %v3436_v5, %v1400_v59  ;;  %v3438_v46 = vpop.f32.mrb[231].mxu1  ;;  %5229 = vmatmul.mubr.f32.gmra.mrb[16].mxu1 %v4059_v45  ;;  %4720 = vmatprep.mubr.f32.mxu0 %v4064_v23  ;;  %v3973_v10 = vmax.f32 %v2604_v44, 0.0  ;;  %v4068_v5 = vld [vmem:[%s15058_s3 + $0x158] sm:$0xff] }
 0x2fb   : > { %v3439_v3 = vadd.f32 %v3438_v46, %v1400_v59  ;;  %5234 = vmatprep.mubr.f32.mxu1 %v4064_v23  ;;  %v3974_v4 = vmax.f32 %v2606_v60, 0.0  ;;  %v2609_v21 = vpop.f32.mrb[232].mxu0 }
 0x2fc   : > { %v3975_v41 = vmax.f32 %v3437_v54, 0.0  ;;  %v13475_v45 = vpack.c.bf16 %v3973_v10, %v3969_v58  ;;  %v2611_v50 = vpop.f32.mrb[233].mxu0  ;;  %v2610_v0 = vadd.f32 %v2609_v21, %v1405_v18  ;;  %v1410_v54 = vpop.permute.xlu1 %1409  ;;  %v4071_v21 = vld [vmem:[%s15058_s3 + $0x170] sm:$0xff] }
 0x2fd   : > { %v3976_v8 = vmax.f32 %v3439_v3, 0.0  ;;  %v3442_v48 = vpop.f32.mrb[232].mxu1  ;;  %4721 = vmatmul.mubr.f32.gmra.mrb[18].mxu0 %v4063_v47  ;;  %v13479_v23 = vpack.c.bf16 %v3974_v4, %v3970_v43  ;;  %v4072_v3 = vld [vmem:[%s15058_s3 + $0x178] sm:$0xff]  ;;  %v2612_v46 = vadd.f32 %v2611_v50, %v1405_v18 }
 0x2fe   : > { %15170 = vst [vmem:[#allocation112_spill] sm:$0xff] %v13475_v45  ;;  %v13477_v44 = vpack.c.bf16 %v3975_v41, %v3971_v38  ;;  %v3444_v59 = vpop.f32.mrb[233].mxu1  ;;  %5235 = vmatmul.mubr.f32.gmra.mrb[18].mxu1 %v4063_v47  ;;  %4726 = vmatprep.mubr.f32.mxu0 %v4068_v5  ;;  %v3443_v60 = vadd.f32 %v3442_v48, %v1405_v18 }
 0x2ff   : > { %15172 = vst [vmem:[#allocation114_spill] sm:$0xff] %v13479_v23  ;;  %v13484_v11 = vpack.c.bf16 %v3976_v8, %v3972_v31  ;;  %5240 = vmatprep.mubr.f32.mxu1 %v4068_v5  ;;  %v2615_v58 = vpop.f32.mrb[234].mxu0  ;;  %v3445_v10 = vadd.f32 %v3444_v59, %v1405_v18  ;;  %v3977_v5 = vmax.f32 %v2610_v0, 0.0  ;;  %v3978_v48 = vmax.f32 %v2612_v46, 0.0  ;;  %v1415_v0 = vpop.permute.xlu0 %1414 }
 0x300   : > { %15171 = vst [vmem:[#allocation113_spill] sm:$0xff] %v13477_v44  ;;  %v2616_v38 = vadd.f32 %v2615_v58, %v1410_v54  ;;  %v2617_v43 = vpop.f32.mrb[235].mxu0  ;;  %v3979_v50 = vmax.f32 %v3443_v60, 0.0  ;;  %v4075_v60 = vld [vmem:[%s15058_s3 + $0x190] sm:$0xff] }
 0x301   : > { %15173 = vst [vmem:[#allocation115_spill] sm:$0xff] %v13484_v11  ;;  %v3448_v47 = vpop.f32.mrb[234].mxu1  ;;  %4727 = vmatmul.mubr.f32.gmra.mrb[20].mxu0 %v4067_v30  ;;  %v2618_v4 = vadd.f32 %v2617_v43, %v1410_v54  ;;  %v3980_v43 = vmax.f32 %v3445_v10, 0.0 }
 0x302   : > { %v3449_v41 = vadd.f32 %v3448_v47, %v1410_v54  ;;  %v3450_v8 = vpop.f32.mrb[235].mxu1  ;;  %5241 = vmatmul.mubr.f32.gmra.mrb[20].mxu1 %v4067_v30  ;;  %4732 = vmatprep.mubr.f32.mxu0 %v4072_v3  ;;  %v3981_v31 = vmax.f32 %v2616_v38, 0.0  ;;  %v4076_v47 = vld [vmem:[%s15058_s3 + $0x198] sm:$0xff] }
 0x303   : > { %v3451_v44 = vadd.f32 %v3450_v8, %v1410_v54  ;;  %5246 = vmatprep.mubr.f32.mxu1 %v4072_v3  ;;  %v3982_v59 = vmax.f32 %v2618_v4, 0.0  ;;  %v2621_v58 = vpop.f32.mrb[236].mxu0 }
 0x304   : > { %v3983_v18 = vmax.f32 %v3449_v41, 0.0  ;;  %v13495_v30 = vpack.c.bf16 %v3981_v31, %v3977_v5  ;;  %v2623_v23 = vpop.f32.mrb[237].mxu0  ;;  %v2622_v10 = vadd.f32 %v2621_v58, %v1415_v0  ;;  %v1420_v41 = vpop.permute.xlu1 %1419  ;;  %v4079_v58 = vld [vmem:[%s15058_s3 + $0x1b0] sm:$0xff] }
 0x305   : > { %v3984_v45 = vmax.f32 %v3451_v44, 0.0  ;;  %v3454_v11 = vpop.f32.mrb[236].mxu1  ;;  %4733 = vmatmul.mubr.f32.gmra.mrb[22].mxu0 %v4071_v21  ;;  %v13499_v3 = vpack.c.bf16 %v3982_v59, %v3978_v48  ;;  %v4080_v44 = vld [vmem:[%s15058_s3 + $0x1b8] sm:$0xff]  ;;  %v2624_v8 = vadd.f32 %v2623_v23, %v1415_v0 }
 0x306   : > { %15174 = vst [vmem:[#allocation116_spill] sm:$0xff] %v13495_v30  ;;  %v13497_v38 = vpack.c.bf16 %v3983_v18, %v3979_v50  ;;  %v3456_v54 = vpop.f32.mrb[237].mxu1  ;;  %5247 = vmatmul.mubr.f32.gmra.mrb[22].mxu1 %v4071_v21  ;;  %4738 = vmatprep.mubr.f32.mxu0 %v4076_v47  ;;  %v3455_v4 = vadd.f32 %v3454_v11, %v1415_v0 }
 0x307   : > { %15176 = vst [vmem:[#allocation118_spill] sm:$0xff] %v13499_v3  ;;  %v13504_v46 = vpack.c.bf16 %v3984_v45, %v3980_v43  ;;  %5252 = vmatprep.mubr.f32.mxu1 %v4076_v47  ;;  %v2627_v5 = vpop.f32.mrb[238].mxu0  ;;  %v3457_v31 = vadd.f32 %v3456_v54, %v1415_v0  ;;  %v3985_v47 = vmax.f32 %v2622_v10, 0.0  ;;  %v3986_v11 = vmax.f32 %v2624_v8, 0.0  ;;  %v1425_v10 = vpop.permute.xlu0 %1424 }
 0x308   : > { %15175 = vst [vmem:[#allocation117_spill] sm:$0xff] %v13497_v38  ;;  %v2628_v50 = vadd.f32 %v2627_v5, %v1420_v41  ;;  %v2629_v48 = vpop.f32.mrb[239].mxu0  ;;  %v3987_v23 = vmax.f32 %v3455_v4, 0.0  ;;  %v4083_v4 = vld [vmem:[%s15058_s3 + $0x1d0] sm:$0xff] }
 0x309   : > { %15177 = vst [vmem:[#allocation119_spill] sm:$0xff] %v13504_v46  ;;  %v3460_v21 = vpop.f32.mrb[238].mxu1  ;;  %4739 = vmatmul.mubr.f32.gmra.mrb[24].mxu0 %v4075_v60  ;;  %v2630_v59 = vadd.f32 %v2629_v48, %v1420_v41  ;;  %v3988_v48 = vmax.f32 %v3457_v31, 0.0 }
 0x30a   : > { %v3461_v18 = vadd.f32 %v3460_v21, %v1420_v41  ;;  %v3462_v45 = vpop.f32.mrb[239].mxu1  ;;  %5253 = vmatmul.mubr.f32.gmra.mrb[24].mxu1 %v4075_v60  ;;  %4744 = vmatprep.mubr.f32.mxu0 %v4080_v44  ;;  %v3989_v43 = vmax.f32 %v2628_v50, 0.0  ;;  %v4084_v21 = vld [vmem:[%s15058_s3 + $0x1d8] sm:$0xff] }
 0x30b   : > { %v3463_v38 = vadd.f32 %v3462_v45, %v1420_v41  ;;  %5258 = vmatprep.mubr.f32.mxu1 %v4080_v44  ;;  %v3990_v54 = vmax.f32 %v2630_v59, 0.0  ;;  %v2633_v5 = vpop.f32.mrb[240].mxu0 }
 0x30c   : > { %v3991_v0 = vmax.f32 %v3461_v18, 0.0  ;;  %v13515_v60 = vpack.c.bf16 %v3989_v43, %v3985_v47  ;;  %v2635_v3 = vpop.f32.mrb[241].mxu0  ;;  %v2634_v31 = vadd.f32 %v2633_v5, %v1425_v10  ;;  %v1430_v18 = vpop.permute.xlu1 %1429  ;;  %v4087_v5 = vld [vmem:[%s15058_s3 + $0x1f0] sm:$0xff] }
 0x30d   : > { %v3992_v30 = vmax.f32 %v3463_v38, 0.0  ;;  %v3466_v46 = vpop.f32.mrb[240].mxu1  ;;  %4745 = vmatmul.mubr.f32.gmra.mrb[26].mxu0 %v4079_v58  ;;  %v13519_v44 = vpack.c.bf16 %v3990_v54, %v3986_v11  ;;  %v4088_v38 = vld [vmem:[%s15058_s3 + $0x1f8] sm:$0xff]  ;;  %v2636_v45 = vadd.f32 %v2635_v3, %v1425_v10 }
 0x30e   : > { %15178 = vst [vmem:[#allocation120_spill] sm:$0xff] %v13515_v60  ;;  %v13517_v50 = vpack.c.bf16 %v3991_v0, %v3987_v23  ;;  %v3468_v41 = vpop.f32.mrb[241].mxu1  ;;  %5259 = vmatmul.mubr.f32.gmra.mrb[26].mxu1 %v4079_v58  ;;  %4750 = vmatprep.mubr.f32.mxu0 %v4084_v21  ;;  %v3467_v59 = vadd.f32 %v3466_v46, %v1425_v10 }
 0x30f   : > { %15180 = vst [vmem:[#allocation122_spill] sm:$0xff] %v13519_v44  ;;  %v13524_v8 = vpack.c.bf16 %v3992_v30, %v3988_v48  ;;  %5264 = vmatprep.mubr.f32.mxu1 %v4084_v21  ;;  %v2639_v47 = vpop.f32.mrb[242].mxu0  ;;  %v3469_v43 = vadd.f32 %v3468_v41, %v1425_v10  ;;  %v3993_v21 = vmax.f32 %v2634_v31, 0.0  ;;  %v3994_v46 = vmax.f32 %v2636_v45, 0.0  ;;  %v1435_v31 = vpop.permute.xlu0 %1434 }
 0x310   : > { %15179 = vst [vmem:[#allocation121_spill] sm:$0xff] %v13517_v50  ;;  %v2640_v23 = vadd.f32 %v2639_v47, %v1430_v18  ;;  %v2641_v11 = vpop.f32.mrb[243].mxu0  ;;  %v3995_v3 = vmax.f32 %v3467_v59, 0.0  ;;  %v4091_v59 = vld [vmem:[%s15058_s3 + $0x210] sm:$0xff] }
 0x311   : > { %15181 = vst [vmem:[#allocation123_spill] sm:$0xff] %v13524_v8  ;;  %v3472_v58 = vpop.f32.mrb[242].mxu1  ;;  %4751 = vmatmul.mubr.f32.gmra.mrb[28].mxu0 %v4083_v4  ;;  %v2642_v54 = vadd.f32 %v2641_v11, %v1430_v18  ;;  %v3996_v11 = vmax.f32 %v3469_v43, 0.0 }
 0x312   : > { %v3473_v0 = vadd.f32 %v3472_v58, %v1430_v18  ;;  %v3474_v30 = vpop.f32.mrb[243].mxu1  ;;  %5265 = vmatmul.mubr.f32.gmra.mrb[28].mxu1 %v4083_v4  ;;  %4756 = vmatprep.mubr.f32.mxu0 %v4088_v38  ;;  %v3997_v48 = vmax.f32 %v2640_v23, 0.0  ;;  %v4092_v58 = vld [vmem:[%s15058_s3 + $0x218] sm:$0xff] }
 0x313   : > { %v3475_v50 = vadd.f32 %v3474_v30, %v1430_v18  ;;  %5270 = vmatprep.mubr.f32.mxu1 %v4088_v38  ;;  %v3998_v41 = vmax.f32 %v2642_v54, 0.0  ;;  %v2645_v47 = vpop.f32.mrb[244].mxu0 }
 0x314   : > { %v3999_v10 = vmax.f32 %v3473_v0, 0.0  ;;  %v13535_v4 = vpack.c.bf16 %v3997_v48, %v3993_v21  ;;  %v2647_v44 = vpop.f32.mrb[245].mxu0  ;;  %v2646_v43 = vadd.f32 %v2645_v47, %v1435_v31  ;;  %v1440_v0 = vpop.permute.xlu1 %1439  ;;  %v4095_v47 = vld [vmem:[%s15058_s3 + $0x230] sm:$0xff] }
 0x315   : > { %v4000_v60 = vmax.f32 %v3475_v50, 0.0  ;;  %v3478_v8 = vpop.f32.mrb[244].mxu1  ;;  %4757 = vmatmul.mubr.f32.gmra.mrb[30].mxu0 %v4087_v5  ;;  %v13539_v38 = vpack.c.bf16 %v3998_v41, %v3994_v46  ;;  %v4096_v50 = vld [vmem:[%s15058_s3 + $0x238] sm:$0xff]  ;;  %v2648_v30 = vadd.f32 %v2647_v44, %v1435_v31 }
 0x316   : > { %15182 = vst [vmem:[#allocation124_spill] sm:$0xff] %v13535_v4  ;;  %v13537_v23 = vpack.c.bf16 %v3999_v10, %v3995_v3  ;;  %v3480_v18 = vpop.f32.mrb[245].mxu1  ;;  %5271 = vmatmul.mubr.f32.gmra.mrb[30].mxu1 %v4087_v5  ;;  %4762 = vmatprep.mubr.f32.mxu0 %v4092_v58  ;;  %v3479_v54 = vadd.f32 %v3478_v8, %v1435_v31 }
 0x317   : > { %15184 = vst [vmem:[#allocation126_spill] sm:$0xff] %v13539_v38  ;;  %v13544_v45 = vpack.c.bf16 %v4000_v60, %v3996_v11  ;;  %5276 = vmatprep.mubr.f32.mxu1 %v4092_v58  ;;  %v2651_v21 = vpop.f32.mrb[246].mxu0  ;;  %v3481_v48 = vadd.f32 %v3480_v18, %v1435_v31  ;;  %v4001_v58 = vmax.f32 %v2646_v43, 0.0  ;;  %v4002_v8 = vmax.f32 %v2648_v30, 0.0  ;;  %v1445_v43 = vpop.permute.xlu0 %1444 }
 0x318   : > { %15183 = vst [vmem:[#allocation125_spill] sm:$0xff] %v13537_v23  ;;  %v2652_v3 = vadd.f32 %v2651_v21, %v1440_v0  ;;  %v2653_v46 = vpop.f32.mrb[247].mxu0  ;;  %v4003_v44 = vmax.f32 %v3479_v54, 0.0  ;;  %v4099_v54 = vld [vmem:[%s15058_s3 + $0x250] sm:$0xff] }
 0x319   : > { %15185 = vst [vmem:[#allocation127_spill] sm:$0xff] %v13544_v45  ;;  %v3484_v5 = vpop.f32.mrb[246].mxu1  ;;  %4763 = vmatmul.mubr.f32.gmra.mrb[32].mxu0 %v4091_v59  ;;  %v2654_v41 = vadd.f32 %v2653_v46, %v1440_v0  ;;  %v4004_v46 = vmax.f32 %v3481_v48, 0.0 }
 0x31a   : > { %v3485_v10 = vadd.f32 %v3484_v5, %v1440_v0  ;;  %v3486_v60 = vpop.f32.mrb[247].mxu1  ;;  %5277 = vmatmul.mubr.f32.gmra.mrb[32].mxu1 %v4091_v59  ;;  %4768 = vmatprep.mubr.f32.mxu0 %v4096_v50  ;;  %v4005_v11 = vmax.f32 %v2652_v3, 0.0  ;;  %v4100_v5 = vld [vmem:[%s15058_s3 + $0x258] sm:$0xff] }
 0x31b   : > { %v3487_v23 = vadd.f32 %v3486_v60, %v1440_v0  ;;  %5282 = vmatprep.mubr.f32.mxu1 %v4096_v50  ;;  %v4006_v18 = vmax.f32 %v2654_v41, 0.0  ;;  %v2657_v21 = vpop.f32.mrb[248].mxu0 }
 0x31c   : > { %v4007_v31 = vmax.f32 %v3485_v10, 0.0  ;;  %v13555_v59 = vpack.c.bf16 %v4005_v11, %v4001_v58  ;;  %v2659_v38 = vpop.f32.mrb[249].mxu0  ;;  %v2658_v48 = vadd.f32 %v2657_v21, %v1445_v43  ;;  %v1450_v10 = vpop.permute.xlu1 %1449  ;;  %v4103_v21 = vld [vmem:[%s15058_s3 + $0x270] sm:$0xff] }
 0x31d   : > { %v4008_v4 = vmax.f32 %v3487_v23, 0.0  ;;  %v3490_v45 = vpop.f32.mrb[248].mxu1  ;;  %4769 = vmatmul.mubr.f32.gmra.mrb[34].mxu0 %v4095_v47  ;;  %v13559_v50 = vpack.c.bf16 %v4006_v18, %v4002_v8  ;;  %v4104_v23 = vld [vmem:[%s15058_s3 + $0x278] sm:$0xff]  ;;  %v2660_v60 = vadd.f32 %v2659_v38, %v1445_v43 }
 0x31e   : > { %15186 = vst [vmem:[#allocation128_spill] sm:$0xff] %v13555_v59  ;;  %v13557_v3 = vpack.c.bf16 %v4007_v31, %v4003_v44  ;;  %v3492_v0 = vpop.f32.mrb[249].mxu1  ;;  %5283 = vmatmul.mubr.f32.gmra.mrb[34].mxu1 %v4095_v47  ;;  %4774 = vmatprep.mubr.f32.mxu0 %v4100_v5  ;;  %v3491_v41 = vadd.f32 %v3490_v45, %v1445_v43 }
 0x31f   : > { %15188 = vst [vmem:[#allocation130_spill] sm:$0xff] %v13559_v50  ;;  %v13564_v30 = vpack.c.bf16 %v4008_v4, %v4004_v46  ;;  %5288 = vmatprep.mubr.f32.mxu1 %v4100_v5  ;;  %v2663_v58 = vpop.f32.mrb[250].mxu0  ;;  %v3493_v11 = vadd.f32 %v3492_v0, %v1445_v43  ;;  %v4009_v5 = vmax.f32 %v2658_v48, 0.0  ;;  %v4010_v45 = vmax.f32 %v2660_v60, 0.0  ;;  %v1455_v48 = vpop.permute.xlu0 %1454 }
 0x320   : > { %15187 = vst [vmem:[#allocation129_spill] sm:$0xff] %v13557_v3  ;;  %v2664_v44 = vadd.f32 %v2663_v58, %v1450_v10  ;;  %v2665_v8 = vpop.f32.mrb[251].mxu0  ;;  %v4011_v38 = vmax.f32 %v3491_v41, 0.0  ;;  %v4107_v41 = vld [vmem:[%s15058_s3 + $0x290] sm:$0xff] }
 0x321   : > { %15189 = vst [vmem:[#allocation131_spill] sm:$0xff] %v13564_v30  ;;  %v3496_v47 = vpop.f32.mrb[250].mxu1  ;;  %4775 = vmatmul.mubr.f32.gmra.mrb[36].mxu0 %v4099_v54  ;;  %v2666_v18 = vadd.f32 %v2665_v8, %v1450_v10  ;;  %v4012_v8 = vmax.f32 %v3493_v11, 0.0 }
 0x322   : > { %v3497_v31 = vadd.f32 %v3496_v47, %v1450_v10  ;;  %v3498_v4 = vpop.f32.mrb[251].mxu1  ;;  %5289 = vmatmul.mubr.f32.gmra.mrb[36].mxu1 %v4099_v54  ;;  %4780 = vmatprep.mubr.f32.mxu0 %v4104_v23  ;;  %v4013_v46 = vmax.f32 %v2664_v44, 0.0  ;;  %v4108_v47 = vld [vmem:[%s15058_s3 + $0x298] sm:$0xff] }
 0x323   : > { %v3499_v3 = vadd.f32 %v3498_v4, %v1450_v10  ;;  %5294 = vmatprep.mubr.f32.mxu1 %v4104_v23  ;;  %v4014_v0 = vmax.f32 %v2666_v18, 0.0  ;;  %v2669_v58 = vpop.f32.mrb[252].mxu0 }
 0x324   : > { %v4015_v43 = vmax.f32 %v3497_v31, 0.0  ;;  %v13575_v54 = vpack.c.bf16 %v4013_v46, %v4009_v5  ;;  %v2671_v50 = vpop.f32.mrb[253].mxu0  ;;  %v2670_v11 = vadd.f32 %v2669_v58, %v1455_v48  ;;  %v1460_v31 = vpop.permute.xlu1 %1459  ;;  %v4111_v58 = vld [vmem:[%s15058_s3 + $0x2b0] sm:$0xff] }
 0x325   : > { %v4016_v59 = vmax.f32 %v3499_v3, 0.0  ;;  %v3502_v30 = vpop.f32.mrb[252].mxu1  ;;  %4781 = vmatmul.mubr.f32.gmra.mrb[38].mxu0 %v4103_v21  ;;  %v13579_v23 = vpack.c.bf16 %v4014_v0, %v4010_v45  ;;  %v4112_v3 = vld [vmem:[%s15058_s3 + $0x2b8] sm:$0xff]  ;;  %v2672_v4 = vadd.f32 %v2671_v50, %v1455_v48 }
 0x326   : > { %15190 = vst [vmem:[#allocation132_spill] sm:$0xff] %v13575_v54  ;;  %v13577_v44 = vpack.c.bf16 %v4015_v43, %v4011_v38  ;;  %v3504_v10 = vpop.f32.mrb[253].mxu1  ;;  %5295 = vmatmul.mubr.f32.gmra.mrb[38].mxu1 %v4103_v21  ;;  %4786 = vmatprep.mubr.f32.mxu0 %v4108_v47  ;;  %v3503_v18 = vadd.f32 %v3502_v30, %v1455_v48  ;;  %v4116_v50 = vld [vmem:[%s15058_s3 + $0x2d8] sm:$0xff] }
 0x327   : > { %15192 = vst [vmem:[#allocation134_spill] sm:$0xff] %v13579_v23  ;;  %v13584_v60 = vpack.c.bf16 %v4016_v59, %v4012_v8  ;;  %5300 = vmatprep.mubr.f32.mxu1 %v4108_v47  ;;  %v2675_v5 = vpop.f32.mrb[254].mxu0  ;;  %v3505_v46 = vadd.f32 %v3504_v10, %v1455_v48  ;;  %v4017_v47 = vmax.f32 %v2670_v11, 0.0  ;;  %v4018_v48 = vmax.f32 %v2672_v4, 0.0  ;;  %v4115_v11 = vld [vmem:[%s15058_s3 + $0x2d0] sm:$0xff] }
 0x328   : > { %15191 = vst [vmem:[#allocation133_spill] sm:$0xff] %v13577_v44  ;;  %v2676_v38 = vadd.f32 %v2675_v5, %v1460_v31  ;;  %v2677_v45 = vpop.f32.mrb[255].mxu0  ;;  %v4019_v30 = vmax.f32 %v3503_v18, 0.0  ;;  %v4124_v18 = vld [vmem:[%s15058_s3 + $0x318] sm:$0xff]  ;;  %v4123_v4 = vld [vmem:[%s15058_s3 + $0x310] sm:$0xff] }
 0x329   : > { %15193 = vst [vmem:[#allocation135_spill] sm:$0xff] %v13584_v60  ;;  %v3508_v21 = vpop.f32.mrb[254].mxu1  ;;  %4787 = vmatmul.mubr.f32.gmra.mrb[40].mxu0 %v4107_v41  ;;  %v2678_v0 = vadd.f32 %v2677_v45, %v1460_v31 }
 0x32a   : > { %v3509_v43 = vadd.f32 %v3508_v21, %v1460_v31  ;;  %v3510_v59 = vpop.f32.mrb[255].mxu1  ;;  %5301 = vmatmul.mubr.f32.gmra.mrb[40].mxu1 %v4107_v41  ;;  %4792 = vmatprep.mubr.f32.mxu0 %v4112_v3  ;;  %v4021_v8 = vmax.f32 %v2676_v38, 0.0  ;;  %v4020_v21 = vmax.f32 %v3505_v46, 0.0  ;;  %v4128_v46 = vld [vmem:[%s15058_s3 + $0x338] sm:$0xff]  ;;  %v4127_v38 = vld [vmem:[%s15058_s3 + $0x330] sm:$0xff] }
 0x32b   : > { %v3511_v44 = vadd.f32 %v3510_v59, %v1460_v31  ;;  %5306 = vmatprep.mubr.f32.mxu1 %v4112_v3  ;;  %v4022_v5 = vmax.f32 %v2678_v0, 0.0  ;;  %v4120_v31 = vld [vmem:[%s15058_s3 + $0x2f8] sm:$0xff]  ;;  %v4131_v0 = vld [vmem:[%s15058_s3 + $0x350] sm:$0xff] }
 0x32c   : > { %v4023_v10 = vmax.f32 %v3509_v43, 0.0  ;;  %v13595_v45 = vpack.c.bf16 %v4021_v8, %v4017_v47  ;;  %v4132_v43 = vld [vmem:[%s15058_s3 + $0x358] sm:$0xff]  ;;  %v4139_v8 = vld [vmem:[%s15058_s3 + $0x390] sm:$0xff] }
 0x32d   : > { %v4024_v41 = vmax.f32 %v3511_v44, 0.0  ;;  %4793 = vmatmul.mubr.f32.gmra.mrb[42].mxu0 %v4111_v58  ;;  %v13599_v60 = vpack.c.bf16 %v4022_v5, %v4018_v48  ;;  %v4119_v44 = vld [vmem:[%s15058_s3 + $0x2f0] sm:$0xff]  ;;  %v4136_v59 = vld [vmem:[%s15058_s3 + $0x378] sm:$0xff] }
 0x32e   : > { %15194 = vst [vmem:[#allocation136_spill] sm:$0xff] %v13595_v45  ;;  %v13597_v54 = vpack.c.bf16 %v4023_v10, %v4019_v30  ;;  %5307 = vmatmul.mubr.f32.gmra.mrb[42].mxu1 %v4111_v58  ;;  %4798 = vmatprep.mubr.f32.mxu0 %v4116_v50  ;;  %v4135_v58 = vld [vmem:[%s15058_s3 + $0x370] sm:$0xff]  ;;  %v4140_v47 = vld [vmem:[%s15058_s3 + $0x398] sm:$0xff] }
 0x32f   : > { %15196 = vst [vmem:[#allocation138_spill] sm:$0xff] %v13599_v60  ;;  %v13604_v3 = vpack.c.bf16 %v4024_v41, %v4020_v21  ;;  %5312 = vmatprep.mubr.f32.mxu1 %v4116_v50  ;;  %v4144_v50 = vld [vmem:[%s15058_s3 + $0x3b8] sm:$0xff]  ;;  %v4143_v30 = vld [vmem:[%s15058_s3 + $0x3b0] sm:$0xff]  ;;  %v15201_v60 = vld [vmem:[#allocation36_spill] sm:$0xff] }
 0x330   : > { %15195 = vst [vmem:[#allocation137_spill] sm:$0xff] %v13597_v54  ;;  %v4148_v48 = vld [vmem:[%s15058_s3 + $0x3d8] sm:$0xff]  ;;  %v4147_v10 = vld [vmem:[%s15058_s3 + $0x3d0] sm:$0xff] }
 0x331   : > { %15197 = vst [vmem:[#allocation139_spill] sm:$0xff] %v13604_v3  ;;  %4799 = vmatmul.mubr.f32.gmra.mrb[44].mxu0 %v4115_v11  ;;  %v4152_v5 = vld [vmem:[%s15058_s3 + $0x3f8] sm:$0xff]  ;;  %v4151_v21 = vld [vmem:[%s15058_s3 + $0x3f0] sm:$0xff]  ;;  %s8366_s3 = sshll.u32 %s14255_s22, 4  ;;  %s8367_s3 = int_to_ptr.vmem [resolvable:$true] %s8366_s3 }
 0x332   : > { %5313 = vmatmul.mubr.f32.gmra.mrb[44].mxu1 %v4115_v11  ;;  %4804 = vmatprep.mubr.f32.mxu0 %v4120_v31  ;;  %p10293_p4 = scmp.lt.s32.totalorder %s8367_s3, %s10291_s16 }
 0x333   : > { %5318 = vmatprep.mubr.f32.mxu1 %v4120_v31 }
 0x335   : > { %4805 = vmatmul.mubr.f32.gmra.mrb[46].mxu0 %v4119_v44 }
 0x336   : > { %5319 = vmatmul.mubr.f32.gmra.mrb[46].mxu1 %v4119_v44  ;;  %4810 = vmatprep.mubr.f32.mxu0 %v4124_v18  ;;  %v15198_v44 = vld [vmem:[#allocation34_spill] sm:$0xff] }
 0x337   : > { %5324 = vmatprep.mubr.f32.mxu1 %v4124_v18 }
 0x339   : > { %4811 = vmatmul.mubr.f32.gmra.mrb[48].mxu0 %v4123_v4 }
 0x33a   : > { %5325 = vmatmul.mubr.f32.gmra.mrb[48].mxu1 %v4123_v4  ;;  %4816 = vmatprep.mubr.f32.mxu0 %v4128_v46 }
 0x33b   : > { %5330 = vmatprep.mubr.f32.mxu1 %v4128_v46 }
 0x33d   : > { %4817 = vmatmul.mubr.f32.gmra.mrb[50].mxu0 %v4127_v38 }
 0x33e   : > { %5331 = vmatmul.mubr.f32.gmra.mrb[50].mxu1 %v4127_v38  ;;  %4822 = vmatprep.mubr.f32.mxu0 %v4132_v43 }
 0x33f   : > { %5336 = vmatprep.mubr.f32.mxu1 %v4132_v43 }
 0x341   : > { %4823 = vmatmul.mubr.f32.gmra.mrb[52].mxu0 %v4131_v0 }
 0x342   : > { %5337 = vmatmul.mubr.f32.gmra.mrb[52].mxu1 %v4131_v0  ;;  %4828 = vmatprep.mubr.f32.mxu0 %v4136_v59 }
 0x343   : > { %5342 = vmatprep.mubr.f32.mxu1 %v4136_v59  ;;  %v15199_v59 = vld [vmem:[#allocation33_spill] sm:$0xff] }
 0x345   : > { %4829 = vmatmul.mubr.f32.gmra.mrb[54].mxu0 %v4135_v58 }
 0x346   : > { %5343 = vmatmul.mubr.f32.gmra.mrb[54].mxu1 %v4135_v58  ;;  %4834 = vmatprep.mubr.f32.mxu0 %v4140_v47 }
 0x347   : > { %5348 = vmatprep.mubr.f32.mxu1 %v4140_v47 }
 0x349   : > { %4835 = vmatmul.mubr.f32.gmra.mrb[56].mxu0 %v4139_v8 }
 0x34a   : > { %5349 = vmatmul.mubr.f32.gmra.mrb[56].mxu1 %v4139_v8  ;;  %4840 = vmatprep.mubr.f32.mxu0 %v4144_v50 }
 0x34b   : > { %5354 = vmatprep.mubr.f32.mxu1 %v4144_v50 }
 0x34d   : > { %4841 = vmatmul.mubr.f32.gmra.mrb[58].mxu0 %v4143_v30 }
 0x34e   : > { %5355 = vmatmul.mubr.f32.gmra.mrb[58].mxu1 %v4143_v30  ;;  %4846 = vmatprep.mubr.f32.mxu0 %v4148_v48 }
 0x34f   : > { %5360 = vmatprep.mubr.f32.mxu1 %v4148_v48 }
 0x351   : > { %4847 = vmatmul.mubr.f32.gmra.mrb[60].mxu0 %v4147_v10 }
 0x352   : > { %5361 = vmatmul.mubr.f32.gmra.mrb[60].mxu1 %v4147_v10  ;;  %4852 = vmatprep.mubr.f32.mxu0 %v4152_v5 }
 0x353   : > { %5366 = vmatprep.mubr.f32.mxu1 %v4152_v5 }
 0x355   : > { %4853 = vmatmul.mubr.f32.gmra.mrb[62].mxu0 %v4151_v21 }
 0x356   : > { %5367 = vmatmul.mubr.f32.gmra.mrb[62].mxu1 %v4151_v21 }
 0x3ac   : > { %v4668_v41 = vpop.f32.mrb[0].mxu0 }
 0x3ad   : > { %v5182_v11 = vpop.f32.mrb[0].mxu1  ;;  %v4670_v31 = vpop.f32.mrb[1].mxu0  ;;  %v9675_v18 = vadd.f32 %v4668_v41, %v15198_v44 }
 0x3ae   : > { %v5184_v4 = vpop.f32.mrb[1].mxu1  ;;  %v9739_v46 = vadd.f32 %v5182_v11, %v15198_v44  ;;  %v9676_v38 = vadd.f32 %v4670_v31, %v15198_v44  ;;  %v13671_v11 = vld.sshfl [vmem:[%s15200_s5] sm:$0x33 pattern:$0x76325410]  ;;  %s10286_s5 = scalar_lea.vmem %s8367_s3, 128 }
 0x3af   : > { %v9740_v0 = vadd.f32 %v5184_v4, %v15198_v44  ;;  %v5373_v50 = vmax.f32 %v9675_v18, 0.0  ;;  %v5516_v18 = vcombine.high %v13671_v11, %v13671_v11  ;;  %p10287_p1 = scmp.ne.s32.totalorder %s8367_s3, %s10286_s5  ;;  %p10294_p5 = scmp.lt.s32.totalorder %s10292_s24, %s10286_s5 }
 0x3b0   : > { %v4674_v43 = vpop.f32.mrb[2].mxu0  ;;  %v5375_v5 = vmax.f32 %v9739_v46, 0.0  ;;  %v5374_v31 = vmax.f32 %v9676_v38, 0.0 }
 0x3b1   : > { %v9677_v58 = vadd.f32 %v4674_v43, %v15199_v59  ;;  %v5188_v47 = vpop.f32.mrb[2].mxu1  ;;  %v4676_v8 = vpop.f32.mrb[3].mxu0  ;;  %5583 = vmatprep.mubr.f32.mxu0 %v5516_v18  ;;  %5654 = vmatprep.mubr.f32.mxu1 %v5516_v18  ;;  %p10288_p2 = pnand %p10287_p1, %p10555_p8  ;;  %p10295_p6 = por %p10294_p5, %p10293_p4 }
 0x3b2   : > { %v9741_v30 = vadd.f32 %v5188_v47, %v15199_v59  ;;  %v9678_v48 = vadd.f32 %v4676_v8, %v15199_v59  ;;  %v5190_v10 = vpop.f32.mrb[3].mxu1  ;;  %v5376_v47 = vmax.f32 %v9740_v0, 0.0 }
 0x3b3   : > { %v5377_v21 = vmax.f32 %v9677_v58, 0.0  ;;  %v9742_v41 = vadd.f32 %v5190_v10, %v15199_v59  ;;  %p10289_p3 = pneg %p10288_p2 }
 0x3b4   : > { %v5379_v44 = vmax.f32 %v9741_v30, 0.0  ;;  %v5378_v4 = vmax.f32 %v9678_v48, 0.0  ;;  %v4680_v43 = vpop.f32.mrb[4].mxu0 }
 0x3b5   : > { %v9037_v54 = vpack.c.bf16 %v5377_v21, %v5373_v50  ;;  %v5380_v8 = vmax.f32 %v9742_v41, 0.0  ;;  %v5194_v45 = vpop.f32.mrb[4].mxu1  ;;  %v4682_v46 = vpop.f32.mrb[5].mxu0  ;;  %v9679_v23 = vadd.f32 %v4680_v43, %v15201_v60  ;;  %v15202_v50 = vld [vmem:[#allocation35_spill] sm:$0xff]  ;;  %p10296_p7 = pnand %p10295_p6, %p10289_p3 }
 0x3b6   : > { %v9101_v58 = vpack.c.bf16 %v5379_v44, %v5375_v5  ;;  %v9035_v3 = vpack.c.bf16 %v5378_v4, %v5374_v31  ;;  %v5196_v59 = vpop.f32.mrb[5].mxu1  ;;  %v9743_v38 = vadd.f32 %v5194_v45, %v15201_v60  ;;  %v9680_v30 = vadd.f32 %v4682_v46, %v15201_v60 }
 0x3b7   : > { %v9099_v10 = vpack.c.bf16 %v5380_v8, %v5376_v47  ;;  %v9744_v0 = vadd.f32 %v5196_v59, %v15201_v60  ;;  %v5381_v43 = vmax.f32 %v9679_v23, 0.0 }
 0x3b8   : > { %v4686_v48 = vpop.f32.mrb[6].mxu0  ;;  %9036 = vmatprep.subr.bf16.mxu0 %v9035_v3  ;;  %v5383_v47 = vmax.f32 %v9743_v38, 0.0  ;;  %v5382_v3 = vmax.f32 %v9680_v30, 0.0 }
 0x3b9   : > { %v9681_v21 = vadd.f32 %v4686_v48, %v15202_v50  ;;  %v5200_v41 = vpop.f32.mrb[6].mxu1  ;;  %9100 = vmatprep.subr.bf16.mxu1 %v9099_v10  ;;  %v4688_v5 = vpop.f32.mrb[7].mxu0  ;;  %9038 = vmatpush1.bf16.msra.mxu0 %v9037_v54  ;;  %v5384_v59 = vmax.f32 %v9744_v0, 0.0 }
 0x3ba   : > { %v9745_v31 = vadd.f32 %v5200_v41, %v15202_v50  ;;  %v9682_v44 = vadd.f32 %v4688_v5, %v15202_v50  ;;  %v5202_v4 = vpop.f32.mrb[7].mxu1  ;;  %9102 = vmatpush1.bf16.msra.mxu1 %v9101_v58 }
 0x3bb   : > { %v5385_v45 = vmax.f32 %v9681_v21, 0.0  ;;  %v9746_v18 = vadd.f32 %v5202_v4, %v15202_v50  ;;  %v15204_v21 = vld [vmem:[#allocation37_spill] sm:$0xff] }
 0x3bc   : > { %v5387_v8 = vmax.f32 %v9745_v31, 0.0  ;;  %v5386_v60 = vmax.f32 %v9682_v44, 0.0  ;;  %v4692_v46 = vpop.f32.mrb[8].mxu0 }
 0x3bd   : > { %v9041_v48 = vpack.c.bf16 %v5385_v45, %v5381_v43  ;;  %v5388_v10 = vmax.f32 %v9746_v18, 0.0  ;;  %v5206_v14 = vpop.f32.mrb[8].mxu1  ;;  %v4694_v54 = vpop.f32.mrb[9].mxu0  ;;  %v9683_v58 = vadd.f32 %v4692_v46, %v15203_v56 }
 0x3be   : > { %v9105_v40 = vpack.c.bf16 %v5387_v8, %v5383_v47  ;;  %v9039_v41 = vpack.c.bf16 %v5386_v60, %v5382_v3  ;;  %v5208_v17 = vpop.f32.mrb[9].mxu1  ;;  %v9747_v23 = vadd.f32 %v5206_v14, %v15203_v56  ;;  %v9684_v50 = vadd.f32 %v4694_v54, %v15203_v56 }
 0x3bf   : > { %v9103_v5 = vpack.c.bf16 %v5388_v10, %v5384_v59  ;;  %v9748_v30 = vadd.f32 %v5208_v17, %v15203_v56  ;;  %v5389_v18 = vmax.f32 %v9683_v58, 0.0 }
 0x3c0   : > { %v4698_v38 = vpop.f32.mrb[10].mxu0  ;;  %9040 = vmatprep.subr.bf16.mxu0 %v9039_v41  ;;  %v5391_v3 = vmax.f32 %v9747_v23, 0.0  ;;  %v5390_v8 = vmax.f32 %v9684_v50, 0.0 }
 0x3c1   : > { %v9685_v0 = vadd.f32 %v4698_v38, %v15204_v21  ;;  %v5212_v31 = vpop.f32.mrb[10].mxu1  ;;  %9104 = vmatprep.subr.bf16.mxu1 %v9103_v5  ;;  %v4700_v44 = vpop.f32.mrb[11].mxu0  ;;  %9042 = vmatpush1.bf16.msra.mxu0 %v9041_v48  ;;  %v5392_v46 = vmax.f32 %v9748_v30, 0.0 }
 0x3c2   : > { %v9749_v4 = vadd.f32 %v5212_v31, %v15204_v21  ;;  %v9686_v43 = vadd.f32 %v4700_v44, %v15204_v21  ;;  %v5214_v45 = vpop.f32.mrb[11].mxu1  ;;  %9106 = vmatpush1.bf16.msra.mxu1 %v9105_v40  ;;  %v15205_v44 = vld [vmem:[#allocation40_spill] sm:$0xff] }
 0x3c3   : > { %v5393_v14 = vmax.f32 %v9685_v0, 0.0  ;;  %v9750_v47 = vadd.f32 %v5214_v45, %v15204_v21  ;;  %v15206_v0 = vld [vmem:[#allocation39_spill] sm:$0xff] }
 0x3c4   : > { %v5395_v60 = vmax.f32 %v9749_v4, 0.0  ;;  %v5394_v56 = vmax.f32 %v9686_v43, 0.0  ;;  %v4704_v17 = vpop.f32.mrb[12].mxu0 }
 0x3c5   : > { %v9045_v59 = vpack.c.bf16 %v5393_v14, %v5389_v18  ;;  %v5396_v10 = vmax.f32 %v9750_v47, 0.0  ;;  %v5218_v54 = vpop.f32.mrb[12].mxu1  ;;  %v4706_v48 = vpop.f32.mrb[13].mxu0  ;;  %v9687_v40 = vadd.f32 %v4704_v17, %v15205_v44 }
 0x3c6   : > { %v9109_v41 = vpack.c.bf16 %v5395_v60, %v5391_v3  ;;  %v9043_v5 = vpack.c.bf16 %v5394_v56, %v5390_v8  ;;  %v5220_v38 = vpop.f32.mrb[13].mxu1  ;;  %v9751_v58 = vadd.f32 %v5218_v54, %v15205_v44  ;;  %v9688_v21 = vadd.f32 %v4706_v48, %v15205_v44 }
 0x3c7   : > { %v9107_v31 = vpack.c.bf16 %v5396_v10, %v5392_v46  ;;  %v9752_v50 = vadd.f32 %v5220_v38, %v15205_v44  ;;  %v5397_v47 = vmax.f32 %v9687_v40, 0.0 }
 0x3c8   : > { %v4710_v23 = vpop.f32.mrb[14].mxu0  ;;  %9044 = vmatprep.subr.bf16.mxu0 %v9043_v5  ;;  %v5399_v60 = vmax.f32 %v9751_v58, 0.0  ;;  %v5398_v56 = vmax.f32 %v9688_v21, 0.0 }
 0x3c9   : > { %v9689_v30 = vadd.f32 %v4710_v23, %v15206_v0  ;;  %v5224_v4 = vpop.f32.mrb[14].mxu1  ;;  %9108 = vmatprep.subr.bf16.mxu1 %v9107_v31  ;;  %v4712_v43 = vpop.f32.mrb[15].mxu0  ;;  %9046 = vmatpush1.bf16.msra.mxu0 %v9045_v59  ;;  %v5400_v54 = vmax.f32 %v9752_v50, 0.0 }
 0x3ca   : > { %v9753_v45 = vadd.f32 %v5224_v4, %v15206_v0  ;;  %v9690_v18 = vadd.f32 %v4712_v43, %v15206_v0  ;;  %v5226_v14 = vpop.f32.mrb[15].mxu1  ;;  %9110 = vmatpush1.bf16.msra.mxu1 %v9109_v41  ;;  %v15207_v43 = vld [vmem:[#allocation42_spill] sm:$0xff] }
 0x3cb   : > { %v5401_v3 = vmax.f32 %v9689_v30, 0.0  ;;  %v9754_v8 = vadd.f32 %v5226_v14, %v15206_v0  ;;  %v15208_v30 = vld [vmem:[#allocation41_spill] sm:$0xff] }
 0x3cc   : > { %v5403_v17 = vmax.f32 %v9753_v45, 0.0  ;;  %v5402_v46 = vmax.f32 %v9690_v18, 0.0  ;;  %v4716_v10 = vpop.f32.mrb[16].mxu0 }
 0x3cd   : > { %v9049_v48 = vpack.c.bf16 %v5401_v3, %v5397_v47  ;;  %v5404_v5 = vmax.f32 %v9754_v8, 0.0  ;;  %v5230_v38 = vpop.f32.mrb[16].mxu1  ;;  %v4718_v59 = vpop.f32.mrb[17].mxu0  ;;  %v9691_v41 = vadd.f32 %v4716_v10, %v15207_v43 }
 0x3ce   : > { %v9113_v31 = vpack.c.bf16 %v5403_v17, %v5399_v60  ;;  %v9047_v44 = vpack.c.bf16 %v5402_v46, %v5398_v56  ;;  %v5232_v23 = vpop.f32.mrb[17].mxu1  ;;  %v9755_v40 = vadd.f32 %v5230_v38, %v15207_v43  ;;  %v9692_v0 = vadd.f32 %v4718_v59, %v15207_v43 }
 0x3cf   : > { %v9111_v4 = vpack.c.bf16 %v5404_v5, %v5400_v54  ;;  %v9756_v21 = vadd.f32 %v5232_v23, %v15207_v43  ;;  %v5405_v8 = vmax.f32 %v9691_v41, 0.0 }
 0x3d0   : > { %v4722_v58 = vpop.f32.mrb[18].mxu0  ;;  %9048 = vmatprep.subr.bf16.mxu0 %v9047_v44  ;;  %v5407_v17 = vmax.f32 %v9755_v40, 0.0  ;;  %v5406_v46 = vmax.f32 %v9692_v0, 0.0 }
 0x3d1   : > { %v9693_v50 = vadd.f32 %v4722_v58, %v15208_v30  ;;  %v5236_v45 = vpop.f32.mrb[18].mxu1  ;;  %9112 = vmatprep.subr.bf16.mxu1 %v9111_v4  ;;  %v4724_v18 = vpop.f32.mrb[19].mxu0  ;;  %9050 = vmatpush1.bf16.msra.mxu0 %v9049_v48  ;;  %v5408_v38 = vmax.f32 %v9756_v21, 0.0 }
 0x3d2   : > { %v9757_v14 = vadd.f32 %v5236_v45, %v15208_v30  ;;  %v9694_v47 = vadd.f32 %v4724_v18, %v15208_v30  ;;  %v5238_v3 = vpop.f32.mrb[19].mxu1  ;;  %9114 = vmatpush1.bf16.msra.mxu1 %v9113_v31  ;;  %v15209_v18 = vld [vmem:[#allocation44_spill] sm:$0xff] }
 0x3d3   : > { %v5409_v60 = vmax.f32 %v9693_v50, 0.0  ;;  %v9758_v56 = vadd.f32 %v5238_v3, %v15208_v30  ;;  %v15210_v50 = vld [vmem:[#allocation43_spill] sm:$0xff] }
 0x3d4   : > { %v5411_v10 = vmax.f32 %v9757_v14, 0.0  ;;  %v5410_v54 = vmax.f32 %v9694_v47, 0.0  ;;  %v4728_v5 = vpop.f32.mrb[20].mxu0 }
 0x3d5   : > { %v9053_v59 = vpack.c.bf16 %v5409_v60, %v5405_v8  ;;  %v5412_v44 = vmax.f32 %v9758_v56, 0.0  ;;  %v5242_v23 = vpop.f32.mrb[20].mxu1  ;;  %v4730_v48 = vpop.f32.mrb[21].mxu0  ;;  %v9695_v31 = vadd.f32 %v4728_v5, %v15209_v18 }
 0x3d6   : > { %v9117_v4 = vpack.c.bf16 %v5411_v10, %v5407_v17  ;;  %v9051_v43 = vpack.c.bf16 %v5410_v54, %v5406_v46  ;;  %v5244_v58 = vpop.f32.mrb[21].mxu1  ;;  %v9759_v41 = vadd.f32 %v5242_v23, %v15209_v18  ;;  %v9696_v30 = vadd.f32 %v4730_v48, %v15209_v18 }
 0x3d7   : > { %v9115_v45 = vpack.c.bf16 %v5412_v44, %v5408_v38  ;;  %v9760_v0 = vadd.f32 %v5244_v58, %v15209_v18  ;;  %v5413_v56 = vmax.f32 %v9695_v31, 0.0 }
 0x3d8   : > { %v4734_v40 = vpop.f32.mrb[22].mxu0  ;;  %9052 = vmatprep.subr.bf16.mxu0 %v9051_v43  ;;  %v5415_v10 = vmax.f32 %v9759_v41, 0.0  ;;  %v5414_v54 = vmax.f32 %v9696_v30, 0.0 }
 0x3d9   : > { %v9697_v21 = vadd.f32 %v4734_v40, %v15210_v50  ;;  %v5248_v14 = vpop.f32.mrb[22].mxu1  ;;  %9116 = vmatprep.subr.bf16.mxu1 %v9115_v45  ;;  %v4736_v47 = vpop.f32.mrb[23].mxu0  ;;  %9054 = vmatpush1.bf16.msra.mxu0 %v9053_v59  ;;  %v5416_v23 = vmax.f32 %v9760_v0, 0.0 }
 0x3da   : > { %v9761_v3 = vadd.f32 %v5248_v14, %v15210_v50  ;;  %v9698_v8 = vadd.f32 %v4736_v47, %v15210_v50  ;;  %v5250_v60 = vpop.f32.mrb[23].mxu1  ;;  %9118 = vmatpush1.bf16.msra.mxu1 %v9117_v4  ;;  %v15211_v47 = vld [vmem:[#allocation46_spill] sm:$0xff] }
 0x3db   : > { %v5417_v17 = vmax.f32 %v9697_v21, 0.0  ;;  %v9762_v46 = vadd.f32 %v5250_v60, %v15210_v50  ;;  %v15212_v21 = vld [vmem:[#allocation45_spill] sm:$0xff] }
 0x3dc   : > { %v5419_v5 = vmax.f32 %v9761_v3, 0.0  ;;  %v5418_v38 = vmax.f32 %v9698_v8, 0.0  ;;  %v4740_v44 = vpop.f32.mrb[24].mxu0 }
 0x3dd   : > { %v9057_v48 = vpack.c.bf16 %v5417_v17, %v5413_v56  ;;  %v5420_v43 = vmax.f32 %v9762_v46, 0.0  ;;  %v5254_v58 = vpop.f32.mrb[24].mxu1  ;;  %v4742_v59 = vpop.f32.mrb[25].mxu0  ;;  %v9699_v4 = vadd.f32 %v4740_v44, %v15211_v47 }
 0x3de   : > { %v9121_v45 = vpack.c.bf16 %v5419_v5, %v5415_v10  ;;  %v9055_v18 = vpack.c.bf16 %v5418_v38, %v5414_v54  ;;  %v5256_v40 = vpop.f32.mrb[25].mxu1  ;;  %v9763_v31 = vadd.f32 %v5254_v58, %v15211_v47  ;;  %v9700_v50 = vadd.f32 %v4742_v59, %v15211_v47 }
 0x3df   : > { %v9119_v14 = vpack.c.bf16 %v5420_v43, %v5416_v23  ;;  %v9764_v30 = vadd.f32 %v5256_v40, %v15211_v47  ;;  %v5421_v46 = vmax.f32 %v9699_v4, 0.0 }
 0x3e0   : > { %v4746_v41 = vpop.f32.mrb[26].mxu0  ;;  %9056 = vmatprep.subr.bf16.mxu0 %v9055_v18  ;;  %v5423_v5 = vmax.f32 %v9763_v31, 0.0  ;;  %v5422_v38 = vmax.f32 %v9700_v50, 0.0 }
 0x3e1   : > { %v9701_v0 = vadd.f32 %v4746_v41, %v15212_v21  ;;  %v5260_v3 = vpop.f32.mrb[26].mxu1  ;;  %9120 = vmatprep.subr.bf16.mxu1 %v9119_v14  ;;  %v4748_v8 = vpop.f32.mrb[27].mxu0  ;;  %9058 = vmatpush1.bf16.msra.mxu0 %v9057_v48  ;;  %v5424_v58 = vmax.f32 %v9764_v30, 0.0 }
 0x3e2   : > { %v9765_v60 = vadd.f32 %v5260_v3, %v15212_v21  ;;  %v9702_v56 = vadd.f32 %v4748_v8, %v15212_v21  ;;  %v5262_v17 = vpop.f32.mrb[27].mxu1  ;;  %9122 = vmatpush1.bf16.msra.mxu1 %v9121_v45  ;;  %v15213_v8 = vld [vmem:[#allocation48_spill] sm:$0xff] }
 0x3e3   : > { %v5425_v10 = vmax.f32 %v9701_v0, 0.0  ;;  %v9766_v54 = vadd.f32 %v5262_v17, %v15212_v21  ;;  %v15214_v0 = vld [vmem:[#allocation47_spill] sm:$0xff] }
 0x3e4   : > { %v5427_v44 = vmax.f32 %v9765_v60, 0.0  ;;  %v5426_v23 = vmax.f32 %v9702_v56, 0.0  ;;  %v4752_v43 = vpop.f32.mrb[28].mxu0 }
 0x3e5   : > { %v9061_v59 = vpack.c.bf16 %v5425_v10, %v5421_v46  ;;  %v5428_v18 = vmax.f32 %v9766_v54, 0.0  ;;  %v5266_v40 = vpop.f32.mrb[28].mxu1  ;;  %v4754_v48 = vpop.f32.mrb[29].mxu0  ;;  %v9703_v45 = vadd.f32 %v4752_v43, %v15213_v8 }
 0x3e6   : > { %v9125_v14 = vpack.c.bf16 %v5427_v44, %v5423_v5  ;;  %v9059_v47 = vpack.c.bf16 %v5426_v23, %v5422_v38  ;;  %v5268_v41 = vpop.f32.mrb[29].mxu1  ;;  %v9767_v4 = vadd.f32 %v5266_v40, %v15213_v8  ;;  %v9704_v21 = vadd.f32 %v4754_v48, %v15213_v8 }
 0x3e7   : > { %v9123_v3 = vpack.c.bf16 %v5428_v18, %v5424_v58  ;;  %v9768_v50 = vadd.f32 %v5268_v41, %v15213_v8  ;;  %v5429_v54 = vmax.f32 %v9703_v45, 0.0 }
 0x3e8   : > { %v4758_v31 = vpop.f32.mrb[30].mxu0  ;;  %9060 = vmatprep.subr.bf16.mxu0 %v9059_v47  ;;  %v5431_v44 = vmax.f32 %v9767_v4, 0.0  ;;  %v5430_v23 = vmax.f32 %v9704_v21, 0.0 }
 0x3e9   : > { %v9705_v30 = vadd.f32 %v4758_v31, %v15214_v0  ;;  %v5272_v60 = vpop.f32.mrb[30].mxu1  ;;  %9124 = vmatprep.subr.bf16.mxu1 %v9123_v3  ;;  %v4760_v56 = vpop.f32.mrb[31].mxu0  ;;  %9062 = vmatpush1.bf16.msra.mxu0 %v9061_v59  ;;  %v5432_v40 = vmax.f32 %v9768_v50, 0.0 }
 0x3ea   : > { %v9769_v17 = vadd.f32 %v5272_v60, %v15214_v0  ;;  %v9706_v46 = vadd.f32 %v4760_v56, %v15214_v0  ;;  %v5274_v10 = vpop.f32.mrb[31].mxu1  ;;  %9126 = vmatpush1.bf16.msra.mxu1 %v9125_v14  ;;  %v15215_v56 = vld [vmem:[#allocation50_spill] sm:$0xff] }
 0x3eb   : > { %v5433_v5 = vmax.f32 %v9705_v30, 0.0  ;;  %v9770_v38 = vadd.f32 %v5274_v10, %v15214_v0  ;;  %v15216_v30 = vld [vmem:[#allocation49_spill] sm:$0xff] }
 0x3ec   : > { %v5435_v43 = vmax.f32 %v9769_v17, 0.0  ;;  %v5434_v58 = vmax.f32 %v9706_v46, 0.0  ;;  %v4764_v18 = vpop.f32.mrb[32].mxu0 }
 0x3ed   : > { %v9065_v48 = vpack.c.bf16 %v5433_v5, %v5429_v54  ;;  %v5436_v47 = vmax.f32 %v9770_v38, 0.0  ;;  %v5278_v41 = vpop.f32.mrb[32].mxu1  ;;  %v4766_v59 = vpop.f32.mrb[33].mxu0  ;;  %v9707_v14 = vadd.f32 %v4764_v18, %v15215_v56 }
 0x3ee   : > { %v9129_v3 = vpack.c.bf16 %v5435_v43, %v5431_v44  ;;  %v9063_v8 = vpack.c.bf16 %v5434_v58, %v5430_v23  ;;  %v5280_v31 = vpop.f32.mrb[33].mxu1  ;;  %v9771_v45 = vadd.f32 %v5278_v41, %v15215_v56  ;;  %v9708_v0 = vadd.f32 %v4766_v59, %v15215_v56 }
 0x3ef   : > { %v9127_v60 = vpack.c.bf16 %v5436_v47, %v5432_v40  ;;  %v9772_v21 = vadd.f32 %v5280_v31, %v15215_v56  ;;  %v5437_v38 = vmax.f32 %v9707_v14, 0.0 }
 0x3f0   : > { %v4770_v4 = vpop.f32.mrb[34].mxu0  ;;  %9064 = vmatprep.subr.bf16.mxu0 %v9063_v8  ;;  %v5439_v43 = vmax.f32 %v9771_v45, 0.0  ;;  %v5438_v58 = vmax.f32 %v9708_v0, 0.0 }
 0x3f1   : > { %v9709_v50 = vadd.f32 %v4770_v4, %v15216_v30  ;;  %v5284_v17 = vpop.f32.mrb[34].mxu1  ;;  %9128 = vmatprep.subr.bf16.mxu1 %v9127_v60  ;;  %v4772_v46 = vpop.f32.mrb[35].mxu0  ;;  %9066 = vmatpush1.bf16.msra.mxu0 %v9065_v48  ;;  %v5440_v41 = vmax.f32 %v9772_v21, 0.0 }
 0x3f2   : > { %v9773_v10 = vadd.f32 %v5284_v17, %v15216_v30  ;;  %v9710_v54 = vadd.f32 %v4772_v46, %v15216_v30  ;;  %v5286_v5 = vpop.f32.mrb[35].mxu1  ;;  %9130 = vmatpush1.bf16.msra.mxu1 %v9129_v3  ;;  %v15217_v46 = vld [vmem:[#allocation52_spill] sm:$0xff] }
 0x3f3   : > { %v5441_v44 = vmax.f32 %v9709_v50, 0.0  ;;  %v9774_v23 = vadd.f32 %v5286_v5, %v15216_v30  ;;  %v15218_v50 = vld [vmem:[#allocation51_spill] sm:$0xff] }
 0x3f4   : > { %v5443_v18 = vmax.f32 %v9773_v10, 0.0  ;;  %v5442_v40 = vmax.f32 %v9710_v54, 0.0  ;;  %v4776_v47 = vpop.f32.mrb[36].mxu0 }
 0x3f5   : > { %v9069_v59 = vpack.c.bf16 %v5441_v44, %v5437_v38  ;;  %v5444_v8 = vmax.f32 %v9774_v23, 0.0  ;;  %v5290_v31 = vpop.f32.mrb[36].mxu1  ;;  %v4778_v48 = vpop.f32.mrb[37].mxu0  ;;  %v9711_v3 = vadd.f32 %v4776_v47, %v15217_v46 }
 0x3f6   : > { %v9133_v60 = vpack.c.bf16 %v5443_v18, %v5439_v43  ;;  %v9067_v56 = vpack.c.bf16 %v5442_v40, %v5438_v58  ;;  %v5292_v4 = vpop.f32.mrb[37].mxu1  ;;  %v9775_v14 = vadd.f32 %v5290_v31, %v15217_v46  ;;  %v9712_v30 = vadd.f32 %v4778_v48, %v15217_v46 }
 0x3f7   : > { %v9131_v17 = vpack.c.bf16 %v5444_v8, %v5440_v41  ;;  %v9776_v0 = vadd.f32 %v5292_v4, %v15217_v46  ;;  %v5445_v23 = vmax.f32 %v9711_v3, 0.0 }
 0x3f8   : > { %v4782_v45 = vpop.f32.mrb[38].mxu0  ;;  %9068 = vmatprep.subr.bf16.mxu0 %v9067_v56  ;;  %v5447_v18 = vmax.f32 %v9775_v14, 0.0  ;;  %v5446_v40 = vmax.f32 %v9712_v30, 0.0 }
 0x3f9   : > { %v9713_v21 = vadd.f32 %v4782_v45, %v15218_v50  ;;  %v5296_v10 = vpop.f32.mrb[38].mxu1  ;;  %9132 = vmatprep.subr.bf16.mxu1 %v9131_v17  ;;  %v4784_v54 = vpop.f32.mrb[39].mxu0  ;;  %9070 = vmatpush1.bf16.msra.mxu0 %v9069_v59  ;;  %v5448_v31 = vmax.f32 %v9776_v0, 0.0 }
 0x3fa   : > { %v9777_v5 = vadd.f32 %v5296_v10, %v15218_v50  ;;  %v9714_v38 = vadd.f32 %v4784_v54, %v15218_v50  ;;  %v5298_v44 = vpop.f32.mrb[39].mxu1  ;;  %9134 = vmatpush1.bf16.msra.mxu1 %v9133_v60  ;;  %v15219_v54 = vld [vmem:[#allocation54_spill] sm:$0xff] }
 0x3fb   : > { %v5449_v43 = vmax.f32 %v9713_v21, 0.0  ;;  %v9778_v58 = vadd.f32 %v5298_v44, %v15218_v50  ;;  %v15220_v21 = vld [vmem:[#allocation53_spill] sm:$0xff] }
 0x3fc   : > { %v5451_v47 = vmax.f32 %v9777_v5, 0.0  ;;  %v5450_v41 = vmax.f32 %v9714_v38, 0.0  ;;  %v4788_v8 = vpop.f32.mrb[40].mxu0 }
 0x3fd   : > { %v9073_v48 = vpack.c.bf16 %v5449_v43, %v5445_v23  ;;  %v5452_v56 = vmax.f32 %v9778_v58, 0.0  ;;  %v5302_v4 = vpop.f32.mrb[40].mxu1  ;;  %v4790_v59 = vpop.f32.mrb[41].mxu0  ;;  %v9715_v60 = vadd.f32 %v4788_v8, %v15219_v54 }
 0x3fe   : > { %v9137_v17 = vpack.c.bf16 %v5451_v47, %v5447_v18  ;;  %v9071_v46 = vpack.c.bf16 %v5450_v41, %v5446_v40  ;;  %v5304_v45 = vpop.f32.mrb[41].mxu1  ;;  %v9779_v3 = vadd.f32 %v5302_v4, %v15219_v54  ;;  %v9716_v50 = vadd.f32 %v4790_v59, %v15219_v54 }
 0x3ff   : > { %v9135_v10 = vpack.c.bf16 %v5452_v56, %v5448_v31  ;;  %v9780_v30 = vadd.f32 %v5304_v45, %v15219_v54  ;;  %v5453_v58 = vmax.f32 %v9715_v60, 0.0 }
 0x400   : > { %v4794_v14 = vpop.f32.mrb[42].mxu0  ;;  %9072 = vmatprep.subr.bf16.mxu0 %v9071_v46  ;;  %v5455_v47 = vmax.f32 %v9779_v3, 0.0  ;;  %v5454_v41 = vmax.f32 %v9716_v50, 0.0 }
 0x401   : > { %v9717_v0 = vadd.f32 %v4794_v14, %v15220_v21  ;;  %v5308_v5 = vpop.f32.mrb[42].mxu1  ;;  %9136 = vmatprep.subr.bf16.mxu1 %v9135_v10  ;;  %v4796_v38 = vpop.f32.mrb[43].mxu0  ;;  %9074 = vmatpush1.bf16.msra.mxu0 %v9073_v48  ;;  %v5456_v4 = vmax.f32 %v9780_v30, 0.0 }
 0x402   : > { %v9781_v44 = vadd.f32 %v5308_v5, %v15220_v21  ;;  %v9718_v23 = vadd.f32 %v4796_v38, %v15220_v21  ;;  %v5310_v43 = vpop.f32.mrb[43].mxu1  ;;  %9138 = vmatpush1.bf16.msra.mxu1 %v9137_v17  ;;  %v15221_v38 = vld [vmem:[#allocation56_spill] sm:$0xff] }
 0x403   : > { %v5457_v18 = vmax.f32 %v9717_v0, 0.0  ;;  %v9782_v40 = vadd.f32 %v5310_v43, %v15220_v21  ;;  %v15222_v0 = vld [vmem:[#allocation55_spill] sm:$0xff] }
 0x404   : > { %v5459_v8 = vmax.f32 %v9781_v44, 0.0  ;;  %v5458_v31 = vmax.f32 %v9718_v23, 0.0  ;;  %v4800_v56 = vpop.f32.mrb[44].mxu0 }
 0x405   : > { %v9077_v59 = vpack.c.bf16 %v5457_v18, %v5453_v58  ;;  %v5460_v46 = vmax.f32 %v9782_v40, 0.0  ;;  %v5314_v45 = vpop.f32.mrb[44].mxu1  ;;  %v4802_v48 = vpop.f32.mrb[45].mxu0  ;;  %v9719_v17 = vadd.f32 %v4800_v56, %v15221_v38 }
 0x406   : > { %v9141_v10 = vpack.c.bf16 %v5459_v8, %v5455_v47  ;;  %v9075_v54 = vpack.c.bf16 %v5458_v31, %v5454_v41  ;;  %v5316_v14 = vpop.f32.mrb[45].mxu1  ;;  %v9783_v60 = vadd.f32 %v5314_v45, %v15221_v38  ;;  %v9720_v21 = vadd.f32 %v4802_v48, %v15221_v38 }
 0x407   : > { %v9139_v5 = vpack.c.bf16 %v5460_v46, %v5456_v4  ;;  %v9784_v50 = vadd.f32 %v5316_v14, %v15221_v38  ;;  %v5461_v40 = vmax.f32 %v9719_v17, 0.0 }
 0x408   : > { %v4806_v3 = vpop.f32.mrb[46].mxu0  ;;  %9076 = vmatprep.subr.bf16.mxu0 %v9075_v54  ;;  %v5463_v8 = vmax.f32 %v9783_v60, 0.0  ;;  %v5462_v31 = vmax.f32 %v9720_v21, 0.0 }
 0x409   : > { %v9721_v30 = vadd.f32 %v4806_v3, %v15222_v0  ;;  %v5320_v44 = vpop.f32.mrb[46].mxu1  ;;  %9140 = vmatprep.subr.bf16.mxu1 %v9139_v5  ;;  %v4808_v23 = vpop.f32.mrb[47].mxu0  ;;  %9078 = vmatpush1.bf16.msra.mxu0 %v9077_v59  ;;  %v5464_v45 = vmax.f32 %v9784_v50, 0.0 }
 0x40a   : > { %v9785_v43 = vadd.f32 %v5320_v44, %v15222_v0  ;;  %v9722_v58 = vadd.f32 %v4808_v23, %v15222_v0  ;;  %v5322_v18 = vpop.f32.mrb[47].mxu1  ;;  %9142 = vmatpush1.bf16.msra.mxu1 %v9141_v10  ;;  %v15223_v23 = vld [vmem:[#allocation58_spill] sm:$0xff] }
 0x40b   : > { %v5465_v47 = vmax.f32 %v9721_v30, 0.0  ;;  %v9786_v41 = vadd.f32 %v5322_v18, %v15222_v0  ;;  %v15224_v30 = vld [vmem:[#allocation57_spill] sm:$0xff] }
 0x40c   : > { %v5467_v56 = vmax.f32 %v9785_v43, 0.0  ;;  %v5466_v4 = vmax.f32 %v9722_v58, 0.0  ;;  %v4812_v46 = vpop.f32.mrb[48].mxu0 }
 0x40d   : > { %v9081_v48 = vpack.c.bf16 %v5465_v47, %v5461_v40  ;;  %v5468_v54 = vmax.f32 %v9786_v41, 0.0  ;;  %v5326_v14 = vpop.f32.mrb[48].mxu1  ;;  %v4814_v59 = vpop.f32.mrb[49].mxu0  ;;  %v9723_v10 = vadd.f32 %v4812_v46, %v15223_v23 }
 0x40e   : > { %v9145_v5 = vpack.c.bf16 %v5467_v56, %v5463_v8  ;;  %v9079_v38 = vpack.c.bf16 %v5466_v4, %v5462_v31  ;;  %v5328_v3 = vpop.f32.mrb[49].mxu1  ;;  %v9787_v17 = vadd.f32 %v5326_v14, %v15223_v23  ;;  %v9724_v0 = vadd.f32 %v4814_v59, %v15223_v23 }
 0x40f   : > { %v9143_v44 = vpack.c.bf16 %v5468_v54, %v5464_v45  ;;  %v9788_v21 = vadd.f32 %v5328_v3, %v15223_v23  ;;  %v5469_v41 = vmax.f32 %v9723_v10, 0.0 }
 0x410   : > { %v4818_v60 = vpop.f32.mrb[50].mxu0  ;;  %9080 = vmatprep.subr.bf16.mxu0 %v9079_v38  ;;  %v5471_v56 = vmax.f32 %v9787_v17, 0.0  ;;  %v5470_v4 = vmax.f32 %v9724_v0, 0.0 }
 0x411   : > { %v9725_v50 = vadd.f32 %v4818_v60, %v15224_v30  ;;  %v5332_v43 = vpop.f32.mrb[50].mxu1  ;;  %9144 = vmatprep.subr.bf16.mxu1 %v9143_v44  ;;  %v4820_v58 = vpop.f32.mrb[51].mxu0  ;;  %9082 = vmatpush1.bf16.msra.mxu0 %v9081_v48  ;;  %v5472_v14 = vmax.f32 %v9788_v21, 0.0 }
 0x412   : > { %v9789_v18 = vadd.f32 %v5332_v43, %v15224_v30  ;;  %v9726_v40 = vadd.f32 %v4820_v58, %v15224_v30  ;;  %v5334_v47 = vpop.f32.mrb[51].mxu1  ;;  %9146 = vmatpush1.bf16.msra.mxu1 %v9145_v5  ;;  %v15225_v58 = vld [vmem:[#allocation60_spill] sm:$0xff] }
 0x413   : > { %v5473_v8 = vmax.f32 %v9725_v50, 0.0  ;;  %v9790_v31 = vadd.f32 %v5334_v47, %v15224_v30  ;;  %v15226_v50 = vld [vmem:[#allocation59_spill] sm:$0xff] }
 0x414   : > { %v5475_v46 = vmax.f32 %v9789_v18, 0.0  ;;  %v5474_v45 = vmax.f32 %v9726_v40, 0.0  ;;  %v4824_v54 = vpop.f32.mrb[52].mxu0 }
 0x415   : > { %v9085_v59 = vpack.c.bf16 %v5473_v8, %v5469_v41  ;;  %v5476_v38 = vmax.f32 %v9790_v31, 0.0  ;;  %v5338_v3 = vpop.f32.mrb[52].mxu1  ;;  %v4826_v48 = vpop.f32.mrb[53].mxu0  ;;  %v9727_v5 = vadd.f32 %v4824_v54, %v15225_v58 }
 0x416   : > { %v9149_v44 = vpack.c.bf16 %v5475_v46, %v5471_v56  ;;  %v9083_v23 = vpack.c.bf16 %v5474_v45, %v5470_v4  ;;  %v5340_v60 = vpop.f32.mrb[53].mxu1  ;;  %v9791_v10 = vadd.f32 %v5338_v3, %v15225_v58  ;;  %v9728_v30 = vadd.f32 %v4826_v48, %v15225_v58 }
 0x417   : > { %v9147_v43 = vpack.c.bf16 %v5476_v38, %v5472_v14  ;;  %v9792_v0 = vadd.f32 %v5340_v60, %v15225_v58  ;;  %v5477_v31 = vmax.f32 %v9727_v5, 0.0 }
 0x418   : > { %v4830_v17 = vpop.f32.mrb[54].mxu0  ;;  %9084 = vmatprep.subr.bf16.mxu0 %v9083_v23  ;;  %v5479_v46 = vmax.f32 %v9791_v10, 0.0  ;;  %v5478_v45 = vmax.f32 %v9728_v30, 0.0 }
 0x419   : > { %v9729_v21 = vadd.f32 %v4830_v17, %v15226_v50  ;;  %v5344_v18 = vpop.f32.mrb[54].mxu1  ;;  %9148 = vmatprep.subr.bf16.mxu1 %v9147_v43  ;;  %v4832_v40 = vpop.f32.mrb[55].mxu0  ;;  %9086 = vmatpush1.bf16.msra.mxu0 %v9085_v59  ;;  %v5480_v3 = vmax.f32 %v9792_v0, 0.0 }
 0x41a   : > { %v9793_v47 = vadd.f32 %v5344_v18, %v15226_v50  ;;  %v9730_v41 = vadd.f32 %v4832_v40, %v15226_v50  ;;  %v5346_v8 = vpop.f32.mrb[55].mxu1  ;;  %9150 = vmatpush1.bf16.msra.mxu1 %v9149_v44  ;;  %v15227_v40 = vld [vmem:[#allocation62_spill] sm:$0xff] }
 0x41b   : > { %v5481_v56 = vmax.f32 %v9729_v21, 0.0  ;;  %v9794_v4 = vadd.f32 %v5346_v8, %v15226_v50  ;;  %v15228_v21 = vld [vmem:[#allocation61_spill] sm:$0xff] }
 0x41c   : > { %v5483_v54 = vmax.f32 %v9793_v47, 0.0  ;;  %v5482_v14 = vmax.f32 %v9730_v41, 0.0  ;;  %v4836_v38 = vpop.f32.mrb[56].mxu0 }
 0x41d   : > { %v9089_v48 = vpack.c.bf16 %v5481_v56, %v5477_v31  ;;  %v5484_v23 = vmax.f32 %v9794_v4, 0.0  ;;  %v5350_v60 = vpop.f32.mrb[56].mxu1  ;;  %v4838_v59 = vpop.f32.mrb[57].mxu0  ;;  %v9731_v44 = vadd.f32 %v4836_v38, %v15227_v40 }
 0x41e   : > { %v9153_v43 = vpack.c.bf16 %v5483_v54, %v5479_v46  ;;  %v9087_v58 = vpack.c.bf16 %v5482_v14, %v5478_v45  ;;  %v5352_v17 = vpop.f32.mrb[57].mxu1  ;;  %v9795_v5 = vadd.f32 %v5350_v60, %v15227_v40  ;;  %v9732_v50 = vadd.f32 %v4838_v59, %v15227_v40 }
 0x41f   : > { %v9151_v18 = vpack.c.bf16 %v5484_v23, %v5480_v3  ;;  %v9796_v30 = vadd.f32 %v5352_v17, %v15227_v40  ;;  %v5485_v4 = vmax.f32 %v9731_v44, 0.0 }
 0x420   : > { %v4842_v10 = vpop.f32.mrb[58].mxu0  ;;  %9088 = vmatprep.subr.bf16.mxu0 %v9087_v58  ;;  %v5487_v54 = vmax.f32 %v9795_v5, 0.0  ;;  %v5486_v14 = vmax.f32 %v9732_v50, 0.0 }
 0x421   : > { %v9733_v0 = vadd.f32 %v4842_v10, %v15228_v21  ;;  %v5356_v47 = vpop.f32.mrb[58].mxu1  ;;  %9152 = vmatprep.subr.bf16.mxu1 %v9151_v18  ;;  %v4844_v41 = vpop.f32.mrb[59].mxu0  ;;  %9090 = vmatpush1.bf16.msra.mxu0 %v9089_v48  ;;  %v5488_v60 = vmax.f32 %v9796_v30, 0.0 }
 0x422   : > { %v9797_v8 = vadd.f32 %v5356_v47, %v15228_v21  ;;  %v9734_v31 = vadd.f32 %v4844_v41, %v15228_v21  ;;  %v5358_v56 = vpop.f32.mrb[59].mxu1  ;;  %9154 = vmatpush1.bf16.msra.mxu1 %v9153_v43  ;;  %v15229_v41 = vld [vmem:[#allocation64_spill] sm:$0xff] }
 0x423   : > { %v5489_v46 = vmax.f32 %v9733_v0, 0.0  ;;  %v9798_v45 = vadd.f32 %v5358_v56, %v15228_v21  ;;  %v15230_v0 = vld [vmem:[#allocation63_spill] sm:$0xff] }
 0x424   : > { %v5491_v38 = vmax.f32 %v9797_v8, 0.0  ;;  %v5490_v3 = vmax.f32 %v9734_v31, 0.0  ;;  %v4848_v23 = vpop.f32.mrb[60].mxu0 }
 0x425   : > { %v9093_v59 = vpack.c.bf16 %v5489_v46, %v5485_v4  ;;  %v5492_v58 = vmax.f32 %v9798_v45, 0.0  ;;  %v5362_v17 = vpop.f32.mrb[60].mxu1  ;;  %v4850_v48 = vpop.f32.mrb[61].mxu0  ;;  %v9735_v43 = vadd.f32 %v4848_v23, %v15229_v41 }
 0x426   : > { %v9157_v18 = vpack.c.bf16 %v5491_v38, %v5487_v54  ;;  %v9091_v40 = vpack.c.bf16 %v5490_v3, %v5486_v14  ;;  %v5364_v10 = vpop.f32.mrb[61].mxu1  ;;  %v9799_v44 = vadd.f32 %v5362_v17, %v15229_v41  ;;  %v9736_v21 = vadd.f32 %v4850_v48, %v15229_v41 }
 0x427   : > { %v9155_v47 = vpack.c.bf16 %v5492_v58, %v5488_v60  ;;  %v9800_v50 = vadd.f32 %v5364_v10, %v15229_v41  ;;  %v5493_v45 = vmax.f32 %v9735_v43, 0.0  ;;  %v15232_v41 = vld [vmem:[#allocation101_spill] sm:$0xff]  ;;  %v15235_v43 = vld [vmem:[#allocation104_spill] sm:$0xff] }
 0x428   : > { %v4854_v5 = vpop.f32.mrb[62].mxu0  ;;  %9092 = vmatprep.subr.bf16.mxu0 %v9091_v40  ;;  %v5495_v38 = vmax.f32 %v9799_v44, 0.0  ;;  %v5494_v3 = vmax.f32 %v9736_v21, 0.0  ;;  %v15261_v44 = vld [vmem:[#allocation19_spill] sm:$0xff]  ;;  %v5666_v21 = vld [vmem:[%s14824_s7 + $0x28] sm:$0xff] }
 0x429   : > { %v9737_v30 = vadd.f32 %v4854_v5, %v15230_v0  ;;  %v5368_v8 = vpop.f32.mrb[62].mxu1  ;;  %9156 = vmatprep.subr.bf16.mxu1 %v9155_v47  ;;  %v4856_v31 = vpop.f32.mrb[63].mxu0  ;;  %9094 = vmatpush1.bf16.msra.mxu0 %v9093_v59  ;;  %v5496_v58 = vmax.f32 %v9800_v50, 0.0  ;;  %v15231_v47 = vld [vmem:[#allocation100_spill] sm:$0xff] }
 0x42a   : > { %v9801_v56 = vadd.f32 %v5368_v8, %v15230_v0  ;;  %v9738_v4 = vadd.f32 %v4856_v31, %v15230_v0  ;;  %v5370_v46 = vpop.f32.mrb[63].mxu1  ;;  %9158 = vmatpush1.bf16.msra.mxu1 %v9157_v18  ;;  %v5662_v18 = vld [vmem:[%s14824_s7 + $0x8] sm:$0xff]  ;;  %v15262_v5 = vld [vmem:[#allocation80_spill] sm:$0xff] }
 0x42b   : > { %v5497_v54 = vmax.f32 %v9737_v30, 0.0  ;;  %v9802_v14 = vadd.f32 %v5370_v46, %v15230_v0  ;;  %v5665_v50 = vld [vmem:[%s14824_s7 + $0x20] sm:$0xff]  ;;  %v15263_v0 = vld [vmem:[#allocation27_spill] sm:$0xff]  ;;  %v15265_v31 = vld [vmem:[#allocation29_spill] sm:$0xff] }
 0x42c   : > { %v5499_v23 = vmax.f32 %v9801_v56, 0.0  ;;  %v5498_v60 = vmax.f32 %v9738_v4, 0.0  ;;  %v15264_v30 = vld [vmem:[#allocation92_spill] sm:$0xff]  ;;  %v5670_v56 = vld [vmem:[%s14824_s7 + $0x48] sm:$0xff] }
 0x42d   : > { %v9097_v17 = vpack.c.bf16 %v5497_v54, %v5493_v45  ;;  %v5500_v48 = vmax.f32 %v9802_v14, 0.0  ;;  %v15266_v4 = vld [vmem:[#allocation85_spill] sm:$0xff]  ;;  %v5669_v46 = vld [vmem:[%s14824_s7 + $0x40] sm:$0xff]  ;;  %v15267_v45 = vld [vmem:[#allocation86_spill] sm:$0xff] }
 0x42e   : > { %v9161_v40 = vpack.c.bf16 %v5499_v23, %v5495_v38  ;;  %v9095_v10 = vpack.c.bf16 %v5498_v60, %v5494_v3  ;;  %v15268_v54 = vld [vmem:[#allocation91_spill] sm:$0xff]  ;;  %v15269_v14 = vld [vmem:[#allocation93_spill] sm:$0xff]  ;;  %v15270_v23 = vld [vmem:[#allocation90_spill] sm:$0xff] }
 0x42f   : > { %v9159_v59 = vpack.c.bf16 %v5500_v48, %v5496_v58  ;;  %v5674_v38 = vld [vmem:[%s14824_s7 + $0x68] sm:$0xff]  ;;  %v5673_v60 = vld [vmem:[%s14824_s7 + $0x60] sm:$0xff]  ;;  %v15271_v58 = vld [vmem:[#allocation75_spill] sm:$0xff] }
 0x430   : > { %9096 = vmatprep.subr.bf16.mxu0 %v9095_v10  ;;  %v15273_v48 = vld [vmem:[#allocation94_spill] sm:$0xff]  ;;  %v15274_v10 = vld [vmem:[#allocation31_spill] sm:$0xff] }
 0x431   : > { %9160 = vmatprep.subr.bf16.mxu1 %v9159_v59  ;;  %9098 = vmatpush1.bf16.msra.mxu0 %v9097_v17  ;;  %v15272_v17 = vld [vmem:[#allocation28_spill] sm:$0xff] }
 0x432   : > { %9162 = vmatpush1.bf16.msra.mxu1 %v9161_v40  ;;  %9164 = vmatprep.subr.bf16.mxu0 %v12792_v12  ;;  %v15233_v12 = vld [vmem:[#allocation102_spill] sm:$0xff]  ;;  %v5678_v40 = vld [vmem:[%s14824_s7 + $0x88] sm:$0xff]  ;;  %v5677_v59 = vld [vmem:[%s14824_s7 + $0x80] sm:$0xff] }
 0x433   : > { %9292 = vmatprep.subr.bf16.mxu1 %v12794_v20  ;;  %v15234_v20 = vld [vmem:[#allocation103_spill] sm:$0xff] }
 0x434   : > { %5584 = vmatmul.mubr.f32.vlgmr.msra.gmra.mrb[64].mxu0 %v13671_v11 }
 0x435   : > { %5655 = vmatmul.mubr.f32.vlgmr.msra.gmra.mrb[64].mxu1 %v13671_v11  ;;  %9166 = vmatpush1.bf16.msra.mxu0 %v15231_v47  ;;  %v15236_v11 = vld [vmem:[#allocation105_spill] sm:$0xff]  ;;  %v15276_v47 = vld [vmem:[#allocation23_spill] sm:$0xff] }
 0x436   : > { %9294 = vmatpush1.bf16.msra.mxu1 %v15232_v41  ;;  %9168 = vmatprep.subr.bf16.mxu0 %v12822_v27  ;;  %v15237_v27 = vld [vmem:[#allocation106_spill] sm:$0xff] }
 0x437   : > { %9296 = vmatprep.subr.bf16.mxu1 %v12824_v61  ;;  %6045 = vmatprep.mubr.f32.mxu0 %v5662_v18  ;;  %v13821_v61 = vpop.permute.xlu0 %5823 }
 0x438   : > { %6559 = vmatprep.mubr.f32.mxu1 %v5662_v18  ;;  %v15275_v18 = vld [vmem:[#allocation21_spill] sm:$0xff] }
 0x439   : > { %9170 = vmatpush1.bf16.msra.mxu0 %v15233_v12  ;;  %v15277_v12 = vld [vmem:[#allocation96_spill] sm:$0xff] }
 0x43a   : > { %9298 = vmatpush1.bf16.msra.mxu1 %v15234_v20  ;;  %9172 = vmatprep.subr.bf16.mxu0 %v12852_v24  ;;  %v5682_v20 = vld [vmem:[%s14824_s7 + $0xa8] sm:$0xff] }
 0x43b   : > { %9300 = vmatprep.subr.bf16.mxu1 %v12854_v33  ;;  %v13828_v24 = vpop.permute.xlu0 %5833 }
 0x43d   : > { %9174 = vmatpush1.bf16.msra.mxu0 %v15235_v43  ;;  %v15278_v43 = vld [vmem:[#allocation95_spill] sm:$0xff] }
 0x43e   : > { %9302 = vmatpush1.bf16.msra.mxu1 %v15236_v11  ;;  %9176 = vmatprep.subr.bf16.mxu0 %v12882_v32  ;;  %v15238_v32 = vld [vmem:[#allocation18_spill] sm:$0xff]  ;;  %v5681_v11 = vld [vmem:[%s14824_s7 + $0xa0] sm:$0xff] }
 0x43f   : > { %9304 = vmatprep.subr.bf16.mxu1 %v12884_v16  ;;  %v13837_v33 = vpop.permute.xlu0 %5843  ;;  %v15239_v16 = vld [vmem:[#allocation16_spill] sm:$0xff] }
 0x441   : > { %9178 = vmatpush1.bf16.msra.mxu0 %v12870_v15 }
 0x442   : > { %9306 = vmatpush1.bf16.msra.mxu1 %v15237_v27  ;;  %9180 = vmatprep.subr.bf16.mxu0 %v12913_v26  ;;  %v15241_v26 = vld [vmem:[#allocation69_spill] sm:$0xff]  ;;  %v15279_v27 = vld [vmem:[#allocation30_spill] sm:$0xff] }
 0x443   : > { %9308 = vmatprep.subr.bf16.mxu1 %v12915_v37  ;;  %v13844_v15 = vpop.permute.xlu0 %5853  ;;  %v15242_v37 = vld [vmem:[#allocation17_spill] sm:$0xff] }
 0x445   : > { %9182 = vmatpush1.bf16.msra.mxu0 %v12903_v25  ;;  %v15240_v25 = vld [vmem:[#allocation20_spill] sm:$0xff] }
 0x446   : > { %9310 = vmatpush1.bf16.msra.mxu1 %v12906_v53  ;;  %9184 = vmatprep.subr.bf16.mxu0 %v12948_v2  ;;  %v15245_v2 = vld [vmem:[#allocation22_spill] sm:$0xff] }
 0x447   : > { %9312 = vmatprep.subr.bf16.mxu1 %v12950_v35  ;;  %v13853_v53 = vpop.permute.xlu0 %5863 }
 0x449   : > { %9186 = vmatpush1.bf16.msra.mxu0 %v12934_v19  ;;  %v15243_v19 = vld [vmem:[#allocation15_spill] sm:$0xff] }
 0x44a   : > { %9314 = vmatpush1.bf16.msra.mxu1 %v12939_v57  ;;  %9188 = vmatprep.subr.bf16.mxu0 %v12984_v62  ;;  %v15244_v57 = vld [vmem:[#allocation67_spill] sm:$0xff]  ;;  %v15248_v62 = vld [vmem:[#allocation70_spill] sm:$0xff] }
 0x44b   : > { %9316 = vmatprep.subr.bf16.mxu1 %v12986_v13  ;;  %v13860_v35 = vpop.permute.xlu0 %5873  ;;  %v15249_v13 = vld [vmem:[#allocation72_spill] sm:$0xff] }
 0x44d   : > { %9190 = vmatpush1.bf16.msra.mxu0 %v12970_v49  ;;  %v15246_v49 = vld [vmem:[#allocation65_spill] sm:$0xff] }
 0x44e   : > { %9318 = vmatpush1.bf16.msra.mxu1 %v12975_v6  ;;  %9192 = vmatprep.subr.bf16.mxu0 %v13020_v34  ;;  %v15247_v6 = vld [vmem:[#allocation66_spill] sm:$0xff]  ;;  %v15252_v34 = vld [vmem:[#allocation76_spill] sm:$0xff] }
 0x44f   : > { %9320 = vmatprep.subr.bf16.mxu1 %v13022_v39  ;;  %v13869_v39 = vpop.permute.xlu0 %5883 }
 0x451   : > { %9194 = vmatpush1.bf16.msra.mxu0 %v13006_v9  ;;  %v15250_v9 = vld [vmem:[#allocation74_spill] sm:$0xff] }
 0x452   : > { %9322 = vmatpush1.bf16.msra.mxu1 %v13011_v63  ;;  %9196 = vmatprep.subr.bf16.mxu0 %v13056_v29  ;;  %v15251_v63 = vld [vmem:[#allocation71_spill] sm:$0xff]  ;;  %v15255_v29 = vld [vmem:[#allocation68_spill] sm:$0xff] }
 0x453   : > { %9324 = vmatprep.subr.bf16.mxu1 %v13058_v55  ;;  %v15256_v55 = vld [vmem:[#allocation79_spill] sm:$0xff] }
 0x455   : > { %9198 = vmatpush1.bf16.msra.mxu0 %v13042_v22  ;;  %v15253_v22 = vld [vmem:[#allocation77_spill] sm:$0xff] }
 0x456   : > { %9326 = vmatpush1.bf16.msra.mxu1 %v13047_v51  ;;  %9200 = vmatprep.subr.bf16.mxu0 %v13092_v28  ;;  %v15254_v51 = vld [vmem:[#allocation24_spill] sm:$0xff]  ;;  %v15258_v28 = vld [vmem:[#allocation82_spill] sm:$0xff] }
 0x457   : > { %9328 = vmatprep.subr.bf16.mxu1 %v13094_v42  ;;  %v5661_v42 = vld [vmem:[%s14824_s7] sm:$0xff] }
 0x459   : > { %9202 = vmatpush1.bf16.msra.mxu0 %v13078_v1  ;;  %v15257_v1 = vld [vmem:[#allocation73_spill] sm:$0xff] }
 0x45a   : > { %9330 = vmatpush1.bf16.msra.mxu1 %v13083_v7  ;;  %9204 = vmatprep.subr.bf16.mxu0 %v13128_v52  ;;  %v13876_v7 = vpop.permute.xlu0 %5893  ;;  %v15259_v52 = vld [vmem:[#allocation83_spill] sm:$0xff] }
 0x45b   : > { %9332 = vmatprep.subr.bf16.mxu1 %v13130_v36  ;;  %v15260_v36 = vld [vmem:[#allocation88_spill] sm:$0xff] }
 0x45d   : > { %9206 = vmatpush1.bf16.msra.mxu0 %v15238_v32  ;;  %v15280_v32 = vld [vmem:[#allocation97_spill] sm:$0xff] }
 0x45e   : > { %9334 = vmatpush1.bf16.msra.mxu1 %v15239_v16  ;;  %9208 = vmatprep.subr.bf16.mxu0 %v15240_v25  ;;  %v13894_v8 = vpop.permute.xlu0 %5903  ;;  %v15281_v16 = vld [vmem:[#allocation98_spill] sm:$0xff]  ;;  %v5686_v25 = vld [vmem:[%s14824_s7 + $0xc8] sm:$0xff] }
 0x45f   : > { %9336 = vmatprep.subr.bf16.mxu1 %v15241_v26 }
 0x461   : > { %9210 = vmatpush1.bf16.msra.mxu0 %v15242_v37  ;;  %v15282_v37 = vld [vmem:[#allocation78_spill] sm:$0xff] }
 0x462   : > { %9338 = vmatpush1.bf16.msra.mxu1 %v15243_v19  ;;  %9212 = vmatprep.subr.bf16.mxu0 %v15244_v57  ;;  %v13910_v3 = vpop.permute.xlu0 %5913  ;;  %v5685_v19 = vld [vmem:[%s14824_s7 + $0xc0] sm:$0xff] }
 0x463   : > { %9340 = vmatprep.subr.bf16.mxu1 %v15245_v2  ;;  %v15283_v57 = vld [vmem:[#allocation32_spill] sm:$0xff]  ;;  %v15284_v2 = vld [vmem:[#allocation81_spill] sm:$0xff] }
 0x465   : > { %9214 = vmatpush1.bf16.msra.mxu0 %v15246_v49  ;;  %v15285_v49 = vld [vmem:[#allocation87_spill] sm:$0xff] }
 0x466   : > { %9342 = vmatpush1.bf16.msra.mxu1 %v15247_v6  ;;  %9216 = vmatprep.subr.bf16.mxu0 %v15248_v62  ;;  %v13928_v41 = vpop.permute.xlu0 %5923  ;;  %v5690_v6 = vld [vmem:[%s14824_s7 + $0xe8] sm:$0xff]  ;;  %v15286_v62 = vld [vmem:[#allocation84_spill] sm:$0xff] }
 0x467   : > { %9344 = vmatprep.subr.bf16.mxu1 %v15249_v13  ;;  %v5689_v13 = vld [vmem:[%s14824_s7 + $0xe0] sm:$0xff] }
 0x469   : > { %9218 = vmatpush1.bf16.msra.mxu0 %v15250_v9  ;;  %v15287_v9 = vld [vmem:[#allocation99_spill] sm:$0xff] }
 0x46a   : > { %9346 = vmatpush1.bf16.msra.mxu1 %v15251_v63  ;;  %9220 = vmatprep.subr.bf16.mxu0 %v15252_v34  ;;  %v13944_v26 = vpop.permute.xlu0 %5933  ;;  %v15288_v63 = vld [vmem:[#allocation26_spill] sm:$0xff] }
 0x46b   : > { %9348 = vmatprep.subr.bf16.mxu1 %v15253_v22  ;;  %v15289_v22 = vld [vmem:[#allocation107_spill] sm:$0xff] }
 0x46d   : > { %9222 = vmatpush1.bf16.msra.mxu0 %v15254_v51  ;;  %v5694_v51 = vld [vmem:[%s14824_s7 + $0x108] sm:$0xff] }
 0x46e   : > { %9350 = vmatpush1.bf16.msra.mxu1 %v15255_v29  ;;  %9224 = vmatprep.subr.bf16.mxu0 %v15256_v55  ;;  %v13962_v34 = vpop.permute.xlu0 %5943  ;;  %v15290_v29 = vld [vmem:[#allocation25_spill] sm:$0xff]  ;;  %v5693_v55 = vld [vmem:[%s14824_s7 + $0x100] sm:$0xff] }
 0x46f   : > { %9352 = vmatprep.subr.bf16.mxu1 %v15257_v1  ;;  %v15291_v1 = vld [vmem:[#allocation89_spill] sm:$0xff] }
 0x471   : > { %9226 = vmatpush1.bf16.msra.mxu0 %v15258_v28  ;;  %v15292_v28 = vld [vmem:[#allocation110_spill] sm:$0xff] }
 0x472   : > { %9354 = vmatpush1.bf16.msra.mxu1 %v15259_v52  ;;  %9228 = vmatprep.subr.bf16.mxu0 %v15260_v36  ;;  %v5698_v52 = vld [vmem:[%s14824_s7 + $0x128] sm:$0xff]  ;;  %v13978_v36 = vpop.permute.xlu0 %5953 }
 0x473   : > { %9356 = vmatprep.subr.bf16.mxu1 %v15261_v44  ;;  %v15294_v44 = vld [vmem:[#allocation108_spill] sm:$0xff] }
 0x474   : > { %6046 = vmatmul.mubr.f32.vlgmr.msra.gmra.mrb[66].mxu0 %v5661_v42 }
 0x475   : > { %6560 = vmatmul.mubr.f32.vlgmr.msra.gmra.mrb[66].mxu1 %v5661_v42  ;;  %9230 = vmatpush1.bf16.msra.mxu0 %v15262_v5  ;;  %v15293_v42 = vld [vmem:[#allocation111_spill] sm:$0xff]  ;;  %v15295_v5 = vld [vmem:[#allocation109_spill] sm:$0xff] }
 0x476   : > { %9358 = vmatpush1.bf16.msra.mxu1 %v15263_v0  ;;  %9232 = vmatprep.subr.bf16.mxu0 %v15264_v30  ;;  %v15297_v0 = vld [vmem:[#allocation115_spill] sm:$0xff]  ;;  %v5702_v30 = vld [vmem:[%s14824_s7 + $0x148] sm:$0xff] }
 0x477   : > { %9360 = vmatprep.subr.bf16.mxu1 %v15265_v31  ;;  %6051 = vmatprep.mubr.f32.mxu0 %v5666_v21  ;;  %v15298_v31 = vld [vmem:[#allocation112_spill] sm:$0xff] }
 0x478   : > { %6565 = vmatprep.mubr.f32.mxu1 %v5666_v21  ;;  %6052 = vmatmul.mubr.f32.gmra.mrb[68].mxu0 %v5665_v50  ;;  %v5697_v21 = vld [vmem:[%s14824_s7 + $0x120] sm:$0xff] }
 0x479   : > { %6566 = vmatmul.mubr.f32.gmra.mrb[68].mxu1 %v5665_v50  ;;  %9234 = vmatpush1.bf16.msra.mxu0 %v15266_v4  ;;  %v15296_v50 = vld [vmem:[#allocation114_spill] sm:$0xff]  ;;  %v15299_v4 = vld [vmem:[#allocation113_spill] sm:$0xff] }
 0x47a   : > { %9362 = vmatpush1.bf16.msra.mxu1 %v15267_v45  ;;  %9236 = vmatprep.subr.bf16.mxu0 %v15268_v54  ;;  %v13996_v45 = vpop.permute.xlu0 %5963  ;;  %v15301_v54 = vld [vmem:[#allocation119_spill] sm:$0xff] }
 0x47b   : > { %9364 = vmatprep.subr.bf16.mxu1 %v15269_v14  ;;  %6057 = vmatprep.mubr.f32.mxu0 %v5670_v56  ;;  %v5706_v14 = vld [vmem:[%s14824_s7 + $0x168] sm:$0xff] }
 0x47c   : > { %6571 = vmatprep.mubr.f32.mxu1 %v5670_v56  ;;  %6058 = vmatmul.mubr.f32.gmra.mrb[70].mxu0 %v5669_v46  ;;  %v5701_v56 = vld [vmem:[%s14824_s7 + $0x140] sm:$0xff] }
 0x47d   : > { %6572 = vmatmul.mubr.f32.gmra.mrb[70].mxu1 %v5669_v46  ;;  %9238 = vmatpush1.bf16.msra.mxu0 %v15270_v23  ;;  %v15300_v46 = vld [vmem:[#allocation118_spill] sm:$0xff]  ;;  %v5705_v23 = vld [vmem:[%s14824_s7 + $0x160] sm:$0xff] }
 0x47e   : > { %9366 = vmatpush1.bf16.msra.mxu1 %v15271_v58  ;;  %9240 = vmatprep.subr.bf16.mxu0 %v15272_v17  ;;  %v15304_v58 = vld [vmem:[#allocation122_spill] sm:$0xff]  ;;  %v15305_v17 = vld [vmem:[#allocation123_spill] sm:$0xff] }
 0x47f   : > { %9368 = vmatprep.subr.bf16.mxu1 %v15273_v48  ;;  %6063 = vmatprep.mubr.f32.mxu0 %v5674_v38  ;;  %v5710_v48 = vld [vmem:[%s14824_s7 + $0x188] sm:$0xff] }
 0x480   : > { %6577 = vmatprep.mubr.f32.mxu1 %v5674_v38  ;;  %6064 = vmatmul.mubr.f32.gmra.mrb[72].mxu0 %v5673_v60  ;;  %v15302_v38 = vld [vmem:[#allocation116_spill] sm:$0xff] }
 0x481   : > { %6578 = vmatmul.mubr.f32.gmra.mrb[72].mxu1 %v5673_v60  ;;  %9242 = vmatpush1.bf16.msra.mxu0 %v15274_v10  ;;  %v15303_v60 = vld [vmem:[#allocation117_spill] sm:$0xff]  ;;  %v15306_v10 = vld [vmem:[#allocation120_spill] sm:$0xff] }
 0x482   : > { %9370 = vmatpush1.bf16.msra.mxu1 %v15275_v18  ;;  %9244 = vmatprep.subr.bf16.mxu0 %v15276_v47  ;;  %v15307_v18 = vld [vmem:[#allocation121_spill] sm:$0xff]  ;;  %v15308_v47 = vld [vmem:[#allocation126_spill] sm:$0xff] }
 0x483   : > { %9372 = vmatprep.subr.bf16.mxu1 %v15277_v12  ;;  %6069 = vmatprep.mubr.f32.mxu0 %v5678_v40  ;;  %v15309_v12 = vld [vmem:[#allocation127_spill] sm:$0xff] }
 0x484   : > { %6583 = vmatprep.mubr.f32.mxu1 %v5678_v40  ;;  %6070 = vmatmul.mubr.f32.gmra.mrb[74].mxu0 %v5677_v59  ;;  %v14012_v40 = vpop.permute.xlu0 %5973 }
 0x485   : > { %6584 = vmatmul.mubr.f32.gmra.mrb[74].mxu1 %v5677_v59  ;;  %9246 = vmatpush1.bf16.msra.mxu0 %v15278_v43  ;;  %v5709_v59 = vld [vmem:[%s14824_s7 + $0x180] sm:$0xff] }
 0x486   : > { %9374 = vmatpush1.bf16.msra.mxu1 %v15279_v27  ;;  %9248 = vmatprep.subr.bf16.mxu0 %v15280_v32  ;;  %v15310_v43 = vld [vmem:[#allocation124_spill] sm:$0xff]  ;;  %v15311_v27 = vld [vmem:[#allocation125_spill] sm:$0xff]  ;;  %v15312_v32 = vld [vmem:[#allocation130_spill] sm:$0xff] }
 0x487   : > { %9376 = vmatprep.subr.bf16.mxu1 %v15281_v16  ;;  %6075 = vmatprep.mubr.f32.mxu0 %v5682_v20 }
 0x488   : > { %6589 = vmatprep.mubr.f32.mxu1 %v5682_v20  ;;  %6076 = vmatmul.mubr.f32.gmra.mrb[76].mxu0 %v5681_v11  ;;  %v5714_v20 = vld [vmem:[%s14824_s7 + $0x1a8] sm:$0xff]  ;;  %v14030_v16 = vpop.permute.xlu0 %7235 }
 0x489   : > { %6590 = vmatmul.mubr.f32.gmra.mrb[76].mxu1 %v5681_v11  ;;  %9250 = vmatpush1.bf16.msra.mxu0 %v15282_v37  ;;  %v5713_v11 = vld [vmem:[%s14824_s7 + $0x1a0] sm:$0xff]  ;;  %v5718_v37 = vld [vmem:[%s14824_s7 + $0x1c8] sm:$0xff] }
 0x48a   : > { %9378 = vmatpush1.bf16.msra.mxu1 %v15283_v57  ;;  %9252 = vmatprep.subr.bf16.mxu0 %v15284_v2  ;;  %v5717_v57 = vld [vmem:[%s14824_s7 + $0x1c0] sm:$0xff]  ;;  %v15315_v2 = vld [vmem:[#allocation129_spill] sm:$0xff] }
 0x48b   : > { %9380 = vmatprep.subr.bf16.mxu1 %v15285_v49  ;;  %6081 = vmatprep.mubr.f32.mxu0 %v5686_v25  ;;  %v15316_v49 = vld [vmem:[#allocation134_spill] sm:$0xff] }
 0x48c   : > { %6595 = vmatprep.mubr.f32.mxu1 %v5686_v25  ;;  %6082 = vmatmul.mubr.f32.gmra.mrb[78].mxu0 %v5685_v19  ;;  %v15313_v25 = vld [vmem:[#allocation131_spill] sm:$0xff] }
 0x48d   : > { %6596 = vmatmul.mubr.f32.gmra.mrb[78].mxu1 %v5685_v19  ;;  %9254 = vmatpush1.bf16.msra.mxu0 %v15286_v62  ;;  %v15314_v19 = vld [vmem:[#allocation128_spill] sm:$0xff]  ;;  %v5722_v62 = vld [vmem:[%s14824_s7 + $0x1e8] sm:$0xff] }
 0x48e   : > { %9382 = vmatpush1.bf16.msra.mxu1 %v15287_v9  ;;  %9256 = vmatprep.subr.bf16.mxu0 %v15288_v63  ;;  %v15318_v9 = vld [vmem:[#allocation132_spill] sm:$0xff] }
 0x48f   : > { %9384 = vmatprep.subr.bf16.mxu1 %v15289_v22  ;;  %6087 = vmatprep.mubr.f32.mxu0 %v5690_v6  ;;  %v5721_v63 = vld [vmem:[%s14824_s7 + $0x1e0] sm:$0xff]  ;;  %v15319_v22 = vld [vmem:[#allocation133_spill] sm:$0xff] }
 0x490   : > { %6601 = vmatprep.mubr.f32.mxu1 %v5690_v6  ;;  %6088 = vmatmul.mubr.f32.gmra.mrb[80].mxu0 %v5689_v13  ;;  %v15317_v6 = vld [vmem:[#allocation135_spill] sm:$0xff] }
 0x491   : > { %6602 = vmatmul.mubr.f32.gmra.mrb[80].mxu1 %v5689_v13  ;;  %9258 = vmatpush1.bf16.msra.mxu0 %v15290_v29  ;;  %v14046_v13 = vpop.permute.xlu0 %7245  ;;  %v15321_v29 = vld [vmem:[#allocation139_spill] sm:$0xff] }
 0x492   : > { %9386 = vmatpush1.bf16.msra.mxu1 %v15291_v1  ;;  %9260 = vmatprep.subr.bf16.mxu0 %v15292_v28  ;;  %v15322_v1 = vld [vmem:[#allocation136_spill] sm:$0xff] }
 0x493   : > { %9388 = vmatprep.subr.bf16.mxu1 %v15293_v42  ;;  %6093 = vmatprep.mubr.f32.mxu0 %v5694_v51  ;;  %v5725_v28 = vld [vmem:[%s14824_s7 + $0x200] sm:$0xff]  ;;  %v15323_v42 = vld [vmem:[#allocation137_spill] sm:$0xff] }
 0x494   : > { %6607 = vmatprep.mubr.f32.mxu1 %v5694_v51  ;;  %6094 = vmatmul.mubr.f32.gmra.mrb[82].mxu0 %v5693_v55  ;;  %v15320_v51 = vld [vmem:[#allocation138_spill] sm:$0xff] }
 0x495   : > { %6608 = vmatmul.mubr.f32.gmra.mrb[82].mxu1 %v5693_v55  ;;  %9262 = vmatpush1.bf16.msra.mxu0 %v15294_v44  ;;  %v5726_v55 = vld [vmem:[%s14824_s7 + $0x208] sm:$0xff]  ;;  %v14066_v44 = vpop.permute.xlu0 %7255 }
 0x496   : > { %9390 = vmatpush1.bf16.msra.mxu1 %v15295_v5  ;;  %9264 = vmatprep.subr.bf16.mxu0 %v15296_v50  ;;  %v5734_v5 = vld [vmem:[%s14824_s7 + $0x248] sm:$0xff] }
 0x497   : > { %9392 = vmatprep.subr.bf16.mxu1 %v15297_v0  ;;  %6099 = vmatprep.mubr.f32.mxu0 %v5698_v52  ;;  %v5733_v0 = vld [vmem:[%s14824_s7 + $0x240] sm:$0xff] }
 0x498   : > { %6613 = vmatprep.mubr.f32.mxu1 %v5698_v52  ;;  %6100 = vmatmul.mubr.f32.gmra.mrb[84].mxu0 %v5697_v21  ;;  %v5730_v52 = vld [vmem:[%s14824_s7 + $0x228] sm:$0xff] }
 0x499   : > { %6614 = vmatmul.mubr.f32.gmra.mrb[84].mxu1 %v5697_v21  ;;  %9266 = vmatpush1.bf16.msra.mxu0 %v15298_v31  ;;  %v5729_v21 = vld [vmem:[%s14824_s7 + $0x220] sm:$0xff]  ;;  %v14074_v50 = vpop.permute.xlu0 %7265 }
 0x49a   : > { %9394 = vmatpush1.bf16.msra.mxu1 %v15299_v4  ;;  %9268 = vmatprep.subr.bf16.mxu0 %v15300_v46  ;;  %v5737_v31 = vld [vmem:[%s14824_s7 + $0x260] sm:$0xff] }
 0x49b   : > { %9396 = vmatprep.subr.bf16.mxu1 %v15301_v54  ;;  %6105 = vmatprep.mubr.f32.mxu0 %v5702_v30  ;;  %v5741_v46 = vld [vmem:[%s14824_s7 + $0x280] sm:$0xff]  ;;  %v5746_v54 = vld [vmem:[%s14824_s7 + $0x2a8] sm:$0xff] }
 0x49c   : > { %6619 = vmatprep.mubr.f32.mxu1 %v5702_v30  ;;  %6106 = vmatmul.mubr.f32.gmra.mrb[86].mxu0 %v5701_v56  ;;  %v5738_v30 = vld [vmem:[%s14824_s7 + $0x268] sm:$0xff] }
 0x49d   : > { %6620 = vmatmul.mubr.f32.gmra.mrb[86].mxu1 %v5701_v56  ;;  %9270 = vmatpush1.bf16.msra.mxu0 %v15302_v38  ;;  %v5742_v56 = vld [vmem:[%s14824_s7 + $0x288] sm:$0xff]  ;;  %v14088_v4 = vpop.permute.xlu0 %7275  ;;  %v5745_v38 = vld [vmem:[%s14824_s7 + $0x2a0] sm:$0xff] }
 0x49e   : > { %9398 = vmatpush1.bf16.msra.mxu1 %v15303_v60  ;;  %9272 = vmatprep.subr.bf16.mxu0 %v15304_v58  ;;  %v5749_v60 = vld [vmem:[%s14824_s7 + $0x2c0] sm:$0xff]  ;;  %v5754_v58 = vld [vmem:[%s14824_s7 + $0x2e8] sm:$0xff] }
 0x49f   : > { %9400 = vmatprep.subr.bf16.mxu1 %v15305_v17  ;;  %6111 = vmatprep.mubr.f32.mxu0 %v5706_v14 }
 0x4a0   : > { %6625 = vmatprep.mubr.f32.mxu1 %v5706_v14  ;;  %6112 = vmatmul.mubr.f32.gmra.mrb[88].mxu0 %v5705_v23 }
 0x4a1   : > { %6626 = vmatmul.mubr.f32.gmra.mrb[88].mxu1 %v5705_v23  ;;  %9274 = vmatpush1.bf16.msra.mxu0 %v15306_v10  ;;  %v14096_v14 = vpop.permute.xlu0 %7285  ;;  %v5750_v23 = vld [vmem:[%s14824_s7 + $0x2c8] sm:$0xff] }
 0x4a2   : > { %9402 = vmatpush1.bf16.msra.mxu1 %v15307_v18  ;;  %9276 = vmatprep.subr.bf16.mxu0 %v15308_v47  ;;  %v5758_v10 = vld [vmem:[%s14824_s7 + $0x308] sm:$0xff]  ;;  %v5757_v18 = vld [vmem:[%s14824_s7 + $0x300] sm:$0xff] }
 0x4a3   : > { %9404 = vmatprep.subr.bf16.mxu1 %v15309_v12  ;;  %6117 = vmatprep.mubr.f32.mxu0 %v5710_v48  ;;  %v5762_v47 = vld [vmem:[%s14824_s7 + $0x328] sm:$0xff]  ;;  %v5761_v12 = vld [vmem:[%s14824_s7 + $0x320] sm:$0xff] }
 0x4a4   : > { %6631 = vmatprep.mubr.f32.mxu1 %v5710_v48  ;;  %6118 = vmatmul.mubr.f32.gmra.mrb[90].mxu0 %v5709_v59  ;;  %v5753_v48 = vld [vmem:[%s14824_s7 + $0x2e0] sm:$0xff] }
 0x4a5   : > { %6632 = vmatmul.mubr.f32.gmra.mrb[90].mxu1 %v5709_v59  ;;  %9278 = vmatpush1.bf16.msra.mxu0 %v15310_v43  ;;  %v14110_v17 = vpop.permute.xlu0 %7295 }
 0x4a6   : > { %9406 = vmatpush1.bf16.msra.mxu1 %v15311_v27  ;;  %9280 = vmatprep.subr.bf16.mxu0 %v15312_v32  ;;  %v5770_v27 = vld [vmem:[%s14824_s7 + $0x368] sm:$0xff] }
 0x4a7   : > { %9408 = vmatprep.subr.bf16.mxu1 %v15313_v25  ;;  %6123 = vmatprep.mubr.f32.mxu0 %v5714_v20  ;;  %v5769_v25 = vld [vmem:[%s14824_s7 + $0x360] sm:$0xff] }
 0x4a8   : > { %6637 = vmatprep.mubr.f32.mxu1 %v5714_v20  ;;  %6124 = vmatmul.mubr.f32.gmra.mrb[92].mxu0 %v5713_v11  ;;  %v5766_v20 = vld [vmem:[%s14824_s7 + $0x348] sm:$0xff] }
 0x4a9   : > { %6638 = vmatmul.mubr.f32.gmra.mrb[92].mxu1 %v5713_v11  ;;  %9282 = vmatpush1.bf16.msra.mxu0 %v15314_v19  ;;  %v14118_v59 = vpop.permute.xlu0 %7305  ;;  %v5765_v11 = vld [vmem:[%s14824_s7 + $0x340] sm:$0xff] }
 0x4aa   : > { %9410 = vmatpush1.bf16.msra.mxu1 %v15315_v2  ;;  %9284 = vmatprep.subr.bf16.mxu0 %v15316_v49  ;;  %v5773_v19 = vld [vmem:[%s14824_s7 + $0x380] sm:$0xff] }
 0x4ab   : > { %9412 = vmatprep.subr.bf16.mxu1 %v15317_v6  ;;  %6129 = vmatprep.mubr.f32.mxu0 %v5718_v37  ;;  %v5777_v49 = vld [vmem:[%s14824_s7 + $0x3a0] sm:$0xff]  ;;  %v5782_v6 = vld [vmem:[%s14824_s7 + $0x3c8] sm:$0xff] }
 0x4ac   : > { %6643 = vmatprep.mubr.f32.mxu1 %v5718_v37  ;;  %6130 = vmatmul.mubr.f32.gmra.mrb[94].mxu0 %v5717_v57  ;;  %v5774_v37 = vld [vmem:[%s14824_s7 + $0x388] sm:$0xff] }
 0x4ad   : > { %6644 = vmatmul.mubr.f32.gmra.mrb[94].mxu1 %v5717_v57  ;;  %9286 = vmatpush1.bf16.msra.mxu0 %v15318_v9  ;;  %v14132_v43 = vpop.permute.xlu0 %7315  ;;  %v5778_v57 = vld [vmem:[%s14824_s7 + $0x3a8] sm:$0xff]  ;;  %v5781_v9 = vld [vmem:[%s14824_s7 + $0x3c0] sm:$0xff] }
 0x4ae   : > { %9414 = vmatpush1.bf16.msra.mxu1 %v15319_v22  ;;  %9288 = vmatprep.subr.bf16.mxu0 %v15320_v51  ;;  %v5785_v22 = vld [vmem:[%s14824_s7 + $0x3e0] sm:$0xff]  ;;  %v5664_v51 = vld [vmem:[%s14824_s7 + $0x18] sm:$0xff] }
 0x4af   : > { %9416 = vmatprep.subr.bf16.mxu1 %v15321_v29  ;;  %6135 = vmatprep.mubr.f32.mxu0 %v5722_v62 }
 0x4b0   : > { %6649 = vmatprep.mubr.f32.mxu1 %v5722_v62  ;;  %6136 = vmatmul.mubr.f32.gmra.mrb[96].mxu0 %v5721_v63 }
 0x4b1   : > { %6650 = vmatmul.mubr.f32.gmra.mrb[96].mxu1 %v5721_v63  ;;  %9290 = vmatpush1.bf16.msra.mxu0 %v15322_v1  ;;  %v14140_v32 = vpop.permute.xlu0 %7325  ;;  %v5786_v63 = vld [vmem:[%s14824_s7 + $0x3e8] sm:$0xff]  ;;  %v5668_v1 = vld [vmem:[%s14824_s7 + $0x38] sm:$0xff] }
 0x4b2   : > { %9418 = vmatpush1.bf16.msra.mxu1 %v15323_v42  ;;  %6141 = vmatprep.mubr.f32.mxu0 %v5726_v55  ;;  %v5667_v42 = vld [vmem:[%s14824_s7 + $0x30] sm:$0xff] }
 0x4b3   : > { %6655 = vmatprep.mubr.f32.mxu1 %v5726_v55  ;;  %v5663_v55 = vld [vmem:[%s14824_s7 + $0x10] sm:$0xff] }
 0x4b4   : > { %6142 = vmatmul.mubr.f32.gmra.mrb[98].mxu0 %v5725_v28 }
 0x4b5   : > { %6656 = vmatmul.mubr.f32.gmra.mrb[98].mxu1 %v5725_v28  ;;  %6147 = vmatprep.mubr.f32.mxu0 %v5730_v52  ;;  %v14154_v2 = vpop.permute.xlu0 %7335 }
 0x4b6   : > { %6661 = vmatprep.mubr.f32.mxu1 %v5730_v52  ;;  %v5672_v52 = vld [vmem:[%s14824_s7 + $0x58] sm:$0xff] }
 0x4b8   : > { %6148 = vmatmul.mubr.f32.gmra.mrb[100].mxu0 %v5729_v21 }
 0x4b9   : > { %6662 = vmatmul.mubr.f32.gmra.mrb[100].mxu1 %v5729_v21  ;;  %6153 = vmatprep.mubr.f32.mxu0 %v5734_v5  ;;  %v14162_v62 = vpop.permute.xlu0 %7345  ;;  %v5671_v21 = vld [vmem:[%s14824_s7 + $0x50] sm:$0xff] }
 0x4ba   : > { %6667 = vmatprep.mubr.f32.mxu1 %v5734_v5  ;;  %v5676_v5 = vld [vmem:[%s14824_s7 + $0x78] sm:$0xff] }
 0x4bc   : > { %6154 = vmatmul.mubr.f32.gmra.mrb[102].mxu0 %v5733_v0 }
 0x4bd   : > { %6668 = vmatmul.mubr.f32.gmra.mrb[102].mxu1 %v5733_v0  ;;  %6159 = vmatprep.mubr.f32.mxu0 %v5738_v30  ;;  %v14176_v29 = vpop.permute.xlu0 %7355 }
 0x4be   : > { %6673 = vmatprep.mubr.f32.mxu1 %v5738_v30  ;;  %v5675_v30 = vld [vmem:[%s14824_s7 + $0x70] sm:$0xff] }
 0x4c0   : > { %6160 = vmatmul.mubr.f32.gmra.mrb[104].mxu0 %v5737_v31 }
 0x4c1   : > { %6674 = vmatmul.mubr.f32.gmra.mrb[104].mxu1 %v5737_v31  ;;  %6165 = vmatprep.mubr.f32.mxu0 %v5742_v56  ;;  %v14184_v28 = vpop.permute.xlu0 %7365  ;;  %v5680_v31 = vld [vmem:[%s14824_s7 + $0x98] sm:$0xff] }
 0x4c2   : > { %6679 = vmatprep.mubr.f32.mxu1 %v5742_v56 }
 0x4c4   : > { %6166 = vmatmul.mubr.f32.gmra.mrb[106].mxu0 %v5741_v46 }
 0x4c5   : > { %6680 = vmatmul.mubr.f32.gmra.mrb[106].mxu1 %v5741_v46  ;;  %6171 = vmatprep.mubr.f32.mxu0 %v5746_v54  ;;  %v14198_v0 = vpop.permute.xlu0 %7375  ;;  %v5679_v46 = vld [vmem:[%s14824_s7 + $0x90] sm:$0xff] }
 0x4c6   : > { %6685 = vmatprep.mubr.f32.mxu1 %v5746_v54  ;;  %v8284_v54 = vlaneseq }
 0x4c8   : > { %6172 = vmatmul.mubr.f32.gmra.mrb[108].mxu0 %v5745_v38 }
 0x4c9   : > { %6686 = vmatmul.mubr.f32.gmra.mrb[108].mxu1 %v5745_v38  ;;  %6177 = vmatprep.mubr.f32.mxu0 %v5750_v23  ;;  %v14206_v56 = vpop.permute.xlu0 %7385  ;;  %v10416_v38 = vmov 1983009808  }
 0x4ca   : > { %6691 = vmatprep.mubr.f32.mxu1 %v5750_v23  ;;  %v8312_v23 = vunpack.c.l.s4 %v10416_v38  ;;  %v5708_v38 = vld [vmem:[%s14824_s7 + $0x178] sm:$0xff] }
 0x4cc   : > { %6178 = vmatmul.mubr.f32.gmra.mrb[110].mxu0 %v5749_v60 }
 0x4cd   : > { %6692 = vmatmul.mubr.f32.gmra.mrb[110].mxu1 %v5749_v60  ;;  %6183 = vmatprep.mubr.f32.mxu0 %v5754_v58  ;;  %v5684_v60 = vld [vmem:[%s14824_s7 + $0xb8] sm:$0xff] }
 0x4ce   : > { %6697 = vmatprep.mubr.f32.mxu1 %v5754_v58  ;;  %v14215_v58 = vshrl.u32 %v8284_v54, 7 }
 0x4d0   : > { %6184 = vmatmul.mubr.f32.gmra.mrb[112].mxu0 %v5753_v48 }
 0x4d1   : > { %6698 = vmatmul.mubr.f32.gmra.mrb[112].mxu1 %v5753_v48  ;;  %6189 = vmatprep.mubr.f32.mxu0 %v5758_v10  ;;  %v8313_v48 = vunpack.c.0.s8 %v8312_v23  ;;  %v5707_v23 = vld [vmem:[%s14824_s7 + $0x170] sm:$0xff] }
 0x4d2   : > { %6703 = vmatprep.mubr.f32.mxu1 %v5758_v10  ;;  %v5683_v10 = vld [vmem:[%s14824_s7 + $0xb0] sm:$0xff] }
 0x4d4   : > { %6190 = vmatmul.mubr.f32.gmra.mrb[114].mxu0 %v5757_v18 }
 0x4d5   : > { %6704 = vmatmul.mubr.f32.gmra.mrb[114].mxu1 %v5757_v18  ;;  %6195 = vmatprep.mubr.f32.mxu0 %v5762_v47  ;;  %v5688_v18 = vld [vmem:[%s14824_s7 + $0xd8] sm:$0xff] }
 0x4d6   : > { %6709 = vmatprep.mubr.f32.mxu1 %v5762_v47  ;;  %v5506_v47 = vpop.permute.xlu0 %5505 }
 0x4d8   : > { %6196 = vmatmul.mubr.f32.gmra.mrb[116].mxu0 %v5761_v12 }
 0x4d9   : > { %6710 = vmatmul.mubr.f32.gmra.mrb[116].mxu1 %v5761_v12  ;;  %6201 = vmatprep.mubr.f32.mxu0 %v5766_v20 }
 0x4da   : > { %6715 = vmatprep.mubr.f32.mxu1 %v5766_v20 }
 0x4dc   : > { %6202 = vmatmul.mubr.f32.gmra.mrb[118].mxu0 %v5765_v11 }
 0x4dd   : > { %6716 = vmatmul.mubr.f32.gmra.mrb[118].mxu1 %v5765_v11  ;;  %6207 = vmatprep.mubr.f32.mxu0 %v5770_v27 }
 0x4de   : > { %6721 = vmatprep.mubr.f32.mxu1 %v5770_v27 }
 0x4e0   : > { %6208 = vmatmul.mubr.f32.gmra.mrb[120].mxu0 %v5769_v25 }
 0x4e1   : > { %6722 = vmatmul.mubr.f32.gmra.mrb[120].mxu1 %v5769_v25  ;;  %6213 = vmatprep.mubr.f32.mxu0 %v5774_v37 }
 0x4e2   : > { %6727 = vmatprep.mubr.f32.mxu1 %v5774_v37 }
 0x4e4   : > { %6214 = vmatmul.mubr.f32.gmra.mrb[122].mxu0 %v5773_v19 }
 0x4e5   : > { %6728 = vmatmul.mubr.f32.gmra.mrb[122].mxu1 %v5773_v19  ;;  %6219 = vmatprep.mubr.f32.mxu0 %v5778_v57  ;;  %v8316_v19 = vsub.s32 %v8313_v48, %v14215_v58  ;;  %v5711_v48 = vld [vmem:[%s14824_s7 + $0x190] sm:$0xff] }
 0x4e6   : > { %6733 = vmatprep.mubr.f32.mxu1 %v5778_v57 }
 0x4e8   : > { %6220 = vmatmul.mubr.f32.gmra.mrb[124].mxu0 %v5777_v49 }
 0x4e9   : > { %6734 = vmatmul.mubr.f32.gmra.mrb[124].mxu1 %v5777_v49  ;;  %6225 = vmatprep.mubr.f32.mxu0 %v5782_v6  ;;  %v5687_v49 = vld [vmem:[%s14824_s7 + $0xd0] sm:$0xff] }
 0x4ea   : > { %6739 = vmatprep.mubr.f32.mxu1 %v5782_v6 }
 0x4ec   : > { %6226 = vmatmul.mubr.f32.gmra.mrb[126].mxu0 %v5781_v9 }
 0x4ed   : > { %6740 = vmatmul.mubr.f32.gmra.mrb[126].mxu1 %v5781_v9  ;;  %6231 = vmatprep.mubr.f32.mxu0 %v5786_v63  ;;  %v5692_v9 = vld [vmem:[%s14824_s7 + $0xf8] sm:$0xff] }
 0x4ee   : > { %6745 = vmatprep.mubr.f32.mxu1 %v5786_v63 }
 0x4f0   : > { %6232 = vmatmul.mubr.f32.gmra.mrb[128].mxu0 %v5785_v22 }
 0x4f1   : > { %6746 = vmatmul.mubr.f32.gmra.mrb[128].mxu1 %v5785_v22  ;;  %6302 = vmatprep.mubr.f32.mxu0 %v5664_v51 }
 0x4f2   : > { %6816 = vmatprep.mubr.f32.mxu1 %v5664_v51 }
 0x4f4   : > { %6303 = vmatmul.mubr.f32.vlgmr.msra.gmra.mrb[66].mxu0 %v5663_v55 }
 0x4f5   : > { %6817 = vmatmul.mubr.f32.vlgmr.msra.gmra.mrb[66].mxu1 %v5663_v55  ;;  %6308 = vmatprep.mubr.f32.mxu0 %v5668_v1  ;;  %v5691_v55 = vld [vmem:[%s14824_s7 + $0xf0] sm:$0xff] }
 0x4f6   : > { %6822 = vmatprep.mubr.f32.mxu1 %v5668_v1 }
 0x4f8   : > { %6309 = vmatmul.mubr.f32.gmra.mrb[68].mxu0 %v5667_v42 }
 0x4f9   : > { %6823 = vmatmul.mubr.f32.gmra.mrb[68].mxu1 %v5667_v42  ;;  %6314 = vmatprep.mubr.f32.mxu0 %v5672_v52  ;;  %v5696_v42 = vld [vmem:[%s14824_s7 + $0x118] sm:$0xff] }
 0x4fa   : > { %6828 = vmatprep.mubr.f32.mxu1 %v5672_v52 }
 0x4fc   : > { %6315 = vmatmul.mubr.f32.gmra.mrb[70].mxu0 %v5671_v21 }
 0x4fd   : > { %6829 = vmatmul.mubr.f32.gmra.mrb[70].mxu1 %v5671_v21  ;;  %6320 = vmatprep.mubr.f32.mxu0 %v5676_v5  ;;  %v5695_v21 = vld [vmem:[%s14824_s7 + $0x110] sm:$0xff] }
 0x4fe   : > { %6834 = vmatprep.mubr.f32.mxu1 %v5676_v5  ;;  %v5700_v5 = vld [vmem:[%s14824_s7 + $0x138] sm:$0xff] }
 0x500   : > { %6321 = vmatmul.mubr.f32.gmra.mrb[72].mxu0 %v5675_v30 }
 0x501   : > { %6835 = vmatmul.mubr.f32.gmra.mrb[72].mxu1 %v5675_v30  ;;  %6326 = vmatprep.mubr.f32.mxu0 %v5680_v31  ;;  %v5699_v30 = vld [vmem:[%s14824_s7 + $0x130] sm:$0xff] }
 0x502   : > { %6840 = vmatprep.mubr.f32.mxu1 %v5680_v31  ;;  %v5704_v31 = vld [vmem:[%s14824_s7 + $0x158] sm:$0xff] }
 0x504   : > { %6327 = vmatmul.mubr.f32.gmra.mrb[74].mxu0 %v5679_v46 }
 0x505   : > { %6841 = vmatmul.mubr.f32.gmra.mrb[74].mxu1 %v5679_v46  ;;  %6332 = vmatprep.mubr.f32.mxu0 %v5684_v60  ;;  %v5703_v46 = vld [vmem:[%s14824_s7 + $0x150] sm:$0xff] }
 0x506   : > { %6846 = vmatprep.mubr.f32.mxu1 %v5684_v60  ;;  %v5712_v60 = vld [vmem:[%s14824_s7 + $0x198] sm:$0xff] }
 0x507   : > { %v5585_v12 = vpop.f32.mrb[64].mxu0 }
 0x508   : > { %v14223_v20 = vadd.f32 %v5585_v12, %v5506_v47  ;;  %v5656_v11 = vpop.f32.mrb[64].mxu1  ;;  %v5587_v27 = vpop.f32.mrb[65].mxu0  ;;  %6333 = vmatmul.mubr.f32.gmra.mrb[76].mxu0 %v5683_v10  ;;  %v5719_v12 = vld [vmem:[%s14824_s7 + $0x1d0] sm:$0xff] }
 0x509   : > { %v14225_v25 = vadd.f32 %v5656_v11, %v5506_v47  ;;  %v14227_v37 = vadd.f32 %v5587_v27, %v5506_v47  ;;  %v5658_v57 = vpop.f32.mrb[65].mxu1  ;;  %6847 = vmatmul.mubr.f32.gmra.mrb[76].mxu1 %v5683_v10  ;;  %6338 = vmatprep.mubr.f32.mxu0 %v5688_v18  ;;  %v5716_v10 = vld [vmem:[%s14824_s7 + $0x1b8] sm:$0xff]  ;;  %v5723_v27 = vld [vmem:[%s14824_s7 + $0x1f0] sm:$0xff] }
 0x50a   : > { %v14233_v6 = vadd.f32 %v5658_v57, %v5506_v47  ;;  %6852 = vmatprep.mubr.f32.mxu1 %v5688_v18  ;;  %v5715_v18 = vld [vmem:[%s14824_s7 + $0x1b0] sm:$0xff]  ;;  %v5720_v47 = vld [vmem:[%s14824_s7 + $0x1d8] sm:$0xff] }
 0x50b   : > { %v8309_v63 = vcombine.low %v14223_v20, %v14227_v37  ;;  %v5724_v11 = vld [vmem:[%s14824_s7 + $0x1f8] sm:$0xff]  ;;  %v5727_v57 = vld [vmem:[%s14824_s7 + $0x210] sm:$0xff] }
 0x50c   : > { %v8310_v22 = vcombine.low %v14225_v25, %v14233_v6  ;;  %6339 = vmatmul.mubr.f32.gmra.mrb[78].mxu0 %v5687_v49 }
 0x50d   : > { %v8317_v51 = vrot.slane %v8309_v63, %v8316_v19  ;;  %6853 = vmatmul.mubr.f32.gmra.mrb[78].mxu1 %v5687_v49  ;;  %6344 = vmatprep.mubr.f32.mxu0 %v5692_v9  ;;  %v5732_v49 = vld [vmem:[%s14824_s7 + $0x238] sm:$0xff] }
 0x50e   : > { %v8324_v1 = vrot.slane %v8310_v22, %v8316_v19  ;;  %6858 = vmatprep.mubr.f32.mxu1 %v5692_v9  ;;  %v5728_v19 = vld [vmem:[%s14824_s7 + $0x218] sm:$0xff]  ;;  %v5731_v9 = vld [vmem:[%s14824_s7 + $0x230] sm:$0xff] }
 0x50f   : > { %v5736_v63 = vld [vmem:[%s14824_s7 + $0x258] sm:$0xff]  ;;  %v5735_v22 = vld [vmem:[%s14824_s7 + $0x250] sm:$0xff] }
 0x510   : > { %6345 = vmatmul.mubr.f32.gmra.mrb[80].mxu0 %v5691_v55  ;;  %v8325_v52 = vcombine.low %v8317_v51, %v8324_v1  ;;  %v5740_v51 = vld [vmem:[%s14824_s7 + $0x278] sm:$0xff] }
 0x511   : > { %6859 = vmatmul.mubr.f32.gmra.mrb[80].mxu1 %v5691_v55  ;;  %6350 = vmatprep.mubr.f32.mxu0 %v5696_v42  ;;  %v5739_v55 = vld [vmem:[%s14824_s7 + $0x270] sm:$0xff]  ;;  %v5744_v1 = vld [vmem:[%s14824_s7 + $0x298] sm:$0xff] }
 0x512   : > { %6864 = vmatprep.mubr.f32.mxu1 %v5696_v42  ;;  %8327 = vst [vmem:[%s14255_s22] sm:$0xff] %v8325_v52  ;;  %v5743_v42 = vld [vmem:[%s14824_s7 + $0x290] sm:$0xff]  ;;  %v5748_v52 = vld [vmem:[%s14824_s7 + $0x2b8] sm:$0xff] }
 0x514   : > { %6351 = vmatmul.mubr.f32.gmra.mrb[82].mxu0 %v5695_v21 }
 0x515   : > { %6865 = vmatmul.mubr.f32.gmra.mrb[82].mxu1 %v5695_v21  ;;  %6356 = vmatprep.mubr.f32.mxu0 %v5700_v5  ;;  %v5747_v21 = vld [vmem:[%s14824_s7 + $0x2b0] sm:$0xff] }
 0x516   : > { %6870 = vmatprep.mubr.f32.mxu1 %v5700_v5  ;;  %v5752_v5 = vld [vmem:[%s14824_s7 + $0x2d8] sm:$0xff] }
 0x518   : > { %6357 = vmatmul.mubr.f32.gmra.mrb[84].mxu0 %v5699_v30 }
 0x519   : > { %6871 = vmatmul.mubr.f32.gmra.mrb[84].mxu1 %v5699_v30  ;;  %6362 = vmatprep.mubr.f32.mxu0 %v5704_v31  ;;  %v5751_v30 = vld [vmem:[%s14824_s7 + $0x2d0] sm:$0xff] }
 0x51a   : > { %6876 = vmatprep.mubr.f32.mxu1 %v5704_v31  ;;  %v5756_v31 = vld [vmem:[%s14824_s7 + $0x2f8] sm:$0xff] }
 0x51c   : > { %6363 = vmatmul.mubr.f32.gmra.mrb[86].mxu0 %v5703_v46 }
 0x51d   : > { %6877 = vmatmul.mubr.f32.gmra.mrb[86].mxu1 %v5703_v46  ;;  %6368 = vmatprep.mubr.f32.mxu0 %v5708_v38  ;;  %v5755_v46 = vld [vmem:[%s14824_s7 + $0x2f0] sm:$0xff] }
 0x51e   : > { %6882 = vmatprep.mubr.f32.mxu1 %v5708_v38  ;;  %v5760_v38 = vld [vmem:[%s14824_s7 + $0x318] sm:$0xff] }
 0x520   : > { %6369 = vmatmul.mubr.f32.gmra.mrb[88].mxu0 %v5707_v23 }
 0x521   : > { %6883 = vmatmul.mubr.f32.gmra.mrb[88].mxu1 %v5707_v23  ;;  %6374 = vmatprep.mubr.f32.mxu0 %v5712_v60  ;;  %v5759_v23 = vld [vmem:[%s14824_s7 + $0x310] sm:$0xff] }
 0x522   : > { %6888 = vmatprep.mubr.f32.mxu1 %v5712_v60  ;;  %v5764_v60 = vld [vmem:[%s14824_s7 + $0x338] sm:$0xff] }
 0x524   : > { %6375 = vmatmul.mubr.f32.gmra.mrb[90].mxu0 %v5711_v48 }
 0x525   : > { %6889 = vmatmul.mubr.f32.gmra.mrb[90].mxu1 %v5711_v48  ;;  %6380 = vmatprep.mubr.f32.mxu0 %v5716_v10  ;;  %v5763_v48 = vld [vmem:[%s14824_s7 + $0x330] sm:$0xff] }
 0x526   : > { %6894 = vmatprep.mubr.f32.mxu1 %v5716_v10  ;;  %v5768_v10 = vld [vmem:[%s14824_s7 + $0x358] sm:$0xff] }
 0x528   : > { %6381 = vmatmul.mubr.f32.gmra.mrb[92].mxu0 %v5715_v18 }
 0x529   : > { %6895 = vmatmul.mubr.f32.gmra.mrb[92].mxu1 %v5715_v18  ;;  %6386 = vmatprep.mubr.f32.mxu0 %v5720_v47  ;;  %v5767_v18 = vld [vmem:[%s14824_s7 + $0x350] sm:$0xff] }
 0x52a   : > { %6900 = vmatprep.mubr.f32.mxu1 %v5720_v47  ;;  %v5772_v47 = vld [vmem:[%s14824_s7 + $0x378] sm:$0xff] }
 0x52c   : > { %6387 = vmatmul.mubr.f32.gmra.mrb[94].mxu0 %v5719_v12 }
 0x52d   : > { %6901 = vmatmul.mubr.f32.gmra.mrb[94].mxu1 %v5719_v12  ;;  %6392 = vmatprep.mubr.f32.mxu0 %v5724_v11  ;;  %v5771_v12 = vld [vmem:[%s14824_s7 + $0x370] sm:$0xff] }
 0x52e   : > { %6906 = vmatprep.mubr.f32.mxu1 %v5724_v11  ;;  %v5776_v11 = vld [vmem:[%s14824_s7 + $0x398] sm:$0xff] }
 0x530   : > { %6393 = vmatmul.mubr.f32.gmra.mrb[96].mxu0 %v5723_v27 }
 0x531   : > { %6907 = vmatmul.mubr.f32.gmra.mrb[96].mxu1 %v5723_v27  ;;  %6398 = vmatprep.mubr.f32.mxu0 %v5728_v19  ;;  %v5775_v27 = vld [vmem:[%s14824_s7 + $0x390] sm:$0xff] }
 0x532   : > { %6912 = vmatprep.mubr.f32.mxu1 %v5728_v19  ;;  %v5780_v19 = vld [vmem:[%s14824_s7 + $0x3b8] sm:$0xff] }
 0x534   : > { %6399 = vmatmul.mubr.f32.gmra.mrb[98].mxu0 %v5727_v57 }
 0x535   : > { %6913 = vmatmul.mubr.f32.gmra.mrb[98].mxu1 %v5727_v57  ;;  %6404 = vmatprep.mubr.f32.mxu0 %v5732_v49  ;;  %v5779_v57 = vld [vmem:[%s14824_s7 + $0x3b0] sm:$0xff] }
 0x536   : > { %6918 = vmatprep.mubr.f32.mxu1 %v5732_v49  ;;  %v5784_v49 = vld [vmem:[%s14824_s7 + $0x3d8] sm:$0xff] }
 0x538   : > { %6405 = vmatmul.mubr.f32.gmra.mrb[100].mxu0 %v5731_v9 }
 0x539   : > { %6919 = vmatmul.mubr.f32.gmra.mrb[100].mxu1 %v5731_v9  ;;  %6410 = vmatprep.mubr.f32.mxu0 %v5736_v63  ;;  %v5783_v9 = vld [vmem:[%s14824_s7 + $0x3d0] sm:$0xff] }
 0x53a   : > { %6924 = vmatprep.mubr.f32.mxu1 %v5736_v63  ;;  %v5788_v63 = vld [vmem:[%s14824_s7 + $0x3f8] sm:$0xff] }
 0x53c   : > { %6411 = vmatmul.mubr.f32.gmra.mrb[102].mxu0 %v5735_v22 }
 0x53d   : > { %6925 = vmatmul.mubr.f32.gmra.mrb[102].mxu1 %v5735_v22  ;;  %6416 = vmatprep.mubr.f32.mxu0 %v5740_v51  ;;  %v5787_v22 = vld [vmem:[%s14824_s7 + $0x3f0] sm:$0xff] }
 0x53e   : > { %6930 = vmatprep.mubr.f32.mxu1 %v5740_v51 }
 0x540   : > { %6417 = vmatmul.mubr.f32.gmra.mrb[104].mxu0 %v5739_v55 }
 0x541   : > { %6931 = vmatmul.mubr.f32.gmra.mrb[104].mxu1 %v5739_v55  ;;  %6422 = vmatprep.mubr.f32.mxu0 %v5744_v1 }
 0x542   : > { %6936 = vmatprep.mubr.f32.mxu1 %v5744_v1 }
 0x544   : > { %6423 = vmatmul.mubr.f32.gmra.mrb[106].mxu0 %v5743_v42 }
 0x545   : > { %6937 = vmatmul.mubr.f32.gmra.mrb[106].mxu1 %v5743_v42  ;;  %6428 = vmatprep.mubr.f32.mxu0 %v5748_v52 }
 0x546   : > { %6942 = vmatprep.mubr.f32.mxu1 %v5748_v52 }
 0x548   : > { %6429 = vmatmul.mubr.f32.gmra.mrb[108].mxu0 %v5747_v21 }
 0x549   : > { %6943 = vmatmul.mubr.f32.gmra.mrb[108].mxu1 %v5747_v21  ;;  %6434 = vmatprep.mubr.f32.mxu0 %v5752_v5  ;;  %v5829_v21 = vpop.permute.xlu1 %5828 }
 0x54a   : > { %6948 = vmatprep.mubr.f32.mxu1 %v5752_v5 }
 0x54c   : > { %6435 = vmatmul.mubr.f32.gmra.mrb[110].mxu0 %v5751_v30 }
 0x54d   : > { %6949 = vmatmul.mubr.f32.gmra.mrb[110].mxu1 %v5751_v30  ;;  %6440 = vmatprep.mubr.f32.mxu0 %v5756_v31 }
 0x54e   : > { %6954 = vmatprep.mubr.f32.mxu1 %v5756_v31 }
 0x550   : > { %6441 = vmatmul.mubr.f32.gmra.mrb[112].mxu0 %v5755_v46 }
 0x551   : > { %6955 = vmatmul.mubr.f32.gmra.mrb[112].mxu1 %v5755_v46  ;;  %6446 = vmatprep.mubr.f32.mxu0 %v5760_v38 }
 0x552   : > { %6960 = vmatprep.mubr.f32.mxu1 %v5760_v38 }
 0x554   : > { %6447 = vmatmul.mubr.f32.gmra.mrb[114].mxu0 %v5759_v23 }
 0x555   : > { %6961 = vmatmul.mubr.f32.gmra.mrb[114].mxu1 %v5759_v23  ;;  %6452 = vmatprep.mubr.f32.mxu0 %v5764_v60 }
 0x556   : > { %6966 = vmatprep.mubr.f32.mxu1 %v5764_v60 }
 0x558   : > { %6453 = vmatmul.mubr.f32.gmra.mrb[116].mxu0 %v5763_v48 }
 0x559   : > { %6967 = vmatmul.mubr.f32.gmra.mrb[116].mxu1 %v5763_v48  ;;  %6458 = vmatprep.mubr.f32.mxu0 %v5768_v10 }
 0x55a   : > { %6972 = vmatprep.mubr.f32.mxu1 %v5768_v10 }
 0x55c   : > { %6459 = vmatmul.mubr.f32.gmra.mrb[118].mxu0 %v5767_v18 }
 0x55d   : > { %6973 = vmatmul.mubr.f32.gmra.mrb[118].mxu1 %v5767_v18  ;;  %6464 = vmatprep.mubr.f32.mxu0 %v5772_v47 }
 0x55e   : > { %6978 = vmatprep.mubr.f32.mxu1 %v5772_v47  ;;  %v7138_v47 = vld [vmem:[%s14826_s9 + $0x8] sm:$0xff] }
 0x560   : > { %6465 = vmatmul.mubr.f32.gmra.mrb[120].mxu0 %v5771_v12 }
 0x561   : > { %6979 = vmatmul.mubr.f32.gmra.mrb[120].mxu1 %v5771_v12  ;;  %6470 = vmatprep.mubr.f32.mxu0 %v5776_v11 }
 0x562   : > { %6984 = vmatprep.mubr.f32.mxu1 %v5776_v11 }
 0x564   : > { %6471 = vmatmul.mubr.f32.gmra.mrb[122].mxu0 %v5775_v27 }
 0x565   : > { %6985 = vmatmul.mubr.f32.gmra.mrb[122].mxu1 %v5775_v27  ;;  %6476 = vmatprep.mubr.f32.mxu0 %v5780_v19 }
 0x566   : > { %6990 = vmatprep.mubr.f32.mxu1 %v5780_v19 }
 0x568   : > { %6477 = vmatmul.mubr.f32.gmra.mrb[124].mxu0 %v5779_v57 }
 0x569   : > { %6991 = vmatmul.mubr.f32.gmra.mrb[124].mxu1 %v5779_v57  ;;  %6482 = vmatprep.mubr.f32.mxu0 %v5784_v49 }
 0x56a   : > { %6996 = vmatprep.mubr.f32.mxu1 %v5784_v49 }
 0x56c   : > { %6483 = vmatmul.mubr.f32.gmra.mrb[126].mxu0 %v5783_v9 }
 0x56d   : > { %6997 = vmatmul.mubr.f32.gmra.mrb[126].mxu1 %v5783_v9  ;;  %6488 = vmatprep.mubr.f32.mxu0 %v5788_v63 }
 0x56e   : > { %7002 = vmatprep.mubr.f32.mxu1 %v5788_v63 }
 0x570   : > { %6489 = vmatmul.mubr.f32.gmra.mrb[128].mxu0 %v5787_v22 }
 0x571   : > { %7003 = vmatmul.mubr.f32.gmra.mrb[128].mxu1 %v5787_v22  ;;  %7457 = vmatprep.mubr.f32.mxu0 %v7138_v47 }
 0x572   : > { %7714 = vmatprep.mubr.f32.mxu1 %v7138_v47 }
 0x5c7   : > { %v6304_v51 = vpop.f32.mrb[66].mxu0 }
 0x5c8   : > { %v6818_v55 = vpop.f32.mrb[66].mxu1  ;;  %v6306_v1 = vpop.f32.mrb[67].mxu0  ;;  %v9803_v52 = vadd.f32 %v6304_v51, %v13821_v61 }
 0x5c9   : > { %v6820_v42 = vpop.f32.mrb[67].mxu1  ;;  %v9867_v5 = vadd.f32 %v6818_v55, %v13821_v61  ;;  %v9804_v30 = vadd.f32 %v6306_v1, %v13821_v61 }
 0x5ca   : > { %v9868_v46 = vadd.f32 %v6820_v42, %v13821_v61  ;;  %v7009_v12 = vmax.f32 %v9803_v52, 0.0 }
 0x5cb   : > { %v6310_v31 = vpop.f32.mrb[68].mxu0  ;;  %v7011_v19 = vmax.f32 %v9867_v5, 0.0  ;;  %v7010_v57 = vmax.f32 %v9804_v30, 0.0 }
 0x5cc   : > { %v9805_v38 = vadd.f32 %v6310_v31, %v5829_v21  ;;  %v6824_v23 = vpop.f32.mrb[68].mxu1  ;;  %v6312_v60 = vpop.f32.mrb[69].mxu0  ;;  %v7012_v63 = vmax.f32 %v9868_v46, 0.0 }
 0x5cd   : > { %v9869_v48 = vadd.f32 %v6824_v23, %v5829_v21  ;;  %v9806_v10 = vadd.f32 %v6312_v60, %v5829_v21  ;;  %v6826_v18 = vpop.f32.mrb[69].mxu1 }
 0x5ce   : > { %v7013_v11 = vmax.f32 %v9805_v38, 0.0  ;;  %v9870_v27 = vadd.f32 %v6826_v18, %v5829_v21  ;;  %v5839_v38 = vpop.permute.xlu1 %5838 }
 0x5cf   : > { %v7015_v49 = vmax.f32 %v9869_v48, 0.0  ;;  %v7014_v9 = vmax.f32 %v9806_v10, 0.0  ;;  %v6316_v61 = vpop.f32.mrb[70].mxu0 }
 0x5d0   : > { %v9421_v22 = vpack.c.bf16 %v7013_v11, %v7009_v12  ;;  %v7016_v51 = vmax.f32 %v9870_v27, 0.0  ;;  %v6830_v55 = vpop.f32.mrb[70].mxu1  ;;  %v6318_v1 = vpop.f32.mrb[71].mxu0  ;;  %v9807_v52 = vadd.f32 %v6316_v61, %v13828_v24 }
 0x5d1   : > { %v9485_v42 = vpack.c.bf16 %v7015_v49, %v7011_v19  ;;  %v9419_v31 = vpack.c.bf16 %v7014_v9, %v7010_v57  ;;  %v6832_v23 = vpop.f32.mrb[71].mxu1  ;;  %v9871_v21 = vadd.f32 %v6830_v55, %v13828_v24  ;;  %v9808_v5 = vadd.f32 %v6318_v1, %v13828_v24 }
 0x5d2   : > { %v9483_v60 = vpack.c.bf16 %v7016_v51, %v7012_v63  ;;  %v9872_v48 = vadd.f32 %v6832_v23, %v13828_v24  ;;  %v7017_v27 = vmax.f32 %v9807_v52, 0.0 }
 0x5d3   : > { %v6322_v30 = vpop.f32.mrb[72].mxu0  ;;  %9420 = vmatprep.subr.bf16.mxu0 %v9419_v31  ;;  %v7019_v49 = vmax.f32 %v9871_v21, 0.0  ;;  %v7018_v9 = vmax.f32 %v9808_v5, 0.0 }
 0x5d4   : > { %v9809_v46 = vadd.f32 %v6322_v30, %v5839_v38  ;;  %v6836_v10 = vpop.f32.mrb[72].mxu1  ;;  %9484 = vmatprep.subr.bf16.mxu1 %v9483_v60  ;;  %v6324_v18 = vpop.f32.mrb[73].mxu0  ;;  %9422 = vmatpush1.bf16.msra.mxu0 %v9421_v22  ;;  %v7020_v55 = vmax.f32 %v9872_v48, 0.0 }
 0x5d5   : > { %v9873_v47 = vadd.f32 %v6836_v10, %v5839_v38  ;;  %v9810_v12 = vadd.f32 %v6324_v18, %v5839_v38  ;;  %v6838_v11 = vpop.f32.mrb[73].mxu1  ;;  %9486 = vmatpush1.bf16.msra.mxu1 %v9485_v42  ;;  %v5849_v42 = vpop.permute.xlu1 %5848 }
 0x5d6   : > { %v7021_v19 = vmax.f32 %v9809_v46, 0.0  ;;  %v9874_v57 = vadd.f32 %v6838_v11, %v5839_v38 }
 0x5d7   : > { %v7023_v61 = vmax.f32 %v9873_v47, 0.0  ;;  %v7022_v63 = vmax.f32 %v9810_v12, 0.0  ;;  %v6328_v51 = vpop.f32.mrb[74].mxu0 }
 0x5d8   : > { %v9425_v1 = vpack.c.bf16 %v7021_v19, %v7017_v27  ;;  %v7024_v24 = vmax.f32 %v9874_v57, 0.0  ;;  %v6842_v31 = vpop.f32.mrb[74].mxu1  ;;  %v6330_v23 = vpop.f32.mrb[75].mxu0  ;;  %v9811_v18 = vadd.f32 %v6328_v51, %v13837_v33 }
 0x5d9   : > { %v9489_v60 = vpack.c.bf16 %v7023_v61, %v7019_v49  ;;  %v9423_v30 = vpack.c.bf16 %v7022_v63, %v7018_v9  ;;  %v6844_v22 = vpop.f32.mrb[75].mxu1  ;;  %v9875_v52 = vadd.f32 %v6842_v31, %v13837_v33  ;;  %v9812_v38 = vadd.f32 %v6330_v23, %v13837_v33 }
 0x5da   : > { %v9487_v10 = vpack.c.bf16 %v7024_v24, %v7020_v55  ;;  %v9876_v5 = vadd.f32 %v6844_v22, %v13837_v33  ;;  %v7025_v19 = vmax.f32 %v9811_v18, 0.0 }
 0x5db   : > { %v6334_v21 = vpop.f32.mrb[76].mxu0  ;;  %9424 = vmatprep.subr.bf16.mxu0 %v9423_v30  ;;  %v7027_v9 = vmax.f32 %v9875_v52, 0.0  ;;  %v7026_v61 = vmax.f32 %v9812_v38, 0.0 }
 0x5dc   : > { %v9813_v48 = vadd.f32 %v6334_v21, %v5849_v42  ;;  %v6848_v46 = vpop.f32.mrb[76].mxu1  ;;  %9488 = vmatprep.subr.bf16.mxu1 %v9487_v10  ;;  %v6336_v47 = vpop.f32.mrb[77].mxu0  ;;  %9426 = vmatpush1.bf16.msra.mxu0 %v9425_v1  ;;  %v7028_v24 = vmax.f32 %v9876_v5, 0.0 }
 0x5dd   : > { %v9877_v12 = vadd.f32 %v6848_v46, %v5849_v42  ;;  %v9814_v11 = vadd.f32 %v6336_v47, %v5849_v42  ;;  %v6850_v27 = vpop.f32.mrb[77].mxu1  ;;  %9490 = vmatpush1.bf16.msra.mxu1 %v9489_v60  ;;  %v5859_v60 = vpop.permute.xlu1 %5858 }
 0x5de   : > { %v7029_v57 = vmax.f32 %v9813_v48, 0.0  ;;  %v9878_v49 = vadd.f32 %v6850_v27, %v5849_v42 }
 0x5df   : > { %v7031_v63 = vmax.f32 %v9877_v12, 0.0  ;;  %v7030_v51 = vmax.f32 %v9814_v11, 0.0  ;;  %v6340_v55 = vpop.f32.mrb[78].mxu0 }
 0x5e0   : > { %v9429_v31 = vpack.c.bf16 %v7029_v57, %v7025_v19  ;;  %v7032_v33 = vmax.f32 %v9878_v49, 0.0  ;;  %v6854_v23 = vpop.f32.mrb[78].mxu1  ;;  %v6342_v30 = vpop.f32.mrb[79].mxu0  ;;  %v9815_v46 = vadd.f32 %v6340_v55, %v13844_v15 }
 0x5e1   : > { %v9493_v22 = vpack.c.bf16 %v7031_v63, %v7027_v9  ;;  %v9427_v10 = vpack.c.bf16 %v7030_v51, %v7026_v61  ;;  %v6856_v1 = vpop.f32.mrb[79].mxu1  ;;  %v9879_v18 = vadd.f32 %v6854_v23, %v13844_v15  ;;  %v9816_v42 = vadd.f32 %v6342_v30, %v13844_v15 }
 0x5e2   : > { %v9491_v21 = vpack.c.bf16 %v7032_v33, %v7028_v24  ;;  %v9880_v38 = vadd.f32 %v6856_v1, %v13844_v15  ;;  %v7033_v19 = vmax.f32 %v9815_v46, 0.0 }
 0x5e3   : > { %v6346_v52 = vpop.f32.mrb[80].mxu0  ;;  %9428 = vmatprep.subr.bf16.mxu0 %v9427_v10  ;;  %v7035_v9 = vmax.f32 %v9879_v18, 0.0  ;;  %v7034_v61 = vmax.f32 %v9816_v42, 0.0 }
 0x5e4   : > { %v9817_v5 = vadd.f32 %v6346_v52, %v5859_v60  ;;  %v6860_v48 = vpop.f32.mrb[80].mxu1  ;;  %9492 = vmatprep.subr.bf16.mxu1 %v9491_v21  ;;  %v6348_v47 = vpop.f32.mrb[81].mxu0  ;;  %9430 = vmatpush1.bf16.msra.mxu0 %v9429_v31  ;;  %v7036_v24 = vmax.f32 %v9880_v38, 0.0 }
 0x5e5   : > { %v9881_v12 = vadd.f32 %v6860_v48, %v5859_v60  ;;  %v9818_v11 = vadd.f32 %v6348_v47, %v5859_v60  ;;  %v6862_v27 = vpop.f32.mrb[81].mxu1  ;;  %9494 = vmatpush1.bf16.msra.mxu1 %v9493_v22  ;;  %v5869_v22 = vpop.permute.xlu1 %5868 }
 0x5e6   : > { %v7037_v57 = vmax.f32 %v9817_v5, 0.0  ;;  %v9882_v49 = vadd.f32 %v6862_v27, %v5859_v60 }
 0x5e7   : > { %v7039_v63 = vmax.f32 %v9881_v12, 0.0  ;;  %v7038_v51 = vmax.f32 %v9818_v11, 0.0  ;;  %v6352_v55 = vpop.f32.mrb[82].mxu0 }
 0x5e8   : > { %v9433_v33 = vpack.c.bf16 %v7037_v57, %v7033_v19  ;;  %v7040_v15 = vmax.f32 %v9882_v49, 0.0  ;;  %v6866_v23 = vpop.f32.mrb[82].mxu1  ;;  %v6354_v30 = vpop.f32.mrb[83].mxu0  ;;  %v9819_v52 = vadd.f32 %v6352_v55, %v13853_v53 }
 0x5e9   : > { %v9497_v10 = vpack.c.bf16 %v7039_v63, %v7035_v9  ;;  %v9431_v1 = vpack.c.bf16 %v7038_v51, %v7034_v61  ;;  %v6868_v31 = vpop.f32.mrb[83].mxu1  ;;  %v9883_v46 = vadd.f32 %v6866_v23, %v13853_v53  ;;  %v9820_v60 = vadd.f32 %v6354_v30, %v13853_v53 }
 0x5ea   : > { %v9495_v21 = vpack.c.bf16 %v7040_v15, %v7036_v24  ;;  %v9884_v42 = vadd.f32 %v6868_v31, %v13853_v53  ;;  %v7041_v27 = vmax.f32 %v9819_v52, 0.0 }
 0x5eb   : > { %v6358_v18 = vpop.f32.mrb[84].mxu0  ;;  %9432 = vmatprep.subr.bf16.mxu0 %v9431_v1  ;;  %v7043_v49 = vmax.f32 %v9883_v46, 0.0  ;;  %v7042_v9 = vmax.f32 %v9820_v60, 0.0 }
 0x5ec   : > { %v9821_v38 = vadd.f32 %v6358_v18, %v5869_v22  ;;  %v6872_v5 = vpop.f32.mrb[84].mxu1  ;;  %9496 = vmatprep.subr.bf16.mxu1 %v9495_v21  ;;  %v6360_v48 = vpop.f32.mrb[85].mxu0  ;;  %9434 = vmatpush1.bf16.msra.mxu0 %v9433_v33  ;;  %v7044_v55 = vmax.f32 %v9884_v42, 0.0 }
 0x5ed   : > { %v9885_v47 = vadd.f32 %v6872_v5, %v5869_v22  ;;  %v9822_v12 = vadd.f32 %v6360_v48, %v5869_v22  ;;  %v6874_v11 = vpop.f32.mrb[85].mxu1  ;;  %9498 = vmatpush1.bf16.msra.mxu1 %v9497_v10  ;;  %v5879_v10 = vpop.permute.xlu1 %5878 }
 0x5ee   : > { %v7045_v19 = vmax.f32 %v9821_v38, 0.0  ;;  %v9886_v57 = vadd.f32 %v6874_v11, %v5869_v22 }
 0x5ef   : > { %v7047_v61 = vmax.f32 %v9885_v47, 0.0  ;;  %v7046_v63 = vmax.f32 %v9822_v12, 0.0  ;;  %v6364_v51 = vpop.f32.mrb[86].mxu0 }
 0x5f0   : > { %v9437_v24 = vpack.c.bf16 %v7045_v19, %v7041_v27  ;;  %v7048_v53 = vmax.f32 %v9886_v57, 0.0  ;;  %v6878_v15 = vpop.f32.mrb[86].mxu1  ;;  %v6366_v23 = vpop.f32.mrb[87].mxu0  ;;  %v9823_v21 = vadd.f32 %v6364_v51, %v13860_v35 }
 0x5f1   : > { %v9501_v30 = vpack.c.bf16 %v7047_v61, %v7043_v49  ;;  %v9435_v1 = vpack.c.bf16 %v7046_v63, %v7042_v9  ;;  %v6880_v33 = vpop.f32.mrb[87].mxu1  ;;  %v9887_v52 = vadd.f32 %v6878_v15, %v13860_v35  ;;  %v9824_v22 = vadd.f32 %v6366_v23, %v13860_v35 }
 0x5f2   : > { %v9499_v31 = vpack.c.bf16 %v7048_v53, %v7044_v55  ;;  %v9888_v60 = vadd.f32 %v6880_v33, %v13860_v35  ;;  %v7049_v12 = vmax.f32 %v9823_v21, 0.0 }
 0x5f3   : > { %v6370_v46 = vpop.f32.mrb[88].mxu0  ;;  %9436 = vmatprep.subr.bf16.mxu0 %v9435_v1  ;;  %v7051_v19 = vmax.f32 %v9887_v52, 0.0  ;;  %v7050_v57 = vmax.f32 %v9824_v22, 0.0 }
 0x5f4   : > { %v9825_v18 = vadd.f32 %v6370_v46, %v5879_v10  ;;  %v6884_v42 = vpop.f32.mrb[88].mxu1  ;;  %9500 = vmatprep.subr.bf16.mxu1 %v9499_v31  ;;  %v6372_v38 = vpop.f32.mrb[89].mxu0  ;;  %9438 = vmatpush1.bf16.msra.mxu0 %v9437_v24  ;;  %v7052_v63 = vmax.f32 %v9888_v60, 0.0 }
 0x5f5   : > { %v9889_v5 = vadd.f32 %v6884_v42, %v5879_v10  ;;  %v9826_v48 = vadd.f32 %v6372_v38, %v5879_v10  ;;  %v6886_v47 = vpop.f32.mrb[89].mxu1  ;;  %9502 = vmatpush1.bf16.msra.mxu1 %v9501_v30  ;;  %v5889_v30 = vpop.permute.xlu1 %5888 }
 0x5f6   : > { %v7053_v11 = vmax.f32 %v9825_v18, 0.0  ;;  %v9890_v27 = vadd.f32 %v6886_v47, %v5879_v10 }
 0x5f7   : > { %v7055_v49 = vmax.f32 %v9889_v5, 0.0  ;;  %v7054_v9 = vmax.f32 %v9826_v48, 0.0  ;;  %v6376_v61 = vpop.f32.mrb[90].mxu0 }
 0x5f8   : > { %v9441_v51 = vpack.c.bf16 %v7053_v11, %v7049_v12  ;;  %v7056_v35 = vmax.f32 %v9890_v27, 0.0  ;;  %v6890_v55 = vpop.f32.mrb[90].mxu1  ;;  %v6378_v53 = vpop.f32.mrb[91].mxu0  ;;  %v9827_v33 = vadd.f32 %v6376_v61, %v13869_v39 }
 0x5f9   : > { %v9505_v15 = vpack.c.bf16 %v7055_v49, %v7051_v19  ;;  %v9439_v23 = vpack.c.bf16 %v7054_v9, %v7050_v57  ;;  %v6892_v24 = vpop.f32.mrb[91].mxu1  ;;  %v9891_v31 = vadd.f32 %v6890_v55, %v13869_v39  ;;  %v9828_v21 = vadd.f32 %v6378_v53, %v13869_v39 }
 0x5fa   : > { %v9503_v1 = vpack.c.bf16 %v7056_v35, %v7052_v63  ;;  %v9892_v52 = vadd.f32 %v6892_v24, %v13869_v39  ;;  %v7057_v5 = vmax.f32 %v9827_v33, 0.0 }
 0x5fb   : > { %v6382_v10 = vpop.f32.mrb[92].mxu0  ;;  %9440 = vmatprep.subr.bf16.mxu0 %v9439_v23  ;;  %v7059_v12 = vmax.f32 %v9891_v31, 0.0  ;;  %v7058_v11 = vmax.f32 %v9828_v21, 0.0 }
 0x5fc   : > { %v9829_v22 = vadd.f32 %v6382_v10, %v5889_v30  ;;  %v6896_v46 = vpop.f32.mrb[92].mxu1  ;;  %9504 = vmatprep.subr.bf16.mxu1 %v9503_v1  ;;  %v6384_v60 = vpop.f32.mrb[93].mxu0  ;;  %9442 = vmatpush1.bf16.msra.mxu0 %v9441_v51  ;;  %v7060_v49 = vmax.f32 %v9892_v52, 0.0 }
 0x5fd   : > { %v9893_v18 = vadd.f32 %v6896_v46, %v5889_v30  ;;  %v9830_v42 = vadd.f32 %v6384_v60, %v5889_v30  ;;  %v6898_v38 = vpop.f32.mrb[93].mxu1  ;;  %9506 = vmatpush1.bf16.msra.mxu1 %v9505_v15  ;;  %v5899_v15 = vpop.permute.xlu1 %5898 }
 0x5fe   : > { %v7061_v48 = vmax.f32 %v9829_v22, 0.0  ;;  %v9894_v47 = vadd.f32 %v6898_v38, %v5889_v30 }
 0x5ff   : > { %v7063_v27 = vmax.f32 %v9893_v18, 0.0  ;;  %v7062_v19 = vmax.f32 %v9830_v42, 0.0  ;;  %v6388_v57 = vpop.f32.mrb[94].mxu0 }
 0x600   : > { %v9445_v9 = vpack.c.bf16 %v7061_v48, %v7057_v5  ;;  %v7064_v39 = vmax.f32 %v9894_v47, 0.0  ;;  %v6902_v61 = vpop.f32.mrb[94].mxu1  ;;  %v6390_v63 = vpop.f32.mrb[95].mxu0  ;;  %v9831_v23 = vadd.f32 %v6388_v57, %v13876_v7 }
 0x601   : > { %v9509_v35 = vpack.c.bf16 %v7063_v27, %v7059_v12  ;;  %v9443_v55 = vpack.c.bf16 %v7062_v19, %v7058_v11  ;;  %v6904_v51 = vpop.f32.mrb[95].mxu1  ;;  %v9895_v24 = vadd.f32 %v6902_v61, %v13876_v7  ;;  %v9832_v1 = vadd.f32 %v6390_v63, %v13876_v7 }
 0x602   : > { %v9507_v53 = vpack.c.bf16 %v7064_v39, %v7060_v49  ;;  %v9896_v30 = vadd.f32 %v6904_v51, %v13876_v7  ;;  %v7065_v60 = vmax.f32 %v9831_v23, 0.0 }
 0x603   : > { %v6394_v33 = vpop.f32.mrb[96].mxu0  ;;  %9444 = vmatprep.subr.bf16.mxu0 %v9443_v55  ;;  %v7067_v38 = vmax.f32 %v9895_v24, 0.0  ;;  %v7066_v5 = vmax.f32 %v9832_v1, 0.0 }
 0x604   : > { %v9833_v31 = vadd.f32 %v6394_v33, %v5899_v15  ;;  %v6908_v21 = vpop.f32.mrb[96].mxu1  ;;  %9508 = vmatprep.subr.bf16.mxu1 %v9507_v53  ;;  %v6396_v10 = vpop.f32.mrb[97].mxu0  ;;  %9446 = vmatpush1.bf16.msra.mxu0 %v9445_v9  ;;  %v7068_v11 = vmax.f32 %v9896_v30, 0.0 }
 0x605   : > { %v9897_v52 = vadd.f32 %v6908_v21, %v5899_v15  ;;  %v9834_v22 = vadd.f32 %v6396_v10, %v5899_v15  ;;  %v6910_v46 = vpop.f32.mrb[97].mxu1  ;;  %9510 = vmatpush1.bf16.msra.mxu1 %v9509_v35  ;;  %v5909_v35 = vpop.permute.xlu1 %5908 }
 0x606   : > { %v7069_v18 = vmax.f32 %v9833_v31, 0.0  ;;  %v9898_v42 = vadd.f32 %v6910_v46, %v5899_v15 }
 0x607   : > { %v7071_v48 = vmax.f32 %v9897_v52, 0.0  ;;  %v7070_v47 = vmax.f32 %v9834_v22, 0.0  ;;  %v6400_v12 = vpop.f32.mrb[98].mxu0 }
 0x608   : > { %v9449_v27 = vpack.c.bf16 %v7069_v18, %v7065_v60  ;;  %v7072_v7 = vmax.f32 %v9898_v42, 0.0  ;;  %v6914_v19 = vpop.f32.mrb[98].mxu1  ;;  %v6402_v57 = vpop.f32.mrb[99].mxu0  ;;  %v9835_v63 = vadd.f32 %v6400_v12, %v13894_v8 }
 0x609   : > { %v9513_v49 = vpack.c.bf16 %v7071_v48, %v7067_v38  ;;  %v9447_v39 = vpack.c.bf16 %v7070_v47, %v7066_v5  ;;  %v6916_v9 = vpop.f32.mrb[99].mxu1  ;;  %v9899_v55 = vadd.f32 %v6914_v19, %v13894_v8  ;;  %v9836_v51 = vadd.f32 %v6402_v57, %v13894_v8  ;;  %v5919_v57 = vpop.permute.xlu1 %5918 }
 0x60a   : > { %v9511_v61 = vpack.c.bf16 %v7072_v7, %v7068_v11  ;;  %v9900_v23 = vadd.f32 %v6916_v9, %v13894_v8  ;;  %v7073_v21 = vmax.f32 %v9835_v63, 0.0 }
 0x60b   : > { %v6406_v53 = vpop.f32.mrb[100].mxu0  ;;  %9448 = vmatprep.subr.bf16.mxu0 %v9447_v39  ;;  %v7075_v22 = vmax.f32 %v9899_v55, 0.0  ;;  %v7074_v46 = vmax.f32 %v9836_v51, 0.0 }
 0x60c   : > { %v9837_v15 = vadd.f32 %v6406_v53, %v5909_v35  ;;  %v6920_v24 = vpop.f32.mrb[100].mxu1  ;;  %9512 = vmatprep.subr.bf16.mxu1 %v9511_v61  ;;  %v6408_v1 = vpop.f32.mrb[101].mxu0  ;;  %9450 = vmatpush1.bf16.msra.mxu0 %v9449_v27  ;;  %v7076_v38 = vmax.f32 %v9900_v23, 0.0 }
 0x60d   : > { %v9901_v33 = vadd.f32 %v6920_v24, %v5909_v35  ;;  %v9838_v30 = vadd.f32 %v6408_v1, %v5909_v35  ;;  %v6922_v31 = vpop.f32.mrb[101].mxu1  ;;  %9514 = vmatpush1.bf16.msra.mxu1 %v9513_v49 }
 0x60e   : > { %v7077_v10 = vmax.f32 %v9837_v15, 0.0  ;;  %v9902_v52 = vadd.f32 %v6922_v31, %v5909_v35 }
 0x60f   : > { %v7079_v60 = vmax.f32 %v9901_v33, 0.0  ;;  %v7078_v18 = vmax.f32 %v9838_v30, 0.0  ;;  %v6412_v42 = vpop.f32.mrb[102].mxu0 }
 0x610   : > { %v9453_v5 = vpack.c.bf16 %v7077_v10, %v7073_v21  ;;  %v7080_v8 = vmax.f32 %v9902_v52, 0.0  ;;  %v6926_v48 = vpop.f32.mrb[102].mxu1  ;;  %v6414_v47 = vpop.f32.mrb[103].mxu0  ;;  %v9839_v19 = vadd.f32 %v6412_v42, %v13910_v3 }
 0x611   : > { %v9517_v12 = vpack.c.bf16 %v7079_v60, %v7075_v22  ;;  %v9451_v11 = vpack.c.bf16 %v7078_v18, %v7074_v46  ;;  %v6928_v27 = vpop.f32.mrb[103].mxu1  ;;  %v9903_v49 = vadd.f32 %v6926_v48, %v13910_v3  ;;  %v9840_v39 = vadd.f32 %v6414_v47, %v13910_v3  ;;  %v5929_v48 = vpop.permute.xlu1 %5928 }
 0x612   : > { %v9515_v7 = vpack.c.bf16 %v7080_v8, %v7076_v38  ;;  %v9904_v61 = vadd.f32 %v6928_v27, %v13910_v3  ;;  %v7081_v15 = vmax.f32 %v9839_v19, 0.0 }
 0x613   : > { %v6418_v9 = vpop.f32.mrb[104].mxu0  ;;  %9452 = vmatprep.subr.bf16.mxu0 %v9451_v11  ;;  %v7083_v33 = vmax.f32 %v9903_v49, 0.0  ;;  %v7082_v30 = vmax.f32 %v9840_v39, 0.0 }
 0x614   : > { %v9841_v63 = vadd.f32 %v6418_v9, %v5919_v57  ;;  %v6932_v35 = vpop.f32.mrb[104].mxu1  ;;  %9516 = vmatprep.subr.bf16.mxu1 %v9515_v7  ;;  %v6420_v55 = vpop.f32.mrb[105].mxu0  ;;  %9454 = vmatpush1.bf16.msra.mxu0 %v9453_v5  ;;  %v7084_v52 = vmax.f32 %v9904_v61, 0.0 }
 0x615   : > { %v9905_v51 = vadd.f32 %v6932_v35, %v5919_v57  ;;  %v9842_v53 = vadd.f32 %v6420_v55, %v5919_v57  ;;  %v6934_v23 = vpop.f32.mrb[105].mxu1  ;;  %9518 = vmatpush1.bf16.msra.mxu1 %v9517_v12 }
 0x616   : > { %v7085_v24 = vmax.f32 %v9841_v63, 0.0  ;;  %v9906_v1 = vadd.f32 %v6934_v23, %v5919_v57 }
 0x617   : > { %v7087_v31 = vmax.f32 %v9905_v51, 0.0  ;;  %v7086_v21 = vmax.f32 %v9842_v53, 0.0  ;;  %v6424_v10 = vpop.f32.mrb[106].mxu0 }
 0x618   : > { %v9457_v22 = vpack.c.bf16 %v7085_v24, %v7081_v15  ;;  %v7088_v3 = vmax.f32 %v9906_v1, 0.0  ;;  %v6938_v46 = vpop.f32.mrb[106].mxu1  ;;  %v6426_v60 = vpop.f32.mrb[107].mxu0  ;;  %v9843_v8 = vadd.f32 %v6424_v10, %v13928_v41 }
 0x619   : > { %v9521_v18 = vpack.c.bf16 %v7087_v31, %v7083_v33  ;;  %v9455_v42 = vpack.c.bf16 %v7086_v21, %v7082_v30  ;;  %v6940_v38 = vpop.f32.mrb[107].mxu1  ;;  %v9907_v47 = vadd.f32 %v6938_v46, %v13928_v41  ;;  %v9844_v12 = vadd.f32 %v6426_v60, %v13928_v41 }
 0x61a   : > { %v9519_v5 = vpack.c.bf16 %v7088_v3, %v7084_v52  ;;  %v9908_v27 = vadd.f32 %v6940_v38, %v13928_v41  ;;  %v7089_v61 = vmax.f32 %v9843_v8, 0.0  ;;  %v5939_v3 = vpop.permute.xlu1 %5938 }
 0x61b   : > { %v6430_v11 = vpop.f32.mrb[108].mxu0  ;;  %9456 = vmatprep.subr.bf16.mxu0 %v9455_v42  ;;  %v7091_v55 = vmax.f32 %v9907_v47, 0.0  ;;  %v7090_v51 = vmax.f32 %v9844_v12, 0.0 }
 0x61c   : > { %v9845_v7 = vadd.f32 %v6430_v11, %v5929_v48  ;;  %v6944_v19 = vpop.f32.mrb[108].mxu1  ;;  %9520 = vmatprep.subr.bf16.mxu1 %v9519_v5  ;;  %v6432_v57 = vpop.f32.mrb[109].mxu0  ;;  %9458 = vmatpush1.bf16.msra.mxu0 %v9457_v22  ;;  %v7092_v24 = vmax.f32 %v9908_v27, 0.0 }
 0x61d   : > { %v9909_v49 = vadd.f32 %v6944_v19, %v5929_v48  ;;  %v9846_v39 = vadd.f32 %v6432_v57, %v5929_v48  ;;  %v6946_v9 = vpop.f32.mrb[109].mxu1  ;;  %9522 = vmatpush1.bf16.msra.mxu1 %v9521_v18 }
 0x61e   : > { %v7093_v63 = vmax.f32 %v9845_v7, 0.0  ;;  %v9910_v35 = vadd.f32 %v6946_v9, %v5929_v48 }
 0x61f   : > { %v7095_v53 = vmax.f32 %v9909_v49, 0.0  ;;  %v7094_v23 = vmax.f32 %v9846_v39, 0.0  ;;  %v6436_v15 = vpop.f32.mrb[110].mxu0 }
 0x620   : > { %v9461_v1 = vpack.c.bf16 %v7093_v63, %v7089_v61  ;;  %v7096_v41 = vmax.f32 %v9910_v35, 0.0  ;;  %v6950_v33 = vpop.f32.mrb[110].mxu1  ;;  %v6438_v30 = vpop.f32.mrb[111].mxu0  ;;  %v9847_v22 = vadd.f32 %v6436_v15, %v13944_v26 }
 0x621   : > { %v9525_v31 = vpack.c.bf16 %v7095_v53, %v7091_v55  ;;  %v9459_v21 = vpack.c.bf16 %v7094_v23, %v7090_v51  ;;  %v6952_v10 = vpop.f32.mrb[111].mxu1  ;;  %v9911_v46 = vadd.f32 %v6950_v33, %v13944_v26  ;;  %v9848_v60 = vadd.f32 %v6438_v30, %v13944_v26 }
 0x622   : > { %v9523_v52 = vpack.c.bf16 %v7096_v41, %v7092_v24  ;;  %v9912_v42 = vadd.f32 %v6952_v10, %v13944_v26  ;;  %v7097_v11 = vmax.f32 %v9847_v22, 0.0 }
 0x623   : > { %v6442_v18 = vpop.f32.mrb[112].mxu0  ;;  %9460 = vmatprep.subr.bf16.mxu0 %v9459_v21  ;;  %v7099_v19 = vmax.f32 %v9911_v46, 0.0  ;;  %v7098_v57 = vmax.f32 %v9848_v60, 0.0 }
 0x624   : > { %v9849_v38 = vadd.f32 %v6442_v18, %v5939_v3  ;;  %v6956_v5 = vpop.f32.mrb[112].mxu1  ;;  %9524 = vmatprep.subr.bf16.mxu1 %v9523_v52  ;;  %v6444_v8 = vpop.f32.mrb[113].mxu0  ;;  %9462 = vmatpush1.bf16.msra.mxu0 %v9461_v1  ;;  %v7100_v61 = vmax.f32 %v9912_v42, 0.0 }
 0x625   : > { %v9913_v48 = vadd.f32 %v6956_v5, %v5939_v3  ;;  %v9850_v47 = vadd.f32 %v6444_v8, %v5939_v3  ;;  %v6958_v12 = vpop.f32.mrb[113].mxu1  ;;  %9526 = vmatpush1.bf16.msra.mxu1 %v9525_v31  ;;  %v5949_v1 = vpop.permute.xlu1 %5948 }
 0x626   : > { %v7101_v27 = vmax.f32 %v9849_v38, 0.0  ;;  %v9914_v7 = vadd.f32 %v6958_v12, %v5939_v3 }
 0x627   : > { %v7103_v49 = vmax.f32 %v9913_v48, 0.0  ;;  %v7102_v39 = vmax.f32 %v9850_v47, 0.0  ;;  %v6448_v9 = vpop.f32.mrb[114].mxu0 }
 0x628   : > { %v9465_v63 = vpack.c.bf16 %v7101_v27, %v7097_v11  ;;  %v7104_v26 = vmax.f32 %v9914_v7, 0.0  ;;  %v6962_v35 = vpop.f32.mrb[114].mxu1  ;;  %v6450_v55 = vpop.f32.mrb[115].mxu0  ;;  %v9851_v24 = vadd.f32 %v6448_v9, %v13962_v34 }
 0x629   : > { %v9529_v51 = vpack.c.bf16 %v7103_v49, %v7099_v19  ;;  %v9463_v53 = vpack.c.bf16 %v7102_v39, %v7098_v57  ;;  %v6964_v23 = vpop.f32.mrb[115].mxu1  ;;  %v9915_v41 = vadd.f32 %v6962_v35, %v13962_v34  ;;  %v9852_v33 = vadd.f32 %v6450_v55, %v13962_v34 }
 0x62a   : > { %v9527_v15 = vpack.c.bf16 %v7104_v26, %v7100_v61  ;;  %v9916_v31 = vadd.f32 %v6964_v23, %v13962_v34  ;;  %v7105_v60 = vmax.f32 %v9851_v24, 0.0  ;;  %v5959_v61 = vpop.permute.xlu1 %5958 }
 0x62b   : > { %v6454_v30 = vpop.f32.mrb[116].mxu0  ;;  %9464 = vmatprep.subr.bf16.mxu0 %v9463_v53  ;;  %v7107_v38 = vmax.f32 %v9915_v41, 0.0  ;;  %v7106_v5 = vmax.f32 %v9852_v33, 0.0 }
 0x62c   : > { %v9853_v21 = vadd.f32 %v6454_v30, %v5949_v1  ;;  %v6968_v10 = vpop.f32.mrb[116].mxu1  ;;  %9528 = vmatprep.subr.bf16.mxu1 %v9527_v15  ;;  %v6456_v52 = vpop.f32.mrb[117].mxu0  ;;  %9466 = vmatpush1.bf16.msra.mxu0 %v9465_v63  ;;  %v7108_v12 = vmax.f32 %v9916_v31, 0.0 }
 0x62d   : > { %v9917_v22 = vadd.f32 %v6968_v10, %v5949_v1  ;;  %v9854_v3 = vadd.f32 %v6456_v52, %v5949_v1  ;;  %v6970_v46 = vpop.f32.mrb[117].mxu1  ;;  %9530 = vmatpush1.bf16.msra.mxu1 %v9529_v51 }
 0x62e   : > { %v7109_v18 = vmax.f32 %v9853_v21, 0.0  ;;  %v9918_v42 = vadd.f32 %v6970_v46, %v5949_v1 }
 0x62f   : > { %v7111_v8 = vmax.f32 %v9917_v22, 0.0  ;;  %v7110_v48 = vmax.f32 %v9854_v3, 0.0  ;;  %v6460_v47 = vpop.f32.mrb[118].mxu0 }
 0x630   : > { %v9469_v11 = vpack.c.bf16 %v7109_v18, %v7105_v60  ;;  %v7112_v34 = vmax.f32 %v9918_v42, 0.0  ;;  %v6974_v27 = vpop.f32.mrb[118].mxu1  ;;  %v6462_v7 = vpop.f32.mrb[119].mxu0  ;;  %v9855_v9 = vadd.f32 %v6460_v47, %v13978_v36 }
 0x631   : > { %v9533_v19 = vpack.c.bf16 %v7111_v8, %v7107_v38  ;;  %v9467_v57 = vpack.c.bf16 %v7110_v48, %v7106_v5  ;;  %v6976_v49 = vpop.f32.mrb[119].mxu1  ;;  %v9919_v63 = vadd.f32 %v6974_v27, %v13978_v36  ;;  %v9856_v26 = vadd.f32 %v6462_v7, %v13978_v36  ;;  %v5969_v47 = vpop.permute.xlu1 %5968 }
 0x632   : > { %v9531_v39 = vpack.c.bf16 %v7112_v34, %v7108_v12  ;;  %v9920_v55 = vadd.f32 %v6976_v49, %v13978_v36  ;;  %v7113_v41 = vmax.f32 %v9855_v9, 0.0 }
 0x633   : > { %v6466_v35 = vpop.f32.mrb[120].mxu0  ;;  %9468 = vmatprep.subr.bf16.mxu0 %v9467_v57  ;;  %v7115_v31 = vmax.f32 %v9919_v63, 0.0  ;;  %v7114_v21 = vmax.f32 %v9856_v26, 0.0 }
 0x634   : > { %v9857_v51 = vadd.f32 %v6466_v35, %v5959_v61  ;;  %v6980_v53 = vpop.f32.mrb[120].mxu1  ;;  %9532 = vmatprep.subr.bf16.mxu1 %v9531_v39  ;;  %v6468_v23 = vpop.f32.mrb[121].mxu0  ;;  %9470 = vmatpush1.bf16.msra.mxu0 %v9469_v11  ;;  %v7116_v3 = vmax.f32 %v9920_v55, 0.0 }
 0x635   : > { %v9921_v15 = vadd.f32 %v6980_v53, %v5959_v61  ;;  %v9858_v24 = vadd.f32 %v6468_v23, %v5959_v61  ;;  %v6982_v1 = vpop.f32.mrb[121].mxu1  ;;  %9534 = vmatpush1.bf16.msra.mxu1 %v9533_v19 }
 0x636   : > { %v7117_v33 = vmax.f32 %v9857_v51, 0.0  ;;  %v9922_v30 = vadd.f32 %v6982_v1, %v5959_v61 }
 0x637   : > { %v7119_v10 = vmax.f32 %v9921_v15, 0.0  ;;  %v7118_v52 = vmax.f32 %v9858_v24, 0.0  ;;  %v6472_v22 = vpop.f32.mrb[122].mxu0 }
 0x638   : > { %v9473_v46 = vpack.c.bf16 %v7117_v33, %v7113_v41  ;;  %v7120_v36 = vmax.f32 %v9922_v30, 0.0  ;;  %v6986_v60 = vpop.f32.mrb[122].mxu1  ;;  %v6474_v18 = vpop.f32.mrb[123].mxu0  ;;  %v9859_v48 = vadd.f32 %v6472_v22, %v13996_v45 }
 0x639   : > { %v9537_v42 = vpack.c.bf16 %v7119_v10, %v7115_v31  ;;  %v9471_v38 = vpack.c.bf16 %v7118_v52, %v7114_v21  ;;  %v6988_v5 = vpop.f32.mrb[123].mxu1  ;;  %v9923_v12 = vadd.f32 %v6986_v60, %v13996_v45  ;;  %v9860_v11 = vadd.f32 %v6474_v18, %v13996_v45  ;;  %v5979_v52 = vpop.permute.xlu1 %5978 }
 0x63a   : > { %v9535_v8 = vpack.c.bf16 %v7120_v36, %v7116_v3  ;;  %v9924_v27 = vadd.f32 %v6988_v5, %v13996_v45  ;;  %v7121_v61 = vmax.f32 %v9859_v48, 0.0 }
 0x63b   : > { %v6478_v34 = vpop.f32.mrb[124].mxu0  ;;  %9472 = vmatprep.subr.bf16.mxu0 %v9471_v38  ;;  %v7123_v35 = vmax.f32 %v9923_v12, 0.0  ;;  %v7122_v55 = vmax.f32 %v9860_v11, 0.0 }
 0x63c   : > { %v9861_v7 = vadd.f32 %v6478_v34, %v5969_v47  ;;  %v6992_v19 = vpop.f32.mrb[124].mxu1  ;;  %9536 = vmatprep.subr.bf16.mxu1 %v9535_v8  ;;  %v6480_v57 = vpop.f32.mrb[125].mxu0  ;;  %9474 = vmatpush1.bf16.msra.mxu0 %v9473_v46  ;;  %v7124_v15 = vmax.f32 %v9924_v27, 0.0 }
 0x63d   : > { %v9925_v49 = vadd.f32 %v6992_v19, %v5969_v47  ;;  %v9862_v39 = vadd.f32 %v6480_v57, %v5969_v47  ;;  %v6994_v9 = vpop.f32.mrb[125].mxu1  ;;  %9538 = vmatpush1.bf16.msra.mxu1 %v9537_v42 }
 0x63e   : > { %v7125_v63 = vmax.f32 %v9861_v7, 0.0  ;;  %v9926_v26 = vadd.f32 %v6994_v9, %v5969_v47 }
 0x63f   : > { %v7127_v51 = vmax.f32 %v9925_v49, 0.0  ;;  %v7126_v53 = vmax.f32 %v9862_v39, 0.0  ;;  %v6484_v23 = vpop.f32.mrb[126].mxu0 }
 0x640   : > { %v9477_v24 = vpack.c.bf16 %v7125_v63, %v7121_v61  ;;  %v7128_v45 = vmax.f32 %v9926_v26, 0.0  ;;  %v6998_v1 = vpop.f32.mrb[126].mxu1  ;;  %v6486_v41 = vpop.f32.mrb[127].mxu0  ;;  %v9863_v10 = vadd.f32 %v6484_v23, %v14012_v40  ;;  %v7137_v61 = vld [vmem:[%s14826_s9] sm:$0xff]  ;;  %v7140_v63 = vld [vmem:[%s14826_s9 + $0x18] sm:$0xff]  ;;  %v7139_v26 = vld [vmem:[%s14826_s9 + $0x10] sm:$0xff] }
 0x641   : > { %v9541_v33 = vpack.c.bf16 %v7127_v51, %v7123_v35  ;;  %v9475_v30 = vpack.c.bf16 %v7126_v53, %v7122_v55  ;;  %v7000_v31 = vpop.f32.mrb[127].mxu1  ;;  %v9927_v22 = vadd.f32 %v6998_v1, %v14012_v40  ;;  %v9864_v3 = vadd.f32 %v6486_v41, %v14012_v40  ;;  %v7142_v35 = vld [vmem:[%s14826_s9 + $0x28] sm:$0xff]  ;;  %v7141_v55 = vld [vmem:[%s14826_s9 + $0x20] sm:$0xff]  ;;  %v7144_v51 = vld [vmem:[%s14826_s9 + $0x38] sm:$0xff] }
 0x642   : > { %v9539_v21 = vpack.c.bf16 %v7128_v45, %v7124_v15  ;;  %v9928_v36 = vadd.f32 %v7000_v31, %v14012_v40  ;;  %v7129_v48 = vmax.f32 %v9863_v10, 0.0  ;;  %v7143_v53 = vld [vmem:[%s14826_s9 + $0x30] sm:$0xff]  ;;  %v7146_v23 = vld [vmem:[%s14826_s9 + $0x48] sm:$0xff]  ;;  %v7145_v15 = vld [vmem:[%s14826_s9 + $0x40] sm:$0xff] }
 0x643   : > { %v6490_v46 = vpop.f32.mrb[128].mxu0  ;;  %9476 = vmatprep.subr.bf16.mxu0 %v9475_v30  ;;  %v7131_v11 = vmax.f32 %v9927_v22, 0.0  ;;  %v7130_v34 = vmax.f32 %v9864_v3, 0.0  ;;  %v7147_v45 = vld [vmem:[%s14826_s9 + $0x50] sm:$0xff]  ;;  %v7150_v1 = vld [vmem:[%s14826_s9 + $0x68] sm:$0xff]  ;;  %v7149_v41 = vld [vmem:[%s14826_s9 + $0x60] sm:$0xff] }
 0x644   : > { %v9865_v60 = vadd.f32 %v6490_v46, %v5979_v52  ;;  %v7004_v18 = vpop.f32.mrb[128].mxu1  ;;  %9540 = vmatprep.subr.bf16.mxu1 %v9539_v21  ;;  %v6492_v42 = vpop.f32.mrb[129].mxu0  ;;  %9478 = vmatpush1.bf16.msra.mxu0 %v9477_v24  ;;  %v7132_v19 = vmax.f32 %v9928_v36, 0.0  ;;  %v7148_v24 = vld [vmem:[%s14826_s9 + $0x58] sm:$0xff]  ;;  %v7151_v30 = vld [vmem:[%s14826_s9 + $0x70] sm:$0xff]  ;;  %v7154_v31 = vld [vmem:[%s14826_s9 + $0x88] sm:$0xff] }
 0x645   : > { %v9929_v38 = vadd.f32 %v7004_v18, %v5979_v52  ;;  %v9866_v5 = vadd.f32 %v6492_v42, %v5979_v52  ;;  %v7006_v8 = vpop.f32.mrb[129].mxu1  ;;  %9542 = vmatpush1.bf16.msra.mxu1 %v9541_v33  ;;  %v7152_v33 = vld [vmem:[%s14826_s9 + $0x78] sm:$0xff]  ;;  %v7153_v21 = vld [vmem:[%s14826_s9 + $0x80] sm:$0xff]  ;;  %v7158_v22 = vld [vmem:[%s14826_s9 + $0xa8] sm:$0xff] }
 0x646   : > { %v7133_v47 = vmax.f32 %v9865_v60, 0.0  ;;  %v9930_v12 = vadd.f32 %v7006_v8, %v5979_v52  ;;  %v7156_v10 = vld [vmem:[%s14826_s9 + $0x98] sm:$0xff]  ;;  %v7155_v52 = vld [vmem:[%s14826_s9 + $0x90] sm:$0xff]  ;;  %v7157_v3 = vld [vmem:[%s14826_s9 + $0xa0] sm:$0xff] }
 0x647   : > { %v7135_v27 = vmax.f32 %v9929_v38, 0.0  ;;  %v7134_v7 = vmax.f32 %v9866_v5, 0.0  ;;  %v7160_v46 = vld [vmem:[%s14826_s9 + $0xb8] sm:$0xff]  ;;  %v7159_v36 = vld [vmem:[%s14826_s9 + $0xb0] sm:$0xff]  ;;  %v7162_v60 = vld [vmem:[%s14826_s9 + $0xc8] sm:$0xff] }
 0x648   : > { %v9481_v57 = vpack.c.bf16 %v7133_v47, %v7129_v48  ;;  %v7136_v49 = vmax.f32 %v9930_v12, 0.0  ;;  %v7161_v18 = vld [vmem:[%s14826_s9 + $0xc0] sm:$0xff]  ;;  %v7164_v42 = vld [vmem:[%s14826_s9 + $0xd8] sm:$0xff]  ;;  %v7163_v38 = vld [vmem:[%s14826_s9 + $0xd0] sm:$0xff] }
 0x649   : > { %v9545_v40 = vpack.c.bf16 %v7135_v27, %v7131_v11  ;;  %v9479_v39 = vpack.c.bf16 %v7134_v7, %v7130_v34  ;;  %v7166_v5 = vld [vmem:[%s14826_s9 + $0xe8] sm:$0xff]  ;;  %v7165_v8 = vld [vmem:[%s14826_s9 + $0xe0] sm:$0xff]  ;;  %v7168_v48 = vld [vmem:[%s14826_s9 + $0xf8] sm:$0xff] }
 0x64a   : > { %v9543_v9 = vpack.c.bf16 %v7136_v49, %v7132_v19  ;;  %v7167_v47 = vld [vmem:[%s14826_s9 + $0xf0] sm:$0xff]  ;;  %v7170_v12 = vld [vmem:[%s14826_s9 + $0x108] sm:$0xff]  ;;  %v7169_v11 = vld [vmem:[%s14826_s9 + $0x100] sm:$0xff] }
 0x64b   : > { %9480 = vmatprep.subr.bf16.mxu0 %v9479_v39  ;;  %v7172_v34 = vld [vmem:[%s14826_s9 + $0x118] sm:$0xff]  ;;  %v7171_v27 = vld [vmem:[%s14826_s9 + $0x110] sm:$0xff]  ;;  %v7174_v7 = vld [vmem:[%s14826_s9 + $0x128] sm:$0xff] }
 0x64c   : > { %9544 = vmatprep.subr.bf16.mxu1 %v9543_v9  ;;  %9482 = vmatpush1.bf16.msra.mxu0 %v9481_v57  ;;  %v7173_v19 = vld [vmem:[%s14826_s9 + $0x120] sm:$0xff]  ;;  %v7176_v57 = vld [vmem:[%s14826_s9 + $0x138] sm:$0xff]  ;;  %v7175_v49 = vld [vmem:[%s14826_s9 + $0x130] sm:$0xff] }
 0x64d   : > { %9546 = vmatpush1.bf16.msra.mxu1 %v9545_v40  ;;  %v7178_v40 = vld [vmem:[%s14826_s9 + $0x148] sm:$0xff]  ;;  %v7177_v39 = vld [vmem:[%s14826_s9 + $0x140] sm:$0xff]  ;;  %v7180_v9 = vld [vmem:[%s14826_s9 + $0x158] sm:$0xff] }
 0x64f   : > { %7458 = vmatmul.mubr.f32.vlgmr.msra.gmra.mrb[130].mxu0 %v7137_v61 }
 0x650   : > { %7715 = vmatmul.mubr.f32.vlgmr.msra.gmra.mrb[130].mxu1 %v7137_v61  ;;  %7463 = vmatprep.mubr.f32.mxu0 %v7140_v63  ;;  %v7179_v61 = vld [vmem:[%s14826_s9 + $0x150] sm:$0xff] }
 0x651   : > { %7720 = vmatprep.mubr.f32.mxu1 %v7140_v63  ;;  %v7182_v63 = vld [vmem:[%s14826_s9 + $0x168] sm:$0xff] }
 0x653   : > { %7464 = vmatmul.mubr.f32.gmra.mrb[132].mxu0 %v7139_v26 }
 0x654   : > { %7721 = vmatmul.mubr.f32.gmra.mrb[132].mxu1 %v7139_v26  ;;  %7469 = vmatprep.mubr.f32.mxu0 %v7142_v35  ;;  %v7181_v26 = vld [vmem:[%s14826_s9 + $0x160] sm:$0xff] }
 0x655   : > { %7726 = vmatprep.mubr.f32.mxu1 %v7142_v35  ;;  %v7184_v35 = vld [vmem:[%s14826_s9 + $0x178] sm:$0xff] }
 0x657   : > { %7470 = vmatmul.mubr.f32.gmra.mrb[134].mxu0 %v7141_v55 }
 0x658   : > { %7727 = vmatmul.mubr.f32.gmra.mrb[134].mxu1 %v7141_v55  ;;  %7475 = vmatprep.mubr.f32.mxu0 %v7144_v51  ;;  %v7183_v55 = vld [vmem:[%s14826_s9 + $0x170] sm:$0xff] }
 0x659   : > { %7732 = vmatprep.mubr.f32.mxu1 %v7144_v51  ;;  %v7186_v51 = vld [vmem:[%s14826_s9 + $0x188] sm:$0xff] }
 0x65b   : > { %7476 = vmatmul.mubr.f32.gmra.mrb[136].mxu0 %v7143_v53 }
 0x65c   : > { %7733 = vmatmul.mubr.f32.gmra.mrb[136].mxu1 %v7143_v53  ;;  %7481 = vmatprep.mubr.f32.mxu0 %v7146_v23  ;;  %v7185_v53 = vld [vmem:[%s14826_s9 + $0x180] sm:$0xff] }
 0x65d   : > { %7738 = vmatprep.mubr.f32.mxu1 %v7146_v23  ;;  %v7188_v23 = vld [vmem:[%s14826_s9 + $0x198] sm:$0xff] }
 0x65f   : > { %7482 = vmatmul.mubr.f32.gmra.mrb[138].mxu0 %v7145_v15 }
 0x660   : > { %7739 = vmatmul.mubr.f32.gmra.mrb[138].mxu1 %v7145_v15  ;;  %7487 = vmatprep.mubr.f32.mxu0 %v7148_v24  ;;  %v7187_v15 = vld [vmem:[%s14826_s9 + $0x190] sm:$0xff] }
 0x661   : > { %7744 = vmatprep.mubr.f32.mxu1 %v7148_v24  ;;  %v7190_v24 = vld [vmem:[%s14826_s9 + $0x1a8] sm:$0xff] }
 0x663   : > { %7488 = vmatmul.mubr.f32.gmra.mrb[140].mxu0 %v7147_v45 }
 0x664   : > { %7745 = vmatmul.mubr.f32.gmra.mrb[140].mxu1 %v7147_v45  ;;  %7493 = vmatprep.mubr.f32.mxu0 %v7150_v1  ;;  %v7189_v45 = vld [vmem:[%s14826_s9 + $0x1a0] sm:$0xff] }
 0x665   : > { %7750 = vmatprep.mubr.f32.mxu1 %v7150_v1  ;;  %v7192_v1 = vld [vmem:[%s14826_s9 + $0x1b8] sm:$0xff] }
 0x667   : > { %7494 = vmatmul.mubr.f32.gmra.mrb[142].mxu0 %v7149_v41 }
 0x668   : > { %7751 = vmatmul.mubr.f32.gmra.mrb[142].mxu1 %v7149_v41  ;;  %7499 = vmatprep.mubr.f32.mxu0 %v7152_v33  ;;  %v7191_v41 = vld [vmem:[%s14826_s9 + $0x1b0] sm:$0xff] }
 0x669   : > { %7756 = vmatprep.mubr.f32.mxu1 %v7152_v33  ;;  %v7194_v33 = vld [vmem:[%s14826_s9 + $0x1c8] sm:$0xff] }
 0x66b   : > { %7500 = vmatmul.mubr.f32.gmra.mrb[144].mxu0 %v7151_v30 }
 0x66c   : > { %7757 = vmatmul.mubr.f32.gmra.mrb[144].mxu1 %v7151_v30  ;;  %7505 = vmatprep.mubr.f32.mxu0 %v7154_v31  ;;  %v7193_v30 = vld [vmem:[%s14826_s9 + $0x1c0] sm:$0xff] }
 0x66d   : > { %7762 = vmatprep.mubr.f32.mxu1 %v7154_v31  ;;  %v7196_v31 = vld [vmem:[%s14826_s9 + $0x1d8] sm:$0xff] }
 0x66f   : > { %7506 = vmatmul.mubr.f32.gmra.mrb[146].mxu0 %v7153_v21 }
 0x670   : > { %7763 = vmatmul.mubr.f32.gmra.mrb[146].mxu1 %v7153_v21  ;;  %7511 = vmatprep.mubr.f32.mxu0 %v7156_v10  ;;  %v7195_v21 = vld [vmem:[%s14826_s9 + $0x1d0] sm:$0xff] }
 0x671   : > { %7768 = vmatprep.mubr.f32.mxu1 %v7156_v10  ;;  %v7198_v10 = vld [vmem:[%s14826_s9 + $0x1e8] sm:$0xff] }
 0x673   : > { %7512 = vmatmul.mubr.f32.gmra.mrb[148].mxu0 %v7155_v52 }
 0x674   : > { %7769 = vmatmul.mubr.f32.gmra.mrb[148].mxu1 %v7155_v52  ;;  %7517 = vmatprep.mubr.f32.mxu0 %v7158_v22  ;;  %v7197_v52 = vld [vmem:[%s14826_s9 + $0x1e0] sm:$0xff] }
 0x675   : > { %7774 = vmatprep.mubr.f32.mxu1 %v7158_v22  ;;  %v7200_v22 = vld [vmem:[%s14826_s9 + $0x1f8] sm:$0xff] }
 0x677   : > { %7518 = vmatmul.mubr.f32.gmra.mrb[150].mxu0 %v7157_v3 }
 0x678   : > { %7775 = vmatmul.mubr.f32.gmra.mrb[150].mxu1 %v7157_v3  ;;  %7523 = vmatprep.mubr.f32.mxu0 %v7160_v46  ;;  %v7199_v3 = vld [vmem:[%s14826_s9 + $0x1f0] sm:$0xff] }
 0x679   : > { %7780 = vmatprep.mubr.f32.mxu1 %v7160_v46 }
 0x67b   : > { %7524 = vmatmul.mubr.f32.gmra.mrb[152].mxu0 %v7159_v36 }
 0x67c   : > { %7781 = vmatmul.mubr.f32.gmra.mrb[152].mxu1 %v7159_v36  ;;  %7529 = vmatprep.mubr.f32.mxu0 %v7162_v60 }
 0x67d   : > { %7786 = vmatprep.mubr.f32.mxu1 %v7162_v60 }
 0x67f   : > { %7530 = vmatmul.mubr.f32.gmra.mrb[154].mxu0 %v7161_v18 }
 0x680   : > { %7787 = vmatmul.mubr.f32.gmra.mrb[154].mxu1 %v7161_v18  ;;  %7535 = vmatprep.mubr.f32.mxu0 %v7164_v42 }
 0x681   : > { %7792 = vmatprep.mubr.f32.mxu1 %v7164_v42 }
 0x683   : > { %7536 = vmatmul.mubr.f32.gmra.mrb[156].mxu0 %v7163_v38 }
 0x684   : > { %7793 = vmatmul.mubr.f32.gmra.mrb[156].mxu1 %v7163_v38  ;;  %7541 = vmatprep.mubr.f32.mxu0 %v7166_v5  ;;  %v7241_v38 = vpop.permute.xlu1 %7240 }
 0x685   : > { %7798 = vmatprep.mubr.f32.mxu1 %v7166_v5 }
 0x687   : > { %7542 = vmatmul.mubr.f32.gmra.mrb[158].mxu0 %v7165_v8 }
 0x688   : > { %7799 = vmatmul.mubr.f32.gmra.mrb[158].mxu1 %v7165_v8  ;;  %7547 = vmatprep.mubr.f32.mxu0 %v7168_v48 }
 0x689   : > { %7804 = vmatprep.mubr.f32.mxu1 %v7168_v48 }
 0x68b   : > { %7548 = vmatmul.mubr.f32.gmra.mrb[160].mxu0 %v7167_v47 }
 0x68c   : > { %7805 = vmatmul.mubr.f32.gmra.mrb[160].mxu1 %v7167_v47  ;;  %7553 = vmatprep.mubr.f32.mxu0 %v7170_v12 }
 0x68d   : > { %7810 = vmatprep.mubr.f32.mxu1 %v7170_v12 }
 0x68f   : > { %7554 = vmatmul.mubr.f32.gmra.mrb[162].mxu0 %v7169_v11 }
 0x690   : > { %7811 = vmatmul.mubr.f32.gmra.mrb[162].mxu1 %v7169_v11  ;;  %7559 = vmatprep.mubr.f32.mxu0 %v7172_v34 }
 0x691   : > { %7816 = vmatprep.mubr.f32.mxu1 %v7172_v34 }
 0x693   : > { %7560 = vmatmul.mubr.f32.gmra.mrb[164].mxu0 %v7171_v27 }
 0x694   : > { %7817 = vmatmul.mubr.f32.gmra.mrb[164].mxu1 %v7171_v27  ;;  %7565 = vmatprep.mubr.f32.mxu0 %v7174_v7 }
 0x695   : > { %7822 = vmatprep.mubr.f32.mxu1 %v7174_v7 }
 0x697   : > { %7566 = vmatmul.mubr.f32.gmra.mrb[166].mxu0 %v7173_v19 }
 0x698   : > { %7823 = vmatmul.mubr.f32.gmra.mrb[166].mxu1 %v7173_v19  ;;  %7571 = vmatprep.mubr.f32.mxu0 %v7176_v57 }
 0x699   : > { %7828 = vmatprep.mubr.f32.mxu1 %v7176_v57  ;;  %v8752_v57 = vld.sshfl [vmem:[%s14828_s11] sm:$0x33 pattern:$0x76325410] }
 0x69b   : > { %7572 = vmatmul.mubr.f32.gmra.mrb[168].mxu0 %v7175_v49 }
 0x69c   : > { %7829 = vmatmul.mubr.f32.gmra.mrb[168].mxu1 %v7175_v49  ;;  %7577 = vmatprep.mubr.f32.mxu0 %v7178_v40 }
 0x69d   : > { %7834 = vmatprep.mubr.f32.mxu1 %v7178_v40 }
 0x69f   : > { %7578 = vmatmul.mubr.f32.gmra.mrb[170].mxu0 %v7177_v39 }
 0x6a0   : > { %7835 = vmatmul.mubr.f32.gmra.mrb[170].mxu1 %v7177_v39  ;;  %7583 = vmatprep.mubr.f32.mxu0 %v7180_v9 }
 0x6a1   : > { %7840 = vmatprep.mubr.f32.mxu1 %v7180_v9  ;;  %v8050_v9 = vcombine.high %v8752_v57, %v8752_v57 }
 0x6a3   : > { %7584 = vmatmul.mubr.f32.gmra.mrb[172].mxu0 %v7179_v61 }
 0x6a4   : > { %7841 = vmatmul.mubr.f32.gmra.mrb[172].mxu1 %v7179_v61  ;;  %7589 = vmatprep.mubr.f32.mxu0 %v7182_v63 }
 0x6a5   : > { %7846 = vmatprep.mubr.f32.mxu1 %v7182_v63 }
 0x6a7   : > { %7590 = vmatmul.mubr.f32.gmra.mrb[174].mxu0 %v7181_v26 }
 0x6a8   : > { %7847 = vmatmul.mubr.f32.gmra.mrb[174].mxu1 %v7181_v26  ;;  %7595 = vmatprep.mubr.f32.mxu0 %v7184_v35 }
 0x6a9   : > { %7852 = vmatprep.mubr.f32.mxu1 %v7184_v35 }
 0x6ab   : > { %7596 = vmatmul.mubr.f32.gmra.mrb[176].mxu0 %v7183_v55 }
 0x6ac   : > { %7853 = vmatmul.mubr.f32.gmra.mrb[176].mxu1 %v7183_v55  ;;  %7601 = vmatprep.mubr.f32.mxu0 %v7186_v51 }
 0x6ad   : > { %7858 = vmatprep.mubr.f32.mxu1 %v7186_v51 }
 0x6af   : > { %7602 = vmatmul.mubr.f32.gmra.mrb[178].mxu0 %v7185_v53 }
 0x6b0   : > { %7859 = vmatmul.mubr.f32.gmra.mrb[178].mxu1 %v7185_v53  ;;  %7607 = vmatprep.mubr.f32.mxu0 %v7188_v23 }
 0x6b1   : > { %7864 = vmatprep.mubr.f32.mxu1 %v7188_v23 }
 0x6b3   : > { %7608 = vmatmul.mubr.f32.gmra.mrb[180].mxu0 %v7187_v15 }
 0x6b4   : > { %7865 = vmatmul.mubr.f32.gmra.mrb[180].mxu1 %v7187_v15  ;;  %7613 = vmatprep.mubr.f32.mxu0 %v7190_v24 }
 0x6b5   : > { %7870 = vmatprep.mubr.f32.mxu1 %v7190_v24 }
 0x6b7   : > { %7614 = vmatmul.mubr.f32.gmra.mrb[182].mxu0 %v7189_v45 }
 0x6b8   : > { %7871 = vmatmul.mubr.f32.gmra.mrb[182].mxu1 %v7189_v45  ;;  %7619 = vmatprep.mubr.f32.mxu0 %v7192_v1 }
 0x6b9   : > { %7876 = vmatprep.mubr.f32.mxu1 %v7192_v1 }
 0x6bb   : > { %7620 = vmatmul.mubr.f32.gmra.mrb[184].mxu0 %v7191_v41 }
 0x6bc   : > { %7877 = vmatmul.mubr.f32.gmra.mrb[184].mxu1 %v7191_v41  ;;  %7625 = vmatprep.mubr.f32.mxu0 %v7194_v33 }
 0x6bd   : > { %7882 = vmatprep.mubr.f32.mxu1 %v7194_v33 }
 0x6bf   : > { %7626 = vmatmul.mubr.f32.gmra.mrb[186].mxu0 %v7193_v30 }
 0x6c0   : > { %7883 = vmatmul.mubr.f32.gmra.mrb[186].mxu1 %v7193_v30  ;;  %7631 = vmatprep.mubr.f32.mxu0 %v7196_v31  ;;  %v7251_v30 = vpop.permute.xlu1 %7250 }
 0x6c1   : > { %7888 = vmatprep.mubr.f32.mxu1 %v7196_v31 }
 0x6c3   : > { %7632 = vmatmul.mubr.f32.gmra.mrb[188].mxu0 %v7195_v21 }
 0x6c4   : > { %7889 = vmatmul.mubr.f32.gmra.mrb[188].mxu1 %v7195_v21  ;;  %7637 = vmatprep.mubr.f32.mxu0 %v7198_v10 }
 0x6c5   : > { %7894 = vmatprep.mubr.f32.mxu1 %v7198_v10 }
 0x6c7   : > { %7638 = vmatmul.mubr.f32.gmra.mrb[190].mxu0 %v7197_v52 }
 0x6c8   : > { %7895 = vmatmul.mubr.f32.gmra.mrb[190].mxu1 %v7197_v52  ;;  %7643 = vmatprep.mubr.f32.mxu0 %v7200_v22 }
 0x6c9   : > { %7900 = vmatprep.mubr.f32.mxu1 %v7200_v22 }
 0x6cb   : > { %7644 = vmatmul.mubr.f32.gmra.mrb[192].mxu0 %v7199_v3 }
 0x6cc   : > { %7901 = vmatmul.mubr.f32.gmra.mrb[192].mxu1 %v7199_v3  ;;  %8117 = vmatprep.mubr.f32.mxu0 %v8050_v9 }
 0x6cd   : > { %8188 = vmatprep.mubr.f32.mxu1 %v8050_v9 }
 0x722   : > { %v7459_v46 = vpop.f32.mrb[130].mxu0 }
 0x723   : > { %v7716_v36 = vpop.f32.mrb[130].mxu1  ;;  %v7461_v60 = vpop.f32.mrb[131].mxu0  ;;  %v7460_v42 = vadd.f32 %v7459_v46, %v14030_v16 }
 0x724   : > { %v7718_v18 = vpop.f32.mrb[131].mxu1  ;;  %v7717_v5 = vadd.f32 %v7716_v36, %v14030_v16  ;;  %v7462_v8 = vadd.f32 %v7461_v60, %v14030_v16 }
 0x725   : > { %v7719_v47 = vadd.f32 %v7718_v18, %v14030_v16  ;;  %v7907_v49 = vmax.f32 %v7460_v42, 0.0 }
 0x726   : > { %v7465_v48 = vpop.f32.mrb[132].mxu0  ;;  %v7909_v61 = vmax.f32 %v7717_v5, 0.0  ;;  %v7908_v63 = vmax.f32 %v7462_v8, 0.0 }
 0x727   : > { %v7466_v12 = vadd.f32 %v7465_v48, %v7241_v38  ;;  %v7722_v11 = vpop.f32.mrb[132].mxu1  ;;  %v7467_v34 = vpop.f32.mrb[133].mxu0  ;;  %v7910_v16 = vmax.f32 %v7719_v47, 0.0 }
 0x728   : > { %v7723_v27 = vadd.f32 %v7722_v11, %v7241_v38  ;;  %v7468_v7 = vadd.f32 %v7467_v34, %v7241_v38  ;;  %v7724_v19 = vpop.f32.mrb[133].mxu1 }
 0x729   : > { %v7911_v40 = vmax.f32 %v7466_v12, 0.0  ;;  %v7725_v39 = vadd.f32 %v7724_v19, %v7241_v38 }
 0x72a   : > { %v7913_v26 = vmax.f32 %v7723_v27, 0.0  ;;  %v7912_v35 = vmax.f32 %v7468_v7, 0.0  ;;  %v7471_v55 = vpop.f32.mrb[134].mxu0 }
 0x72b   : > { %v9549_v51 = vpack.c.bf16 %v7911_v40, %v7907_v49  ;;  %v7914_v53 = vmax.f32 %v7725_v39, 0.0  ;;  %v7728_v23 = vpop.f32.mrb[134].mxu1  ;;  %v7473_v15 = vpop.f32.mrb[135].mxu0  ;;  %v7472_v33 = vadd.f32 %v7471_v55, %v14046_v13 }
 0x72c   : > { %v9613_v24 = vpack.c.bf16 %v7913_v26, %v7909_v61  ;;  %v9547_v45 = vpack.c.bf16 %v7912_v35, %v7908_v63  ;;  %v7730_v1 = vpop.f32.mrb[135].mxu1  ;;  %v7729_v31 = vadd.f32 %v7728_v23, %v14046_v13  ;;  %v7474_v21 = vadd.f32 %v7473_v15, %v14046_v13  ;;  %v7261_v61 = vpop.permute.xlu1 %7260 }
 0x72d   : > { %v9611_v41 = vpack.c.bf16 %v7914_v53, %v7910_v16  ;;  %v7731_v52 = vadd.f32 %v7730_v1, %v14046_v13  ;;  %v7915_v42 = vmax.f32 %v7472_v33, 0.0 }
 0x72e   : > { %v7477_v10 = vpop.f32.mrb[136].mxu0  ;;  %9548 = vmatprep.subr.bf16.mxu0 %v9547_v45  ;;  %v7917_v8 = vmax.f32 %v7729_v31, 0.0  ;;  %v7916_v48 = vmax.f32 %v7474_v21, 0.0 }
 0x72f   : > { %v7478_v22 = vadd.f32 %v7477_v10, %v7251_v30  ;;  %v7734_v3 = vpop.f32.mrb[136].mxu1  ;;  %9612 = vmatprep.subr.bf16.mxu1 %v9611_v41  ;;  %v7479_v46 = vpop.f32.mrb[137].mxu0  ;;  %9550 = vmatpush1.bf16.msra.mxu0 %v9549_v51  ;;  %v7918_v34 = vmax.f32 %v7731_v52, 0.0 }
 0x730   : > { %v7735_v36 = vadd.f32 %v7734_v3, %v7251_v30  ;;  %v7480_v60 = vadd.f32 %v7479_v46, %v7251_v30  ;;  %v7736_v18 = vpop.f32.mrb[137].mxu1  ;;  %9614 = vmatpush1.bf16.msra.mxu1 %v9613_v24 }
 0x731   : > { %v7919_v38 = vmax.f32 %v7478_v22, 0.0  ;;  %v7737_v5 = vadd.f32 %v7736_v18, %v7251_v30 }
 0x732   : > { %v7921_v47 = vmax.f32 %v7735_v36, 0.0  ;;  %v7920_v12 = vmax.f32 %v7480_v60, 0.0  ;;  %v7483_v11 = vpop.f32.mrb[138].mxu0 }
 0x733   : > { %v9553_v27 = vpack.c.bf16 %v7919_v38, %v7915_v42  ;;  %v7922_v13 = vmax.f32 %v7737_v5, 0.0  ;;  %v7740_v7 = vpop.f32.mrb[138].mxu1  ;;  %v7485_v19 = vpop.f32.mrb[139].mxu0  ;;  %v7484_v9 = vadd.f32 %v7483_v11, %v14066_v44 }
 0x734   : > { %v9617_v57 = vpack.c.bf16 %v7921_v47, %v7917_v8  ;;  %v9551_v49 = vpack.c.bf16 %v7920_v12, %v7916_v48  ;;  %v7742_v40 = vpop.f32.mrb[139].mxu1  ;;  %v7741_v63 = vadd.f32 %v7740_v7, %v14066_v44  ;;  %v7486_v26 = vadd.f32 %v7485_v19, %v14066_v44  ;;  %v7271_v5 = vpop.permute.xlu1 %7270 }
 0x735   : > { %v9615_v39 = vpack.c.bf16 %v7922_v13, %v7918_v34  ;;  %v7743_v55 = vadd.f32 %v7742_v40, %v14066_v44  ;;  %v7923_v45 = vmax.f32 %v7484_v9, 0.0 }
 0x736   : > { %v7489_v35 = vpop.f32.mrb[140].mxu0  ;;  %9552 = vmatprep.subr.bf16.mxu0 %v9551_v49  ;;  %v7925_v33 = vmax.f32 %v7741_v63, 0.0  ;;  %v7924_v30 = vmax.f32 %v7486_v26, 0.0 }
 0x737   : > { %v7490_v16 = vadd.f32 %v7489_v35, %v7261_v61  ;;  %v7746_v51 = vpop.f32.mrb[140].mxu1  ;;  %9616 = vmatprep.subr.bf16.mxu1 %v9615_v39  ;;  %v7491_v53 = vpop.f32.mrb[141].mxu0  ;;  %9554 = vmatpush1.bf16.msra.mxu0 %v9553_v27  ;;  %v7926_v52 = vmax.f32 %v7743_v55, 0.0 }
 0x738   : > { %v7747_v23 = vadd.f32 %v7746_v51, %v7261_v61  ;;  %v7492_v15 = vadd.f32 %v7491_v53, %v7261_v61  ;;  %v7748_v24 = vpop.f32.mrb[141].mxu1  ;;  %9618 = vmatpush1.bf16.msra.mxu1 %v9617_v57 }
 0x739   : > { %v7927_v1 = vmax.f32 %v7490_v16, 0.0  ;;  %v7749_v41 = vadd.f32 %v7748_v24, %v7261_v61 }
 0x73a   : > { %v7929_v31 = vmax.f32 %v7747_v23, 0.0  ;;  %v7928_v21 = vmax.f32 %v7492_v15, 0.0  ;;  %v7495_v10 = vpop.f32.mrb[142].mxu0 }
 0x73b   : > { %v9557_v22 = vpack.c.bf16 %v7927_v1, %v7923_v45  ;;  %v7930_v44 = vmax.f32 %v7749_v41, 0.0  ;;  %v7752_v3 = vpop.f32.mrb[142].mxu1  ;;  %v7497_v46 = vpop.f32.mrb[143].mxu0  ;;  %v7496_v38 = vadd.f32 %v7495_v10, %v14074_v50 }
 0x73c   : > { %v9621_v36 = vpack.c.bf16 %v7929_v31, %v7925_v33  ;;  %v9555_v60 = vpack.c.bf16 %v7928_v21, %v7924_v30  ;;  %v7754_v18 = vpop.f32.mrb[143].mxu1  ;;  %v7753_v8 = vadd.f32 %v7752_v3, %v14074_v50  ;;  %v7498_v48 = vadd.f32 %v7497_v46, %v14074_v50  ;;  %v7281_v1 = vpop.permute.xlu1 %7280 }
 0x73d   : > { %v9619_v42 = vpack.c.bf16 %v7930_v44, %v7926_v52  ;;  %v7755_v12 = vadd.f32 %v7754_v18, %v14074_v50  ;;  %v7931_v57 = vmax.f32 %v7496_v38, 0.0 }
 0x73e   : > { %v7501_v47 = vpop.f32.mrb[144].mxu0  ;;  %9556 = vmatprep.subr.bf16.mxu0 %v9555_v60  ;;  %v7933_v39 = vmax.f32 %v7753_v8, 0.0  ;;  %v7932_v9 = vmax.f32 %v7498_v48, 0.0 }
 0x73f   : > { %v7502_v11 = vadd.f32 %v7501_v47, %v7271_v5  ;;  %v7758_v34 = vpop.f32.mrb[144].mxu1  ;;  %9620 = vmatprep.subr.bf16.mxu1 %v9619_v42  ;;  %v7503_v27 = vpop.f32.mrb[145].mxu0  ;;  %9558 = vmatpush1.bf16.msra.mxu0 %v9557_v22  ;;  %v7934_v35 = vmax.f32 %v7755_v12, 0.0 }
 0x740   : > { %v7759_v13 = vadd.f32 %v7758_v34, %v7271_v5  ;;  %v7504_v7 = vadd.f32 %v7503_v27, %v7271_v5  ;;  %v7760_v19 = vpop.f32.mrb[145].mxu1  ;;  %9622 = vmatpush1.bf16.msra.mxu1 %v9621_v36 }
 0x741   : > { %v7935_v49 = vmax.f32 %v7502_v11, 0.0  ;;  %v7761_v40 = vadd.f32 %v7760_v19, %v7271_v5 }
 0x742   : > { %v7937_v61 = vmax.f32 %v7759_v13, 0.0  ;;  %v7936_v63 = vmax.f32 %v7504_v7, 0.0  ;;  %v7507_v26 = vpop.f32.mrb[146].mxu0 }
 0x743   : > { %v9561_v55 = vpack.c.bf16 %v7935_v49, %v7931_v57  ;;  %v7938_v50 = vmax.f32 %v7761_v40, 0.0  ;;  %v7764_v16 = vpop.f32.mrb[146].mxu1  ;;  %v7509_v51 = vpop.f32.mrb[147].mxu0  ;;  %v7508_v45 = vadd.f32 %v7507_v26, %v14088_v4 }
 0x744   : > { %v9625_v53 = vpack.c.bf16 %v7937_v61, %v7933_v39  ;;  %v9559_v23 = vpack.c.bf16 %v7936_v63, %v7932_v9  ;;  %v7766_v15 = vpop.f32.mrb[147].mxu1  ;;  %v7765_v41 = vadd.f32 %v7764_v16, %v14088_v4  ;;  %v7510_v33 = vadd.f32 %v7509_v51, %v14088_v4  ;;  %v7291_v57 = vpop.permute.xlu1 %7290 }
 0x745   : > { %v9623_v24 = vpack.c.bf16 %v7938_v50, %v7934_v35  ;;  %v7767_v31 = vadd.f32 %v7766_v15, %v14088_v4  ;;  %v7939_v46 = vmax.f32 %v7508_v45, 0.0 }
 0x746   : > { %v7513_v30 = vpop.f32.mrb[148].mxu0  ;;  %9560 = vmatprep.subr.bf16.mxu0 %v9559_v23  ;;  %v7941_v18 = vmax.f32 %v7765_v41, 0.0  ;;  %v7940_v42 = vmax.f32 %v7510_v33, 0.0 }
 0x747   : > { %v7514_v21 = vadd.f32 %v7513_v30, %v7281_v1  ;;  %v7770_v10 = vpop.f32.mrb[148].mxu1  ;;  %9624 = vmatprep.subr.bf16.mxu1 %v9623_v24  ;;  %v7515_v52 = vpop.f32.mrb[149].mxu0  ;;  %9562 = vmatpush1.bf16.msra.mxu0 %v9561_v55  ;;  %v7942_v48 = vmax.f32 %v7767_v31, 0.0 }
 0x748   : > { %v7771_v22 = vadd.f32 %v7770_v10, %v7281_v1  ;;  %v7516_v44 = vadd.f32 %v7515_v52, %v7281_v1  ;;  %v7772_v3 = vpop.f32.mrb[149].mxu1  ;;  %9626 = vmatpush1.bf16.msra.mxu1 %v9625_v53 }
 0x749   : > { %v7943_v36 = vmax.f32 %v7514_v21, 0.0  ;;  %v7773_v60 = vadd.f32 %v7772_v3, %v7281_v1  ;;  %v7301_v3 = vpop.permute.xlu1 %7300 }
 0x74a   : > { %v7945_v38 = vmax.f32 %v7771_v22, 0.0  ;;  %v7944_v5 = vmax.f32 %v7516_v44, 0.0  ;;  %v7519_v8 = vpop.f32.mrb[150].mxu0 }
 0x74b   : > { %v9565_v47 = vpack.c.bf16 %v7943_v36, %v7939_v46  ;;  %v7946_v4 = vmax.f32 %v7773_v60, 0.0  ;;  %v7776_v12 = vpop.f32.mrb[150].mxu1  ;;  %v7521_v11 = vpop.f32.mrb[151].mxu0  ;;  %v7520_v19 = vadd.f32 %v7519_v8, %v14096_v14 }
 0x74c   : > { %v9629_v34 = vpack.c.bf16 %v7945_v38, %v7941_v18  ;;  %v9563_v27 = vpack.c.bf16 %v7944_v5, %v7940_v42  ;;  %v7778_v13 = vpop.f32.mrb[151].mxu1  ;;  %v7777_v49 = vadd.f32 %v7776_v12, %v14096_v14  ;;  %v7522_v40 = vadd.f32 %v7521_v11, %v14096_v14 }
 0x74d   : > { %v9627_v7 = vpack.c.bf16 %v7946_v4, %v7942_v48  ;;  %v7779_v9 = vadd.f32 %v7778_v13, %v14096_v14  ;;  %v7947_v16 = vmax.f32 %v7520_v19, 0.0 }
 0x74e   : > { %v7525_v39 = vpop.f32.mrb[152].mxu0  ;;  %9564 = vmatprep.subr.bf16.mxu0 %v9563_v27  ;;  %v7949_v23 = vmax.f32 %v7777_v49, 0.0  ;;  %v7948_v15 = vmax.f32 %v7522_v40, 0.0 }
 0x74f   : > { %v7526_v61 = vadd.f32 %v7525_v39, %v7291_v57  ;;  %v7782_v63 = vpop.f32.mrb[152].mxu1  ;;  %9628 = vmatprep.subr.bf16.mxu1 %v9627_v7  ;;  %v7527_v26 = vpop.f32.mrb[153].mxu0  ;;  %9566 = vmatpush1.bf16.msra.mxu0 %v9565_v47  ;;  %v7950_v41 = vmax.f32 %v7779_v9, 0.0 }
 0x750   : > { %v7783_v35 = vadd.f32 %v7782_v63, %v7291_v57  ;;  %v7528_v55 = vadd.f32 %v7527_v26, %v7291_v57  ;;  %v7784_v50 = vpop.f32.mrb[153].mxu1  ;;  %9630 = vmatpush1.bf16.msra.mxu1 %v9629_v34 }
 0x751   : > { %v7951_v51 = vmax.f32 %v7526_v61, 0.0  ;;  %v7785_v53 = vadd.f32 %v7784_v50, %v7291_v57 }
 0x752   : > { %v7953_v24 = vmax.f32 %v7783_v35, 0.0  ;;  %v7952_v45 = vmax.f32 %v7528_v55, 0.0  ;;  %v7531_v1 = vpop.f32.mrb[154].mxu0  ;;  %v7311_v55 = vpop.permute.xlu1 %7310 }
 0x753   : > { %v9569_v33 = vpack.c.bf16 %v7951_v51, %v7947_v16  ;;  %v7954_v14 = vmax.f32 %v7785_v53, 0.0  ;;  %v7788_v30 = vpop.f32.mrb[154].mxu1  ;;  %v7533_v31 = vpop.f32.mrb[155].mxu0  ;;  %v7532_v44 = vadd.f32 %v7531_v1, %v14110_v17 }
 0x754   : > { %v9633_v21 = vpack.c.bf16 %v7953_v24, %v7949_v23  ;;  %v9567_v10 = vpack.c.bf16 %v7952_v45, %v7948_v15  ;;  %v7790_v52 = vpop.f32.mrb[155].mxu1  ;;  %v7789_v46 = vadd.f32 %v7788_v30, %v14110_v17  ;;  %v7534_v36 = vadd.f32 %v7533_v31, %v14110_v17 }
 0x755   : > { %v9631_v22 = vpack.c.bf16 %v7954_v14, %v7950_v41  ;;  %v7791_v18 = vadd.f32 %v7790_v52, %v14110_v17  ;;  %v7955_v4 = vmax.f32 %v7532_v44, 0.0 }
 0x756   : > { %v7537_v60 = vpop.f32.mrb[156].mxu0  ;;  %9568 = vmatprep.subr.bf16.mxu0 %v9567_v10  ;;  %v7957_v34 = vmax.f32 %v7789_v46, 0.0  ;;  %v7956_v27 = vmax.f32 %v7534_v36, 0.0 }
 0x757   : > { %v7538_v42 = vadd.f32 %v7537_v60, %v7301_v3  ;;  %v7794_v38 = vpop.f32.mrb[156].mxu1  ;;  %9632 = vmatprep.subr.bf16.mxu1 %v9631_v22  ;;  %v7539_v5 = vpop.f32.mrb[157].mxu0  ;;  %9570 = vmatpush1.bf16.msra.mxu0 %v9569_v33  ;;  %v7958_v57 = vmax.f32 %v7791_v18, 0.0 }
 0x758   : > { %v7795_v8 = vadd.f32 %v7794_v38, %v7301_v3  ;;  %v7540_v48 = vadd.f32 %v7539_v5, %v7301_v3  ;;  %v7796_v47 = vpop.f32.mrb[157].mxu1  ;;  %9634 = vmatpush1.bf16.msra.mxu1 %v9633_v21 }
 0x759   : > { %v7959_v12 = vmax.f32 %v7538_v42, 0.0  ;;  %v7797_v11 = vadd.f32 %v7796_v47, %v7301_v3 }
 0x75a   : > { %v7961_v13 = vmax.f32 %v7795_v8, 0.0  ;;  %v7960_v7 = vmax.f32 %v7540_v48, 0.0  ;;  %v7543_v19 = vpop.f32.mrb[158].mxu0  ;;  %v7321_v8 = vpop.permute.xlu1 %7320 }
 0x75b   : > { %v9573_v49 = vpack.c.bf16 %v7959_v12, %v7955_v4  ;;  %v7962_v17 = vmax.f32 %v7797_v11, 0.0  ;;  %v7800_v40 = vpop.f32.mrb[158].mxu1  ;;  %v7545_v39 = vpop.f32.mrb[159].mxu0  ;;  %v7544_v35 = vadd.f32 %v7543_v19, %v14118_v59 }
 0x75c   : > { %v9637_v9 = vpack.c.bf16 %v7961_v13, %v7957_v34  ;;  %v9571_v61 = vpack.c.bf16 %v7960_v7, %v7956_v27  ;;  %v7802_v63 = vpop.f32.mrb[159].mxu1  ;;  %v7801_v50 = vadd.f32 %v7800_v40, %v14118_v59  ;;  %v7546_v16 = vadd.f32 %v7545_v39, %v14118_v59 }
 0x75d   : > { %v9635_v26 = vpack.c.bf16 %v7962_v17, %v7958_v57  ;;  %v7803_v53 = vadd.f32 %v7802_v63, %v14118_v59  ;;  %v7963_v33 = vmax.f32 %v7544_v35, 0.0 }
 0x75e   : > { %v7549_v51 = vpop.f32.mrb[160].mxu0  ;;  %9572 = vmatprep.subr.bf16.mxu0 %v9571_v61  ;;  %v7965_v31 = vmax.f32 %v7801_v50, 0.0  ;;  %v7964_v21 = vmax.f32 %v7546_v16, 0.0 }
 0x75f   : > { %v7550_v23 = vadd.f32 %v7549_v51, %v7311_v55  ;;  %v7806_v15 = vpop.f32.mrb[160].mxu1  ;;  %9636 = vmatprep.subr.bf16.mxu1 %v9635_v26  ;;  %v7551_v24 = vpop.f32.mrb[161].mxu0  ;;  %9574 = vmatpush1.bf16.msra.mxu0 %v9573_v49  ;;  %v7966_v44 = vmax.f32 %v7803_v53, 0.0 }
 0x760   : > { %v7807_v45 = vadd.f32 %v7806_v15, %v7311_v55  ;;  %v7552_v1 = vadd.f32 %v7551_v24, %v7311_v55  ;;  %v7808_v41 = vpop.f32.mrb[161].mxu1  ;;  %9638 = vmatpush1.bf16.msra.mxu1 %v9637_v9  ;;  %v7331_v24 = vpop.permute.xlu1 %7330 }
 0x761   : > { %v7967_v14 = vmax.f32 %v7550_v23, 0.0  ;;  %v7809_v30 = vadd.f32 %v7808_v41, %v7311_v55 }
 0x762   : > { %v7969_v10 = vmax.f32 %v7807_v45, 0.0  ;;  %v7968_v52 = vmax.f32 %v7552_v1, 0.0  ;;  %v7555_v22 = vpop.f32.mrb[162].mxu0 }
 0x763   : > { %v9577_v3 = vpack.c.bf16 %v7967_v14, %v7963_v33  ;;  %v7970_v59 = vmax.f32 %v7809_v30, 0.0  ;;  %v7812_v46 = vpop.f32.mrb[162].mxu1  ;;  %v7557_v36 = vpop.f32.mrb[163].mxu0  ;;  %v7556_v5 = vadd.f32 %v7555_v22, %v14132_v43 }
 0x764   : > { %v9641_v60 = vpack.c.bf16 %v7969_v10, %v7965_v31  ;;  %v9575_v18 = vpack.c.bf16 %v7968_v52, %v7964_v21  ;;  %v7814_v42 = vpop.f32.mrb[163].mxu1  ;;  %v7813_v48 = vadd.f32 %v7812_v46, %v14132_v43  ;;  %v7558_v47 = vadd.f32 %v7557_v36, %v14132_v43 }
 0x765   : > { %v9639_v38 = vpack.c.bf16 %v7970_v59, %v7966_v44  ;;  %v7815_v12 = vadd.f32 %v7814_v42, %v14132_v43  ;;  %v7971_v57 = vmax.f32 %v7556_v5, 0.0 }
 0x766   : > { %v7561_v4 = vpop.f32.mrb[164].mxu0  ;;  %9576 = vmatprep.subr.bf16.mxu0 %v9575_v18  ;;  %v7973_v40 = vmax.f32 %v7813_v48, 0.0  ;;  %v7972_v39 = vmax.f32 %v7558_v47, 0.0 }
 0x767   : > { %v7562_v11 = vadd.f32 %v7561_v4, %v7321_v8  ;;  %v7818_v34 = vpop.f32.mrb[164].mxu1  ;;  %9640 = vmatprep.subr.bf16.mxu1 %v9639_v38  ;;  %v7563_v27 = vpop.f32.mrb[165].mxu0  ;;  %9578 = vmatpush1.bf16.msra.mxu0 %v9577_v3  ;;  %v7974_v26 = vmax.f32 %v7815_v12, 0.0 }
 0x768   : > { %v7819_v13 = vadd.f32 %v7818_v34, %v7321_v8  ;;  %v7564_v7 = vadd.f32 %v7563_v27, %v7321_v8  ;;  %v7820_v19 = vpop.f32.mrb[165].mxu1  ;;  %9642 = vmatpush1.bf16.msra.mxu1 %v9641_v60  ;;  %v7341_v34 = vpop.permute.xlu1 %7340 }
 0x769   : > { %v7975_v49 = vmax.f32 %v7562_v11, 0.0  ;;  %v7821_v17 = vadd.f32 %v7820_v19, %v7321_v8 }
 0x76a   : > { %v7977_v9 = vmax.f32 %v7819_v13, 0.0  ;;  %v7976_v61 = vmax.f32 %v7564_v7, 0.0  ;;  %v7567_v63 = vpop.f32.mrb[166].mxu0 }
 0x76b   : > { %v9581_v35 = vpack.c.bf16 %v7975_v49, %v7971_v57  ;;  %v7978_v43 = vmax.f32 %v7821_v17, 0.0  ;;  %v7824_v55 = vpop.f32.mrb[166].mxu1  ;;  %v7569_v50 = vpop.f32.mrb[167].mxu0  ;;  %v7568_v15 = vadd.f32 %v7567_v63, %v14140_v32 }
 0x76c   : > { %v9645_v16 = vpack.c.bf16 %v7977_v9, %v7973_v40  ;;  %v9579_v51 = vpack.c.bf16 %v7976_v61, %v7972_v39  ;;  %v7826_v53 = vpop.f32.mrb[167].mxu1  ;;  %v7825_v45 = vadd.f32 %v7824_v55, %v14140_v32  ;;  %v7570_v1 = vadd.f32 %v7569_v50, %v14140_v32 }
 0x76d   : > { %v9643_v23 = vpack.c.bf16 %v7978_v43, %v7974_v26  ;;  %v7827_v33 = vadd.f32 %v7826_v53, %v14140_v32  ;;  %v7979_v22 = vmax.f32 %v7568_v15, 0.0 }
 0x76e   : > { %v7573_v41 = vpop.f32.mrb[168].mxu0  ;;  %9580 = vmatprep.subr.bf16.mxu0 %v9579_v51  ;;  %v7981_v59 = vmax.f32 %v7825_v45, 0.0  ;;  %v7980_v46 = vmax.f32 %v7570_v1, 0.0 }
 0x76f   : > { %v7574_v14 = vadd.f32 %v7573_v41, %v7331_v24  ;;  %v7830_v30 = vpop.f32.mrb[168].mxu1  ;;  %9644 = vmatprep.subr.bf16.mxu1 %v9643_v23  ;;  %v7575_v31 = vpop.f32.mrb[169].mxu0  ;;  %9582 = vmatpush1.bf16.msra.mxu0 %v9581_v35  ;;  %v7982_v42 = vmax.f32 %v7827_v33, 0.0 }
 0x770   : > { %v7831_v21 = vadd.f32 %v7830_v30, %v7331_v24  ;;  %v7576_v10 = vadd.f32 %v7575_v31, %v7331_v24  ;;  %v7832_v52 = vpop.f32.mrb[169].mxu1  ;;  %9646 = vmatpush1.bf16.msra.mxu1 %v9645_v16 }
 0x771   : > { %v7983_v44 = vmax.f32 %v7574_v14, 0.0  ;;  %v7833_v3 = vadd.f32 %v7832_v52, %v7331_v24  ;;  %v7351_v14 = vpop.permute.xlu1 %7350 }
 0x772   : > { %v7985_v36 = vmax.f32 %v7831_v21, 0.0  ;;  %v7984_v60 = vmax.f32 %v7576_v10, 0.0  ;;  %v7579_v18 = vpop.f32.mrb[170].mxu0 }
 0x773   : > { %v9585_v38 = vpack.c.bf16 %v7983_v44, %v7979_v22  ;;  %v7986_v32 = vmax.f32 %v7833_v3, 0.0  ;;  %v7836_v5 = vpop.f32.mrb[170].mxu1  ;;  %v7581_v8 = vpop.f32.mrb[171].mxu0  ;;  %v7580_v11 = vadd.f32 %v7579_v18, %v14154_v2 }
 0x774   : > { %v9649_v48 = vpack.c.bf16 %v7985_v36, %v7981_v59  ;;  %v9583_v47 = vpack.c.bf16 %v7984_v60, %v7980_v46  ;;  %v7838_v4 = vpop.f32.mrb[171].mxu1  ;;  %v7837_v27 = vadd.f32 %v7836_v5, %v14154_v2  ;;  %v7582_v13 = vadd.f32 %v7581_v8, %v14154_v2 }
 0x775   : > { %v9647_v12 = vpack.c.bf16 %v7986_v32, %v7982_v42  ;;  %v7839_v19 = vadd.f32 %v7838_v4, %v14154_v2  ;;  %v7987_v61 = vmax.f32 %v7580_v11, 0.0 }
 0x776   : > { %v7585_v7 = vpop.f32.mrb[172].mxu0  ;;  %9584 = vmatprep.subr.bf16.mxu0 %v9583_v47  ;;  %v7989_v35 = vmax.f32 %v7837_v27, 0.0  ;;  %v7988_v43 = vmax.f32 %v7582_v13, 0.0 }
 0x777   : > { %v7586_v57 = vadd.f32 %v7585_v7, %v7341_v34  ;;  %v7842_v49 = vpop.f32.mrb[172].mxu1  ;;  %9648 = vmatprep.subr.bf16.mxu1 %v9647_v12  ;;  %v7587_v17 = vpop.f32.mrb[173].mxu0  ;;  %9586 = vmatpush1.bf16.msra.mxu0 %v9585_v38  ;;  %v7990_v51 = vmax.f32 %v7839_v19, 0.0 }
 0x778   : > { %v7843_v40 = vadd.f32 %v7842_v49, %v7341_v34  ;;  %v7588_v39 = vadd.f32 %v7587_v17, %v7341_v34  ;;  %v7844_v9 = vpop.f32.mrb[173].mxu1  ;;  %9650 = vmatpush1.bf16.msra.mxu1 %v9649_v48  ;;  %v7361_v19 = vpop.permute.xlu1 %7360 }
 0x779   : > { %v7991_v63 = vmax.f32 %v7586_v57, 0.0  ;;  %v7845_v26 = vadd.f32 %v7844_v9, %v7341_v34 }
 0x77a   : > { %v7993_v55 = vmax.f32 %v7843_v40, 0.0  ;;  %v7992_v50 = vmax.f32 %v7588_v39, 0.0  ;;  %v7591_v16 = vpop.f32.mrb[174].mxu0 }
 0x77b   : > { %v9589_v53 = vpack.c.bf16 %v7991_v63, %v7987_v61  ;;  %v7994_v2 = vmax.f32 %v7845_v26, 0.0  ;;  %v7848_v23 = vpop.f32.mrb[174].mxu1  ;;  %v7593_v15 = vpop.f32.mrb[175].mxu0  ;;  %v7592_v33 = vadd.f32 %v7591_v16, %v14162_v62 }
 0x77c   : > { %v9653_v24 = vpack.c.bf16 %v7993_v55, %v7989_v35  ;;  %v9587_v45 = vpack.c.bf16 %v7992_v50, %v7988_v43  ;;  %v7850_v1 = vpop.f32.mrb[175].mxu1  ;;  %v7849_v30 = vadd.f32 %v7848_v23, %v14162_v62  ;;  %v7594_v31 = vadd.f32 %v7593_v15, %v14162_v62 }
 0x77d   : > { %v9651_v41 = vpack.c.bf16 %v7994_v2, %v7990_v51  ;;  %v7851_v10 = vadd.f32 %v7850_v1, %v14162_v62  ;;  %v7995_v36 = vmax.f32 %v7592_v33, 0.0 }
 0x77e   : > { %v7597_v21 = vpop.f32.mrb[176].mxu0  ;;  %9588 = vmatprep.subr.bf16.mxu0 %v9587_v45  ;;  %v7997_v42 = vmax.f32 %v7849_v30, 0.0  ;;  %v7996_v38 = vmax.f32 %v7594_v31, 0.0 }
 0x77f   : > { %v7598_v52 = vadd.f32 %v7597_v21, %v7351_v14  ;;  %v7854_v22 = vpop.f32.mrb[176].mxu1  ;;  %9652 = vmatprep.subr.bf16.mxu1 %v9651_v41  ;;  %v7599_v44 = vpop.f32.mrb[177].mxu0  ;;  %9590 = vmatpush1.bf16.msra.mxu0 %v9589_v53  ;;  %v7998_v48 = vmax.f32 %v7851_v10, 0.0 }
 0x780   : > { %v7855_v3 = vadd.f32 %v7854_v22, %v7351_v14  ;;  %v7600_v59 = vadd.f32 %v7599_v44, %v7351_v14  ;;  %v7856_v46 = vpop.f32.mrb[177].mxu1  ;;  %9654 = vmatpush1.bf16.msra.mxu1 %v9653_v24  ;;  %v7371_v21 = vpop.permute.xlu1 %7370 }
 0x781   : > { %v7999_v60 = vmax.f32 %v7598_v52, 0.0  ;;  %v7857_v18 = vadd.f32 %v7856_v46, %v7351_v14 }
 0x782   : > { %v8001_v32 = vmax.f32 %v7855_v3, 0.0  ;;  %v8000_v5 = vmax.f32 %v7600_v59, 0.0  ;;  %v7603_v8 = vpop.f32.mrb[178].mxu0 }
 0x783   : > { %v9593_v47 = vpack.c.bf16 %v7999_v60, %v7995_v36  ;;  %v8002_v62 = vmax.f32 %v7857_v18, 0.0  ;;  %v7860_v4 = vpop.f32.mrb[178].mxu1  ;;  %v7605_v12 = vpop.f32.mrb[179].mxu0  ;;  %v7604_v7 = vadd.f32 %v7603_v8, %v14176_v29 }
 0x784   : > { %v9657_v11 = vpack.c.bf16 %v8001_v32, %v7997_v42  ;;  %v9591_v34 = vpack.c.bf16 %v8000_v5, %v7996_v38  ;;  %v7862_v27 = vpop.f32.mrb[179].mxu1  ;;  %v7861_v57 = vadd.f32 %v7860_v4, %v14176_v29  ;;  %v7606_v49 = vadd.f32 %v7605_v12, %v14176_v29 }
 0x785   : > { %v9655_v13 = vpack.c.bf16 %v8002_v62, %v7998_v48  ;;  %v7863_v40 = vadd.f32 %v7862_v27, %v14176_v29  ;;  %v8003_v43 = vmax.f32 %v7604_v7, 0.0 }
 0x786   : > { %v7609_v17 = vpop.f32.mrb[180].mxu0  ;;  %9592 = vmatprep.subr.bf16.mxu0 %v9591_v34  ;;  %v8005_v16 = vmax.f32 %v7861_v57, 0.0  ;;  %v8004_v51 = vmax.f32 %v7606_v49, 0.0  ;;  %v7381_v49 = vpop.permute.xlu1 %7380 }
 0x787   : > { %v7610_v39 = vadd.f32 %v7609_v17, %v7361_v19  ;;  %v7866_v9 = vpop.f32.mrb[180].mxu1  ;;  %9656 = vmatprep.subr.bf16.mxu1 %v9655_v13  ;;  %v7611_v61 = vpop.f32.mrb[181].mxu0  ;;  %9594 = vmatpush1.bf16.msra.mxu0 %v9593_v47  ;;  %v8006_v15 = vmax.f32 %v7863_v40, 0.0 }
 0x788   : > { %v7867_v63 = vadd.f32 %v7866_v9, %v7361_v19  ;;  %v7612_v26 = vadd.f32 %v7611_v61, %v7361_v19  ;;  %v7868_v35 = vpop.f32.mrb[181].mxu1  ;;  %9658 = vmatpush1.bf16.msra.mxu1 %v9657_v11 }
 0x789   : > { %v8007_v55 = vmax.f32 %v7610_v39, 0.0  ;;  %v7869_v50 = vadd.f32 %v7868_v35, %v7361_v19 }
 0x78a   : > { %v8009_v53 = vmax.f32 %v7867_v63, 0.0  ;;  %v8008_v2 = vmax.f32 %v7612_v26, 0.0  ;;  %v7615_v23 = vpop.f32.mrb[182].mxu0 }
 0x78b   : > { %v9597_v24 = vpack.c.bf16 %v8007_v55, %v8003_v43  ;;  %v8010_v29 = vmax.f32 %v7869_v50, 0.0  ;;  %v7872_v45 = vpop.f32.mrb[182].mxu1  ;;  %v7617_v1 = vpop.f32.mrb[183].mxu0  ;;  %v7616_v31 = vadd.f32 %v7615_v23, %v14184_v28 }
 0x78c   : > { %v9661_v41 = vpack.c.bf16 %v8009_v53, %v8005_v16  ;;  %v9595_v33 = vpack.c.bf16 %v8008_v2, %v8004_v51  ;;  %v7874_v14 = vpop.f32.mrb[183].mxu1  ;;  %v7873_v10 = vadd.f32 %v7872_v45, %v14184_v28  ;;  %v7618_v52 = vadd.f32 %v7617_v1, %v14184_v28 }
 0x78d   : > { %v9659_v30 = vpack.c.bf16 %v8010_v29, %v8006_v15  ;;  %v7875_v44 = vadd.f32 %v7874_v14, %v14184_v28  ;;  %v8011_v42 = vmax.f32 %v7616_v31, 0.0 }
 0x78e   : > { %v7621_v22 = vpop.f32.mrb[184].mxu0  ;;  %9596 = vmatprep.subr.bf16.mxu0 %v9595_v33  ;;  %v8013_v5 = vmax.f32 %v7873_v10, 0.0  ;;  %v8012_v8 = vmax.f32 %v7618_v52, 0.0  ;;  %v7391_v10 = vpop.permute.xlu1 %7390 }
 0x78f   : > { %v7622_v3 = vadd.f32 %v7621_v22, %v7371_v21  ;;  %v7878_v59 = vpop.f32.mrb[184].mxu1  ;;  %9660 = vmatprep.subr.bf16.mxu1 %v9659_v30  ;;  %v7623_v46 = vpop.f32.mrb[185].mxu0  ;;  %9598 = vmatpush1.bf16.msra.mxu0 %v9597_v24  ;;  %v8014_v4 = vmax.f32 %v7875_v44, 0.0 }
 0x790   : > { %v7879_v36 = vadd.f32 %v7878_v59, %v7371_v21  ;;  %v7624_v60 = vadd.f32 %v7623_v46, %v7371_v21  ;;  %v7880_v18 = vpop.f32.mrb[185].mxu1  ;;  %9662 = vmatpush1.bf16.msra.mxu1 %v9661_v41 }
 0x791   : > { %v8015_v38 = vmax.f32 %v7622_v3, 0.0  ;;  %v7881_v32 = vadd.f32 %v7880_v18, %v7371_v21 }
 0x792   : > { %v8017_v48 = vmax.f32 %v7879_v36, 0.0  ;;  %v8016_v47 = vmax.f32 %v7624_v60, 0.0  ;;  %v7627_v62 = vpop.f32.mrb[186].mxu0 }
 0x793   : > { %v9601_v12 = vpack.c.bf16 %v8015_v38, %v8011_v42  ;;  %v8018_v28 = vmax.f32 %v7881_v32, 0.0  ;;  %v7884_v11 = vpop.f32.mrb[186].mxu1  ;;  %v7629_v34 = vpop.f32.mrb[187].mxu0  ;;  %v7628_v57 = vadd.f32 %v7627_v62, %v14198_v0 }
 0x794   : > { %v9665_v27 = vpack.c.bf16 %v8017_v48, %v8013_v5  ;;  %v9599_v13 = vpack.c.bf16 %v8016_v47, %v8012_v8  ;;  %v7886_v7 = vpop.f32.mrb[187].mxu1  ;;  %v7885_v17 = vadd.f32 %v7884_v11, %v14198_v0  ;;  %v7630_v40 = vadd.f32 %v7629_v34, %v14198_v0 }
 0x795   : > { %v9663_v19 = vpack.c.bf16 %v8018_v28, %v8014_v4  ;;  %v7887_v9 = vadd.f32 %v7886_v7, %v14198_v0  ;;  %v8019_v50 = vmax.f32 %v7628_v57, 0.0 }
 0x796   : > { %v7633_v39 = vpop.f32.mrb[188].mxu0  ;;  %9600 = vmatprep.subr.bf16.mxu0 %v9599_v13  ;;  %v8021_v53 = vmax.f32 %v7885_v17, 0.0  ;;  %v8020_v2 = vmax.f32 %v7630_v40, 0.0 }
 0x797   : > { %v7634_v61 = vadd.f32 %v7633_v39, %v7381_v49  ;;  %v7890_v63 = vpop.f32.mrb[188].mxu1  ;;  %9664 = vmatprep.subr.bf16.mxu1 %v9663_v19  ;;  %v7635_v26 = vpop.f32.mrb[189].mxu0  ;;  %9602 = vmatpush1.bf16.msra.mxu0 %v9601_v12  ;;  %v8022_v29 = vmax.f32 %v7887_v9, 0.0 }
 0x798   : > { %v7891_v35 = vadd.f32 %v7890_v63, %v7381_v49  ;;  %v7636_v43 = vadd.f32 %v7635_v26, %v7381_v49  ;;  %v7892_v55 = vpop.f32.mrb[189].mxu1  ;;  %9666 = vmatpush1.bf16.msra.mxu1 %v9665_v27  ;;  %v10285_v27 = vld.sshfl [vmem:[%s14828_s11] sm:$0x33 pattern:$0x76325410] }
 0x799   : > { %v8023_v16 = vmax.f32 %v7634_v61, 0.0  ;;  %v7893_v51 = vadd.f32 %v7892_v55, %v7381_v49 }
 0x79a   : > { %v8025_v23 = vmax.f32 %v7891_v35, 0.0  ;;  %v8024_v15 = vmax.f32 %v7636_v43, 0.0  ;;  %v7639_v24 = vpop.f32.mrb[190].mxu0 }
 0x79b   : > { %v9605_v45 = vpack.c.bf16 %v8023_v16, %v8019_v50  ;;  %v8026_v0 = vmax.f32 %v7893_v51, 0.0  ;;  %v7896_v1 = vpop.f32.mrb[190].mxu1  ;;  %v7641_v41 = vpop.f32.mrb[191].mxu0  ;;  %v7640_v21 = vadd.f32 %v7639_v24, %v14206_v56 }
 0x79c   : > { %v9669_v33 = vpack.c.bf16 %v8025_v23, %v8021_v53  ;;  %v9603_v14 = vpack.c.bf16 %v8024_v15, %v8020_v2  ;;  %v7898_v30 = vpop.f32.mrb[191].mxu1  ;;  %v7897_v52 = vadd.f32 %v7896_v1, %v14206_v56  ;;  %v7642_v22 = vadd.f32 %v7641_v41, %v14206_v56 }
 0x79d   : > { %v9667_v31 = vpack.c.bf16 %v8026_v0, %v8022_v29  ;;  %v7899_v3 = vadd.f32 %v7898_v30, %v14206_v56  ;;  %v8027_v38 = vmax.f32 %v7640_v21, 0.0 }
 0x79e   : > { %v7645_v44 = vpop.f32.mrb[192].mxu0  ;;  %9604 = vmatprep.subr.bf16.mxu0 %v9603_v14  ;;  %v8029_v8 = vmax.f32 %v7897_v52, 0.0  ;;  %v8028_v48 = vmax.f32 %v7642_v22, 0.0 }
 0x79f   : > { %v7646_v59 = vadd.f32 %v7645_v44, %v7391_v10  ;;  %v7902_v46 = vpop.f32.mrb[192].mxu1  ;;  %9668 = vmatprep.subr.bf16.mxu1 %v9667_v31  ;;  %v7647_v36 = vpop.f32.mrb[193].mxu0  ;;  %9606 = vmatpush1.bf16.msra.mxu0 %v9605_v45  ;;  %v8030_v4 = vmax.f32 %v7899_v3, 0.0 }
 0x7a0   : > { %v7903_v60 = vadd.f32 %v7902_v46, %v7391_v10  ;;  %v7648_v18 = vadd.f32 %v7647_v36, %v7391_v10  ;;  %v7904_v42 = vpop.f32.mrb[193].mxu1  ;;  %9670 = vmatpush1.bf16.msra.mxu1 %v9669_v33 }
 0x7a1   : > { %v8031_v32 = vmax.f32 %v7646_v59, 0.0  ;;  %v7905_v5 = vadd.f32 %v7904_v42, %v7391_v10 }
 0x7a2   : > { %v8033_v47 = vmax.f32 %v7903_v60, 0.0  ;;  %v8032_v62 = vmax.f32 %v7648_v18, 0.0 }
 0x7a3   : > { %v9609_v56 = vpack.c.bf16 %v8031_v32, %v8027_v38  ;;  %v8034_v12 = vmax.f32 %v7905_v5, 0.0 }
 0x7a4   : > { %v9673_v28 = vpack.c.bf16 %v8033_v47, %v8029_v8  ;;  %v9607_v11 = vpack.c.bf16 %v8032_v62, %v8028_v48 }
 0x7a5   : > { %v9671_v34 = vpack.c.bf16 %v8034_v12, %v8030_v4 }
 0x7a6   : > { %9608 = vmatprep.subr.bf16.mxu0 %v9607_v11 }
 0x7a7   : > { %9672 = vmatprep.subr.bf16.mxu1 %v9671_v34  ;;  %9610 = vmatpush1.bf16.msra.mxu0 %v9609_v56 }
 0x7a8   : > { %9674 = vmatpush1.bf16.msra.mxu1 %v9673_v28 }
 0x7aa   : > { %8118 = vmatmul.mubr.f32.vlgmr.msra.gmra.mrb[194].mxu0 %v10285_v27 }
 0x7ab   : > { %8189 = vmatmul.mubr.f32.vlgmr.msra.gmra.mrb[194].mxu1 %v10285_v27 }
 0x7ac   : > { %10299 = shalt.err (!%p10296_p7)
}
 0x7ad   : > { %s10300_s0 = scalar_lea.hbm %s14727_s2, 128  ;;  %s10304_s21 = scalar_lea.hbm %s15326_s1, 512 }
 0x7ae   : > { %p10301_p10 = scmp.ne.s32.totalorder %s14727_s2, %s10300_s0  ;;  %p10305_p13 = scmp.lt.u32.totalorder %s14727_s2, %s15326_s1 }
 0x7af   : > { %p10306_p0 = scmp.lt.u32.totalorder %s10304_s21, %s10300_s0  ;;  %p10308_p2 = scmp.lt.u32.totalorder %s10300_s0, %s14727_s2 }
 0x7b0   : > { %p10302_p11 = pnand %p10301_p10, %p10555_p8 }
 0x7b1   : > { %p10307_p1 = por %p10306_p0, %p10305_p13 }
 0x7b2   : > { %p10303_p12 = pneg %p10302_p11 }
 0x7b3   : > { %p10309_p3 = por %p10308_p2, %p10307_p1 }
 0x7b5   : > { %p10310_p4 = pnand %p10309_p3, %p10303_p12 }
 0x7b7   : > { %10313 = shalt.err (!%p10310_p4)
}
 0x7b8   : > { %10188 = dma.vmem_to_hbm [thread:$0]  (%p10555_p8), %s8367_s3, 128, %s14727_s2, %s8334_s4   ;;  %v8199_v13 = vrot.slane %v14223_v20, 1  ;;  %v8201_v7 = vrot.slane %v14225_v25, 1  ;;  %v8200_v19 = vrot.slane %v14227_v37, 1  ;;  %v8202_v57 = vrot.slane %v14233_v6, 1  ;;  %v8040_v23 = vpop.permute.xlu1 %8039 }
 0x7b9   : > { %v10418_v15 = vmov 1966171168   ;;  %s8493_s2 = sshll.u32 %s10605_s28, 2  ;;  %s8757_s3 = sshll.u32 %s14721_s13, 4  ;;  %vm8306_vm1 = vcmp.lt.s32.totalorder %v8284_v54, 512 }
 0x7ba   : > { %v8207_v49 = vsub.f32 %v14223_v20, %v8199_v13  ;;  %v8209_v17 = vsub.f32 %v14225_v25, %v8201_v7  ;;  %v8208_v40 = vsub.f32 %v14227_v37, %v8200_v19  ;;  %v8210_v39 = vsub.f32 %v14233_v6, %v8202_v57  ;;  %s539_s4 = scalar_lea.vmem [#allocation3], %s8493_s2  ;;  %s15327_s16 = sld [smem:[#allocation146_spill]] }
 0x7bb   : > { %v8282_v24 = vunpack.c.l.s4 %v10418_v15  ;;  %s8350_s5 = sshll.u32 %s539_s4, 4  ;;  %s8329_s22 = scalar_lea.sflag [#allocation4], %s10605_s28  ;;  %s14765_s5 = int_to_ptr.vmem [resolvable:$true] %s8350_s5 }
 0x7bc   : > { %v8211_v9 = vmul.f32 1.442695, %v8207_v49  ;;  %v8215_v61 = vmul.f32 1.442695, %v8209_v17  ;;  %v8213_v63 = vmul.f32 1.442695, %v8208_v40 }
 0x7bd   : > { %v8217_v26 = vmul.f32 1.442695, %v8210_v39  ;;  %v8283_v48 = vunpack.c.0.s8 %v8282_v24  ;;  %s10314_s27 = scalar_lea.vmem %s14765_s5, 64  ;;  %s10419_s13 = smov [#allocation3]  }
 0x7be   : > { %10269 = vpow2.f32 %v8211_v9  ;;  %p10315_p5 = scmp.ne.s32.totalorder %s14765_s5, %s10314_s27  ;;  %s10318_s21 = sshll.u32 %s10419_s13, 4  ;;  %s10319_s21 = int_to_ptr.vmem [resolvable:$false] %s10318_s21 }
 0x7bf   : > { %10271 = vpow2.f32 %v8215_v61  ;;  %v8286_v27 = vsub.s32 %v8283_v48, %v14215_v58  ;;  %s10320_s25 = scalar_lea.vmem %s10319_s21, 128  ;;  %p10321_p10 = scmp.lt.s32.totalorder %s14765_s5, %s10319_s21 }
 0x7c0   : > { %10273 = vpow2.f32 %v8213_v63  ;;  %s15328_s24 = smov %s15327_s16  ;;  %s14763_s0 = scalar_lea.hbm %s15327_s16, %s8757_s3 }
 0x7c1   : > { %10275 = vpow2.f32 %v8217_v26  ;;  %p10316_p6 = pnand %p10315_p5, %p10555_p8  ;;  %p10322_p11 = scmp.lt.s32.totalorder %s10320_s25, %s10314_s27 }
 0x7c3   : > { %p10317_p7 = pneg %p10316_p6  ;;  %p10323_p12 = por %p10322_p11, %p10321_p10 }
 0x7c5   : > { %p10324_p13 = pnand %p10323_p12, %p10317_p7 }
 0x7c8   : > { %v10270_v35 = vpop.eup %10269 }
 0x7c9   : > { %v10272_v43 = vpop.eup %10271  ;;  %v8219_v16 = vadd.f32 1.0, %v10270_v35 }
 0x7ca   : > { %v10274_v55 = vpop.eup %10273  ;;  %v8221_v20 = vadd.f32 1.0, %v10272_v43 }
 0x7cb   : > { %v10276_v50 = vpop.eup %10275  ;;  %v8220_v51 = vadd.f32 1.0, %v10274_v55  ;;  %10277 = vrcp.f32 %v8219_v16 }
 0x7cc   : > { %v8222_v25 = vadd.f32 1.0, %v10276_v50  ;;  %10279 = vrcp.f32 %v8221_v20 }
 0x7cd   : > { %10281 = vrcp.f32 %v8220_v51 }
 0x7ce   : > { %10283 = vrcp.f32 %v8222_v25 }
 0x7d5   : > { %v10278_v37 = vpop.eup %10277 }
 0x7d6   : > { %v10280_v6 = vpop.eup %10279  ;;  %v8231_v45 = vsub.f32 1.0, %v10278_v37  ;;  %v8243_v0 = vrot.slane %v10278_v37, 7 }
 0x7d7   : > { %v10282_v53 = vpop.eup %10281  ;;  %v8233_v33 = vsub.f32 1.0, %v10280_v6  ;;  %v8245_v14 = vrot.slane %v10280_v6, 7 }
 0x7d8   : > { %v10284_v2 = vpop.eup %10283  ;;  %v8232_v31 = vsub.f32 1.0, %v10282_v53  ;;  %v8244_v52 = vrot.slane %v10282_v53, 7 }
 0x7d9   : > { %v8234_v44 = vsub.f32 1.0, %v10284_v2  ;;  %v8246_v36 = vrot.slane %v10284_v2, 7 }
 0x87d   : > { %v8119_v29 = vpop.f32.mrb[194].mxu0 }
 0x87e   : > { %v8120_v1 = vadd.f32 %v8119_v29, %v8040_v23  ;;  %v8190_v41 = vpop.f32.mrb[194].mxu1  ;;  %v8121_v30 = vpop.f32.mrb[195].mxu0 }
 0x87f   : > { %v8191_v21 = vadd.f32 %v8190_v41, %v8040_v23  ;;  %v8122_v10 = vadd.f32 %v8121_v30, %v8040_v23  ;;  %v8192_v22 = vpop.f32.mrb[195].mxu1 }
 0x880   : > { %v8235_v3 = vmul.f32 %v8231_v45, %v8120_v1  ;;  %v8251_v59 = vmul.f32 %v8243_v0, %v8120_v1  ;;  %v8193_v46 = vadd.f32 %v8192_v22, %v8040_v23 }
 0x881   : > { %v8237_v60 = vmul.f32 %v8233_v33, %v8191_v21  ;;  %v8253_v18 = vmul.f32 %v8245_v14, %v8191_v21  ;;  %v8236_v42 = vmul.f32 %v8232_v31, %v8122_v10  ;;  %v8252_v38 = vmul.f32 %v8244_v52, %v8122_v10 }
 0x882   : > { %v8259_v32 = vrot.slane %v8251_v59, 1  ;;  %v8238_v5 = vmul.f32 %v8234_v44, %v8193_v46  ;;  %v8254_v8 = vmul.f32 %v8246_v36, %v8193_v46 }
 0x883   : > { %v8261_v47 = vrot.slane %v8253_v18, 1  ;;  %v8260_v62 = vrot.slane %v8252_v38, 1 }
 0x884   : > { %v8267_v4 = vadd.f32 %v8259_v32, %v8235_v3  ;;  %v8262_v56 = vrot.slane %v8254_v8, 1 }
 0x885   : > { %v8269_v12 = vadd.f32 %v8261_v47, %v8237_v60  ;;  %v8268_v28 = vadd.f32 %v8260_v62, %v8236_v42 }
 0x886   : > { %v8271_v11 = vmul.f32 0.5, %v8267_v4  ;;  %v8270_v34 = vadd.f32 %v8262_v56, %v8238_v5 }
 0x887   : > { %v8273_v13 = vmul.f32 0.5, %v8269_v12  ;;  %v8272_v7 = vmul.f32 0.5, %v8268_v28 }
 0x888   : > { %v8274_v19 = vmul.f32 0.5, %v8270_v34 }
 0x889   : > { %v8279_v57 = vcombine.low %v8271_v11, %v8272_v7 }
 0x88a   : > { %v8280_v49 = vcombine.low %v8273_v13, %v8274_v19 }
 0x88b   : > { %v8287_v17 = vrot.slane %v8279_v57, %v8286_v27 }
 0x88c   : > { %v8294_v40 = vrot.slane %v8280_v49, %v8286_v27 }
 0x88e   : > { %v8295_v39 = vcombine.low %v8287_v17, %v8294_v40 }
 0x890   : > { %v8302_v9 = vrot.slane %v8295_v39, %v8286_v27 }
 0x892   : > { %8308 = vst.msk [vmem:[%s539_s4] sm:$0xf] %vm8306_vm1, %v8302_v9 }
 0x893   : > { %10327 = shalt.err (!%p10324_p13)
}
 0x894   : > { %s10328_s28 = scalar_lea.hbm %s14763_s0, 64  ;;  %s10332_s3 = scalar_lea.hbm %s15328_s24, 256 }
 0x895   : > { %p10329_p0 = scmp.ne.s32.totalorder %s14763_s0, %s10328_s28  ;;  %p10333_p3 = scmp.lt.u32.totalorder %s14763_s0, %s15328_s24 }
 0x896   : > { %p10334_p4 = scmp.lt.u32.totalorder %s10332_s3, %s10328_s28  ;;  %p10336_p6 = scmp.lt.u32.totalorder %s10328_s28, %s14763_s0 }
 0x897   : > { %p10330_p1 = pnand %p10329_p0, %p10555_p8 }
 0x898   : > { %p10335_p5 = por %p10334_p4, %p10333_p3 }
 0x899   : > { %p10331_p2 = pneg %p10330_p1 }
 0x89a   : > { %p10337_p7 = por %p10336_p6, %p10335_p5 }
 0x89c   : > { %p10338_p10 = pnand %p10337_p7, %p10331_p2 }
 0x89e   : > { %10341 = shalt.err (!%p10338_p10)
}
 0x89f   : > { %10187 = dma.vmem_to_hbm [thread:$0]  (%p10555_p8), %s14765_s5, 64, %s14763_s0, %s8329_s22  }
 0x8a0 PF: > { %s15329_s26 = sld [smem:[#allocation9_spill]]  ;;  %p10198_p11 = scmp.ge.s32.totalorder %s10412_s20, 2 }
 0x8a2   : > { %p10192_p12 = pnand %p10198_p11, %p10559_p9 }
 0x8a6   : > { %s8378_s27 = sand.u32 1, %s15329_s26  }
 0x8a7   : > { %s8379_s13 = scalar_lea.sflag [#allocation4], %s8378_s27 }
 0x8a8   : > { %10375 = dma.done.wait (!%p10192_p12), %s8379_s13, 64  }
 0x8a9   : > { %10377 = vsyncadd (!%p10192_p12), %s8379_s13, 4294967232  ;;  %s8388_s21 = scalar_lea.sflag [#allocation6], %s8378_s27 }
 0x8aa   : > { %10379 = dma.done.wait (!%p10192_p12), %s8388_s21, 128  }
 0x8ab   : > { %10381 = vsyncadd (!%p10192_p12), %s8388_s21, 4294967168  ;;  %s31_s20 = sadd.s32 1, %s10412_s20   ;;  %s15331_s23 = sld [smem:[#allocation11_spill]] }
 0x8ac   : > { %p28_p13 = scmp.ge.s32.totalorder %s31_s20, 6   ;;  %s15332_s5 = sld [smem:[#allocation12_spill]] }
 0x8ad   : > { %s15333_s29 = smov %s10388_s30  ;;  %s15334_s30 = smov %s10392_s15 }
 0x8ae   : > { %s15335_s15 = smov %s10567_s17  ;;  %s15336_s16 = smov %s10404_s18 }
 0x8af   : > { %s15337_s17 = smov %s10408_s19  ;;  %30 = sbr.rel (!%p28_p13) target bundleno = 16 (0x10), region = 152 }
 0x8b1   : > { %s15338_s18 = smov %s15331_s23 }
 0x8b2   : > { %s15339_s19 = smov %s15332_s5 }
 0x8b6   :  { %8393 = vsyncpa [#allocation4], 1 }
 0x8b7   :  { %8395 = vsyncpa [#allocation4 + $0x1], 1 }
 0x8b8   :  { %8396 = vsyncpa [#allocation6], 1 }
 0x8b9   :  { %8398 = vsyncpa [#allocation6 + $0x1], 1 }

</bundles_post_ra>
